<compile_context>
chip_gen: v7x
topology: tpu7x:2x2x1
jax: 0.10.0
libtpu: 0.0.40
codegen_flags: <defaults>
</compile_context>

<pallas_src>
import functools

import numpy as np
import jax
import jax.numpy as jnp
from jax import lax
from jax.experimental import pallas as pl
from jax.experimental.pallas import tpu as pltpu


# ----------------------- trace-time operand construction ------------------- #
# (pure numpy, done once outside the hot path)

def _conv_toeplitz(w_oihw, Hin, Win, stride, pad):
    """Dense Toeplitz fold of a Conv2d: (Cin*Hin*Win, Cout*Hout*Wout), channel-major."""
    w = np.asarray(w_oihw, np.float32)
    Cout, Cin, KH, KW = w.shape
    Hout = (Hin + 2 * pad - KH) // stride + 1
    Wout = (Win + 2 * pad - KW) // stride + 1
    hw_out = Hout * Wout
    M = np.zeros((Cin * Hin * Win, Cout * hw_out), np.float32)
    for ci in range(Cin):
        for ki in range(KH):
            for kj in range(KW):
                for ho in range(Hout):
                    h = stride * ho + ki - pad
                    if not (0 <= h < Hin):
                        continue
                    for wo in range(Wout):
                        w_in = stride * wo + kj - pad
                        if not (0 <= w_in < Win):
                            continue
                        irow = ci * Hin * Win + h * Win + w_in
                        M[irow, ho * Wout + wo::hw_out] = w[:, ci, ki, kj]
    return M, Hout, Wout


# ------------------------------ fused kernel ------------------------------- #

def _encoder_kernel(x_ref, w1_ref, w2_ref, w3_ref, wh_ref, pt_ref, vec_ref, o_ref,
                    *, c1, c2, k1, k2, k3, hidden, esd, cnt1, cnt2, eps):
    f32 = jnp.float32
    bf16 = jnp.bfloat16

    def stack2(a, b):
        # Build [[a]; [b]] of shape (2, K) from two (1, K) rows (no concatenate).
        rows = lax.broadcasted_iota(jnp.int32, (2, a.shape[1]), 0)
        return jnp.where(rows == 0, a, b)

    def conv_mm(a, w_ref, k_out, bias_row):
        # One folded-Toeplitz MXU matmul per Conv2d; bias is pre-broadcast per column.
        y = jnp.dot(a.astype(bf16), w_ref[...], preferred_element_type=f32)
        return y + vec_ref[bias_row:bias_row + 1, 0:k_out]

    def batchnorm(y, c, pt, affine_row, cnt):
        # Training-mode BatchNorm2d: single-pass batch stats, biased variance.
        s1 = jnp.sum(y, axis=0, keepdims=True)
        s2 = jnp.sum(y * y, axis=0, keepdims=True)
        sums = stack2(s1, s2)                                              # (2, K)
        ch = lax.dot_general(sums, pt, (((1,), (1,)), ((), ())),
                             preferred_element_type=f32)                   # (2, C)
        inv = 1.0 / cnt
        mean = ch[0:1, :] * inv
        var = ch[1:2, :] * inv - mean * mean
        gamma = vec_ref[affine_row:affine_row + 1, 0:c]
        beta = vec_ref[affine_row + 1:affine_row + 2, 0:c]
        scale = gamma * lax.rsqrt(var + eps)
        shift = beta - mean * scale
        bc = jnp.dot(stack2(scale, shift), pt, preferred_element_type=f32)  # (2, K)
        return y * bc[0:1, :] + bc[1:2, :]

    x = x_ref[...]

    # Block 1: Conv2d(ch, 8, 3, s=2, p=1) -> ReLU -> BatchNorm2d(8)
    y = conv_mm(x, w1_ref, k1, 0)
    y = jnp.maximum(y, 0.0)
    y = batchnorm(y, c1, pt_ref[0:c1, 0:k1], 1, cnt1)

    # Block 2: Conv2d(8, 16, 3, s=2, p=1) -> BatchNorm2d(16) -> ReLU
    y = conv_mm(y, w2_ref, k2, 3)
    y = batchnorm(y, c2, pt_ref[c1:c1 + c2, 0:k2], 4, cnt2)
    y = jnp.maximum(y, 0.0)

    # Block 3: Conv2d(16, 32, 3, s=2, p=0) -> ReLU
    y = conv_mm(y, w3_ref, k3, 6)
    y = jnp.maximum(y, 0.0)

    # Head: flatten (identity in this layout) -> Linear(., 128) -> ReLU -> Linear(128, esd)
    z = jnp.dot(y, wh_ref[0:k3, :], preferred_element_type=f32) + vec_ref[7:8, 0:hidden]
    z = jnp.maximum(z, 0.0)
    out = lax.dot_general(z, wh_ref[k3:k3 + esd, :], (((1,), (1,)), ((), ())),
                          preferred_element_type=f32)
    o_ref[...] = out + vec_ref[8:9, 0:esd]


# ------------------------------ host wrappers ------------------------------ #

def init_params(key, ch=1, encoded_space_dim=16, input_size=28):
    h1 = (input_size + 2 - 3) // 2 + 1
    h2 = (h1 + 2 - 3) // 2 + 1
    h3 = (h2 - 3) // 2 + 1
    conv_out = 32 * h3 * h3  # == Encoder._get_conv_output_size()

    ks = jax.random.split(key, 14)

    def w(k, shape, fan_in):
        return jax.random.normal(k, shape, jnp.float32) / (fan_in ** 0.5)

    return {
        "conv1_w": w(ks[0], (8, ch, 3, 3), 9 * ch), "conv1_b": w(ks[1], (8,), 9 * ch),
        "bn1_g": 1.0 + 0.1 * jax.random.normal(ks[2], (8,), jnp.float32),
        "bn1_b": 0.1 * jax.random.normal(ks[3], (8,), jnp.float32),
        "conv2_w": w(ks[4], (16, 8, 3, 3), 72), "conv2_b": w(ks[5], (16,), 72),
        "bn2_g": 1.0 + 0.1 * jax.random.normal(ks[6], (16,), jnp.float32),
        "bn2_b": 0.1 * jax.random.normal(ks[7], (16,), jnp.float32),
        "conv3_w": w(ks[8], (32, 16, 3, 3), 144), "conv3_b": w(ks[9], (32,), 144),
        "lin1_w": w(ks[10], (conv_out, 128), conv_out), "lin1_b": w(ks[11], (128,), conv_out),
        "lin2_w": w(ks[12], (128, encoded_space_dim), 128),
        "lin2_b": w(ks[13], (encoded_space_dim,), 128),
    }


def prepare_ops(params, batch, ch=1, input_size=28, encoded_space_dim=16, eps=1e-5):
    N = batch
    C1, C2, C3 = 8, 16, 32
    hidden = 128

    w1_np, H1, W1 = _conv_toeplitz(params["conv1_w"], input_size, input_size, 2, 1)
    w2_np, H2, W2 = _conv_toeplitz(params["conv2_w"], H1, W1, 2, 1)
    w3_np, H3, W3 = _conv_toeplitz(params["conv3_w"], H2, W2, 2, 0)
    hw1, hw2, hw3 = H1 * W1, H2 * W2, H3 * W3
    k1, k2, k3 = C1 * hw1, C2 * hw2, C3 * hw3

    # Packed head weights: rows [0,k3) = lin1 (k3,128); rows [k3,k3+esd) = lin2^T (esd,128).
    wh_np = np.zeros((k3 + encoded_space_dim, hidden), np.float32)
    wh_np[:k3] = np.asarray(params["lin1_w"], np.float32)
    wh_np[k3:] = np.asarray(params["lin2_w"], np.float32).T

    # Packed per-channel broadcast matrices (used both for pooling via A@B^T and broadcast).
    ptw = max(k1, k2)
    pt_np = np.zeros((C1 + C2, ptw), np.float32)
    pt_np[:C1, :k1] = np.kron(np.eye(C1, dtype=np.float32), np.ones((1, hw1), np.float32))
    pt_np[C1:, :k2] = np.kron(np.eye(C2, dtype=np.float32), np.ones((1, hw2), np.float32))

    # Packed small vectors (conv biases pre-broadcast per column, BN affines, head biases).
    vw = max(k1, k2, k3, hidden, encoded_space_dim)
    vec_np = np.zeros((16, vw), np.float32)
    vec_np[0, :k1] = np.repeat(np.asarray(params["conv1_b"], np.float32), hw1)
    vec_np[1, :C1] = np.asarray(params["bn1_g"], np.float32)
    vec_np[2, :C1] = np.asarray(params["bn1_b"], np.float32)
    vec_np[3, :k2] = np.repeat(np.asarray(params["conv2_b"], np.float32), hw2)
    vec_np[4, :C2] = np.asarray(params["bn2_g"], np.float32)
    vec_np[5, :C2] = np.asarray(params["bn2_b"], np.float32)
    vec_np[6, :k3] = np.repeat(np.asarray(params["conv3_b"], np.float32), hw3)
    vec_np[7, :hidden] = np.asarray(params["lin1_b"], np.float32)
    vec_np[8, :encoded_space_dim] = np.asarray(params["lin2_b"], np.float32)

    operands = (jnp.asarray(w1_np, jnp.bfloat16),
                jnp.asarray(w2_np, jnp.bfloat16),
                jnp.asarray(w3_np, jnp.bfloat16),
                jnp.asarray(wh_np),
                jnp.asarray(pt_np),
                jnp.asarray(vec_np))
    static = dict(c1=C1, c2=C2, k1=k1, k2=k2, k3=k3, hidden=hidden,
                  esd=encoded_space_dim, cnt1=float(N * hw1), cnt2=float(N * hw2),
                  eps=float(eps))
    return dict(operands=operands, static=static, batch=N,
                in_feat=ch * input_size * input_size, out_dim=encoded_space_dim)


def make_encoder_fn(ops):
    kern = functools.partial(_encoder_kernel, **ops["static"])
    N, out_dim, in_feat = ops["batch"], ops["out_dim"], ops["in_feat"]
    operands = ops["operands"]

    def fwd(x_nchw, *consts):
        # NCHW flatten is a pure reshape (no transpose): the Toeplitz weights consume
        # the channel-major (ci, h, w) ordering directly.
        x2d = x_nchw.reshape(N, in_feat).astype(jnp.float32)
        return pl.pallas_call(
            kern,
            out_shape=jax.ShapeDtypeStruct((N, out_dim), jnp.float32),
            compiler_params=pltpu.CompilerParams(vmem_limit_bytes=32 * 1024 * 1024),
        )(x2d, *consts)

    jitted = jax.jit(fwd)
    return lambda x: jitted(x, *operands)


# -------------------------- pure-JAX reference (check) --------------------- #

def encoder_reference(params, x_nchw, eps=1e-5):
    hi = jax.lax.Precision.HIGHEST
    x = jnp.transpose(x_nchw, (0, 2, 3, 1)).astype(jnp.float32)

    def conv(x, w_oihw, b, stride, pad):
        w = jnp.transpose(w_oihw, (2, 3, 1, 0))  # OIHW -> HWIO
        y = lax.conv_general_dilated(x, w, (stride, stride),
                                     [(pad, pad), (pad, pad)],
                                     dimension_numbers=("NHWC", "HWIO", "NHWC"),
                                     precision=hi)
        return y + b

    def bnorm(y, g, b):
        m = jnp.mean(y, axis=(0, 1, 2))
        v = jnp.mean((y - m) ** 2, axis=(0, 1, 2))
        return (y - m) * lax.rsqrt(v + eps) * g + b

    y = conv(x, params["conv1_w"], params["conv1_b"], 2, 1)
    y = jnp.maximum(y, 0.0)
    y = bnorm(y, params["bn1_g"], params["bn1_b"])
    y = conv(y, params["conv2_w"], params["conv2_b"], 2, 1)
    y = bnorm(y, params["bn2_g"], params["bn2_b"])
    y = jnp.maximum(y, 0.0)
    y = conv(y, params["conv3_w"], params["conv3_b"], 2, 0)
    y = jnp.maximum(y, 0.0)
    y = jnp.transpose(y, (0, 3, 1, 2)).reshape(y.shape[0], -1)   # NCHW flatten order
    y = jnp.maximum(jnp.dot(y, params["lin1_w"], precision=hi) + params["lin1_b"], 0.0)
    return jnp.dot(y, params["lin2_w"], precision=hi) + params["lin2_b"]


if __name__ == "__main__":
    key = jax.random.PRNGKey(0)
    k_param, k_x = jax.random.split(key)

    batch, ch, input_size, encoded_space_dim = 2, 1, 28, 16
    params = init_params(k_param, ch=ch, encoded_space_dim=encoded_space_dim,
                         input_size=input_size)
    x = jax.random.normal(k_x, (batch, ch, input_size, input_size), jnp.float32)

    ops = prepare_ops(params, batch=batch, ch=ch, input_size=input_size,
                      encoded_space_dim=encoded_space_dim)
    run = make_encoder_fn(ops)

    out = jax.block_until_ready(run(x))
    assert out.shape == (batch, encoded_space_dim), out.shape

    ref = jax.block_until_ready(jax.jit(encoder_reference)(params, x))
    err = float(np.max(np.abs(np.asarray(out) - np.asarray(ref))))
    assert np.allclose(np.asarray(out), np.asarray(ref), atol=2e-2, rtol=2e-2), err

    print("KERNEL_OK")
</pallas_src>

<mosaic_0001>
module attributes {stable_mosaic.version = 11 : i64} {
  func.func @_encoder_kernel(%arg0: memref<2x784xf32, #tpu.memory_space<vmem>>, %arg1: memref<784x1568xbf16, #tpu.memory_space<vmem>>, %arg2: memref<1568x784xbf16, #tpu.memory_space<vmem>>, %arg3: memref<784x288xbf16, #tpu.memory_space<vmem>>, %arg4: memref<304x128xf32, #tpu.memory_space<vmem>>, %arg5: memref<24x1568xf32, #tpu.memory_space<vmem>>, %arg6: memref<16x1568xf32, #tpu.memory_space<vmem>>, %arg7: memref<2x16xf32, #tpu.memory_space<vmem>>) attributes {dimension_semantics = [], scalar_prefetch = 0 : i64, scratch_operands = 0 : i64, tpu.core_type = #tpu.core_type<tc>} {
    %c0 = arith.constant 0 : index
    %c0_0 = arith.constant 0 : index
    %0 = vector.load %arg0[%c0, %c0_0] : memref<2x784xf32, #tpu.memory_space<vmem>>, vector<2x784xf32>
    %1 = arith.truncf %0 : vector<2x784xf32> to vector<2x784xbf16>
    %c0_1 = arith.constant 0 : index
    %c0_2 = arith.constant 0 : index
    %2 = vector.load %arg1[%c0_1, %c0_2] : memref<784x1568xbf16, #tpu.memory_space<vmem>>, vector<784x1568xbf16>
    %cst = arith.constant dense<0.000000e+00> : vector<2x1568xf32>
    %3 = tpu.matmul %1, %2, %cst {dimension_numbers = #tpu.dot_dimension_numbers<[1], [0], [0], [1], [0, 0, 1, 1], [], []>} : vector<2x784xbf16>, vector<784x1568xbf16>, vector<2x1568xf32> -> vector<2x1568xf32>
    %c0_3 = arith.constant 0 : index
    %c0_4 = arith.constant 0 : index
    %4 = vector.load %arg6[%c0_3, %c0_4] : memref<16x1568xf32, #tpu.memory_space<vmem>>, vector<1x1568xf32>
    %5 = vector.broadcast %4 : vector<1x1568xf32> to vector<2x1568xf32>
    %6 = arith.addf %3, %5 : vector<2x1568xf32>
    %cst_5 = arith.constant 0.000000e+00 : f32
    %7 = vector.broadcast %cst_5 : f32 to vector<2x1568xf32>
    %8 = arith.maximumf %6, %7 : vector<2x1568xf32>
    %c0_6 = arith.constant 0 : index
    %c0_7 = arith.constant 0 : index
    %9 = vector.load %arg5[%c0_6, %c0_7] : memref<24x1568xf32, #tpu.memory_space<vmem>>, vector<8x1568xf32>
    %cst_8 = arith.constant dense<0.000000e+00> : vector<1568xf32>
    %10 = vector.multi_reduction <add>, %8, %cst_8 [0] : vector<2x1568xf32> to vector<1568xf32>
    %11 = vector.shape_cast %10 : vector<1568xf32> to vector<1x1568xf32>
    %12 = arith.mulf %8, %8 : vector<2x1568xf32>
    %cst_9 = arith.constant dense<0.000000e+00> : vector<1568xf32>
    %13 = vector.multi_reduction <add>, %12, %cst_9 [0] : vector<2x1568xf32> to vector<1568xf32>
    %14 = vector.shape_cast %13 : vector<1568xf32> to vector<1x1568xf32>
    %15 = tpu.iota {dimensions = array<i32: 0>} : vector<2x1568xi32>
    %c0_i32 = arith.constant 0 : i32
    %16 = vector.broadcast %c0_i32 : i32 to vector<2x1568xi32>
    %17 = arith.cmpi eq, %15, %16 : vector<2x1568xi32>
    %18 = vector.shape_cast %11 : vector<1x1568xf32> to vector<1x1568xf32>
    %19 = vector.broadcast %18 : vector<1x1568xf32> to vector<2x1568xf32>
    %20 = vector.shape_cast %14 : vector<1x1568xf32> to vector<1x1568xf32>
    %21 = vector.broadcast %20 : vector<1x1568xf32> to vector<2x1568xf32>
    %22 = arith.select %17, %19, %21 : vector<2x1568xi1>, vector<2x1568xf32>
    %cst_10 = arith.constant dense<0.000000e+00> : vector<2x8xf32>
    %23 = tpu.matmul %22, %9, %cst_10 {dimension_numbers = #tpu.dot_dimension_numbers<[1], [1], [0], [0], [0, 0, 1, 0], [], []>} : vector<2x1568xf32>, vector<8x1568xf32>, vector<2x8xf32> -> vector<2x8xf32>
    %24 = vector.extract_strided_slice %23 {offsets = [0, 0], sizes = [1, 8], strides = [1, 1]} : vector<2x8xf32> to vector<1x8xf32>
    %cst_11 = arith.constant 0.00255102036 : f32
    %25 = vector.broadcast %cst_11 : f32 to vector<1x8xf32>
    %26 = arith.mulf %24, %25 : vector<1x8xf32>
    %27 = vector.extract_strided_slice %23 {offsets = [1, 0], sizes = [1, 8], strides = [1, 1]} : vector<2x8xf32> to vector<1x8xf32>
    %cst_12 = arith.constant 0.00255102036 : f32
    %28 = vector.broadcast %cst_12 : f32 to vector<1x8xf32>
    %29 = arith.mulf %27, %28 : vector<1x8xf32>
    %30 = arith.mulf %26, %26 : vector<1x8xf32>
    %31 = arith.subf %29, %30 : vector<1x8xf32>
    %c1 = arith.constant 1 : index
    %c0_13 = arith.constant 0 : index
    %32 = vector.load %arg6[%c1, %c0_13] : memref<16x1568xf32, #tpu.memory_space<vmem>>, vector<1x8xf32>
    %c2 = arith.constant 2 : index
    %c0_14 = arith.constant 0 : index
    %33 = vector.load %arg6[%c2, %c0_14] : memref<16x1568xf32, #tpu.memory_space<vmem>>, vector<1x8xf32>
    %cst_15 = arith.constant 9.99999974E-6 : f32
    %34 = vector.broadcast %cst_15 : f32 to vector<1x8xf32>
    %35 = arith.addf %31, %34 : vector<1x8xf32>
    %36 = math.rsqrt %35 : vector<1x8xf32>
    %37 = arith.mulf %32, %36 : vector<1x8xf32>
    %38 = arith.mulf %26, %37 : vector<1x8xf32>
    %39 = arith.subf %33, %38 : vector<1x8xf32>
    %40 = tpu.iota {dimensions = array<i32: 0>} : vector<2x8xi32>
    %c0_i32_16 = arith.constant 0 : i32
    %41 = vector.broadcast %c0_i32_16 : i32 to vector<2x8xi32>
    %42 = arith.cmpi eq, %40, %41 : vector<2x8xi32>
    %43 = vector.shape_cast %37 : vector<1x8xf32> to vector<1x8xf32>
    %44 = vector.broadcast %43 : vector<1x8xf32> to vector<2x8xf32>
    %45 = vector.shape_cast %39 : vector<1x8xf32> to vector<1x8xf32>
    %46 = vector.broadcast %45 : vector<1x8xf32> to vector<2x8xf32>
    %47 = arith.select %42, %44, %46 : vector<2x8xi1>, vector<2x8xf32>
    %cst_17 = arith.constant dense<0.000000e+00> : vector<2x1568xf32>
    %48 = tpu.matmul %47, %9, %cst_17 {dimension_numbers = #tpu.dot_dimension_numbers<[1], [0], [0], [1], [0, 0, 1, 1], [], []>} : vector<2x8xf32>, vector<8x1568xf32>, vector<2x1568xf32> -> vector<2x1568xf32>
    %49 = vector.extract_strided_slice %48 {offsets = [0, 0], sizes = [1, 1568], strides = [1, 1]} : vector<2x1568xf32> to vector<1x1568xf32>
    %50 = vector.broadcast %49 : vector<1x1568xf32> to vector<2x1568xf32>
    %51 = arith.mulf %8, %50 : vector<2x1568xf32>
    %52 = vector.extract_strided_slice %48 {offsets = [1, 0], sizes = [1, 1568], strides = [1, 1]} : vector<2x1568xf32> to vector<1x1568xf32>
    %53 = vector.broadcast %52 : vector<1x1568xf32> to vector<2x1568xf32>
    %54 = arith.addf %51, %53 : vector<2x1568xf32>
    %55 = arith.truncf %54 : vector<2x1568xf32> to vector<2x1568xbf16>
    %c0_18 = arith.constant 0 : index
    %c0_19 = arith.constant 0 : index
    %56 = vector.load %arg2[%c0_18, %c0_19] : memref<1568x784xbf16, #tpu.memory_space<vmem>>, vector<1568x784xbf16>
    %cst_20 = arith.constant dense<0.000000e+00> : vector<2x784xf32>
    %57 = tpu.matmul %55, %56, %cst_20 {dimension_numbers = #tpu.dot_dimension_numbers<[1], [0], [0], [1], [0, 0, 1, 1], [], []>} : vector<2x1568xbf16>, vector<1568x784xbf16>, vector<2x784xf32> -> vector<2x784xf32>
    %c3 = arith.constant 3 : index
    %c0_21 = arith.constant 0 : index
    %58 = vector.load %arg6[%c3, %c0_21] : memref<16x1568xf32, #tpu.memory_space<vmem>>, vector<1x784xf32>
    %59 = vector.broadcast %58 : vector<1x784xf32> to vector<2x784xf32>
    %60 = arith.addf %57, %59 : vector<2x784xf32>
    %c8 = arith.constant 8 : index
    %c0_22 = arith.constant 0 : index
    %61 = vector.load %arg5[%c8, %c0_22] : memref<24x1568xf32, #tpu.memory_space<vmem>>, vector<16x784xf32>
    %cst_23 = arith.constant dense<0.000000e+00> : vector<784xf32>
    %62 = vector.multi_reduction <add>, %60, %cst_23 [0] : vector<2x784xf32> to vector<784xf32>
    %63 = vector.shape_cast %62 : vector<784xf32> to vector<1x784xf32>
    %64 = arith.mulf %60, %60 : vector<2x784xf32>
    %cst_24 = arith.constant dense<0.000000e+00> : vector<784xf32>
    %65 = vector.multi_reduction <add>, %64, %cst_24 [0] : vector<2x784xf32> to vector<784xf32>
    %66 = vector.shape_cast %65 : vector<784xf32> to vector<1x784xf32>
    %67 = tpu.iota {dimensions = array<i32: 0>} : vector<2x784xi32>
    %c0_i32_25 = arith.constant 0 : i32
    %68 = vector.broadcast %c0_i32_25 : i32 to vector<2x784xi32>
    %69 = arith.cmpi eq, %67, %68 : vector<2x784xi32>
    %70 = vector.shape_cast %63 : vector<1x784xf32> to vector<1x784xf32>
    %71 = vector.broadcast %70 : vector<1x784xf32> to vector<2x784xf32>
    %72 = vector.shape_cast %66 : vector<1x784xf32> to vector<1x784xf32>
    %73 = vector.broadcast %72 : vector<1x784xf32> to vector<2x784xf32>
    %74 = arith.select %69, %71, %73 : vector<2x784xi1>, vector<2x784xf32>
    %cst_26 = arith.constant dense<0.000000e+00> : vector<2x16xf32>
    %75 = tpu.matmul %74, %61, %cst_26 {dimension_numbers = #tpu.dot_dimension_numbers<[1], [1], [0], [0], [0, 0, 1, 0], [], []>} : vector<2x784xf32>, vector<16x784xf32>, vector<2x16xf32> -> vector<2x16xf32>
    %76 = vector.extract_strided_slice %75 {offsets = [0, 0], sizes = [1, 16], strides = [1, 1]} : vector<2x16xf32> to vector<1x16xf32>
    %cst_27 = arith.constant 0.0102040814 : f32
    %77 = vector.broadcast %cst_27 : f32 to vector<1x16xf32>
    %78 = arith.mulf %76, %77 : vector<1x16xf32>
    %79 = vector.extract_strided_slice %75 {offsets = [1, 0], sizes = [1, 16], strides = [1, 1]} : vector<2x16xf32> to vector<1x16xf32>
    %cst_28 = arith.constant 0.0102040814 : f32
    %80 = vector.broadcast %cst_28 : f32 to vector<1x16xf32>
    %81 = arith.mulf %79, %80 : vector<1x16xf32>
    %82 = arith.mulf %78, %78 : vector<1x16xf32>
    %83 = arith.subf %81, %82 : vector<1x16xf32>
    %c4 = arith.constant 4 : index
    %c0_29 = arith.constant 0 : index
    %84 = vector.load %arg6[%c4, %c0_29] : memref<16x1568xf32, #tpu.memory_space<vmem>>, vector<1x16xf32>
    %c5 = arith.constant 5 : index
    %c0_30 = arith.constant 0 : index
    %85 = vector.load %arg6[%c5, %c0_30] : memref<16x1568xf32, #tpu.memory_space<vmem>>, vector<1x16xf32>
    %cst_31 = arith.constant 9.99999974E-6 : f32
    %86 = vector.broadcast %cst_31 : f32 to vector<1x16xf32>
    %87 = arith.addf %83, %86 : vector<1x16xf32>
    %88 = math.rsqrt %87 : vector<1x16xf32>
    %89 = arith.mulf %84, %88 : vector<1x16xf32>
    %90 = arith.mulf %78, %89 : vector<1x16xf32>
    %91 = arith.subf %85, %90 : vector<1x16xf32>
    %92 = tpu.iota {dimensions = array<i32: 0>} : vector<2x16xi32>
    %c0_i32_32 = arith.constant 0 : i32
    %93 = vector.broadcast %c0_i32_32 : i32 to vector<2x16xi32>
    %94 = arith.cmpi eq, %92, %93 : vector<2x16xi32>
    %95 = vector.shape_cast %89 : vector<1x16xf32> to vector<1x16xf32>
    %96 = vector.broadcast %95 : vector<1x16xf32> to vector<2x16xf32>
    %97 = vector.shape_cast %91 : vector<1x16xf32> to vector<1x16xf32>
    %98 = vector.broadcast %97 : vector<1x16xf32> to vector<2x16xf32>
    %99 = arith.select %94, %96, %98 : vector<2x16xi1>, vector<2x16xf32>
    %cst_33 = arith.constant dense<0.000000e+00> : vector<2x784xf32>
    %100 = tpu.matmul %99, %61, %cst_33 {dimension_numbers = #tpu.dot_dimension_numbers<[1], [0], [0], [1], [0, 0, 1, 1], [], []>} : vector<2x16xf32>, vector<16x784xf32>, vector<2x784xf32> -> vector<2x784xf32>
    %101 = vector.extract_strided_slice %100 {offsets = [0, 0], sizes = [1, 784], strides = [1, 1]} : vector<2x784xf32> to vector<1x784xf32>
    %102 = vector.broadcast %101 : vector<1x784xf32> to vector<2x784xf32>
    %103 = arith.mulf %60, %102 : vector<2x784xf32>
    %104 = vector.extract_strided_slice %100 {offsets = [1, 0], sizes = [1, 784], strides = [1, 1]} : vector<2x784xf32> to vector<1x784xf32>
    %105 = vector.broadcast %104 : vector<1x784xf32> to vector<2x784xf32>
    %106 = arith.addf %103, %105 : vector<2x784xf32>
    %cst_34 = arith.constant 0.000000e+00 : f32
    %107 = vector.broadcast %cst_34 : f32 to vector<2x784xf32>
    %108 = arith.maximumf %106, %107 : vector<2x784xf32>
    %109 = arith.truncf %108 : vector<2x784xf32> to vector<2x784xbf16>
    %c0_35 = arith.constant 0 : index
    %c0_36 = arith.constant 0 : index
    %110 = vector.load %arg3[%c0_35, %c0_36] : memref<784x288xbf16, #tpu.memory_space<vmem>>, vector<784x288xbf16>
    %cst_37 = arith.constant dense<0.000000e+00> : vector<2x288xf32>
    %111 = tpu.matmul %109, %110, %cst_37 {dimension_numbers = #tpu.dot_dimension_numbers<[1], [0], [0], [1], [0, 0, 1, 1], [], []>} : vector<2x784xbf16>, vector<784x288xbf16>, vector<2x288xf32> -> vector<2x288xf32>
    %c6 = arith.constant 6 : index
    %c0_38 = arith.constant 0 : index
    %112 = vector.load %arg6[%c6, %c0_38] : memref<16x1568xf32, #tpu.memory_space<vmem>>, vector<1x288xf32>
    %113 = vector.broadcast %112 : vector<1x288xf32> to vector<2x288xf32>
    %114 = arith.addf %111, %113 : vector<2x288xf32>
    %cst_39 = arith.constant 0.000000e+00 : f32
    %115 = vector.broadcast %cst_39 : f32 to vector<2x288xf32>
    %116 = arith.maximumf %114, %115 : vector<2x288xf32>
    %c0_40 = arith.constant 0 : index
    %c0_41 = arith.constant 0 : index
    %117 = vector.load %arg4[%c0_40, %c0_41] : memref<304x128xf32, #tpu.memory_space<vmem>>, vector<288x128xf32>
    %cst_42 = arith.constant dense<0.000000e+00> : vector<2x128xf32>
    %118 = tpu.matmul %116, %117, %cst_42 {dimension_numbers = #tpu.dot_dimension_numbers<[1], [0], [0], [1], [0, 0, 1, 1], [], []>} : vector<2x288xf32>, vector<288x128xf32>, vector<2x128xf32> -> vector<2x128xf32>
    %c7 = arith.constant 7 : index
    %c0_43 = arith.constant 0 : index
    %119 = vector.load %arg6[%c7, %c0_43] : memref<16x1568xf32, #tpu.memory_space<vmem>>, vector<1x128xf32>
    %120 = vector.broadcast %119 : vector<1x128xf32> to vector<2x128xf32>
    %121 = arith.addf %118, %120 : vector<2x128xf32>
    %cst_44 = arith.constant 0.000000e+00 : f32
    %122 = vector.broadcast %cst_44 : f32 to vector<2x128xf32>
    %123 = arith.maximumf %121, %122 : vector<2x128xf32>
    %c288 = arith.constant 288 : index
    %c0_45 = arith.constant 0 : index
    %124 = vector.load %arg4[%c288, %c0_45] : memref<304x128xf32, #tpu.memory_space<vmem>>, vector<16x128xf32>
    %cst_46 = arith.constant dense<0.000000e+00> : vector<2x16xf32>
    %125 = tpu.matmul %123, %124, %cst_46 {dimension_numbers = #tpu.dot_dimension_numbers<[1], [1], [0], [0], [0, 0, 1, 0], [], []>} : vector<2x128xf32>, vector<16x128xf32>, vector<2x16xf32> -> vector<2x16xf32>
    %c8_47 = arith.constant 8 : index
    %c0_48 = arith.constant 0 : index
    %126 = vector.load %arg6[%c8_47, %c0_48] : memref<16x1568xf32, #tpu.memory_space<vmem>>, vector<1x16xf32>
    %127 = vector.broadcast %126 : vector<1x16xf32> to vector<2x16xf32>
    %128 = arith.addf %125, %127 : vector<2x16xf32>
    %c0_49 = arith.constant 0 : index
    %c0_50 = arith.constant 0 : index
    %129 = vector.load %arg7[%c0_49, %c0_50] : memref<2x16xf32, #tpu.memory_space<vmem>>, vector<2x16xf32>
    tpu.vector_store %arg7[%c0_49, %c0_50], %128 {strides = array<i32>} : memref<2x16xf32, #tpu.memory_space<vmem>>, vector<2x16xf32>,
    return
  }
}

</mosaic_0001>

<bundles_post_ra>
// kernel: fwd.1
= control target key start
LH: loop header
LB: loop body
LE: loop exit
PB: predicated region body
PF: predicated region fallthrough
CT: control target
= control target key end

     0   :  { %v18834_v36 = vmov 1983009808   ;;  %v36_v38 = vlaneseq  ;;  %vm4073_vm0 = vcmask 130048   ;;  %vm5247_vm1 = vcmask 1041408   ;;  %s24328_s0 = inlined_call_operand.vmem [shape: f32[2,784], index: 0, kind: input, shape index: {}]   ;;  %s24329_s1 = inlined_call_operand.vmem [shape: bf16[784,1568], index: 1, kind: input, shape index: {}]   ;;  %s24330_s2 = inlined_call_operand.vmem [shape: bf16[1568,784], index: 2, kind: input, shape index: {}]   ;;  %s24331_s3 = inlined_call_operand.vmem [shape: bf16[784,288], index: 3, kind: input, shape index: {}]   ;;  %s24332_s4 = inlined_call_operand.vmem [shape: f32[304,128], index: 4, kind: input, shape index: {}]   ;;  %s24333_s5 = inlined_call_operand.vmem [shape: f32[24,1568], index: 5, kind: input, shape index: {}]   ;;  %s24334_s6 = inlined_call_operand.vmem [shape: f32[16,1568], index: 6, kind: input, shape index: {}]   ;;  %s24335_s7 = inlined_call_operand.hbm [shape: f32[2,16], index: 7, kind: output, shape index: {}]  }
   0x1   :  { %v16692_v0 = vld [vmem:[%s24329_s1 + $0x4] ss:$52 sps:$4 sm:$0xff]   ;;  %v16694_v1 = vld [vmem:[%s24329_s1 + $0xc] ss:$52 sps:$4 sm:$0xff]   ;;  %v16697_v3 = vld [vmem:[%s24329_s1 + $0x8] ss:$52 sps:$4 sm:$0xff]   ;;  %v34_v37 = vunpack.c.l.s4 %v18834_v36 }
   0x2   :  { %4077 = vmatprep.subr.bf16.mxu0 %v16692_v0  ;;  %v16696_v2 = vld [vmem:[%s24329_s1] ss:$52 sps:$4 sm:$0xff]   ;;  %4241 = vmatprep.subr.bf16.mxu1 %v16694_v1  ;;  %v16702_v6 = vld [vmem:[%s24329_s1 + $0x68] ss:$52 sps:$4 sm:$0xff]   ;;  %v16703_v7 = vld [vmem:[%s24329_s1 + $0x70] ss:$52 sps:$4 sm:$0xff]  }
   0x3   :  { %v16698_v4 = vld [vmem:[%s24329_s1 + $0x6c] ss:$52 sps:$4 sm:$0xff]   ;;  %4078 = vmatpush1.bf16.msra.mxu0 %v16696_v2  ;;  %4242 = vmatpush1.bf16.msra.mxu1 %v16697_v3  ;;  %v16700_v5 = vld [vmem:[%s24329_s1 + $0x74] ss:$52 sps:$4 sm:$0xff]   ;;  %v16706_v9 = vld [vmem:[%s24329_s1 + $0xdc] ss:$52 sps:$4 sm:$0xff]   ;;  %v35_v42 = vunpack.c.0.s8 %v34_v37 }
   0x4   :  { %4079 = vmatprep.subr.bf16.mxu0 %v16698_v4  ;;  %4243 = vmatprep.subr.bf16.mxu1 %v16700_v5  ;;  %v16704_v8 = vld [vmem:[%s24329_s1 + $0xd4] ss:$52 sps:$4 sm:$0xff]   ;;  %v16708_v10 = vld [vmem:[%s24329_s1 + $0xd0] ss:$52 sps:$4 sm:$0xff]   ;;  %v16709_v11 = vld [vmem:[%s24329_s1 + $0xd8] ss:$52 sps:$4 sm:$0xff]  }
   0x5   :  { %v16710_v12 = vld [vmem:[%s24329_s1 + $0x13c] ss:$52 sps:$4 sm:$0xff]   ;;  %v16712_v13 = vld [vmem:[%s24329_s1 + $0x144] ss:$52 sps:$4 sm:$0xff]   ;;  %v16715_v15 = vld [vmem:[%s24329_s1 + $0x140] ss:$52 sps:$4 sm:$0xff]  }
   0x6   :  { %v16714_v14 = vld [vmem:[%s24329_s1 + $0x138] ss:$52 sps:$4 sm:$0xff]   ;;  %v16720_v18 = vld [vmem:[%s24329_s1 + $0x1a0] ss:$52 sps:$4 sm:$0xff]   ;;  %v16721_v19 = vld [vmem:[%s24329_s1 + $0x1a8] ss:$52 sps:$4 sm:$0xff]  }
   0x7   :  { %4080 = vmatpush1.bf16.msra.mxu0 %v16702_v6  ;;  %4244 = vmatpush1.bf16.msra.mxu1 %v16703_v7  ;;  %v16716_v16 = vld [vmem:[%s24329_s1 + $0x1a4] ss:$52 sps:$4 sm:$0xff]   ;;  %v16718_v17 = vld [vmem:[%s24329_s1 + $0x1ac] ss:$52 sps:$4 sm:$0xff]   ;;  %v16724_v21 = vld [vmem:[%s24329_s1 + $0x214] ss:$52 sps:$4 sm:$0xff]  }
   0x8   :  { %4081 = vmatprep.subr.bf16.mxu0 %v16704_v8  ;;  %4245 = vmatprep.subr.bf16.mxu1 %v16706_v9  ;;  %v16722_v20 = vld [vmem:[%s24329_s1 + $0x20c] ss:$52 sps:$4 sm:$0xff]   ;;  %v16726_v22 = vld [vmem:[%s24329_s1 + $0x208] ss:$52 sps:$4 sm:$0xff]   ;;  %v16727_v23 = vld [vmem:[%s24329_s1 + $0x210] ss:$52 sps:$4 sm:$0xff]  }
   0x9   :  { %v16728_v24 = vld [vmem:[%s24329_s1 + $0x274] ss:$52 sps:$4 sm:$0xff]   ;;  %v16730_v25 = vld [vmem:[%s24329_s1 + $0x27c] ss:$52 sps:$4 sm:$0xff]   ;;  %v16733_v27 = vld [vmem:[%s24329_s1 + $0x278] ss:$52 sps:$4 sm:$0xff]  }
   0xa   :  { %v16732_v26 = vld [vmem:[%s24329_s1 + $0x270] ss:$52 sps:$4 sm:$0xff]   ;;  %v16738_v30 = vld [vmem:[%s24329_s1 + $0x2d8] ss:$52 sps:$4 sm:$0xff]   ;;  %v16739_v31 = vld [vmem:[%s24329_s1 + $0x2e0] ss:$52 sps:$4 sm:$0xff]  }
   0xb   :  { %4082 = vmatpush1.bf16.msra.mxu0 %v16708_v10  ;;  %4246 = vmatpush1.bf16.msra.mxu1 %v16709_v11  ;;  %v16734_v28 = vld [vmem:[%s24329_s1 + $0x2dc] ss:$52 sps:$4 sm:$0xff]   ;;  %v16736_v29 = vld [vmem:[%s24329_s1 + $0x2e4] ss:$52 sps:$4 sm:$0xff]   ;;  %v16742_v33 = vld [vmem:[%s24329_s1 + $0x34c] ss:$52 sps:$4 sm:$0xff]  }
   0xc   :  { %4083 = vmatprep.subr.bf16.mxu0 %v16710_v12  ;;  %4247 = vmatprep.subr.bf16.mxu1 %v16712_v13  ;;  %v16740_v32 = vld [vmem:[%s24329_s1 + $0x344] ss:$52 sps:$4 sm:$0xff]   ;;  %v16744_v34 = vld [vmem:[%s24329_s1 + $0x340] ss:$52 sps:$4 sm:$0xff]   ;;  %v16745_v35 = vld [vmem:[%s24329_s1 + $0x348] ss:$52 sps:$4 sm:$0xff]  }
   0xd   :  { %v16746_v39 = vld [vmem:[%s24329_s1 + $0x3ac] ss:$52 sps:$4 sm:$0xff]   ;;  %v16748_v40 = vld [vmem:[%s24329_s1 + $0x3b4] ss:$52 sps:$4 sm:$0xff]   ;;  %v18997_v43 = vshrl.u32 %v36_v38, 7  ;;  %vm18837_vm3 = vmmov 0  }
   0xe   :  { %v16750_v41 = vld [vmem:[%s24329_s1 + $0x3a8] ss:$52 sps:$4 sm:$0xff]   ;;  %v16751_v44 = vld [vmem:[%s24329_s1 + $0x3b0] ss:$52 sps:$4 sm:$0xff]   ;;  %v16757_v48 = vld [vmem:[%s24329_s1 + $0x418] ss:$52 sps:$4 sm:$0xff]  }
   0xf   :  { %4084 = vmatpush1.bf16.msra.mxu0 %v16714_v14  ;;  %4248 = vmatpush1.bf16.msra.mxu1 %v16715_v15  ;;  %v16752_v45 = vld [vmem:[%s24329_s1 + $0x414] ss:$52 sps:$4 sm:$0xff]   ;;  %v16754_v46 = vld [vmem:[%s24329_s1 + $0x41c] ss:$52 sps:$4 sm:$0xff]   ;;  %v19015_v49 = vsub.s32 %v35_v42, %v18997_v43  ;;  %v16760_v51 = vld [vmem:[%s24329_s1 + $0x484] ss:$52 sps:$4 sm:$0xff]  }
  0x10   :  { %4085 = vmatprep.subr.bf16.mxu0 %v16716_v16  ;;  %4249 = vmatprep.subr.bf16.mxu1 %v16718_v17  ;;  %v16756_v47 = vld [vmem:[%s24329_s1 + $0x410] ss:$52 sps:$4 sm:$0xff]   ;;  %v16762_v53 = vld [vmem:[%s24329_s1 + $0x478] ss:$52 sps:$4 sm:$0xff]   ;;  %v16763_v55 = vld [vmem:[%s24329_s1 + $0x480] ss:$52 sps:$4 sm:$0xff]  }
  0x11   :  { %v16758_v50 = vld [vmem:[%s24329_s1 + $0x47c] ss:$52 sps:$4 sm:$0xff]   ;;  %v28_v52 = vld [vmem:[%s24328_s0] sm:$0xff]  ;;  %v16772_v63 = vld [vmem:[%s24329_s1 + $0x554] ss:$52 sps:$4 sm:$0xff]   ;;  %vm5446_vm2 = vcmp.eq.s32.totalorder %v18997_v43, 0 }
  0x12   :  { %v39_v54 = vrot.slane %v28_v52, %v19015_v49  ;;  %v16764_v56 = vld [vmem:[%s24329_s1 + $0x4e4] ss:$52 sps:$4 sm:$0xff]   ;;  %v16766_v57 = vld [vmem:[%s24329_s1 + $0x4ec] ss:$52 sps:$4 sm:$0xff]   ;;  %v16769_v61 = vld [vmem:[%s24329_s1 + $0x4e8] ss:$52 sps:$4 sm:$0xff]   ;;  %v32_v4 = vcombine.high %v28_v52, %v28_v52 }
  0x13   :  { %4086 = vmatpush1.bf16.msra.mxu0 %v16720_v18  ;;  %4250 = vmatpush1.bf16.msra.mxu1 %v16721_v19  ;;  %v16768_v59 = vld [vmem:[%s24329_s1 + $0x4e0] ss:$52 sps:$4 sm:$0xff]   ;;  %v16774_v0 = vld [vmem:[%s24329_s1 + $0x548] ss:$52 sps:$4 sm:$0xff]   ;;  %v16775_v1 = vld [vmem:[%s24329_s1 + $0x550] ss:$52 sps:$4 sm:$0xff]  }
  0x14   :  { %4087 = vmatprep.subr.bf16.mxu0 %v16722_v20  ;;  %4251 = vmatprep.subr.bf16.mxu1 %v16724_v21  ;;  %v47_v58 = vcombine.high %v39_v54, %v39_v54  ;;  %v16770_v62 = vld [vmem:[%s24329_s1 + $0x54c] ss:$52 sps:$4 sm:$0xff]   ;;  %v16776_v2 = vld [vmem:[%s24329_s1 + $0x5b4] ss:$52 sps:$4 sm:$0xff]   ;;  %v16778_v3 = vld [vmem:[%s24329_s1 + $0x5bc] ss:$52 sps:$4 sm:$0xff]   ;;  %v19080_v9 = vrot.slane %v32_v4, %v19015_v49  ;;  %v19099_v16 = vpack.c.bf16 %v39_v54, %v39_v54 }
  0x15   :  { %v16780_v5 = vld [vmem:[%s24329_s1 + $0x5b0] ss:$52 sps:$4 sm:$0xff]   ;;  %v16781_v6 = vld [vmem:[%s24329_s1 + $0x5b8] ss:$52 sps:$4 sm:$0xff]   ;;  %v16787_v11 = vld [vmem:[%s24329_s1 + $0x620] ss:$52 sps:$4 sm:$0xff]  }
  0x16   :  { %v19042_v60 = vpack.c.bf16 %v47_v58, %v47_v58  ;;  %v16782_v7 = vld [vmem:[%s24329_s1 + $0x61c] ss:$52 sps:$4 sm:$0xff]   ;;  %v16784_v8 = vld [vmem:[%s24329_s1 + $0x624] ss:$52 sps:$4 sm:$0xff]   ;;  %v16793_v13 = vld [vmem:[%s24329_s1 + $0x68c] ss:$52 sps:$4 sm:$0xff]   ;;  %v48_v14 = vcombine.high %v19080_v9, %v19080_v9 }
  0x17   :  { %4088 = vmatpush1.bf16.msra.mxu0 %v16726_v22  ;;  %4252 = vmatpush1.bf16.msra.mxu1 %v16727_v23  ;;  %v16786_v10 = vld [vmem:[%s24329_s1 + $0x618] ss:$52 sps:$4 sm:$0xff]   ;;  %v16788_v15 = vld [vmem:[%s24329_s1 + $0x680] ss:$52 sps:$4 sm:$0xff]   ;;  %v16791_v17 = vld [vmem:[%s24329_s1 + $0x688] ss:$52 sps:$4 sm:$0xff]  }
  0x18   :  { %4089 = vmatprep.subr.bf16.mxu0 %v16728_v24  ;;  %4253 = vmatprep.subr.bf16.mxu1 %v16730_v25  ;;  %v16790_v12 = vld [vmem:[%s24329_s1 + $0x684] ss:$52 sps:$4 sm:$0xff]   ;;  %v16796_v18 = vld [vmem:[%s24329_s1 + $0x6ec] ss:$52 sps:$4 sm:$0xff]   ;;  %v16799_v19 = vld [vmem:[%s24329_s1 + $0x6f4] ss:$52 sps:$4 sm:$0xff]   ;;  %v19110_v20 = vpack.c.bf16 %v48_v14, %v48_v14 }
  0x19   :  { %4109 = vmatprep.mubr.bf16.mxu0 %v19042_v60  ;;  %4273 = vmatprep.mubr.bf16.mxu1 %v19042_v60  ;;  %v16794_v21 = vld [vmem:[%s24329_s1 + $0x6e8] ss:$52 sps:$4 sm:$0xff]   ;;  %v16797_v22 = vld [vmem:[%s24329_s1 + $0x6f0] ss:$52 sps:$4 sm:$0xff]   ;;  %v16827_v42 = vld [vmem:[%s24329_s1 + $0x8f8] ss:$52 sps:$4 sm:$0xff]  }
  0x1a   :  { %v16802_v23 = vld [vmem:[%s24329_s1 + $0x754] ss:$52 sps:$4 sm:$0xff]   ;;  %v16805_v24 = vld [vmem:[%s24329_s1 + $0x75c] ss:$52 sps:$4 sm:$0xff]   ;;  %v16875_v14 = vld [vmem:[%s24329_s1 + $0xc38] ss:$52 sps:$4 sm:$0xff]  }
  0x1b   :  { %4090 = vmatpush1.bf16.msra.mxu0 %v16732_v26  ;;  %4254 = vmatpush1.bf16.msra.mxu1 %v16733_v27  ;;  %v16800_v25 = vld [vmem:[%s24329_s1 + $0x750] ss:$52 sps:$4 sm:$0xff]   ;;  %v16803_v26 = vld [vmem:[%s24329_s1 + $0x758] ss:$52 sps:$4 sm:$0xff]   ;;  %v16823_v36 = vld [vmem:[%s24329_s1 + $0x894] ss:$52 sps:$4 sm:$0xff]  }
  0x1c   :  { %4091 = vmatprep.subr.bf16.mxu0 %v16734_v28  ;;  %4255 = vmatprep.subr.bf16.mxu1 %v16736_v29  ;;  %v16808_v27 = vld [vmem:[%s24329_s1 + $0x7bc] ss:$52 sps:$4 sm:$0xff]   ;;  %v16811_v28 = vld [vmem:[%s24329_s1 + $0x7c4] ss:$52 sps:$4 sm:$0xff]   ;;  %v16847_v54 = vld [vmem:[%s24329_s1 + $0xa34] ss:$52 sps:$4 sm:$0xff]  }
  0x1d   :  { %v16806_v29 = vld [vmem:[%s24329_s1 + $0x7b8] ss:$52 sps:$4 sm:$0xff]   ;;  %v16818_v37 = vld [vmem:[%s24329_s1 + $0x888] ss:$52 sps:$4 sm:$0xff]   ;;  %v16821_v38 = vld [vmem:[%s24329_s1 + $0x890] ss:$52 sps:$4 sm:$0xff]  }
  0x1e   :  { %v16839_v52 = vld [vmem:[%s24329_s1 + $0x9c8] ss:$52 sps:$4 sm:$0xff]   ;;  %v16860_v4 = vld [vmem:[%s24329_s1 + $0xb60] ss:$52 sps:$4 sm:$0xff]  }
  0x1f   :  { %4092 = vmatpush1.bf16.msra.mxu0 %v16738_v30  ;;  %4256 = vmatpush1.bf16.msra.mxu1 %v16739_v31  ;;  %v16809_v30 = vld [vmem:[%s24329_s1 + $0x7c0] ss:$52 sps:$4 sm:$0xff]   ;;  %v16814_v31 = vld [vmem:[%s24329_s1 + $0x824] ss:$52 sps:$4 sm:$0xff]   ;;  %v16853_v58 = vld [vmem:[%s24329_s1 + $0xa9c] ss:$52 sps:$4 sm:$0xff]  }
  0x20   :  { %4093 = vmatprep.subr.bf16.mxu0 %v16740_v32  ;;  %4257 = vmatprep.subr.bf16.mxu1 %v16742_v33  ;;  %v16817_v32 = vld [vmem:[%s24329_s1 + $0x82c] ss:$52 sps:$4 sm:$0xff]  }
  0x21   :  { %v16812_v33 = vld [vmem:[%s24329_s1 + $0x820] ss:$52 sps:$4 sm:$0xff]  }
  0x23   :  { %4094 = vmatpush1.bf16.msra.mxu0 %v16744_v34  ;;  %4258 = vmatpush1.bf16.msra.mxu1 %v16745_v35  ;;  %v16815_v34 = vld [vmem:[%s24329_s1 + $0x828] ss:$52 sps:$4 sm:$0xff]   ;;  %v16820_v35 = vld [vmem:[%s24329_s1 + $0x88c] ss:$52 sps:$4 sm:$0xff]  }
  0x24   :  { %4095 = vmatprep.subr.bf16.mxu0 %v16746_v39  ;;  %4259 = vmatprep.subr.bf16.mxu1 %v16748_v40  ;;  %v16826_v39 = vld [vmem:[%s24329_s1 + $0x8f4] ss:$52 sps:$4 sm:$0xff]   ;;  %v16829_v40 = vld [vmem:[%s24329_s1 + $0x8fc] ss:$52 sps:$4 sm:$0xff]  }
  0x27   :  { %4096 = vmatpush1.bf16.msra.mxu0 %v16750_v41  ;;  %4260 = vmatpush1.bf16.msra.mxu1 %v16751_v44  ;;  %v16824_v41 = vld [vmem:[%s24329_s1 + $0x8f0] ss:$52 sps:$4 sm:$0xff]  }
  0x28   :  { %4097 = vmatprep.subr.bf16.mxu0 %v16752_v45  ;;  %4261 = vmatprep.subr.bf16.mxu1 %v16754_v46  ;;  %v16832_v44 = vld [vmem:[%s24329_s1 + $0x95c] ss:$52 sps:$4 sm:$0xff]   ;;  %v16835_v45 = vld [vmem:[%s24329_s1 + $0x964] ss:$52 sps:$4 sm:$0xff]  }
  0x29   :  { %v16830_v46 = vld [vmem:[%s24329_s1 + $0x958] ss:$52 sps:$4 sm:$0xff]  }
  0x2b   :  { %4098 = vmatpush1.bf16.msra.mxu0 %v16756_v47  ;;  %4262 = vmatpush1.bf16.msra.mxu1 %v16757_v48  ;;  %v16833_v47 = vld [vmem:[%s24329_s1 + $0x960] ss:$52 sps:$4 sm:$0xff]   ;;  %v16838_v48 = vld [vmem:[%s24329_s1 + $0x9c4] ss:$52 sps:$4 sm:$0xff]  }
  0x2c   :  { %4099 = vmatprep.subr.bf16.mxu0 %v16758_v50  ;;  %4263 = vmatprep.subr.bf16.mxu1 %v16760_v51  ;;  %v16841_v50 = vld [vmem:[%s24329_s1 + $0x9cc] ss:$52 sps:$4 sm:$0xff]  }
  0x2d   :  { %v16836_v51 = vld [vmem:[%s24329_s1 + $0x9c0] ss:$52 sps:$4 sm:$0xff]  }
  0x2f   :  { %4100 = vmatpush1.bf16.msra.mxu0 %v16762_v53  ;;  %4264 = vmatpush1.bf16.msra.mxu1 %v16763_v55  ;;  %v16844_v53 = vld [vmem:[%s24329_s1 + $0xa2c] ss:$52 sps:$4 sm:$0xff]   ;;  %v16842_v55 = vld [vmem:[%s24329_s1 + $0xa28] ss:$52 sps:$4 sm:$0xff]  }
  0x30   :  { %4101 = vmatprep.subr.bf16.mxu0 %v16764_v56  ;;  %4265 = vmatprep.subr.bf16.mxu1 %v16766_v57  ;;  %v16845_v56 = vld [vmem:[%s24329_s1 + $0xa30] ss:$52 sps:$4 sm:$0xff]   ;;  %v16850_v57 = vld [vmem:[%s24329_s1 + $0xa94] ss:$52 sps:$4 sm:$0xff]  }
  0x33   :  { %4102 = vmatpush1.bf16.msra.mxu0 %v16768_v59  ;;  %4266 = vmatpush1.bf16.msra.mxu1 %v16769_v61  ;;  %v16848_v59 = vld [vmem:[%s24329_s1 + $0xa90] ss:$52 sps:$4 sm:$0xff]   ;;  %v16851_v61 = vld [vmem:[%s24329_s1 + $0xa98] ss:$52 sps:$4 sm:$0xff]  }
  0x34   :  { %4103 = vmatprep.subr.bf16.mxu0 %v16770_v62  ;;  %4267 = vmatprep.subr.bf16.mxu1 %v16772_v63  ;;  %v16856_v62 = vld [vmem:[%s24329_s1 + $0xafc] ss:$52 sps:$4 sm:$0xff]   ;;  %v16859_v63 = vld [vmem:[%s24329_s1 + $0xb04] ss:$52 sps:$4 sm:$0xff]  }
  0x37   :  { %4104 = vmatpush1.bf16.msra.mxu0 %v16774_v0  ;;  %4268 = vmatpush1.bf16.msra.mxu1 %v16775_v1  ;;  %v16854_v0 = vld [vmem:[%s24329_s1 + $0xaf8] ss:$52 sps:$4 sm:$0xff]   ;;  %v16857_v1 = vld [vmem:[%s24329_s1 + $0xb00] ss:$52 sps:$4 sm:$0xff]  }
  0x38   :  { %4105 = vmatprep.subr.bf16.mxu0 %v16776_v2  ;;  %4269 = vmatprep.subr.bf16.mxu1 %v16778_v3  ;;  %v16862_v2 = vld [vmem:[%s24329_s1 + $0xb64] ss:$52 sps:$4 sm:$0xff]   ;;  %v16865_v3 = vld [vmem:[%s24329_s1 + $0xb6c] ss:$52 sps:$4 sm:$0xff]  }
  0x3b   :  { %4106 = vmatpush1.bf16.msra.mxu0 %v16780_v5  ;;  %4270 = vmatpush1.bf16.msra.mxu1 %v16781_v6  ;;  %v16863_v5 = vld [vmem:[%s24329_s1 + $0xb68] ss:$52 sps:$4 sm:$0xff]   ;;  %v16868_v6 = vld [vmem:[%s24329_s1 + $0xbcc] ss:$52 sps:$4 sm:$0xff]  }
  0x3c   :  { %4107 = vmatprep.subr.bf16.mxu0 %v16782_v7  ;;  %4271 = vmatprep.subr.bf16.mxu1 %v16784_v8  ;;  %v16871_v7 = vld [vmem:[%s24329_s1 + $0xbd4] ss:$52 sps:$4 sm:$0xff]  }
  0x3d   :  { %v16866_v8 = vld [vmem:[%s24329_s1 + $0xbc8] ss:$52 sps:$4 sm:$0xff]  }
  0x3f   :  { %4108 = vmatpush1.bf16.msra.mxu0 %v16786_v10  ;;  %4272 = vmatpush1.bf16.msra.mxu1 %v16787_v11  ;;  %v16869_v10 = vld [vmem:[%s24329_s1 + $0xbd0] ss:$52 sps:$4 sm:$0xff]   ;;  %v16874_v11 = vld [vmem:[%s24329_s1 + $0xc34] ss:$52 sps:$4 sm:$0xff]  }
  0x40   :  { %4118 = vmatprep.subr.bf16.mxu0 %v16790_v12  ;;  %4282 = vmatprep.subr.bf16.mxu1 %v16793_v13  ;;  %v16877_v12 = vld [vmem:[%s24329_s1 + $0xc3c] ss:$52 sps:$4 sm:$0xff]  }
  0x41   :  { %v16872_v13 = vld [vmem:[%s24329_s1 + $0xc30] ss:$52 sps:$4 sm:$0xff]  }
  0x42   :  { %4110 = vmatmul.mubr.bf16.vlgmr.msra.gmra.mrb[0].mxu0 %v19099_v16  ;;  %4274 = vmatmul.mubr.bf16.vlgmr.msra.gmra.mrb[0].mxu1 %v19099_v16 }
  0x43   :  { %4119 = vmatpush1.bf16.msra.mxu0 %v16788_v15  ;;  %4283 = vmatpush1.bf16.msra.mxu1 %v16791_v17  ;;  %v16880_v15 = vld [vmem:[%s24329_s1 + $0xc9c] ss:$52 sps:$4 sm:$0xff]   ;;  %v16883_v17 = vld [vmem:[%s24329_s1 + $0xca4] ss:$52 sps:$4 sm:$0xff]  }
  0x44   :  { %4120 = vmatprep.subr.bf16.mxu0 %v16796_v18  ;;  %4284 = vmatprep.subr.bf16.mxu1 %v16799_v19  ;;  %v16878_v18 = vld [vmem:[%s24329_s1 + $0xc98] ss:$52 sps:$4 sm:$0xff]   ;;  %v16881_v19 = vld [vmem:[%s24329_s1 + $0xca0] ss:$52 sps:$4 sm:$0xff]  }
  0x45   :  { %4150 = vmatprep.mubr.bf16.mxu0 %v19110_v20  ;;  %4314 = vmatprep.mubr.bf16.mxu1 %v19110_v20 }
  0x47   :  { %4121 = vmatpush1.bf16.msra.mxu0 %v16794_v21  ;;  %4285 = vmatpush1.bf16.msra.mxu1 %v16797_v22  ;;  %v16887_v21 = vld [vmem:[%s24329_s1 + $0xd04] ss:$52 sps:$4 sm:$0xff]   ;;  %v16890_v22 = vld [vmem:[%s24329_s1 + $0xd0c] ss:$52 sps:$4 sm:$0xff]  }
  0x48   :  { %4122 = vmatprep.subr.bf16.mxu0 %v16802_v23  ;;  %4286 = vmatprep.subr.bf16.mxu1 %v16805_v24  ;;  %v16885_v23 = vld [vmem:[%s24329_s1 + $0xd00] ss:$52 sps:$4 sm:$0xff]   ;;  %v19301_v24 = vpack.c.bf16 %v19080_v9, %v19080_v9 }
  0x49   :  { %v16896_v9 = vld [vmem:[%s24329_s1 + $0xd74] ss:$52 sps:$4 sm:$0xff]  }
  0x4b   :  { %4123 = vmatpush1.bf16.msra.mxu0 %v16800_v25  ;;  %4287 = vmatpush1.bf16.msra.mxu1 %v16803_v26  ;;  %v16888_v25 = vld [vmem:[%s24329_s1 + $0xd08] ss:$52 sps:$4 sm:$0xff]  }
  0x4c   :  { %4124 = vmatprep.subr.bf16.mxu0 %v16808_v27  ;;  %4288 = vmatprep.subr.bf16.mxu1 %v16811_v28  ;;  %v19309_v26 = vld [vmem:[%s24328_s0 + $0x8] sm:$0x3f] }
  0x4d   :  { %v16893_v27 = vld [vmem:[%s24329_s1 + $0xd6c] ss:$52 sps:$4 sm:$0xff]   ;;  %v19319_v28 = vrot.slane %v19309_v26, %v19015_v49 }
  0x4f   :  { %4125 = vmatpush1.bf16.msra.mxu0 %v16806_v29  ;;  %4289 = vmatpush1.bf16.msra.mxu1 %v16809_v30  ;;  %v64_v29 = vcombine.high %v19319_v28, %v19319_v28  ;;  %v16891_v30 = vld [vmem:[%s24329_s1 + $0xd68] ss:$52 sps:$4 sm:$0xff]  }
  0x50   :  { %4126 = vmatprep.subr.bf16.mxu0 %v16814_v31  ;;  %4290 = vmatprep.subr.bf16.mxu1 %v16817_v32  ;;  %v16894_v31 = vld [vmem:[%s24329_s1 + $0xd70] ss:$52 sps:$4 sm:$0xff]   ;;  %v16899_v32 = vld [vmem:[%s24329_s1 + $0xdd4] ss:$52 sps:$4 sm:$0xff]  }
  0x53   :  { %4127 = vmatpush1.bf16.msra.mxu0 %v16812_v33  ;;  %4291 = vmatpush1.bf16.msra.mxu1 %v16815_v34  ;;  %v16902_v33 = vld [vmem:[%s24329_s1 + $0xddc] ss:$52 sps:$4 sm:$0xff]   ;;  %v19337_v34 = vpack.c.bf16 %v64_v29, %v64_v29 }
  0x54   :  { %4128 = vmatprep.subr.bf16.mxu0 %v16820_v35  ;;  %4292 = vmatprep.subr.bf16.mxu1 %v16823_v36  ;;  %v16897_v35 = vld [vmem:[%s24329_s1 + $0xdd0] ss:$52 sps:$4 sm:$0xff]   ;;  %v16900_v36 = vld [vmem:[%s24329_s1 + $0xdd8] ss:$52 sps:$4 sm:$0xff]  }
  0x55   :  { %v16977_v29 = vld [vmem:[%s24329_s1 + $0x131c] ss:$52 sps:$4 sm:$0xff]  }
  0x57   :  { %4129 = vmatpush1.bf16.msra.mxu0 %v16818_v37  ;;  %4293 = vmatpush1.bf16.msra.mxu1 %v16821_v38  ;;  %v16905_v37 = vld [vmem:[%s24329_s1 + $0xe3c] ss:$52 sps:$4 sm:$0xff]   ;;  %v16908_v38 = vld [vmem:[%s24329_s1 + $0xe44] ss:$52 sps:$4 sm:$0xff]  }
  0x58   :  { %4130 = vmatprep.subr.bf16.mxu0 %v16826_v39  ;;  %4294 = vmatprep.subr.bf16.mxu1 %v16829_v40  ;;  %v16903_v39 = vld [vmem:[%s24329_s1 + $0xe38] ss:$52 sps:$4 sm:$0xff]   ;;  %v16906_v40 = vld [vmem:[%s24329_s1 + $0xe40] ss:$52 sps:$4 sm:$0xff]  }
  0x5b   :  { %4131 = vmatpush1.bf16.msra.mxu0 %v16824_v41  ;;  %4295 = vmatpush1.bf16.msra.mxu1 %v16827_v42  ;;  %v16911_v41 = vld [vmem:[%s24329_s1 + $0xea4] ss:$52 sps:$4 sm:$0xff]   ;;  %v16914_v42 = vld [vmem:[%s24329_s1 + $0xeac] ss:$52 sps:$4 sm:$0xff]  }
  0x5c   :  { %4132 = vmatprep.subr.bf16.mxu0 %v16832_v44  ;;  %4296 = vmatprep.subr.bf16.mxu1 %v16835_v45  ;;  %v16909_v44 = vld [vmem:[%s24329_s1 + $0xea0] ss:$52 sps:$4 sm:$0xff]   ;;  %v16912_v45 = vld [vmem:[%s24329_s1 + $0xea8] ss:$52 sps:$4 sm:$0xff]  }
  0x5f   :  { %4133 = vmatpush1.bf16.msra.mxu0 %v16830_v46  ;;  %4297 = vmatpush1.bf16.msra.mxu1 %v16833_v47  ;;  %v16917_v46 = vld [vmem:[%s24329_s1 + $0xf0c] ss:$52 sps:$4 sm:$0xff]   ;;  %v16920_v47 = vld [vmem:[%s24329_s1 + $0xf14] ss:$52 sps:$4 sm:$0xff]  }
  0x60   :  { %4134 = vmatprep.subr.bf16.mxu0 %v16838_v48  ;;  %4298 = vmatprep.subr.bf16.mxu1 %v16841_v50  ;;  %v16915_v48 = vld [vmem:[%s24329_s1 + $0xf08] ss:$52 sps:$4 sm:$0xff]   ;;  %v16918_v50 = vld [vmem:[%s24329_s1 + $0xf10] ss:$52 sps:$4 sm:$0xff]  }
  0x63   :  { %4135 = vmatpush1.bf16.msra.mxu0 %v16836_v51  ;;  %4299 = vmatpush1.bf16.msra.mxu1 %v16839_v52  ;;  %v16923_v51 = vld [vmem:[%s24329_s1 + $0xf74] ss:$52 sps:$4 sm:$0xff]   ;;  %v16926_v52 = vld [vmem:[%s24329_s1 + $0xf7c] ss:$52 sps:$4 sm:$0xff]  }
  0x64   :  { %4136 = vmatprep.subr.bf16.mxu0 %v16844_v53  ;;  %4300 = vmatprep.subr.bf16.mxu1 %v16847_v54  ;;  %v16921_v53 = vld [vmem:[%s24329_s1 + $0xf70] ss:$52 sps:$4 sm:$0xff]   ;;  %v16924_v54 = vld [vmem:[%s24329_s1 + $0xf78] ss:$52 sps:$4 sm:$0xff]  }
  0x67   :  { %4137 = vmatpush1.bf16.msra.mxu0 %v16842_v55  ;;  %4301 = vmatpush1.bf16.msra.mxu1 %v16845_v56  ;;  %v16929_v55 = vld [vmem:[%s24329_s1 + $0xfdc] ss:$52 sps:$4 sm:$0xff]   ;;  %v16932_v56 = vld [vmem:[%s24329_s1 + $0xfe4] ss:$52 sps:$4 sm:$0xff]  }
  0x68   :  { %4138 = vmatprep.subr.bf16.mxu0 %v16850_v57  ;;  %4302 = vmatprep.subr.bf16.mxu1 %v16853_v58  ;;  %v16927_v57 = vld [vmem:[%s24329_s1 + $0xfd8] ss:$52 sps:$4 sm:$0xff]   ;;  %v16930_v58 = vld [vmem:[%s24329_s1 + $0xfe0] ss:$52 sps:$4 sm:$0xff]  }
  0x6b   :  { %4139 = vmatpush1.bf16.msra.mxu0 %v16848_v59  ;;  %4303 = vmatpush1.bf16.msra.mxu1 %v16851_v61  ;;  %v16935_v59 = vld [vmem:[%s24329_s1 + $0x1044] ss:$52 sps:$4 sm:$0xff]   ;;  %v16938_v61 = vld [vmem:[%s24329_s1 + $0x104c] ss:$52 sps:$4 sm:$0xff]  }
  0x6c   :  { %4140 = vmatprep.subr.bf16.mxu0 %v16856_v62  ;;  %4304 = vmatprep.subr.bf16.mxu1 %v16859_v63  ;;  %v16933_v62 = vld [vmem:[%s24329_s1 + $0x1040] ss:$52 sps:$4 sm:$0xff]   ;;  %v16936_v63 = vld [vmem:[%s24329_s1 + $0x1048] ss:$52 sps:$4 sm:$0xff]  }
  0x6f   :  { %4141 = vmatpush1.bf16.msra.mxu0 %v16854_v0  ;;  %4305 = vmatpush1.bf16.msra.mxu1 %v16857_v1  ;;  %v16941_v0 = vld [vmem:[%s24329_s1 + $0x10ac] ss:$52 sps:$4 sm:$0xff]   ;;  %v16944_v1 = vld [vmem:[%s24329_s1 + $0x10b4] ss:$52 sps:$4 sm:$0xff]  }
  0x70   :  { %4142 = vmatprep.subr.bf16.mxu0 %v16862_v2  ;;  %4306 = vmatprep.subr.bf16.mxu1 %v16865_v3  ;;  %v16939_v2 = vld [vmem:[%s24329_s1 + $0x10a8] ss:$52 sps:$4 sm:$0xff]   ;;  %v16942_v3 = vld [vmem:[%s24329_s1 + $0x10b0] ss:$52 sps:$4 sm:$0xff]  }
  0x73   :  { %4143 = vmatpush1.bf16.msra.mxu0 %v16860_v4  ;;  %4307 = vmatpush1.bf16.msra.mxu1 %v16863_v5  ;;  %v16947_v4 = vld [vmem:[%s24329_s1 + $0x1114] ss:$52 sps:$4 sm:$0xff]   ;;  %v16950_v5 = vld [vmem:[%s24329_s1 + $0x111c] ss:$52 sps:$4 sm:$0xff]  }
  0x74   :  { %4144 = vmatprep.subr.bf16.mxu0 %v16868_v6  ;;  %4308 = vmatprep.subr.bf16.mxu1 %v16871_v7  ;;  %v16945_v6 = vld [vmem:[%s24329_s1 + $0x1110] ss:$52 sps:$4 sm:$0xff]   ;;  %v16948_v7 = vld [vmem:[%s24329_s1 + $0x1118] ss:$52 sps:$4 sm:$0xff]  }
  0x77   :  { %4145 = vmatpush1.bf16.msra.mxu0 %v16866_v8  ;;  %4309 = vmatpush1.bf16.msra.mxu1 %v16869_v10  ;;  %v16953_v8 = vld [vmem:[%s24329_s1 + $0x117c] ss:$52 sps:$4 sm:$0xff]   ;;  %v16956_v10 = vld [vmem:[%s24329_s1 + $0x1184] ss:$52 sps:$4 sm:$0xff]  }
  0x78   :  { %4146 = vmatprep.subr.bf16.mxu0 %v16874_v11  ;;  %4310 = vmatprep.subr.bf16.mxu1 %v16877_v12  ;;  %v16951_v11 = vld [vmem:[%s24329_s1 + $0x1178] ss:$52 sps:$4 sm:$0xff]   ;;  %v16954_v12 = vld [vmem:[%s24329_s1 + $0x1180] ss:$52 sps:$4 sm:$0xff]  }
  0x7b   :  { %4147 = vmatpush1.bf16.msra.mxu0 %v16872_v13  ;;  %4311 = vmatpush1.bf16.msra.mxu1 %v16875_v14  ;;  %v16959_v13 = vld [vmem:[%s24329_s1 + $0x11e4] ss:$52 sps:$4 sm:$0xff]   ;;  %v16962_v14 = vld [vmem:[%s24329_s1 + $0x11ec] ss:$52 sps:$4 sm:$0xff]  }
  0x7c   :  { %4148 = vmatprep.subr.bf16.mxu0 %v16880_v15  ;;  %4312 = vmatprep.subr.bf16.mxu1 %v16883_v17  ;;  %v16957_v15 = vld [vmem:[%s24329_s1 + $0x11e0] ss:$52 sps:$4 sm:$0xff]   ;;  %v16960_v17 = vld [vmem:[%s24329_s1 + $0x11e8] ss:$52 sps:$4 sm:$0xff]  }
  0x7f   :  { %4149 = vmatpush1.bf16.msra.mxu0 %v16878_v18  ;;  %4313 = vmatpush1.bf16.msra.mxu1 %v16881_v19  ;;  %v16965_v18 = vld [vmem:[%s24329_s1 + $0x124c] ss:$52 sps:$4 sm:$0xff]   ;;  %v16968_v19 = vld [vmem:[%s24329_s1 + $0x1254] ss:$52 sps:$4 sm:$0xff]  }
  0x80   :  { %4159 = vmatprep.subr.bf16.mxu0 %v16887_v21  ;;  %4323 = vmatprep.subr.bf16.mxu1 %v16890_v22  ;;  %v16963_v21 = vld [vmem:[%s24329_s1 + $0x1248] ss:$52 sps:$4 sm:$0xff]   ;;  %v16966_v22 = vld [vmem:[%s24329_s1 + $0x1250] ss:$52 sps:$4 sm:$0xff]  }
  0x82   :  { %4151 = vmatmul.mubr.bf16.vlgmr.msra.gmra.mrb[0].mxu0 %v19301_v24  ;;  %4315 = vmatmul.mubr.bf16.vlgmr.msra.gmra.mrb[0].mxu1 %v19301_v24 }
  0x83   :  { %4160 = vmatpush1.bf16.msra.mxu0 %v16885_v23  ;;  %4324 = vmatpush1.bf16.msra.mxu1 %v16888_v25  ;;  %v16971_v23 = vld [vmem:[%s24329_s1 + $0x12b4] ss:$52 sps:$4 sm:$0xff]   ;;  %v16974_v25 = vld [vmem:[%s24329_s1 + $0x12bc] ss:$52 sps:$4 sm:$0xff]  }
  0x84   :  { %4161 = vmatprep.subr.bf16.mxu0 %v16893_v27  ;;  %4325 = vmatprep.subr.bf16.mxu1 %v16896_v9  ;;  %v16969_v27 = vld [vmem:[%s24329_s1 + $0x12b0] ss:$52 sps:$4 sm:$0xff]   ;;  %v16972_v9 = vld [vmem:[%s24329_s1 + $0x12b8] ss:$52 sps:$4 sm:$0xff]  }
  0x85   :  { %4191 = vmatprep.mubr.bf16.mxu0 %v19337_v34  ;;  %4355 = vmatprep.mubr.bf16.mxu1 %v19337_v34 }
  0x87   :  { %4162 = vmatpush1.bf16.msra.mxu0 %v16891_v30  ;;  %4326 = vmatpush1.bf16.msra.mxu1 %v16894_v31  ;;  %v16980_v30 = vld [vmem:[%s24329_s1 + $0x1324] ss:$52 sps:$4 sm:$0xff]  }
  0x88   :  { %4163 = vmatprep.subr.bf16.mxu0 %v16899_v32  ;;  %4327 = vmatprep.subr.bf16.mxu1 %v16902_v33  ;;  %v16975_v31 = vld [vmem:[%s24329_s1 + $0x1318] ss:$52 sps:$4 sm:$0xff]   ;;  %v16978_v32 = vld [vmem:[%s24329_s1 + $0x1320] ss:$52 sps:$4 sm:$0xff]  }
  0x89   :  { %v16983_v33 = vld [vmem:[%s24329_s1 + $0x1384] ss:$52 sps:$4 sm:$0xff]  }
  0x8b   :  { %4164 = vmatpush1.bf16.msra.mxu0 %v16897_v35  ;;  %4328 = vmatpush1.bf16.msra.mxu1 %v16900_v36  ;;  %v16986_v35 = vld [vmem:[%s24329_s1 + $0x138c] ss:$52 sps:$4 sm:$0xff]   ;;  %v19511_v36 = vpack.c.bf16 %v19319_v28, %v19319_v28  ;;  %v16992_v28 = vld [vmem:[%s24329_s1 + $0x1c] ss:$52 sps:$4 sm:$0xff]  }
  0x8c   :  { %4165 = vmatprep.subr.bf16.mxu0 %v16905_v37  ;;  %4329 = vmatprep.subr.bf16.mxu1 %v16908_v38  ;;  %v16981_v37 = vld [vmem:[%s24329_s1 + $0x1380] ss:$52 sps:$4 sm:$0xff]   ;;  %v16984_v38 = vld [vmem:[%s24329_s1 + $0x1388] ss:$52 sps:$4 sm:$0xff]  }
  0x8f   :  { %4166 = vmatpush1.bf16.msra.mxu0 %v16903_v39  ;;  %4330 = vmatpush1.bf16.msra.mxu1 %v16906_v40  ;;  %v16989_v39 = vld [vmem:[%s24329_s1 + $0x14] ss:$52 sps:$4 sm:$0xff]   ;;  %v49_v40 = vcombine.high %v19309_v26, %v19309_v26  ;;  %v16990_v26 = vld [vmem:[%s24329_s1 + $0x18] ss:$52 sps:$4 sm:$0xff]  }
  0x90   :  { %4167 = vmatprep.subr.bf16.mxu0 %v16911_v41  ;;  %4331 = vmatprep.subr.bf16.mxu1 %v16914_v42  ;;  %v18835_v41 = vmov 0  }
  0x91   :  { %v63_v42 = vrot.slane %v49_v40, %v19015_v49  ;;  %v16994_v49 = vld [vmem:[%s24329_s1 + $0x78] ss:$52 sps:$4 sm:$0xff]   ;;  %v17069_v40 = vld [vmem:[%s24329_s1 + $0x560] ss:$52 sps:$4 sm:$0xff]  }
  0x93   :  { %4168 = vmatpush1.bf16.msra.mxu0 %v16909_v44  ;;  %4332 = vmatpush1.bf16.msra.mxu1 %v16912_v45  ;;  %v19532_v44 = vpack.c.bf16 %v63_v42, %v63_v42  ;;  %v16987_v45 = vld [vmem:[%s24329_s1 + $0x10] ss:$52 sps:$4 sm:$0xff]  }
  0x94   :  { %4169 = vmatprep.subr.bf16.mxu0 %v16917_v46  ;;  %4333 = vmatprep.subr.bf16.mxu1 %v16920_v47  ;;  %v16996_v46 = vld [vmem:[%s24329_s1 + $0x7c] ss:$52 sps:$4 sm:$0xff]   ;;  %v16999_v47 = vld [vmem:[%s24329_s1 + $0x84] ss:$52 sps:$4 sm:$0xff]  }
  0x95   :  { %v17074_v42 = vld [vmem:[%s24329_s1 + $0x5c4] ss:$52 sps:$4 sm:$0xff]  }
  0x97   :  { %4170 = vmatpush1.bf16.msra.mxu0 %v16915_v48  ;;  %4334 = vmatpush1.bf16.msra.mxu1 %v16918_v50  ;;  %v16997_v48 = vld [vmem:[%s24329_s1 + $0x80] ss:$52 sps:$4 sm:$0xff]   ;;  %v17002_v50 = vld [vmem:[%s24329_s1 + $0xe4] ss:$52 sps:$4 sm:$0xff]  }
  0x98   :  { %4171 = vmatprep.subr.bf16.mxu0 %v16923_v51  ;;  %4335 = vmatprep.subr.bf16.mxu1 %v16926_v52  ;;  %v17005_v51 = vld [vmem:[%s24329_s1 + $0xec] ss:$52 sps:$4 sm:$0xff]  }
  0x99   :  { %v17000_v52 = vld [vmem:[%s24329_s1 + $0xe0] ss:$52 sps:$4 sm:$0xff]  }
  0x9b   :  { %4172 = vmatpush1.bf16.msra.mxu0 %v16921_v53  ;;  %4336 = vmatpush1.bf16.msra.mxu1 %v16924_v54  ;;  %v17003_v53 = vld [vmem:[%s24329_s1 + $0xe8] ss:$52 sps:$4 sm:$0xff]   ;;  %v17008_v54 = vld [vmem:[%s24329_s1 + $0x14c] ss:$52 sps:$4 sm:$0xff]  }
  0x9c   :  { %4173 = vmatprep.subr.bf16.mxu0 %v16929_v55  ;;  %4337 = vmatprep.subr.bf16.mxu1 %v16932_v56  ;;  %v17011_v55 = vld [vmem:[%s24329_s1 + $0x154] ss:$52 sps:$4 sm:$0xff]  }
  0x9d   :  { %v17006_v56 = vld [vmem:[%s24329_s1 + $0x148] ss:$52 sps:$4 sm:$0xff]  }
  0x9f   :  { %4174 = vmatpush1.bf16.msra.mxu0 %v16927_v57  ;;  %4338 = vmatpush1.bf16.msra.mxu1 %v16930_v58  ;;  %v17009_v57 = vld [vmem:[%s24329_s1 + $0x150] ss:$52 sps:$4 sm:$0xff]   ;;  %v17014_v58 = vld [vmem:[%s24329_s1 + $0x1b4] ss:$52 sps:$4 sm:$0xff]  }
  0xa0   :  { %4175 = vmatprep.subr.bf16.mxu0 %v16935_v59  ;;  %4339 = vmatprep.subr.bf16.mxu1 %v16938_v61  ;;  %v17017_v59 = vld [vmem:[%s24329_s1 + $0x1bc] ss:$52 sps:$4 sm:$0xff]  }
  0xa1   :  { %v17012_v61 = vld [vmem:[%s24329_s1 + $0x1b0] ss:$52 sps:$4 sm:$0xff]  }
  0xa3   :  { %4176 = vmatpush1.bf16.msra.mxu0 %v16933_v62  ;;  %4340 = vmatpush1.bf16.msra.mxu1 %v16936_v63  ;;  %v17015_v62 = vld [vmem:[%s24329_s1 + $0x1b8] ss:$52 sps:$4 sm:$0xff]   ;;  %v17020_v63 = vld [vmem:[%s24329_s1 + $0x21c] ss:$52 sps:$4 sm:$0xff]  }
  0xa4   :  { %4177 = vmatprep.subr.bf16.mxu0 %v16941_v0  ;;  %4341 = vmatprep.subr.bf16.mxu1 %v16944_v1  ;;  %v17023_v0 = vld [vmem:[%s24329_s1 + $0x224] ss:$52 sps:$4 sm:$0xff]  }
  0xa5   :  { %v17018_v1 = vld [vmem:[%s24329_s1 + $0x218] ss:$52 sps:$4 sm:$0xff]  }
  0xa7   :  { %4178 = vmatpush1.bf16.msra.mxu0 %v16939_v2  ;;  %4342 = vmatpush1.bf16.msra.mxu1 %v16942_v3  ;;  %v17021_v2 = vld [vmem:[%s24329_s1 + $0x220] ss:$52 sps:$4 sm:$0xff]   ;;  %v17026_v3 = vld [vmem:[%s24329_s1 + $0x284] ss:$52 sps:$4 sm:$0xff]  }
  0xa8   :  { %4179 = vmatprep.subr.bf16.mxu0 %v16947_v4  ;;  %4343 = vmatprep.subr.bf16.mxu1 %v16950_v5  ;;  %v17029_v4 = vld [vmem:[%s24329_s1 + $0x28c] ss:$52 sps:$4 sm:$0xff]  }
  0xa9   :  { %v17024_v5 = vld [vmem:[%s24329_s1 + $0x280] ss:$52 sps:$4 sm:$0xff]  }
  0xab   :  { %4180 = vmatpush1.bf16.msra.mxu0 %v16945_v6  ;;  %4344 = vmatpush1.bf16.msra.mxu1 %v16948_v7  ;;  %v17027_v6 = vld [vmem:[%s24329_s1 + $0x288] ss:$52 sps:$4 sm:$0xff]   ;;  %v17032_v7 = vld [vmem:[%s24329_s1 + $0x2ec] ss:$52 sps:$4 sm:$0xff]  }
  0xac   :  { %4181 = vmatprep.subr.bf16.mxu0 %v16953_v8  ;;  %4345 = vmatprep.subr.bf16.mxu1 %v16956_v10  ;;  %v17035_v8 = vld [vmem:[%s24329_s1 + $0x2f4] ss:$52 sps:$4 sm:$0xff]  }
  0xad   :  { %v17030_v10 = vld [vmem:[%s24329_s1 + $0x2e8] ss:$52 sps:$4 sm:$0xff]  }
  0xaf   :  { %4182 = vmatpush1.bf16.msra.mxu0 %v16951_v11  ;;  %4346 = vmatpush1.bf16.msra.mxu1 %v16954_v12  ;;  %v17033_v11 = vld [vmem:[%s24329_s1 + $0x2f0] ss:$52 sps:$4 sm:$0xff]   ;;  %v17038_v12 = vld [vmem:[%s24329_s1 + $0x354] ss:$52 sps:$4 sm:$0xff]  }
  0xb0   :  { %4183 = vmatprep.subr.bf16.mxu0 %v16959_v13  ;;  %4347 = vmatprep.subr.bf16.mxu1 %v16962_v14  ;;  %v17041_v13 = vld [vmem:[%s24329_s1 + $0x35c] ss:$52 sps:$4 sm:$0xff]  }
  0xb1   :  { %v17036_v14 = vld [vmem:[%s24329_s1 + $0x350] ss:$52 sps:$4 sm:$0xff]  }
  0xb3   :  { %4184 = vmatpush1.bf16.msra.mxu0 %v16957_v15  ;;  %4348 = vmatpush1.bf16.msra.mxu1 %v16960_v17  ;;  %v17039_v15 = vld [vmem:[%s24329_s1 + $0x358] ss:$52 sps:$4 sm:$0xff]   ;;  %v17044_v17 = vld [vmem:[%s24329_s1 + $0x3bc] ss:$52 sps:$4 sm:$0xff]  }
  0xb4   :  { %4185 = vmatprep.subr.bf16.mxu0 %v16965_v18  ;;  %4349 = vmatprep.subr.bf16.mxu1 %v16968_v19  ;;  %v17047_v18 = vld [vmem:[%s24329_s1 + $0x3c4] ss:$52 sps:$4 sm:$0xff]  }
  0xb5   :  { %v17042_v19 = vld [vmem:[%s24329_s1 + $0x3b8] ss:$52 sps:$4 sm:$0xff]  }
  0xb7   :  { %4186 = vmatpush1.bf16.msra.mxu0 %v16963_v21  ;;  %4350 = vmatpush1.bf16.msra.mxu1 %v16966_v22  ;;  %v17045_v21 = vld [vmem:[%s24329_s1 + $0x3c0] ss:$52 sps:$4 sm:$0xff]   ;;  %v17050_v22 = vld [vmem:[%s24329_s1 + $0x424] ss:$52 sps:$4 sm:$0xff]  }
  0xb8   :  { %4187 = vmatprep.subr.bf16.mxu0 %v16971_v23  ;;  %4351 = vmatprep.subr.bf16.mxu1 %v16974_v25  ;;  %v17053_v23 = vld [vmem:[%s24329_s1 + $0x42c] ss:$52 sps:$4 sm:$0xff]  }
  0xb9   :  { %v17048_v25 = vld [vmem:[%s24329_s1 + $0x420] ss:$52 sps:$4 sm:$0xff]  }
  0xbb   :  { %4188 = vmatpush1.bf16.msra.mxu0 %v16969_v27  ;;  %4352 = vmatpush1.bf16.msra.mxu1 %v16972_v9  ;;  %v17051_v27 = vld [vmem:[%s24329_s1 + $0x428] ss:$52 sps:$4 sm:$0xff]   ;;  %v17056_v9 = vld [vmem:[%s24329_s1 + $0x48c] ss:$52 sps:$4 sm:$0xff]  }
  0xbc   :  { %4189 = vmatprep.subr.bf16.mxu0 %v16977_v29  ;;  %4353 = vmatprep.subr.bf16.mxu1 %v16980_v30  ;;  %v17059_v29 = vld [vmem:[%s24329_s1 + $0x494] ss:$52 sps:$4 sm:$0xff]  }
  0xbd   :  { %v17054_v30 = vld [vmem:[%s24329_s1 + $0x488] ss:$52 sps:$4 sm:$0xff]  }
  0xbf   :  { %4190 = vmatpush1.bf16.msra.mxu0 %v16975_v31  ;;  %4354 = vmatpush1.bf16.msra.mxu1 %v16978_v32  ;;  %v17057_v31 = vld [vmem:[%s24329_s1 + $0x490] ss:$52 sps:$4 sm:$0xff]   ;;  %v17062_v32 = vld [vmem:[%s24329_s1 + $0x4f4] ss:$52 sps:$4 sm:$0xff]  }
  0xc0   :  { %4200 = vmatprep.subr.bf16.mxu0 %v16983_v33  ;;  %4364 = vmatprep.subr.bf16.mxu1 %v16986_v35  ;;  %v17065_v33 = vld [vmem:[%s24329_s1 + $0x4fc] ss:$52 sps:$4 sm:$0xff]  }
  0xc1   :  { %v17060_v35 = vld [vmem:[%s24329_s1 + $0x4f0] ss:$52 sps:$4 sm:$0xff]  }
  0xc2   :  { %4192 = vmatmul.mubr.bf16.vlgmr.msra.gmra.mrb[0].mxu0 %v19511_v36  ;;  %4356 = vmatmul.mubr.bf16.vlgmr.msra.gmra.mrb[0].mxu1 %v19511_v36 }
  0xc3   :  { %4201 = vmatpush1.bf16.msra.mxu0 %v16981_v37  ;;  %4365 = vmatpush1.bf16.msra.mxu1 %v16984_v38  ;;  %v17063_v37 = vld [vmem:[%s24329_s1 + $0x4f8] ss:$52 sps:$4 sm:$0xff]   ;;  %v17068_v38 = vld [vmem:[%s24329_s1 + $0x55c] ss:$52 sps:$4 sm:$0xff]  }
  0xc4   :  { %4232 = vmatprep.mubr.bf16.mxu0 %v18835_v41  ;;  %4396 = vmatprep.mubr.bf16.mxu1 %v18835_v41 }
  0xc5   :  { %4405 = vmatprep.subr.bf16.mxu0 %v16989_v39  ;;  %4569 = vmatprep.subr.bf16.mxu1 %v16992_v28  ;;  %v17071_v39 = vld [vmem:[%s24329_s1 + $0x564] ss:$52 sps:$4 sm:$0xff]  }
  0xc6   :  { %v17066_v28 = vld [vmem:[%s24329_s1 + $0x558] ss:$52 sps:$4 sm:$0xff]  }
  0xce   :  { %15168 = vmatmul.mubr.msk.bf16.vlgmr.msra.gmra.mrb[0].mxu0 %vm4073_vm0, %v19532_v44  ;;  %15169 = vmatmul.mubr.msk.bf16.vlgmr.msra.gmra.mrb[0].mxu1 %vm4073_vm0, %v19532_v44 }
  0xcf   :  { %4406 = vmatpush1.bf16.msra.mxu0 %v16987_v45  ;;  %4570 = vmatpush1.bf16.msra.mxu1 %v16990_v26  ;;  %v17077_v45 = vld [vmem:[%s24329_s1 + $0x5cc] ss:$52 sps:$4 sm:$0xff]  }
  0xd0   :  { %4407 = vmatprep.subr.bf16.mxu0 %v16996_v46  ;;  %4571 = vmatprep.subr.bf16.mxu1 %v16999_v47  ;;  %v17072_v26 = vld [vmem:[%s24329_s1 + $0x5c0] ss:$52 sps:$4 sm:$0xff]   ;;  %v17075_v46 = vld [vmem:[%s24329_s1 + $0x5c8] ss:$52 sps:$4 sm:$0xff]  }
  0xd1   :  { %4437 = vmatprep.mubr.bf16.mxu0 %v19042_v60  ;;  %4601 = vmatprep.mubr.bf16.mxu1 %v19042_v60  ;;  %v17080_v47 = vld [vmem:[%s24329_s1 + $0x62c] ss:$52 sps:$4 sm:$0xff]  }
  0xd3   :  { %4408 = vmatpush1.bf16.msra.mxu0 %v16994_v49  ;;  %4572 = vmatpush1.bf16.msra.mxu1 %v16997_v48  ;;  %v17083_v49 = vld [vmem:[%s24329_s1 + $0x634] ss:$52 sps:$4 sm:$0xff]  }
  0xd4   :  { %4409 = vmatprep.subr.bf16.mxu0 %v17002_v50  ;;  %4573 = vmatprep.subr.bf16.mxu1 %v17005_v51  ;;  %v17078_v48 = vld [vmem:[%s24329_s1 + $0x628] ss:$52 sps:$4 sm:$0xff]   ;;  %v17081_v50 = vld [vmem:[%s24329_s1 + $0x630] ss:$52 sps:$4 sm:$0xff]  }
  0xd5   :  { %v17086_v51 = vld [vmem:[%s24329_s1 + $0x694] ss:$52 sps:$4 sm:$0xff]  }
  0xd7   :  { %4410 = vmatpush1.bf16.msra.mxu0 %v17000_v52  ;;  %4574 = vmatpush1.bf16.msra.mxu1 %v17003_v53  ;;  %v17089_v52 = vld [vmem:[%s24329_s1 + $0x69c] ss:$52 sps:$4 sm:$0xff]  }
  0xd8   :  { %4411 = vmatprep.subr.bf16.mxu0 %v17008_v54  ;;  %4575 = vmatprep.subr.bf16.mxu1 %v17011_v55  ;;  %v17084_v53 = vld [vmem:[%s24329_s1 + $0x690] ss:$52 sps:$4 sm:$0xff]   ;;  %v17087_v54 = vld [vmem:[%s24329_s1 + $0x698] ss:$52 sps:$4 sm:$0xff]  }
  0xd9   :  { %v17092_v55 = vld [vmem:[%s24329_s1 + $0x6fc] ss:$52 sps:$4 sm:$0xff]  }
  0xdb   :  { %4412 = vmatpush1.bf16.msra.mxu0 %v17006_v56  ;;  %4576 = vmatpush1.bf16.msra.mxu1 %v17009_v57  ;;  %v17095_v56 = vld [vmem:[%s24329_s1 + $0x704] ss:$52 sps:$4 sm:$0xff]  }
  0xdc   :  { %4413 = vmatprep.subr.bf16.mxu0 %v17014_v58  ;;  %4577 = vmatprep.subr.bf16.mxu1 %v17017_v59  ;;  %v17090_v57 = vld [vmem:[%s24329_s1 + $0x6f8] ss:$52 sps:$4 sm:$0xff]   ;;  %v17093_v58 = vld [vmem:[%s24329_s1 + $0x700] ss:$52 sps:$4 sm:$0xff]  }
  0xdd   :  { %v17098_v59 = vld [vmem:[%s24329_s1 + $0x764] ss:$52 sps:$4 sm:$0xff]  }
  0xdf   :  { %4414 = vmatpush1.bf16.msra.mxu0 %v17012_v61  ;;  %4578 = vmatpush1.bf16.msra.mxu1 %v17015_v62  ;;  %v17101_v61 = vld [vmem:[%s24329_s1 + $0x76c] ss:$52 sps:$4 sm:$0xff]  }
  0xe0   :  { %4415 = vmatprep.subr.bf16.mxu0 %v17020_v63  ;;  %4579 = vmatprep.subr.bf16.mxu1 %v17023_v0  ;;  %v17096_v62 = vld [vmem:[%s24329_s1 + $0x760] ss:$52 sps:$4 sm:$0xff]   ;;  %v17099_v63 = vld [vmem:[%s24329_s1 + $0x768] ss:$52 sps:$4 sm:$0xff]  }
  0xe1   :  { %v17104_v0 = vld [vmem:[%s24329_s1 + $0x7cc] ss:$52 sps:$4 sm:$0xff]  }
  0xe3   :  { %4416 = vmatpush1.bf16.msra.mxu0 %v17018_v1  ;;  %4580 = vmatpush1.bf16.msra.mxu1 %v17021_v2  ;;  %v17107_v1 = vld [vmem:[%s24329_s1 + $0x7d4] ss:$52 sps:$4 sm:$0xff]  }
  0xe4   :  { %4417 = vmatprep.subr.bf16.mxu0 %v17026_v3  ;;  %4581 = vmatprep.subr.bf16.mxu1 %v17029_v4  ;;  %v17102_v2 = vld [vmem:[%s24329_s1 + $0x7c8] ss:$52 sps:$4 sm:$0xff]   ;;  %v17105_v3 = vld [vmem:[%s24329_s1 + $0x7d0] ss:$52 sps:$4 sm:$0xff]  }
  0xe5   :  { %v17110_v4 = vld [vmem:[%s24329_s1 + $0x834] ss:$52 sps:$4 sm:$0xff]  }
  0xe7   :  { %4418 = vmatpush1.bf16.msra.mxu0 %v17024_v5  ;;  %4582 = vmatpush1.bf16.msra.mxu1 %v17027_v6  ;;  %v17113_v5 = vld [vmem:[%s24329_s1 + $0x83c] ss:$52 sps:$4 sm:$0xff]  }
  0xe8   :  { %4419 = vmatprep.subr.bf16.mxu0 %v17032_v7  ;;  %4583 = vmatprep.subr.bf16.mxu1 %v17035_v8  ;;  %v17108_v6 = vld [vmem:[%s24329_s1 + $0x830] ss:$52 sps:$4 sm:$0xff]   ;;  %v17111_v7 = vld [vmem:[%s24329_s1 + $0x838] ss:$52 sps:$4 sm:$0xff]  }
  0xe9   :  { %v17116_v8 = vld [vmem:[%s24329_s1 + $0x89c] ss:$52 sps:$4 sm:$0xff]  }
  0xeb   :  { %4420 = vmatpush1.bf16.msra.mxu0 %v17030_v10  ;;  %4584 = vmatpush1.bf16.msra.mxu1 %v17033_v11  ;;  %v17119_v10 = vld [vmem:[%s24329_s1 + $0x8a4] ss:$52 sps:$4 sm:$0xff]  }
  0xec   :  { %4421 = vmatprep.subr.bf16.mxu0 %v17038_v12  ;;  %4585 = vmatprep.subr.bf16.mxu1 %v17041_v13  ;;  %v17114_v11 = vld [vmem:[%s24329_s1 + $0x898] ss:$52 sps:$4 sm:$0xff]   ;;  %v17117_v12 = vld [vmem:[%s24329_s1 + $0x8a0] ss:$52 sps:$4 sm:$0xff]  }
  0xed   :  { %v17122_v13 = vld [vmem:[%s24329_s1 + $0x904] ss:$52 sps:$4 sm:$0xff]  }
  0xef   :  { %4422 = vmatpush1.bf16.msra.mxu0 %v17036_v14  ;;  %4586 = vmatpush1.bf16.msra.mxu1 %v17039_v15  ;;  %v17125_v14 = vld [vmem:[%s24329_s1 + $0x90c] ss:$52 sps:$4 sm:$0xff]  }
  0xf0   :  { %4423 = vmatprep.subr.bf16.mxu0 %v17044_v17  ;;  %4587 = vmatprep.subr.bf16.mxu1 %v17047_v18  ;;  %v17120_v15 = vld [vmem:[%s24329_s1 + $0x900] ss:$52 sps:$4 sm:$0xff]   ;;  %v17123_v17 = vld [vmem:[%s24329_s1 + $0x908] ss:$52 sps:$4 sm:$0xff]  }
  0xf1   :  { %v17128_v18 = vld [vmem:[%s24329_s1 + $0x96c] ss:$52 sps:$4 sm:$0xff]  }
  0xf3   :  { %4424 = vmatpush1.bf16.msra.mxu0 %v17042_v19  ;;  %4588 = vmatpush1.bf16.msra.mxu1 %v17045_v21  ;;  %v17131_v19 = vld [vmem:[%s24329_s1 + $0x974] ss:$52 sps:$4 sm:$0xff]  }
  0xf4   :  { %4425 = vmatprep.subr.bf16.mxu0 %v17050_v22  ;;  %4589 = vmatprep.subr.bf16.mxu1 %v17053_v23  ;;  %v17126_v21 = vld [vmem:[%s24329_s1 + $0x968] ss:$52 sps:$4 sm:$0xff]   ;;  %v17129_v22 = vld [vmem:[%s24329_s1 + $0x970] ss:$52 sps:$4 sm:$0xff]  }
  0xf5   :  { %v17134_v23 = vld [vmem:[%s24329_s1 + $0x9d4] ss:$52 sps:$4 sm:$0xff]  }
  0xf7   :  { %4426 = vmatpush1.bf16.msra.mxu0 %v17048_v25  ;;  %4590 = vmatpush1.bf16.msra.mxu1 %v17051_v27  ;;  %v17137_v25 = vld [vmem:[%s24329_s1 + $0x9dc] ss:$52 sps:$4 sm:$0xff]  }
  0xf8   :  { %4427 = vmatprep.subr.bf16.mxu0 %v17056_v9  ;;  %4591 = vmatprep.subr.bf16.mxu1 %v17059_v29  ;;  %v17132_v27 = vld [vmem:[%s24329_s1 + $0x9d0] ss:$52 sps:$4 sm:$0xff]   ;;  %v17135_v9 = vld [vmem:[%s24329_s1 + $0x9d8] ss:$52 sps:$4 sm:$0xff]  }
  0xf9   :  { %v17140_v29 = vld [vmem:[%s24329_s1 + $0xa3c] ss:$52 sps:$4 sm:$0xff]  }
  0xfb   :  { %4428 = vmatpush1.bf16.msra.mxu0 %v17054_v30  ;;  %4592 = vmatpush1.bf16.msra.mxu1 %v17057_v31  ;;  %v17143_v30 = vld [vmem:[%s24329_s1 + $0xa44] ss:$52 sps:$4 sm:$0xff]  }
  0xfc   :  { %4429 = vmatprep.subr.bf16.mxu0 %v17062_v32  ;;  %4593 = vmatprep.subr.bf16.mxu1 %v17065_v33  ;;  %v17138_v31 = vld [vmem:[%s24329_s1 + $0xa38] ss:$52 sps:$4 sm:$0xff]   ;;  %v17141_v32 = vld [vmem:[%s24329_s1 + $0xa40] ss:$52 sps:$4 sm:$0xff]  }
  0xfd   :  { %v17146_v33 = vld [vmem:[%s24329_s1 + $0xaa4] ss:$52 sps:$4 sm:$0xff]  }
  0xff   :  { %4430 = vmatpush1.bf16.msra.mxu0 %v17060_v35  ;;  %4594 = vmatpush1.bf16.msra.mxu1 %v17063_v37  ;;  %v17149_v35 = vld [vmem:[%s24329_s1 + $0xaac] ss:$52 sps:$4 sm:$0xff]  }
 0x100   :  { %4431 = vmatprep.subr.bf16.mxu0 %v17068_v38  ;;  %4595 = vmatprep.subr.bf16.mxu1 %v17071_v39  ;;  %v17144_v37 = vld [vmem:[%s24329_s1 + $0xaa0] ss:$52 sps:$4 sm:$0xff]   ;;  %v17147_v38 = vld [vmem:[%s24329_s1 + $0xaa8] ss:$52 sps:$4 sm:$0xff]  }
 0x101   :  { %v17152_v39 = vld [vmem:[%s24329_s1 + $0xb0c] ss:$52 sps:$4 sm:$0xff]  }
 0x103   :  { %4432 = vmatpush1.bf16.msra.mxu0 %v17066_v28  ;;  %4596 = vmatpush1.bf16.msra.mxu1 %v17069_v40  ;;  %v17155_v28 = vld [vmem:[%s24329_s1 + $0xb14] ss:$52 sps:$4 sm:$0xff]  }
 0x104   :  { %4433 = vmatprep.subr.bf16.mxu0 %v17074_v42  ;;  %4597 = vmatprep.subr.bf16.mxu1 %v17077_v45  ;;  %v17150_v40 = vld [vmem:[%s24329_s1 + $0xb08] ss:$52 sps:$4 sm:$0xff]   ;;  %v17153_v42 = vld [vmem:[%s24329_s1 + $0xb10] ss:$52 sps:$4 sm:$0xff]  }
 0x105   :  { %v17158_v45 = vld [vmem:[%s24329_s1 + $0xb74] ss:$52 sps:$4 sm:$0xff]  }
 0x107   :  { %4434 = vmatpush1.bf16.msra.mxu0 %v17072_v26  ;;  %4598 = vmatpush1.bf16.msra.mxu1 %v17075_v46  ;;  %v17161_v26 = vld [vmem:[%s24329_s1 + $0xb7c] ss:$52 sps:$4 sm:$0xff]  }
 0x108   :  { %4435 = vmatprep.subr.bf16.mxu0 %v17080_v47  ;;  %4599 = vmatprep.subr.bf16.mxu1 %v17083_v49  ;;  %v17156_v46 = vld [vmem:[%s24329_s1 + $0xb70] ss:$52 sps:$4 sm:$0xff]   ;;  %v17159_v47 = vld [vmem:[%s24329_s1 + $0xb78] ss:$52 sps:$4 sm:$0xff]  }
 0x109   :  { %v17164_v49 = vld [vmem:[%s24329_s1 + $0xbdc] ss:$52 sps:$4 sm:$0xff]  }
 0x10b   :  { %4436 = vmatpush1.bf16.msra.mxu0 %v17078_v48  ;;  %4600 = vmatpush1.bf16.msra.mxu1 %v17081_v50  ;;  %v17167_v48 = vld [vmem:[%s24329_s1 + $0xbe4] ss:$52 sps:$4 sm:$0xff]  }
 0x10c   :  { %4446 = vmatprep.subr.bf16.mxu0 %v17086_v51  ;;  %4610 = vmatprep.subr.bf16.mxu1 %v17089_v52  ;;  %v17162_v50 = vld [vmem:[%s24329_s1 + $0xbd8] ss:$52 sps:$4 sm:$0xff]   ;;  %v17165_v51 = vld [vmem:[%s24329_s1 + $0xbe0] ss:$52 sps:$4 sm:$0xff]  }
 0x10d   :  { %v17170_v52 = vld [vmem:[%s24329_s1 + $0xc44] ss:$52 sps:$4 sm:$0xff]  }
 0x10e   :  { %4438 = vmatmul.mubr.bf16.vlgmr.msra.gmra.mrb[4].mxu0 %v19099_v16  ;;  %4602 = vmatmul.mubr.bf16.vlgmr.msra.gmra.mrb[4].mxu1 %v19099_v16 }
 0x10f   :  { %4447 = vmatpush1.bf16.msra.mxu0 %v17084_v53  ;;  %4611 = vmatpush1.bf16.msra.mxu1 %v17087_v54  ;;  %v17173_v53 = vld [vmem:[%s24329_s1 + $0xc4c] ss:$52 sps:$4 sm:$0xff]  }
 0x110   :  { %4448 = vmatprep.subr.bf16.mxu0 %v17092_v55  ;;  %4612 = vmatprep.subr.bf16.mxu1 %v17095_v56  ;;  %v17168_v54 = vld [vmem:[%s24329_s1 + $0xc40] ss:$52 sps:$4 sm:$0xff]   ;;  %v17171_v55 = vld [vmem:[%s24329_s1 + $0xc48] ss:$52 sps:$4 sm:$0xff]  }
 0x111   :  { %4478 = vmatprep.mubr.bf16.mxu0 %v19110_v20  ;;  %4642 = vmatprep.mubr.bf16.mxu1 %v19110_v20  ;;  %v17176_v56 = vld [vmem:[%s24329_s1 + $0xcac] ss:$52 sps:$4 sm:$0xff]  }
 0x113   :  { %4449 = vmatpush1.bf16.msra.mxu0 %v17090_v57  ;;  %4613 = vmatpush1.bf16.msra.mxu1 %v17093_v58  ;;  %v17179_v57 = vld [vmem:[%s24329_s1 + $0xcb4] ss:$52 sps:$4 sm:$0xff]  }
 0x114   :  { %4450 = vmatprep.subr.bf16.mxu0 %v17098_v59  ;;  %4614 = vmatprep.subr.bf16.mxu1 %v17101_v61  ;;  %v17174_v58 = vld [vmem:[%s24329_s1 + $0xca8] ss:$52 sps:$4 sm:$0xff]   ;;  %v17177_v59 = vld [vmem:[%s24329_s1 + $0xcb0] ss:$52 sps:$4 sm:$0xff]  }
 0x115   :  { %v17182_v61 = vld [vmem:[%s24329_s1 + $0xd14] ss:$52 sps:$4 sm:$0xff]  }
 0x117   :  { %4451 = vmatpush1.bf16.msra.mxu0 %v17096_v62  ;;  %4615 = vmatpush1.bf16.msra.mxu1 %v17099_v63  ;;  %v17185_v62 = vld [vmem:[%s24329_s1 + $0xd1c] ss:$52 sps:$4 sm:$0xff]  }
 0x118   :  { %4452 = vmatprep.subr.bf16.mxu0 %v17104_v0  ;;  %4616 = vmatprep.subr.bf16.mxu1 %v17107_v1  ;;  %v17180_v63 = vld [vmem:[%s24329_s1 + $0xd10] ss:$52 sps:$4 sm:$0xff]   ;;  %v17183_v0 = vld [vmem:[%s24329_s1 + $0xd18] ss:$52 sps:$4 sm:$0xff]  }
 0x119   :  { %v17188_v1 = vld [vmem:[%s24329_s1 + $0xd7c] ss:$52 sps:$4 sm:$0xff]  }
 0x11b   :  { %4453 = vmatpush1.bf16.msra.mxu0 %v17102_v2  ;;  %4617 = vmatpush1.bf16.msra.mxu1 %v17105_v3  ;;  %v17191_v2 = vld [vmem:[%s24329_s1 + $0xd84] ss:$52 sps:$4 sm:$0xff]  }
 0x11c   :  { %4454 = vmatprep.subr.bf16.mxu0 %v17110_v4  ;;  %4618 = vmatprep.subr.bf16.mxu1 %v17113_v5  ;;  %v17186_v3 = vld [vmem:[%s24329_s1 + $0xd78] ss:$52 sps:$4 sm:$0xff]   ;;  %v17189_v4 = vld [vmem:[%s24329_s1 + $0xd80] ss:$52 sps:$4 sm:$0xff]  }
 0x11d   :  { %v17194_v5 = vld [vmem:[%s24329_s1 + $0xde4] ss:$52 sps:$4 sm:$0xff]  }
 0x11f   :  { %4455 = vmatpush1.bf16.msra.mxu0 %v17108_v6  ;;  %4619 = vmatpush1.bf16.msra.mxu1 %v17111_v7  ;;  %v17197_v6 = vld [vmem:[%s24329_s1 + $0xdec] ss:$52 sps:$4 sm:$0xff]  }
 0x120   :  { %4456 = vmatprep.subr.bf16.mxu0 %v17116_v8  ;;  %4620 = vmatprep.subr.bf16.mxu1 %v17119_v10  ;;  %v17192_v7 = vld [vmem:[%s24329_s1 + $0xde0] ss:$52 sps:$4 sm:$0xff]   ;;  %v17195_v8 = vld [vmem:[%s24329_s1 + $0xde8] ss:$52 sps:$4 sm:$0xff]  }
 0x121   :  { %v17200_v10 = vld [vmem:[%s24329_s1 + $0xe4c] ss:$52 sps:$4 sm:$0xff]  }
 0x123   :  { %4457 = vmatpush1.bf16.msra.mxu0 %v17114_v11  ;;  %4621 = vmatpush1.bf16.msra.mxu1 %v17117_v12  ;;  %v17203_v11 = vld [vmem:[%s24329_s1 + $0xe54] ss:$52 sps:$4 sm:$0xff]  }
 0x124   :  { %4458 = vmatprep.subr.bf16.mxu0 %v17122_v13  ;;  %4622 = vmatprep.subr.bf16.mxu1 %v17125_v14  ;;  %v17198_v12 = vld [vmem:[%s24329_s1 + $0xe48] ss:$52 sps:$4 sm:$0xff]   ;;  %v17201_v13 = vld [vmem:[%s24329_s1 + $0xe50] ss:$52 sps:$4 sm:$0xff]  }
 0x125   :  { %v17206_v14 = vld [vmem:[%s24329_s1 + $0xeb4] ss:$52 sps:$4 sm:$0xff]  }
 0x127   :  { %4459 = vmatpush1.bf16.msra.mxu0 %v17120_v15  ;;  %4623 = vmatpush1.bf16.msra.mxu1 %v17123_v17  ;;  %v17209_v15 = vld [vmem:[%s24329_s1 + $0xebc] ss:$52 sps:$4 sm:$0xff]  }
 0x128   :  { %4460 = vmatprep.subr.bf16.mxu0 %v17128_v18  ;;  %4624 = vmatprep.subr.bf16.mxu1 %v17131_v19  ;;  %v17204_v17 = vld [vmem:[%s24329_s1 + $0xeb0] ss:$52 sps:$4 sm:$0xff]   ;;  %v17207_v18 = vld [vmem:[%s24329_s1 + $0xeb8] ss:$52 sps:$4 sm:$0xff]  }
 0x129   :  { %v17212_v19 = vld [vmem:[%s24329_s1 + $0xf1c] ss:$52 sps:$4 sm:$0xff]  }
 0x12b   :  { %4461 = vmatpush1.bf16.msra.mxu0 %v17126_v21  ;;  %4625 = vmatpush1.bf16.msra.mxu1 %v17129_v22  ;;  %v17215_v21 = vld [vmem:[%s24329_s1 + $0xf24] ss:$52 sps:$4 sm:$0xff]  }
 0x12c   :  { %4462 = vmatprep.subr.bf16.mxu0 %v17134_v23  ;;  %4626 = vmatprep.subr.bf16.mxu1 %v17137_v25  ;;  %v17210_v22 = vld [vmem:[%s24329_s1 + $0xf18] ss:$52 sps:$4 sm:$0xff]   ;;  %v17213_v23 = vld [vmem:[%s24329_s1 + $0xf20] ss:$52 sps:$4 sm:$0xff]  }
 0x12d   :  { %v17218_v25 = vld [vmem:[%s24329_s1 + $0xf84] ss:$52 sps:$4 sm:$0xff]  }
 0x12f   :  { %4463 = vmatpush1.bf16.msra.mxu0 %v17132_v27  ;;  %4627 = vmatpush1.bf16.msra.mxu1 %v17135_v9  ;;  %v17221_v27 = vld [vmem:[%s24329_s1 + $0xf8c] ss:$52 sps:$4 sm:$0xff]  }
 0x130   :  { %4464 = vmatprep.subr.bf16.mxu0 %v17140_v29  ;;  %4628 = vmatprep.subr.bf16.mxu1 %v17143_v30  ;;  %v17216_v9 = vld [vmem:[%s24329_s1 + $0xf80] ss:$52 sps:$4 sm:$0xff]   ;;  %v17219_v29 = vld [vmem:[%s24329_s1 + $0xf88] ss:$52 sps:$4 sm:$0xff]  }
 0x131   :  { %v17224_v30 = vld [vmem:[%s24329_s1 + $0xfec] ss:$52 sps:$4 sm:$0xff]  }
 0x133   :  { %4465 = vmatpush1.bf16.msra.mxu0 %v17138_v31  ;;  %4629 = vmatpush1.bf16.msra.mxu1 %v17141_v32  ;;  %v17227_v31 = vld [vmem:[%s24329_s1 + $0xff4] ss:$52 sps:$4 sm:$0xff]  }
 0x134   :  { %4466 = vmatprep.subr.bf16.mxu0 %v17146_v33  ;;  %4630 = vmatprep.subr.bf16.mxu1 %v17149_v35  ;;  %v17222_v32 = vld [vmem:[%s24329_s1 + $0xfe8] ss:$52 sps:$4 sm:$0xff]   ;;  %v17225_v33 = vld [vmem:[%s24329_s1 + $0xff0] ss:$52 sps:$4 sm:$0xff]  }
 0x135   :  { %v17230_v35 = vld [vmem:[%s24329_s1 + $0x1054] ss:$52 sps:$4 sm:$0xff]  }
 0x137   :  { %4467 = vmatpush1.bf16.msra.mxu0 %v17144_v37  ;;  %4631 = vmatpush1.bf16.msra.mxu1 %v17147_v38  ;;  %v17233_v37 = vld [vmem:[%s24329_s1 + $0x105c] ss:$52 sps:$4 sm:$0xff]  }
 0x138   :  { %4468 = vmatprep.subr.bf16.mxu0 %v17152_v39  ;;  %4632 = vmatprep.subr.bf16.mxu1 %v17155_v28  ;;  %v17228_v38 = vld [vmem:[%s24329_s1 + $0x1050] ss:$52 sps:$4 sm:$0xff]   ;;  %v17231_v39 = vld [vmem:[%s24329_s1 + $0x1058] ss:$52 sps:$4 sm:$0xff]  }
 0x139   :  { %v17236_v28 = vld [vmem:[%s24329_s1 + $0x10bc] ss:$52 sps:$4 sm:$0xff]  }
 0x13b   :  { %4469 = vmatpush1.bf16.msra.mxu0 %v17150_v40  ;;  %4633 = vmatpush1.bf16.msra.mxu1 %v17153_v42  ;;  %v17239_v40 = vld [vmem:[%s24329_s1 + $0x10c4] ss:$52 sps:$4 sm:$0xff]  }
 0x13c   :  { %4470 = vmatprep.subr.bf16.mxu0 %v17158_v45  ;;  %4634 = vmatprep.subr.bf16.mxu1 %v17161_v26  ;;  %v17234_v42 = vld [vmem:[%s24329_s1 + $0x10b8] ss:$52 sps:$4 sm:$0xff]   ;;  %v17237_v45 = vld [vmem:[%s24329_s1 + $0x10c0] ss:$52 sps:$4 sm:$0xff]  }
 0x13d   :  { %v17242_v26 = vld [vmem:[%s24329_s1 + $0x1124] ss:$52 sps:$4 sm:$0xff]  }
 0x13f   :  { %4471 = vmatpush1.bf16.msra.mxu0 %v17156_v46  ;;  %4635 = vmatpush1.bf16.msra.mxu1 %v17159_v47  ;;  %v17245_v46 = vld [vmem:[%s24329_s1 + $0x112c] ss:$52 sps:$4 sm:$0xff]  }
 0x140   :  { %4472 = vmatprep.subr.bf16.mxu0 %v17164_v49  ;;  %4636 = vmatprep.subr.bf16.mxu1 %v17167_v48  ;;  %v17240_v47 = vld [vmem:[%s24329_s1 + $0x1120] ss:$52 sps:$4 sm:$0xff]   ;;  %v17243_v49 = vld [vmem:[%s24329_s1 + $0x1128] ss:$52 sps:$4 sm:$0xff]  }
 0x141   :  { %v17248_v48 = vld [vmem:[%s24329_s1 + $0x118c] ss:$52 sps:$4 sm:$0xff]  }
 0x143   :  { %4473 = vmatpush1.bf16.msra.mxu0 %v17162_v50  ;;  %4637 = vmatpush1.bf16.msra.mxu1 %v17165_v51  ;;  %v17251_v50 = vld [vmem:[%s24329_s1 + $0x1194] ss:$52 sps:$4 sm:$0xff]  }
 0x144   :  { %4474 = vmatprep.subr.bf16.mxu0 %v17170_v52  ;;  %4638 = vmatprep.subr.bf16.mxu1 %v17173_v53  ;;  %v17246_v51 = vld [vmem:[%s24329_s1 + $0x1188] ss:$52 sps:$4 sm:$0xff]   ;;  %v17249_v52 = vld [vmem:[%s24329_s1 + $0x1190] ss:$52 sps:$4 sm:$0xff]  }
 0x145   :  { %v17254_v53 = vld [vmem:[%s24329_s1 + $0x11f4] ss:$52 sps:$4 sm:$0xff]  }
 0x147   :  { %4475 = vmatpush1.bf16.msra.mxu0 %v17168_v54  ;;  %4639 = vmatpush1.bf16.msra.mxu1 %v17171_v55  ;;  %v17257_v54 = vld [vmem:[%s24329_s1 + $0x11fc] ss:$52 sps:$4 sm:$0xff]  }
 0x148   :  { %4476 = vmatprep.subr.bf16.mxu0 %v17176_v56  ;;  %4640 = vmatprep.subr.bf16.mxu1 %v17179_v57  ;;  %v17252_v55 = vld [vmem:[%s24329_s1 + $0x11f0] ss:$52 sps:$4 sm:$0xff]   ;;  %v17255_v56 = vld [vmem:[%s24329_s1 + $0x11f8] ss:$52 sps:$4 sm:$0xff]  }
 0x149   :  { %v17260_v57 = vld [vmem:[%s24329_s1 + $0x125c] ss:$52 sps:$4 sm:$0xff]  }
 0x14b   :  { %4477 = vmatpush1.bf16.msra.mxu0 %v17174_v58  ;;  %4641 = vmatpush1.bf16.msra.mxu1 %v17177_v59  ;;  %v17263_v58 = vld [vmem:[%s24329_s1 + $0x1264] ss:$52 sps:$4 sm:$0xff]  }
 0x14c   :  { %4487 = vmatprep.subr.bf16.mxu0 %v17182_v61  ;;  %4651 = vmatprep.subr.bf16.mxu1 %v17185_v62  ;;  %v17258_v59 = vld [vmem:[%s24329_s1 + $0x1258] ss:$52 sps:$4 sm:$0xff]   ;;  %v17261_v61 = vld [vmem:[%s24329_s1 + $0x1260] ss:$52 sps:$4 sm:$0xff]  }
 0x14d   :  { %v17266_v62 = vld [vmem:[%s24329_s1 + $0x12c4] ss:$52 sps:$4 sm:$0xff]  }
 0x14e   :  { %4479 = vmatmul.mubr.bf16.vlgmr.msra.gmra.mrb[4].mxu0 %v19301_v24  ;;  %4643 = vmatmul.mubr.bf16.vlgmr.msra.gmra.mrb[4].mxu1 %v19301_v24 }
 0x14f   :  { %4488 = vmatpush1.bf16.msra.mxu0 %v17180_v63  ;;  %4652 = vmatpush1.bf16.msra.mxu1 %v17183_v0  ;;  %v17269_v63 = vld [vmem:[%s24329_s1 + $0x12cc] ss:$52 sps:$4 sm:$0xff]  }
 0x150   :  { %4489 = vmatprep.subr.bf16.mxu0 %v17188_v1  ;;  %4653 = vmatprep.subr.bf16.mxu1 %v17191_v2  ;;  %v17264_v0 = vld [vmem:[%s24329_s1 + $0x12c0] ss:$52 sps:$4 sm:$0xff]   ;;  %v17267_v1 = vld [vmem:[%s24329_s1 + $0x12c8] ss:$52 sps:$4 sm:$0xff]  }
 0x151   :  { %4519 = vmatprep.mubr.bf16.mxu0 %v19337_v34  ;;  %4683 = vmatprep.mubr.bf16.mxu1 %v19337_v34  ;;  %v17272_v2 = vld [vmem:[%s24329_s1 + $0x132c] ss:$52 sps:$4 sm:$0xff]  }
 0x153   :  { %4490 = vmatpush1.bf16.msra.mxu0 %v17186_v3  ;;  %4654 = vmatpush1.bf16.msra.mxu1 %v17189_v4  ;;  %v17275_v3 = vld [vmem:[%s24329_s1 + $0x1334] ss:$52 sps:$4 sm:$0xff]  }
 0x154   :  { %4491 = vmatprep.subr.bf16.mxu0 %v17194_v5  ;;  %4655 = vmatprep.subr.bf16.mxu1 %v17197_v6  ;;  %v17270_v4 = vld [vmem:[%s24329_s1 + $0x1328] ss:$52 sps:$4 sm:$0xff]   ;;  %v17273_v5 = vld [vmem:[%s24329_s1 + $0x1330] ss:$52 sps:$4 sm:$0xff]  }
 0x155   :  { %v17278_v6 = vld [vmem:[%s24329_s1 + $0x1394] ss:$52 sps:$4 sm:$0xff]  }
 0x157   :  { %4492 = vmatpush1.bf16.msra.mxu0 %v17192_v7  ;;  %4656 = vmatpush1.bf16.msra.mxu1 %v17195_v8  ;;  %v17281_v7 = vld [vmem:[%s24329_s1 + $0x139c] ss:$52 sps:$4 sm:$0xff]  }
 0x158   :  { %4493 = vmatprep.subr.bf16.mxu0 %v17200_v10  ;;  %4657 = vmatprep.subr.bf16.mxu1 %v17203_v11  ;;  %v17276_v8 = vld [vmem:[%s24329_s1 + $0x1390] ss:$52 sps:$4 sm:$0xff]   ;;  %v17279_v10 = vld [vmem:[%s24329_s1 + $0x1398] ss:$52 sps:$4 sm:$0xff]  }
 0x159   :  { %v17284_v11 = vld [vmem:[%s24329_s1 + $0x24] ss:$52 sps:$4 sm:$0xff]  }
 0x15b   :  { %4494 = vmatpush1.bf16.msra.mxu0 %v17198_v12  ;;  %4658 = vmatpush1.bf16.msra.mxu1 %v17201_v13  ;;  %v17287_v12 = vld [vmem:[%s24329_s1 + $0x2c] ss:$52 sps:$4 sm:$0xff]  }
 0x15c   :  { %4495 = vmatprep.subr.bf16.mxu0 %v17206_v14  ;;  %4659 = vmatprep.subr.bf16.mxu1 %v17209_v15  ;;  %v17282_v13 = vld [vmem:[%s24329_s1 + $0x20] ss:$52 sps:$4 sm:$0xff]   ;;  %v17285_v14 = vld [vmem:[%s24329_s1 + $0x28] ss:$52 sps:$4 sm:$0xff]  }
 0x15d   :  { %v17290_v15 = vld [vmem:[%s24329_s1 + $0x8c] ss:$52 sps:$4 sm:$0xff]  }
 0x15f   :  { %4496 = vmatpush1.bf16.msra.mxu0 %v17204_v17  ;;  %4660 = vmatpush1.bf16.msra.mxu1 %v17207_v18  ;;  %v17293_v17 = vld [vmem:[%s24329_s1 + $0x94] ss:$52 sps:$4 sm:$0xff]  }
 0x160   :  { %4497 = vmatprep.subr.bf16.mxu0 %v17212_v19  ;;  %4661 = vmatprep.subr.bf16.mxu1 %v17215_v21  ;;  %v17288_v18 = vld [vmem:[%s24329_s1 + $0x88] ss:$52 sps:$4 sm:$0xff]   ;;  %v17291_v19 = vld [vmem:[%s24329_s1 + $0x90] ss:$52 sps:$4 sm:$0xff]  }
 0x161   :  { %v17296_v21 = vld [vmem:[%s24329_s1 + $0xf4] ss:$52 sps:$4 sm:$0xff]  }
 0x163   :  { %4498 = vmatpush1.bf16.msra.mxu0 %v17210_v22  ;;  %4662 = vmatpush1.bf16.msra.mxu1 %v17213_v23  ;;  %v17299_v22 = vld [vmem:[%s24329_s1 + $0xfc] ss:$52 sps:$4 sm:$0xff]  }
 0x164   :  { %4499 = vmatprep.subr.bf16.mxu0 %v17218_v25  ;;  %4663 = vmatprep.subr.bf16.mxu1 %v17221_v27  ;;  %v17294_v23 = vld [vmem:[%s24329_s1 + $0xf0] ss:$52 sps:$4 sm:$0xff]   ;;  %v17297_v25 = vld [vmem:[%s24329_s1 + $0xf8] ss:$52 sps:$4 sm:$0xff]  }
 0x165   :  { %v17302_v27 = vld [vmem:[%s24329_s1 + $0x15c] ss:$52 sps:$4 sm:$0xff]  }
 0x167   :  { %4500 = vmatpush1.bf16.msra.mxu0 %v17216_v9  ;;  %4664 = vmatpush1.bf16.msra.mxu1 %v17219_v29  ;;  %v17305_v9 = vld [vmem:[%s24329_s1 + $0x164] ss:$52 sps:$4 sm:$0xff]  }
 0x168   :  { %4501 = vmatprep.subr.bf16.mxu0 %v17224_v30  ;;  %4665 = vmatprep.subr.bf16.mxu1 %v17227_v31 }
 0x16b   :  { %4502 = vmatpush1.bf16.msra.mxu0 %v17222_v32  ;;  %4666 = vmatpush1.bf16.msra.mxu1 %v17225_v33 }
 0x16c   :  { %4503 = vmatprep.subr.bf16.mxu0 %v17230_v35  ;;  %4667 = vmatprep.subr.bf16.mxu1 %v17233_v37  ;;  %v17300_v37 = vld [vmem:[%s24329_s1 + $0x158] ss:$52 sps:$4 sm:$0xff]  }
 0x16f   :  { %4504 = vmatpush1.bf16.msra.mxu0 %v17228_v38  ;;  %4668 = vmatpush1.bf16.msra.mxu1 %v17231_v39  ;;  %v17303_v38 = vld [vmem:[%s24329_s1 + $0x160] ss:$52 sps:$4 sm:$0xff]  }
 0x170   :  { %4505 = vmatprep.subr.bf16.mxu0 %v17236_v28  ;;  %4669 = vmatprep.subr.bf16.mxu1 %v17239_v40  ;;  %v17308_v40 = vld [vmem:[%s24329_s1 + $0x1c4] ss:$52 sps:$4 sm:$0xff]  }
 0x173   :  { %4506 = vmatpush1.bf16.msra.mxu0 %v17234_v42  ;;  %4670 = vmatpush1.bf16.msra.mxu1 %v17237_v45  ;;  %v17311_v42 = vld [vmem:[%s24329_s1 + $0x1cc] ss:$52 sps:$4 sm:$0xff]  }
 0x174   :  { %4507 = vmatprep.subr.bf16.mxu0 %v17242_v26  ;;  %4671 = vmatprep.subr.bf16.mxu1 %v17245_v46  ;;  %v17306_v45 = vld [vmem:[%s24329_s1 + $0x1c0] ss:$52 sps:$4 sm:$0xff]   ;;  %v17309_v26 = vld [vmem:[%s24329_s1 + $0x1c8] ss:$52 sps:$4 sm:$0xff]  }
 0x175   :  { %v17314_v46 = vld [vmem:[%s24329_s1 + $0x22c] ss:$52 sps:$4 sm:$0xff]  }
 0x177   :  { %4508 = vmatpush1.bf16.msra.mxu0 %v17240_v47  ;;  %4672 = vmatpush1.bf16.msra.mxu1 %v17243_v49  ;;  %v17317_v47 = vld [vmem:[%s24329_s1 + $0x234] ss:$52 sps:$4 sm:$0xff]  }
 0x178   :  { %4509 = vmatprep.subr.bf16.mxu0 %v17248_v48  ;;  %4673 = vmatprep.subr.bf16.mxu1 %v17251_v50  ;;  %v17312_v49 = vld [vmem:[%s24329_s1 + $0x228] ss:$52 sps:$4 sm:$0xff]   ;;  %v17315_v48 = vld [vmem:[%s24329_s1 + $0x230] ss:$52 sps:$4 sm:$0xff]  }
 0x179   :  { %v17320_v50 = vld [vmem:[%s24329_s1 + $0x294] ss:$52 sps:$4 sm:$0xff]  }
 0x17b   :  { %4510 = vmatpush1.bf16.msra.mxu0 %v17246_v51  ;;  %4674 = vmatpush1.bf16.msra.mxu1 %v17249_v52  ;;  %v17323_v51 = vld [vmem:[%s24329_s1 + $0x29c] ss:$52 sps:$4 sm:$0xff]  }
 0x17c   :  { %4511 = vmatprep.subr.bf16.mxu0 %v17254_v53  ;;  %4675 = vmatprep.subr.bf16.mxu1 %v17257_v54  ;;  %v17318_v52 = vld [vmem:[%s24329_s1 + $0x290] ss:$52 sps:$4 sm:$0xff]   ;;  %v17321_v53 = vld [vmem:[%s24329_s1 + $0x298] ss:$52 sps:$4 sm:$0xff]  }
 0x17d   :  { %v17326_v54 = vld [vmem:[%s24329_s1 + $0x2fc] ss:$52 sps:$4 sm:$0xff]  }
 0x17f   :  { %4512 = vmatpush1.bf16.msra.mxu0 %v17252_v55  ;;  %4676 = vmatpush1.bf16.msra.mxu1 %v17255_v56  ;;  %v17329_v55 = vld [vmem:[%s24329_s1 + $0x304] ss:$52 sps:$4 sm:$0xff]  }
 0x180   :  { %4513 = vmatprep.subr.bf16.mxu0 %v17260_v57  ;;  %4677 = vmatprep.subr.bf16.mxu1 %v17263_v58  ;;  %v17324_v56 = vld [vmem:[%s24329_s1 + $0x2f8] ss:$52 sps:$4 sm:$0xff]   ;;  %v17327_v57 = vld [vmem:[%s24329_s1 + $0x300] ss:$52 sps:$4 sm:$0xff]  }
 0x181   :  { %v17332_v58 = vld [vmem:[%s24329_s1 + $0x364] ss:$52 sps:$4 sm:$0xff]  }
 0x183   :  { %4514 = vmatpush1.bf16.msra.mxu0 %v17258_v59  ;;  %4678 = vmatpush1.bf16.msra.mxu1 %v17261_v61  ;;  %v17335_v59 = vld [vmem:[%s24329_s1 + $0x36c] ss:$52 sps:$4 sm:$0xff]  }
 0x184   :  { %4515 = vmatprep.subr.bf16.mxu0 %v17266_v62  ;;  %4679 = vmatprep.subr.bf16.mxu1 %v17269_v63  ;;  %v17330_v61 = vld [vmem:[%s24329_s1 + $0x360] ss:$52 sps:$4 sm:$0xff]   ;;  %v17333_v62 = vld [vmem:[%s24329_s1 + $0x368] ss:$52 sps:$4 sm:$0xff]  }
 0x185   :  { %v17338_v63 = vld [vmem:[%s24329_s1 + $0x3cc] ss:$52 sps:$4 sm:$0xff]  }
 0x187   :  { %4516 = vmatpush1.bf16.msra.mxu0 %v17264_v0  ;;  %4680 = vmatpush1.bf16.msra.mxu1 %v17267_v1  ;;  %v17341_v0 = vld [vmem:[%s24329_s1 + $0x3d4] ss:$52 sps:$4 sm:$0xff]  }
 0x188   :  { %4517 = vmatprep.subr.bf16.mxu0 %v17272_v2  ;;  %4681 = vmatprep.subr.bf16.mxu1 %v17275_v3  ;;  %v17336_v1 = vld [vmem:[%s24329_s1 + $0x3c8] ss:$52 sps:$4 sm:$0xff]   ;;  %v17339_v2 = vld [vmem:[%s24329_s1 + $0x3d0] ss:$52 sps:$4 sm:$0xff]  }
 0x189   :  { %v17344_v3 = vld [vmem:[%s24329_s1 + $0x434] ss:$52 sps:$4 sm:$0xff]  }
 0x18b   :  { %4518 = vmatpush1.bf16.msra.mxu0 %v17270_v4  ;;  %4682 = vmatpush1.bf16.msra.mxu1 %v17273_v5  ;;  %v17347_v4 = vld [vmem:[%s24329_s1 + $0x43c] ss:$52 sps:$4 sm:$0xff]  }
 0x18c   :  { %4528 = vmatprep.subr.bf16.mxu0 %v17278_v6  ;;  %4692 = vmatprep.subr.bf16.mxu1 %v17281_v7  ;;  %v17342_v5 = vld [vmem:[%s24329_s1 + $0x430] ss:$52 sps:$4 sm:$0xff]   ;;  %v17345_v6 = vld [vmem:[%s24329_s1 + $0x438] ss:$52 sps:$4 sm:$0xff]  }
 0x18d   :  { %v17350_v7 = vld [vmem:[%s24329_s1 + $0x49c] ss:$52 sps:$4 sm:$0xff]  }
 0x18e   :  { %4520 = vmatmul.mubr.bf16.vlgmr.msra.gmra.mrb[4].mxu0 %v19511_v36  ;;  %4684 = vmatmul.mubr.bf16.vlgmr.msra.gmra.mrb[4].mxu1 %v19511_v36 }
 0x18f   :  { %4529 = vmatpush1.bf16.msra.mxu0 %v17276_v8  ;;  %4693 = vmatpush1.bf16.msra.mxu1 %v17279_v10  ;;  %v17353_v8 = vld [vmem:[%s24329_s1 + $0x4a4] ss:$52 sps:$4 sm:$0xff]  }
 0x190   :  { %4560 = vmatprep.mubr.bf16.mxu0 %v18835_v41  ;;  %4724 = vmatprep.mubr.bf16.mxu1 %v18835_v41  ;;  %v17348_v10 = vld [vmem:[%s24329_s1 + $0x498] ss:$52 sps:$4 sm:$0xff]  }
 0x191   :  { %4733 = vmatprep.subr.bf16.mxu0 %v17284_v11  ;;  %4897 = vmatprep.subr.bf16.mxu1 %v17287_v12  ;;  %v17351_v11 = vld [vmem:[%s24329_s1 + $0x4a0] ss:$52 sps:$4 sm:$0xff]   ;;  %v17356_v12 = vld [vmem:[%s24329_s1 + $0x504] ss:$52 sps:$4 sm:$0xff]  }
 0x19a   :  { %15170 = vmatmul.mubr.msk.bf16.vlgmr.msra.gmra.mrb[4].mxu0 %vm4073_vm0, %v19532_v44  ;;  %15171 = vmatmul.mubr.msk.bf16.vlgmr.msra.gmra.mrb[4].mxu1 %vm4073_vm0, %v19532_v44 }
 0x19b   :  { %4734 = vmatpush1.bf16.msra.mxu0 %v17282_v13  ;;  %4898 = vmatpush1.bf16.msra.mxu1 %v17285_v14  ;;  %v17359_v13 = vld [vmem:[%s24329_s1 + $0x50c] ss:$52 sps:$4 sm:$0xff]  }
 0x19c   :  { %4735 = vmatprep.subr.bf16.mxu0 %v17290_v15  ;;  %4899 = vmatprep.subr.bf16.mxu1 %v17293_v17  ;;  %v17354_v14 = vld [vmem:[%s24329_s1 + $0x500] ss:$52 sps:$4 sm:$0xff]   ;;  %v17357_v15 = vld [vmem:[%s24329_s1 + $0x508] ss:$52 sps:$4 sm:$0xff]  }
 0x19d   :  { %4765 = vmatprep.mubr.bf16.mxu0 %v19042_v60  ;;  %4929 = vmatprep.mubr.bf16.mxu1 %v19042_v60  ;;  %v17362_v17 = vld [vmem:[%s24329_s1 + $0x56c] ss:$52 sps:$4 sm:$0xff]  }
 0x19f   :  { %4736 = vmatpush1.bf16.msra.mxu0 %v17288_v18  ;;  %4900 = vmatpush1.bf16.msra.mxu1 %v17291_v19  ;;  %v17365_v18 = vld [vmem:[%s24329_s1 + $0x574] ss:$52 sps:$4 sm:$0xff]  }
 0x1a0   :  { %4737 = vmatprep.subr.bf16.mxu0 %v17296_v21  ;;  %4901 = vmatprep.subr.bf16.mxu1 %v17299_v22  ;;  %v17360_v19 = vld [vmem:[%s24329_s1 + $0x568] ss:$52 sps:$4 sm:$0xff]   ;;  %v17363_v21 = vld [vmem:[%s24329_s1 + $0x570] ss:$52 sps:$4 sm:$0xff]  }
 0x1a1   :  { %v20182_v29 = vpop.f32.mrb[0].mxu0  ;;  %v20184_v30 = vpop.f32.mrb[0].mxu1  ;;  %v17368_v22 = vld [vmem:[%s24329_s1 + $0x5d4] ss:$52 sps:$4 sm:$0xff]  }
 0x1a2   :  { %v20186_v31 = vpop.f32.mrb[1].mxu0  ;;  %v20188_v32 = vpop.f32.mrb[1].mxu1 }
 0x1a3   :  { %4738 = vmatpush1.bf16.msra.mxu0 %v17294_v23  ;;  %4902 = vmatpush1.bf16.msra.mxu1 %v17297_v25  ;;  %v4238_v33 = vpop.f32.mrb[2].mxu0  ;;  %v4402_v35 = vpop.f32.mrb[2].mxu1  ;;  %v17371_v23 = vld [vmem:[%s24329_s1 + $0x5dc] ss:$52 sps:$4 sm:$0xff]  }
 0x1a4   :  { %v4239_v39 = vpop.f32.mrb[3].mxu0  ;;  %v4403_v28 = vpop.f32.mrb[3].mxu1  ;;  %4739 = vmatprep.subr.bf16.mxu0 %v17302_v27  ;;  %4903 = vmatprep.subr.bf16.mxu1 %v17305_v9  ;;  %v17366_v25 = vld [vmem:[%s24329_s1 + $0x5d0] ss:$52 sps:$4 sm:$0xff]   ;;  %v17369_v27 = vld [vmem:[%s24329_s1 + $0x5d8] ss:$52 sps:$4 sm:$0xff]  }
 0x1a5   :  { %v17374_v9 = vld [vmem:[%s24329_s1 + $0x63c] ss:$52 sps:$4 sm:$0xff]   ;;  %v17377_v33 = vld [vmem:[%s24329_s1 + $0x644] ss:$52 sps:$4 sm:$0xff]   ;;  %v17383_v39 = vld [vmem:[%s24329_s1 + $0x6ac] ss:$52 sps:$4 sm:$0xff]  }
 0x1a6   :  { %v17372_v35 = vld [vmem:[%s24329_s1 + $0x638] ss:$52 sps:$4 sm:$0xff]   ;;  %v17378_v28 = vld [vmem:[%s24329_s1 + $0x6a0] ss:$52 sps:$4 sm:$0xff]  }
 0x1a7   :  { %4740 = vmatpush1.bf16.msra.mxu0 %v17300_v37  ;;  %4904 = vmatpush1.bf16.msra.mxu1 %v17303_v38  ;;  %v17375_v37 = vld [vmem:[%s24329_s1 + $0x640] ss:$52 sps:$4 sm:$0xff]   ;;  %v17380_v38 = vld [vmem:[%s24329_s1 + $0x6a4] ss:$52 sps:$4 sm:$0xff]  }
 0x1a8   :  { %4741 = vmatprep.subr.bf16.mxu0 %v17308_v40  ;;  %4905 = vmatprep.subr.bf16.mxu1 %v17311_v42  ;;  %v17381_v40 = vld [vmem:[%s24329_s1 + $0x6a8] ss:$52 sps:$4 sm:$0xff]   ;;  %v17386_v42 = vld [vmem:[%s24329_s1 + $0x70c] ss:$52 sps:$4 sm:$0xff]  }
 0x1ab   :  { %4742 = vmatpush1.bf16.msra.mxu0 %v17306_v45  ;;  %4906 = vmatpush1.bf16.msra.mxu1 %v17309_v26  ;;  %v17389_v45 = vld [vmem:[%s24329_s1 + $0x714] ss:$52 sps:$4 sm:$0xff]  }
 0x1ac   :  { %4743 = vmatprep.subr.bf16.mxu0 %v17314_v46  ;;  %4907 = vmatprep.subr.bf16.mxu1 %v17317_v47  ;;  %v17384_v26 = vld [vmem:[%s24329_s1 + $0x708] ss:$52 sps:$4 sm:$0xff]   ;;  %v17387_v46 = vld [vmem:[%s24329_s1 + $0x710] ss:$52 sps:$4 sm:$0xff]  }
 0x1ad   :  { %v17392_v47 = vld [vmem:[%s24329_s1 + $0x774] ss:$52 sps:$4 sm:$0xff]  }
 0x1af   :  { %4744 = vmatpush1.bf16.msra.mxu0 %v17312_v49  ;;  %4908 = vmatpush1.bf16.msra.mxu1 %v17315_v48  ;;  %v17395_v49 = vld [vmem:[%s24329_s1 + $0x77c] ss:$52 sps:$4 sm:$0xff]  }
 0x1b0   :  { %4745 = vmatprep.subr.bf16.mxu0 %v17320_v50  ;;  %4909 = vmatprep.subr.bf16.mxu1 %v17323_v51  ;;  %v17390_v48 = vld [vmem:[%s24329_s1 + $0x770] ss:$52 sps:$4 sm:$0xff]   ;;  %v17393_v50 = vld [vmem:[%s24329_s1 + $0x778] ss:$52 sps:$4 sm:$0xff]  }
 0x1b1   :  { %v17398_v51 = vld [vmem:[%s24329_s1 + $0x7dc] ss:$52 sps:$4 sm:$0xff]  }
 0x1b3   :  { %4746 = vmatpush1.bf16.msra.mxu0 %v17318_v52  ;;  %4910 = vmatpush1.bf16.msra.mxu1 %v17321_v53  ;;  %v17401_v52 = vld [vmem:[%s24329_s1 + $0x7e4] ss:$52 sps:$4 sm:$0xff]  }
 0x1b4   :  { %4747 = vmatprep.subr.bf16.mxu0 %v17326_v54  ;;  %4911 = vmatprep.subr.bf16.mxu1 %v17329_v55  ;;  %v17396_v53 = vld [vmem:[%s24329_s1 + $0x7d8] ss:$52 sps:$4 sm:$0xff]   ;;  %v17399_v54 = vld [vmem:[%s24329_s1 + $0x7e0] ss:$52 sps:$4 sm:$0xff]  }
 0x1b5   :  { %v17404_v55 = vld [vmem:[%s24329_s1 + $0x844] ss:$52 sps:$4 sm:$0xff]  }
 0x1b7   :  { %4748 = vmatpush1.bf16.msra.mxu0 %v17324_v56  ;;  %4912 = vmatpush1.bf16.msra.mxu1 %v17327_v57  ;;  %v17407_v56 = vld [vmem:[%s24329_s1 + $0x84c] ss:$52 sps:$4 sm:$0xff]  }
 0x1b8   :  { %4749 = vmatprep.subr.bf16.mxu0 %v17332_v58  ;;  %4913 = vmatprep.subr.bf16.mxu1 %v17335_v59  ;;  %v17402_v57 = vld [vmem:[%s24329_s1 + $0x840] ss:$52 sps:$4 sm:$0xff]   ;;  %v17405_v58 = vld [vmem:[%s24329_s1 + $0x848] ss:$52 sps:$4 sm:$0xff]  }
 0x1b9   :  { %v17410_v59 = vld [vmem:[%s24329_s1 + $0x8ac] ss:$52 sps:$4 sm:$0xff]  }
 0x1bb   :  { %4750 = vmatpush1.bf16.msra.mxu0 %v17330_v61  ;;  %4914 = vmatpush1.bf16.msra.mxu1 %v17333_v62  ;;  %v17413_v61 = vld [vmem:[%s24329_s1 + $0x8b4] ss:$52 sps:$4 sm:$0xff]  }
 0x1bc   :  { %4751 = vmatprep.subr.bf16.mxu0 %v17338_v63  ;;  %4915 = vmatprep.subr.bf16.mxu1 %v17341_v0  ;;  %v17408_v62 = vld [vmem:[%s24329_s1 + $0x8a8] ss:$52 sps:$4 sm:$0xff]   ;;  %v17411_v63 = vld [vmem:[%s24329_s1 + $0x8b0] ss:$52 sps:$4 sm:$0xff]  }
 0x1bd   :  { %v17416_v0 = vld [vmem:[%s24329_s1 + $0x914] ss:$52 sps:$4 sm:$0xff]  }
 0x1bf   :  { %4752 = vmatpush1.bf16.msra.mxu0 %v17336_v1  ;;  %4916 = vmatpush1.bf16.msra.mxu1 %v17339_v2  ;;  %v17419_v1 = vld [vmem:[%s24329_s1 + $0x91c] ss:$52 sps:$4 sm:$0xff]  }
 0x1c0   :  { %4753 = vmatprep.subr.bf16.mxu0 %v17344_v3  ;;  %4917 = vmatprep.subr.bf16.mxu1 %v17347_v4  ;;  %v17414_v2 = vld [vmem:[%s24329_s1 + $0x910] ss:$52 sps:$4 sm:$0xff]   ;;  %v17417_v3 = vld [vmem:[%s24329_s1 + $0x918] ss:$52 sps:$4 sm:$0xff]  }
 0x1c1   :  { %v17422_v4 = vld [vmem:[%s24329_s1 + $0x97c] ss:$52 sps:$4 sm:$0xff]  }
 0x1c3   :  { %4754 = vmatpush1.bf16.msra.mxu0 %v17342_v5  ;;  %4918 = vmatpush1.bf16.msra.mxu1 %v17345_v6  ;;  %v17425_v5 = vld [vmem:[%s24329_s1 + $0x984] ss:$52 sps:$4 sm:$0xff]  }
 0x1c4   :  { %4755 = vmatprep.subr.bf16.mxu0 %v17350_v7  ;;  %4919 = vmatprep.subr.bf16.mxu1 %v17353_v8  ;;  %v17420_v6 = vld [vmem:[%s24329_s1 + $0x978] ss:$52 sps:$4 sm:$0xff]   ;;  %v17423_v7 = vld [vmem:[%s24329_s1 + $0x980] ss:$52 sps:$4 sm:$0xff]  }
 0x1c5   :  { %v17428_v8 = vld [vmem:[%s24329_s1 + $0x9e4] ss:$52 sps:$4 sm:$0xff]  }
 0x1c7   :  { %4756 = vmatpush1.bf16.msra.mxu0 %v17348_v10  ;;  %4920 = vmatpush1.bf16.msra.mxu1 %v17351_v11  ;;  %v17431_v10 = vld [vmem:[%s24329_s1 + $0x9ec] ss:$52 sps:$4 sm:$0xff]  }
 0x1c8   :  { %4757 = vmatprep.subr.bf16.mxu0 %v17356_v12  ;;  %4921 = vmatprep.subr.bf16.mxu1 %v17359_v13  ;;  %v17426_v11 = vld [vmem:[%s24329_s1 + $0x9e0] ss:$52 sps:$4 sm:$0xff]   ;;  %v17429_v12 = vld [vmem:[%s24329_s1 + $0x9e8] ss:$52 sps:$4 sm:$0xff]  }
 0x1c9   :  { %v17434_v13 = vld [vmem:[%s24329_s1 + $0xa4c] ss:$52 sps:$4 sm:$0xff]  }
 0x1cb   :  { %4758 = vmatpush1.bf16.msra.mxu0 %v17354_v14  ;;  %4922 = vmatpush1.bf16.msra.mxu1 %v17357_v15  ;;  %v17437_v14 = vld [vmem:[%s24329_s1 + $0xa54] ss:$52 sps:$4 sm:$0xff]  }
 0x1cc   :  { %4759 = vmatprep.subr.bf16.mxu0 %v17362_v17  ;;  %4923 = vmatprep.subr.bf16.mxu1 %v17365_v18  ;;  %v17432_v15 = vld [vmem:[%s24329_s1 + $0xa48] ss:$52 sps:$4 sm:$0xff]   ;;  %v17435_v17 = vld [vmem:[%s24329_s1 + $0xa50] ss:$52 sps:$4 sm:$0xff]  }
 0x1cd   :  { %v17440_v18 = vld [vmem:[%s24329_s1 + $0xab4] ss:$52 sps:$4 sm:$0xff]  }
 0x1cf   :  { %4760 = vmatpush1.bf16.msra.mxu0 %v17360_v19  ;;  %4924 = vmatpush1.bf16.msra.mxu1 %v17363_v21  ;;  %v17443_v19 = vld [vmem:[%s24329_s1 + $0xabc] ss:$52 sps:$4 sm:$0xff]  }
 0x1d0   :  { %4761 = vmatprep.subr.bf16.mxu0 %v17368_v22  ;;  %4925 = vmatprep.subr.bf16.mxu1 %v17371_v23  ;;  %v17438_v21 = vld [vmem:[%s24329_s1 + $0xab0] ss:$52 sps:$4 sm:$0xff]   ;;  %v17441_v22 = vld [vmem:[%s24329_s1 + $0xab8] ss:$52 sps:$4 sm:$0xff]  }
 0x1d1   :  { %v17446_v23 = vld [vmem:[%s24329_s1 + $0xb1c] ss:$52 sps:$4 sm:$0xff]  }
 0x1d3   :  { %4762 = vmatpush1.bf16.msra.mxu0 %v17366_v25  ;;  %4926 = vmatpush1.bf16.msra.mxu1 %v17369_v27  ;;  %v17449_v25 = vld [vmem:[%s24329_s1 + $0xb24] ss:$52 sps:$4 sm:$0xff]  }
 0x1d4   :  { %4763 = vmatprep.subr.bf16.mxu0 %v17374_v9  ;;  %4927 = vmatprep.subr.bf16.mxu1 %v17377_v33  ;;  %v17444_v27 = vld [vmem:[%s24329_s1 + $0xb18] ss:$52 sps:$4 sm:$0xff]   ;;  %v17447_v9 = vld [vmem:[%s24329_s1 + $0xb20] ss:$52 sps:$4 sm:$0xff]  }
 0x1d5   :  { %v17452_v33 = vld [vmem:[%s24329_s1 + $0xb84] ss:$52 sps:$4 sm:$0xff]  }
 0x1d7   :  { %4764 = vmatpush1.bf16.msra.mxu0 %v17372_v35  ;;  %4928 = vmatpush1.bf16.msra.mxu1 %v17375_v37  ;;  %v17455_v35 = vld [vmem:[%s24329_s1 + $0xb8c] ss:$52 sps:$4 sm:$0xff]  }
 0x1d8   :  { %4774 = vmatprep.subr.bf16.mxu0 %v17380_v38  ;;  %4938 = vmatprep.subr.bf16.mxu1 %v17383_v39  ;;  %v17450_v37 = vld [vmem:[%s24329_s1 + $0xb80] ss:$52 sps:$4 sm:$0xff]   ;;  %v17453_v38 = vld [vmem:[%s24329_s1 + $0xb88] ss:$52 sps:$4 sm:$0xff]  }
 0x1d9   :  { %v17458_v39 = vld [vmem:[%s24329_s1 + $0xbec] ss:$52 sps:$4 sm:$0xff]  }
 0x1da   :  { %4766 = vmatmul.mubr.bf16.vlgmr.msra.gmra.mrb[8].mxu0 %v19099_v16  ;;  %4930 = vmatmul.mubr.bf16.vlgmr.msra.gmra.mrb[8].mxu1 %v19099_v16 }
 0x1db   :  { %4775 = vmatpush1.bf16.msra.mxu0 %v17378_v28  ;;  %4939 = vmatpush1.bf16.msra.mxu1 %v17381_v40  ;;  %v17461_v28 = vld [vmem:[%s24329_s1 + $0xbf4] ss:$52 sps:$4 sm:$0xff]  }
 0x1dc   :  { %4776 = vmatprep.subr.bf16.mxu0 %v17386_v42  ;;  %4940 = vmatprep.subr.bf16.mxu1 %v17389_v45  ;;  %v17456_v40 = vld [vmem:[%s24329_s1 + $0xbe8] ss:$52 sps:$4 sm:$0xff]   ;;  %v17459_v42 = vld [vmem:[%s24329_s1 + $0xbf0] ss:$52 sps:$4 sm:$0xff]  }
 0x1dd   :  { %4806 = vmatprep.mubr.bf16.mxu0 %v19110_v20  ;;  %4970 = vmatprep.mubr.bf16.mxu1 %v19110_v20  ;;  %v17464_v45 = vld [vmem:[%s24329_s1 + $0xc54] ss:$52 sps:$4 sm:$0xff]  }
 0x1df   :  { %4777 = vmatpush1.bf16.msra.mxu0 %v17384_v26  ;;  %4941 = vmatpush1.bf16.msra.mxu1 %v17387_v46  ;;  %v17467_v26 = vld [vmem:[%s24329_s1 + $0xc5c] ss:$52 sps:$4 sm:$0xff]  }
 0x1e0   :  { %4778 = vmatprep.subr.bf16.mxu0 %v17392_v47  ;;  %4942 = vmatprep.subr.bf16.mxu1 %v17395_v49  ;;  %v17462_v46 = vld [vmem:[%s24329_s1 + $0xc50] ss:$52 sps:$4 sm:$0xff]   ;;  %v17465_v47 = vld [vmem:[%s24329_s1 + $0xc58] ss:$52 sps:$4 sm:$0xff]  }
 0x1e1   :  { %v17470_v49 = vld [vmem:[%s24329_s1 + $0xcbc] ss:$52 sps:$4 sm:$0xff]  }
 0x1e3   :  { %4779 = vmatpush1.bf16.msra.mxu0 %v17390_v48  ;;  %4943 = vmatpush1.bf16.msra.mxu1 %v17393_v50  ;;  %v17473_v48 = vld [vmem:[%s24329_s1 + $0xcc4] ss:$52 sps:$4 sm:$0xff]  }
 0x1e4   :  { %4780 = vmatprep.subr.bf16.mxu0 %v17398_v51  ;;  %4944 = vmatprep.subr.bf16.mxu1 %v17401_v52  ;;  %v17468_v50 = vld [vmem:[%s24329_s1 + $0xcb8] ss:$52 sps:$4 sm:$0xff]   ;;  %v17471_v51 = vld [vmem:[%s24329_s1 + $0xcc0] ss:$52 sps:$4 sm:$0xff]  }
 0x1e5   :  { %v17476_v52 = vld [vmem:[%s24329_s1 + $0xd24] ss:$52 sps:$4 sm:$0xff]  }
 0x1e7   :  { %4781 = vmatpush1.bf16.msra.mxu0 %v17396_v53  ;;  %4945 = vmatpush1.bf16.msra.mxu1 %v17399_v54  ;;  %v17479_v53 = vld [vmem:[%s24329_s1 + $0xd2c] ss:$52 sps:$4 sm:$0xff]  }
 0x1e8   :  { %4782 = vmatprep.subr.bf16.mxu0 %v17404_v55  ;;  %4946 = vmatprep.subr.bf16.mxu1 %v17407_v56  ;;  %v17474_v54 = vld [vmem:[%s24329_s1 + $0xd20] ss:$52 sps:$4 sm:$0xff]   ;;  %v17477_v55 = vld [vmem:[%s24329_s1 + $0xd28] ss:$52 sps:$4 sm:$0xff]  }
 0x1e9   :  { %v17482_v56 = vld [vmem:[%s24329_s1 + $0xd8c] ss:$52 sps:$4 sm:$0xff]  }
 0x1eb   :  { %4783 = vmatpush1.bf16.msra.mxu0 %v17402_v57  ;;  %4947 = vmatpush1.bf16.msra.mxu1 %v17405_v58  ;;  %v17485_v57 = vld [vmem:[%s24329_s1 + $0xd94] ss:$52 sps:$4 sm:$0xff]  }
 0x1ec   :  { %4784 = vmatprep.subr.bf16.mxu0 %v17410_v59  ;;  %4948 = vmatprep.subr.bf16.mxu1 %v17413_v61  ;;  %v17480_v58 = vld [vmem:[%s24329_s1 + $0xd88] ss:$52 sps:$4 sm:$0xff]   ;;  %v17483_v59 = vld [vmem:[%s24329_s1 + $0xd90] ss:$52 sps:$4 sm:$0xff]  }
 0x1ed   :  { %v17488_v61 = vld [vmem:[%s24329_s1 + $0xdf4] ss:$52 sps:$4 sm:$0xff]  }
 0x1ef   :  { %4785 = vmatpush1.bf16.msra.mxu0 %v17408_v62  ;;  %4949 = vmatpush1.bf16.msra.mxu1 %v17411_v63  ;;  %v17491_v62 = vld [vmem:[%s24329_s1 + $0xdfc] ss:$52 sps:$4 sm:$0xff]  }
 0x1f0   :  { %4786 = vmatprep.subr.bf16.mxu0 %v17416_v0  ;;  %4950 = vmatprep.subr.bf16.mxu1 %v17419_v1  ;;  %v17486_v63 = vld [vmem:[%s24329_s1 + $0xdf0] ss:$52 sps:$4 sm:$0xff]   ;;  %v17489_v0 = vld [vmem:[%s24329_s1 + $0xdf8] ss:$52 sps:$4 sm:$0xff]  }
 0x1f1   :  { %v17494_v1 = vld [vmem:[%s24329_s1 + $0xe5c] ss:$52 sps:$4 sm:$0xff]  }
 0x1f3   :  { %4787 = vmatpush1.bf16.msra.mxu0 %v17414_v2  ;;  %4951 = vmatpush1.bf16.msra.mxu1 %v17417_v3  ;;  %v17497_v2 = vld [vmem:[%s24329_s1 + $0xe64] ss:$52 sps:$4 sm:$0xff]  }
 0x1f4   :  { %4788 = vmatprep.subr.bf16.mxu0 %v17422_v4  ;;  %4952 = vmatprep.subr.bf16.mxu1 %v17425_v5  ;;  %v17492_v3 = vld [vmem:[%s24329_s1 + $0xe58] ss:$52 sps:$4 sm:$0xff]   ;;  %v17495_v4 = vld [vmem:[%s24329_s1 + $0xe60] ss:$52 sps:$4 sm:$0xff]  }
 0x1f5   :  { %v17500_v5 = vld [vmem:[%s24329_s1 + $0xec4] ss:$52 sps:$4 sm:$0xff]  }
 0x1f7   :  { %4789 = vmatpush1.bf16.msra.mxu0 %v17420_v6  ;;  %4953 = vmatpush1.bf16.msra.mxu1 %v17423_v7  ;;  %v17503_v6 = vld [vmem:[%s24329_s1 + $0xecc] ss:$52 sps:$4 sm:$0xff]  }
 0x1f8   :  { %4790 = vmatprep.subr.bf16.mxu0 %v17428_v8  ;;  %4954 = vmatprep.subr.bf16.mxu1 %v17431_v10  ;;  %v17498_v7 = vld [vmem:[%s24329_s1 + $0xec0] ss:$52 sps:$4 sm:$0xff]   ;;  %v17501_v8 = vld [vmem:[%s24329_s1 + $0xec8] ss:$52 sps:$4 sm:$0xff]  }
 0x1f9   :  { %v17506_v10 = vld [vmem:[%s24329_s1 + $0xf2c] ss:$52 sps:$4 sm:$0xff]  }
 0x1fb   :  { %4791 = vmatpush1.bf16.msra.mxu0 %v17426_v11  ;;  %4955 = vmatpush1.bf16.msra.mxu1 %v17429_v12  ;;  %v17509_v11 = vld [vmem:[%s24329_s1 + $0xf34] ss:$52 sps:$4 sm:$0xff]  }
 0x1fc   :  { %4792 = vmatprep.subr.bf16.mxu0 %v17434_v13  ;;  %4956 = vmatprep.subr.bf16.mxu1 %v17437_v14  ;;  %v17504_v12 = vld [vmem:[%s24329_s1 + $0xf28] ss:$52 sps:$4 sm:$0xff]   ;;  %v17507_v13 = vld [vmem:[%s24329_s1 + $0xf30] ss:$52 sps:$4 sm:$0xff]  }
 0x1fd   :  { %v17512_v14 = vld [vmem:[%s24329_s1 + $0xf94] ss:$52 sps:$4 sm:$0xff]  }
 0x1ff   :  { %4793 = vmatpush1.bf16.msra.mxu0 %v17432_v15  ;;  %4957 = vmatpush1.bf16.msra.mxu1 %v17435_v17  ;;  %v17515_v15 = vld [vmem:[%s24329_s1 + $0xf9c] ss:$52 sps:$4 sm:$0xff]  }
 0x200   :  { %4794 = vmatprep.subr.bf16.mxu0 %v17440_v18  ;;  %4958 = vmatprep.subr.bf16.mxu1 %v17443_v19  ;;  %v17510_v17 = vld [vmem:[%s24329_s1 + $0xf90] ss:$52 sps:$4 sm:$0xff]   ;;  %v17513_v18 = vld [vmem:[%s24329_s1 + $0xf98] ss:$52 sps:$4 sm:$0xff]  }
 0x201   :  { %v17518_v19 = vld [vmem:[%s24329_s1 + $0xffc] ss:$52 sps:$4 sm:$0xff]  }
 0x203   :  { %4795 = vmatpush1.bf16.msra.mxu0 %v17438_v21  ;;  %4959 = vmatpush1.bf16.msra.mxu1 %v17441_v22  ;;  %v17521_v21 = vld [vmem:[%s24329_s1 + $0x1004] ss:$52 sps:$4 sm:$0xff]  }
 0x204   :  { %4796 = vmatprep.subr.bf16.mxu0 %v17446_v23  ;;  %4960 = vmatprep.subr.bf16.mxu1 %v17449_v25  ;;  %v17516_v22 = vld [vmem:[%s24329_s1 + $0xff8] ss:$52 sps:$4 sm:$0xff]   ;;  %v17519_v23 = vld [vmem:[%s24329_s1 + $0x1000] ss:$52 sps:$4 sm:$0xff]  }
 0x205   :  { %v17524_v25 = vld [vmem:[%s24329_s1 + $0x1064] ss:$52 sps:$4 sm:$0xff]  }
 0x207   :  { %4797 = vmatpush1.bf16.msra.mxu0 %v17444_v27  ;;  %4961 = vmatpush1.bf16.msra.mxu1 %v17447_v9  ;;  %v17527_v27 = vld [vmem:[%s24329_s1 + $0x106c] ss:$52 sps:$4 sm:$0xff]  }
 0x208   :  { %4798 = vmatprep.subr.bf16.mxu0 %v17452_v33  ;;  %4962 = vmatprep.subr.bf16.mxu1 %v17455_v35  ;;  %v17522_v9 = vld [vmem:[%s24329_s1 + $0x1060] ss:$52 sps:$4 sm:$0xff]   ;;  %v17525_v33 = vld [vmem:[%s24329_s1 + $0x1068] ss:$52 sps:$4 sm:$0xff]  }
 0x209   :  { %v17530_v35 = vld [vmem:[%s24329_s1 + $0x10cc] ss:$52 sps:$4 sm:$0xff]  }
 0x20b   :  { %4799 = vmatpush1.bf16.msra.mxu0 %v17450_v37  ;;  %4963 = vmatpush1.bf16.msra.mxu1 %v17453_v38  ;;  %v17533_v37 = vld [vmem:[%s24329_s1 + $0x10d4] ss:$52 sps:$4 sm:$0xff]  }
 0x20c   :  { %4800 = vmatprep.subr.bf16.mxu0 %v17458_v39  ;;  %4964 = vmatprep.subr.bf16.mxu1 %v17461_v28  ;;  %v17528_v38 = vld [vmem:[%s24329_s1 + $0x10c8] ss:$52 sps:$4 sm:$0xff]   ;;  %v17531_v39 = vld [vmem:[%s24329_s1 + $0x10d0] ss:$52 sps:$4 sm:$0xff]  }
 0x20d   :  { %v17536_v28 = vld [vmem:[%s24329_s1 + $0x1134] ss:$52 sps:$4 sm:$0xff]  }
 0x20f   :  { %4801 = vmatpush1.bf16.msra.mxu0 %v17456_v40  ;;  %4965 = vmatpush1.bf16.msra.mxu1 %v17459_v42  ;;  %v17539_v40 = vld [vmem:[%s24329_s1 + $0x113c] ss:$52 sps:$4 sm:$0xff]  }
 0x210   :  { %4802 = vmatprep.subr.bf16.mxu0 %v17464_v45  ;;  %4966 = vmatprep.subr.bf16.mxu1 %v17467_v26  ;;  %v17534_v42 = vld [vmem:[%s24329_s1 + $0x1130] ss:$52 sps:$4 sm:$0xff]   ;;  %v17537_v45 = vld [vmem:[%s24329_s1 + $0x1138] ss:$52 sps:$4 sm:$0xff]  }
 0x211   :  { %v17542_v26 = vld [vmem:[%s24329_s1 + $0x119c] ss:$52 sps:$4 sm:$0xff]  }
 0x213   :  { %4803 = vmatpush1.bf16.msra.mxu0 %v17462_v46  ;;  %4967 = vmatpush1.bf16.msra.mxu1 %v17465_v47  ;;  %v17545_v46 = vld [vmem:[%s24329_s1 + $0x11a4] ss:$52 sps:$4 sm:$0xff]  }
 0x214   :  { %4804 = vmatprep.subr.bf16.mxu0 %v17470_v49  ;;  %4968 = vmatprep.subr.bf16.mxu1 %v17473_v48  ;;  %v765_v47 = vld [vmem:[%s24334_s6] ss:$8 sm:$0xf] }
 0x215   :  { %v766_v49 = vld [vmem:[%s24334_s6] ss:$8 sm:$0xf0] }
 0x216   :  { %v17540_v48 = vld [vmem:[%s24329_s1 + $0x1198] ss:$52 sps:$4 sm:$0xff]  }
 0x217   :  { %4805 = vmatpush1.bf16.msra.mxu0 %v17468_v50  ;;  %4969 = vmatpush1.bf16.msra.mxu1 %v17471_v51  ;;  %v17543_v50 = vld [vmem:[%s24329_s1 + $0x11a0] ss:$52 sps:$4 sm:$0xff]   ;;  %v17548_v51 = vld [vmem:[%s24329_s1 + $0x1204] ss:$52 sps:$4 sm:$0xff]  }
 0x218   :  { %4815 = vmatprep.subr.bf16.mxu0 %v17476_v52  ;;  %4979 = vmatprep.subr.bf16.mxu1 %v17479_v53  ;;  %v17551_v52 = vld [vmem:[%s24329_s1 + $0x120c] ss:$52 sps:$4 sm:$0xff]   ;;  %v20697_v53 = vsub.s32 0, %v18997_v43 }
 0x21a   :  { %4807 = vmatmul.mubr.bf16.vlgmr.msra.gmra.mrb[8].mxu0 %v19301_v24  ;;  %4971 = vmatmul.mubr.bf16.vlgmr.msra.gmra.mrb[8].mxu1 %v19301_v24 }
 0x21b   :  { %4816 = vmatpush1.bf16.msra.mxu0 %v17474_v54  ;;  %4980 = vmatpush1.bf16.msra.mxu1 %v17477_v55  ;;  %v20699_v54 = vor.u32 %v766_v49, %v765_v47  ;;  %v17546_v55 = vld [vmem:[%s24329_s1 + $0x1200] ss:$52 sps:$4 sm:$0xff]  }
 0x21c   :  { %4817 = vmatprep.subr.bf16.mxu0 %v17482_v56  ;;  %4981 = vmatprep.subr.bf16.mxu1 %v17485_v57  ;;  %v17549_v56 = vld [vmem:[%s24329_s1 + $0x1208] ss:$52 sps:$4 sm:$0xff]   ;;  %v20708_v57 = vsub.s32 2, %v18997_v43 }
 0x21d   :  { %4847 = vmatprep.mubr.bf16.mxu0 %v19337_v34  ;;  %5011 = vmatprep.mubr.bf16.mxu1 %v19337_v34 }
 0x21f   :  { %4818 = vmatpush1.bf16.msra.mxu0 %v17480_v58  ;;  %4982 = vmatpush1.bf16.msra.mxu1 %v17483_v59  ;;  %v17554_v58 = vld [vmem:[%s24329_s1 + $0x126c] ss:$52 sps:$4 sm:$0xff]   ;;  %v17557_v59 = vld [vmem:[%s24329_s1 + $0x1274] ss:$52 sps:$4 sm:$0xff]  }
 0x220   :  { %4819 = vmatprep.subr.bf16.mxu0 %v17488_v61  ;;  %4983 = vmatprep.subr.bf16.mxu1 %v17491_v62  ;;  %v20717_v61 = vsub.s32 1, %v18997_v43  ;;  %v777_v62 = vrot.slane %v20699_v54, %v20697_v53 }
 0x223   :  { %4820 = vmatpush1.bf16.msra.mxu0 %v17486_v63  ;;  %4984 = vmatpush1.bf16.msra.mxu1 %v17489_v0  ;;  %v17552_v63 = vld [vmem:[%s24329_s1 + $0x1268] ss:$52 sps:$4 sm:$0xff]   ;;  %v17555_v0 = vld [vmem:[%s24329_s1 + $0x1270] ss:$52 sps:$4 sm:$0xff]  }
 0x224   :  { %4821 = vmatprep.subr.bf16.mxu0 %v17494_v1  ;;  %4985 = vmatprep.subr.bf16.mxu1 %v17497_v2  ;;  %v785_v1 = vrot.slane %v20699_v54, %v20708_v57  ;;  %v20730_v2 = vsub.s32 3, %v18997_v43 }
 0x227   :  { %4822 = vmatpush1.bf16.msra.mxu0 %v17492_v3  ;;  %4986 = vmatpush1.bf16.msra.mxu1 %v17495_v4  ;;  %v17560_v3 = vld [vmem:[%s24329_s1 + $0x12d4] ss:$52 sps:$4 sm:$0xff]   ;;  %v17563_v4 = vld [vmem:[%s24329_s1 + $0x12dc] ss:$52 sps:$4 sm:$0xff]  }
 0x228   :  { %4823 = vmatprep.subr.bf16.mxu0 %v17500_v5  ;;  %4987 = vmatprep.subr.bf16.mxu1 %v17503_v6  ;;  %v16492_v5 = vadd.f32 %v20182_v29, %v777_v62  ;;  %v781_v6 = vrot.slane %v20699_v54, %v20717_v61  ;;  %v17566_v29 = vld [vmem:[%s24329_s1 + $0x133c] ss:$52 sps:$4 sm:$0xff]  }
 0x22b   :  { %4824 = vmatpush1.bf16.msra.mxu0 %v17498_v7  ;;  %4988 = vmatpush1.bf16.msra.mxu1 %v17501_v8  ;;  %v17558_v7 = vld [vmem:[%s24329_s1 + $0x12d0] ss:$52 sps:$4 sm:$0xff]   ;;  %v17561_v8 = vld [vmem:[%s24329_s1 + $0x12d8] ss:$52 sps:$4 sm:$0xff]  }
 0x22c   :  { %4825 = vmatprep.subr.bf16.mxu0 %v17506_v10  ;;  %4989 = vmatprep.subr.bf16.mxu1 %v17509_v11  ;;  %v16494_v10 = vadd.f32 %v20184_v30, %v785_v1  ;;  %v789_v11 = vrot.slane %v20699_v54, %v20730_v2  ;;  %v17564_v30 = vld [vmem:[%s24329_s1 + $0x1338] ss:$52 sps:$4 sm:$0xff]  }
 0x22f   :  { %4826 = vmatpush1.bf16.msra.mxu0 %v17504_v12  ;;  %4990 = vmatpush1.bf16.msra.mxu1 %v17507_v13  ;;  %v17569_v12 = vld [vmem:[%s24329_s1 + $0x1344] ss:$52 sps:$4 sm:$0xff]   ;;  %v20756_v13 = vmax.f32 %v16492_v5, 0.0 }
 0x230   :  { %4827 = vmatprep.subr.bf16.mxu0 %v17512_v14  ;;  %4991 = vmatprep.subr.bf16.mxu1 %v17515_v15  ;;  %v16493_v14 = vadd.f32 %v20186_v31, %v781_v6  ;;  %v17567_v15 = vld [vmem:[%s24329_s1 + $0x1340] ss:$52 sps:$4 sm:$0xff]   ;;  %v17582_v6 = vld [vmem:[%s24329_s1 + $0x98] ss:$52 sps:$4 sm:$0xff]  }
 0x231   :  { %v17575_v31 = vld [vmem:[%s24329_s1 + $0x13ac] ss:$52 sps:$4 sm:$0xff]  }
 0x233   :  { %4828 = vmatpush1.bf16.msra.mxu0 %v17510_v17  ;;  %4992 = vmatpush1.bf16.msra.mxu1 %v17513_v18  ;;  %v20765_v17 = vmax.f32 %v16494_v10, 0.0  ;;  %v16495_v18 = vadd.f32 %v20188_v32, %v789_v11  ;;  %v17570_v32 = vld [vmem:[%s24329_s1 + $0x13a0] ss:$52 sps:$4 sm:$0xff]  }
 0x234   :  { %4829 = vmatprep.subr.bf16.mxu0 %v17518_v19  ;;  %4993 = vmatprep.subr.bf16.mxu1 %v17521_v21  ;;  %v17572_v19 = vld [vmem:[%s24329_s1 + $0x13a4] ss:$52 sps:$4 sm:$0xff]   ;;  %v5248_v21 = vsel %vm5247_vm1, %v20756_v13, 0.0 }
 0x237   :  { %4830 = vmatpush1.bf16.msra.mxu0 %v17516_v22  ;;  %4994 = vmatpush1.bf16.msra.mxu1 %v17519_v23  ;;  %v20776_v22 = vmax.f32 %v16493_v14, 0.0  ;;  %v17573_v23 = vld [vmem:[%s24329_s1 + $0x13a8] ss:$52 sps:$4 sm:$0xff]  }
 0x238   :  { %4831 = vmatprep.subr.bf16.mxu0 %v17524_v25  ;;  %4995 = vmatprep.subr.bf16.mxu1 %v17527_v27  ;;  %v5340_v25 = vmul.f32 %v20756_v13, %v20756_v13  ;;  %v5262_v27 = vsel %vm5247_vm1, %v20765_v17, 0.0 }
 0x23b   :  { %4832 = vmatpush1.bf16.msra.mxu0 %v17522_v9  ;;  %4996 = vmatpush1.bf16.msra.mxu1 %v17525_v33  ;;  %v20788_v9 = vmax.f32 %v16495_v18, 0.0  ;;  %v17576_v33 = vld [vmem:[%s24329_s1 + $0x370] ss:$52 sps:$4 sm:$0xff]   ;;  %v17587_v18 = vld [vmem:[%s24329_s1 + $0x780] ss:$52 sps:$4 sm:$0xff]  }
 0x23c   :  { %4833 = vmatprep.subr.bf16.mxu0 %v17530_v35  ;;  %4997 = vmatprep.subr.bf16.mxu1 %v17533_v37  ;;  %v17577_v35 = vld [vmem:[%s24329_s1 + $0x9f0] ss:$52 sps:$4 sm:$0xff]   ;;  %v5249_v37 = vrot.slane %v5248_v21, 4 }
 0x23d   :  { %v5269_v49 = vsel %vm5247_vm1, %v20788_v9, 0.0  ;;  %v5343_v62 = vmul.f32 %v20788_v9, %v20788_v9 }
 0x23f   :  { %4834 = vmatpush1.bf16.msra.mxu0 %v17528_v38  ;;  %4998 = vmatpush1.bf16.msra.mxu1 %v17531_v39  ;;  %v5342_v38 = vmul.f32 %v20765_v17, %v20765_v17  ;;  %v5255_v39 = vsel %vm5247_vm1, %v20776_v22, 0.0  ;;  %v5374_v11 = vsel %vm5247_vm1, %v5343_v62, 0.0 }
 0x240   :  { %4835 = vmatprep.subr.bf16.mxu0 %v17536_v28  ;;  %4999 = vmatprep.subr.bf16.mxu1 %v17539_v40  ;;  %v5353_v28 = vsel %vm5247_vm1, %v5340_v25, 0.0  ;;  %v5263_v40 = vrot.slane %v5262_v27, 4 }
 0x241   :  { %v5354_v47 = vrot.slane %v5353_v28, 4 }
 0x243   :  { %4836 = vmatpush1.bf16.msra.mxu0 %v17534_v42  ;;  %5000 = vmatpush1.bf16.msra.mxu1 %v17537_v45  ;;  %v5367_v42 = vsel %vm5247_vm1, %v5342_v38, 0.0  ;;  %v5256_v45 = vrot.slane %v5255_v39, 4  ;;  %v20829_v1 = vadd.f32 %v5354_v47, %v5353_v28 }
 0x244   :  { %4837 = vmatprep.subr.bf16.mxu0 %v17542_v26  ;;  %5001 = vmatprep.subr.bf16.mxu1 %v17545_v46  ;;  %v5341_v26 = vmul.f32 %v20776_v22, %v20776_v22  ;;  %v5250_v46 = vadd.f32 %v5249_v37, %v5248_v21  ;;  %v17588_v21 = vld [vmem:[%s24329_s1 + $0x4a8] ss:$52 sps:$4 sm:$0xff]  }
 0x245   :  { %v5356_v14 = vrot.slane %v20829_v1, 2 }
 0x247   :  { %4838 = vmatpush1.bf16.msra.mxu0 %v17540_v48  ;;  %5002 = vmatpush1.bf16.msra.mxu1 %v17543_v50  ;;  %v20810_v48 = vadd.f32 %v5263_v40, %v5262_v27  ;;  %v5368_v50 = vrot.slane %v5367_v42, 4 }
 0x248   :  { %4839 = vmatprep.subr.bf16.mxu0 %v17548_v51  ;;  %5003 = vmatprep.subr.bf16.mxu1 %v17551_v52  ;;  %v20812_v51 = vadd.f32 %v5256_v45, %v5255_v39  ;;  %v5360_v52 = vsel %vm5247_vm1, %v5341_v26, 0.0  ;;  %v17592_v39 = vld [vmem:[%s24329_s1 + $0x510] ss:$52 sps:$4 sm:$0xff]  }
 0x249   :  { %v17593_v26 = vld [vmem:[%s24329_s1 + $0xb90] ss:$52 sps:$4 sm:$0xff]  }
 0x24a   :  { %v5258_v5 = vrot.slane %v20812_v51, 2 }
 0x24b   :  { %4840 = vmatpush1.bf16.msra.mxu0 %v17546_v55  ;;  %5004 = vmatpush1.bf16.msra.mxu1 %v17549_v56  ;;  %v17578_v55 = vld [vmem:[%s24329_s1 + $0x30] ss:$52 sps:$4 sm:$0xff]  }
 0x24c   :  { %4841 = vmatprep.subr.bf16.mxu0 %v17554_v58  ;;  %5005 = vmatprep.subr.bf16.mxu1 %v17557_v59  ;;  %v17579_v56 = vld [vmem:[%s24329_s1 + $0x6b0] ss:$52 sps:$4 sm:$0xff]   ;;  %v5251_v58 = vrot.slane %v5250_v46, 2  ;;  %v5270_v59 = vrot.slane %v5269_v49, 4  ;;  %v20905_v62 = vadd.f32 %v5258_v5, %v20812_v51  ;;  %v17598_v5 = vld [vmem:[%s24329_s1 + $0x238] ss:$52 sps:$4 sm:$0xff]  }
 0x24e   :  { %v20841_v10 = vadd.f32 %v5270_v59, %v5269_v49  ;;  %v800_v49 = vsub.s32 6, %v18997_v43  ;;  %v804_v59 = vsub.s32 7, %v18997_v43 }
 0x24f   :  { %4842 = vmatpush1.bf16.msra.mxu0 %v17552_v63  ;;  %5006 = vmatpush1.bf16.msra.mxu1 %v17555_v0  ;;  %v17580_v63 = vld [vmem:[%s24329_s1 + $0x3d8] ss:$52 sps:$4 sm:$0xff]  }
 0x250   :  { %4843 = vmatprep.subr.bf16.mxu0 %v17560_v3  ;;  %5007 = vmatprep.subr.bf16.mxu1 %v17563_v4  ;;  %v17581_v0 = vld [vmem:[%s24329_s1 + $0xa58] ss:$52 sps:$4 sm:$0xff]   ;;  %v5265_v3 = vrot.slane %v20810_v48, 2  ;;  %v20832_v4 = vadd.f32 %v5368_v50, %v5367_v42  ;;  %v801_v51 = vrot.slane %v20699_v54, %v800_v49 }
 0x253   :  { %4844 = vmatpush1.bf16.msra.mxu0 %v17558_v7  ;;  %5008 = vmatpush1.bf16.msra.mxu1 %v17561_v8  ;;  %v17583_v7 = vld [vmem:[%s24329_s1 + $0x718] ss:$52 sps:$4 sm:$0xff]   ;;  %v5361_v8 = vrot.slane %v5360_v52, 4 }
 0x254   :  { %4845 = vmatprep.subr.bf16.mxu0 %v17566_v29  ;;  %5009 = vmatprep.subr.bf16.mxu1 %v17569_v12  ;;  %v17584_v29 = vld [vmem:[%s24329_s1 + $0x440] ss:$52 sps:$4 sm:$0xff]  }
 0x255   :  { %v17585_v12 = vld [vmem:[%s24329_s1 + $0xac0] ss:$52 sps:$4 sm:$0xff]  }
 0x257   :  { %4846 = vmatpush1.bf16.msra.mxu0 %v17564_v30  ;;  %5010 = vmatpush1.bf16.msra.mxu1 %v17567_v15  ;;  %v5370_v30 = vrot.slane %v20832_v4, 2  ;;  %v17586_v15 = vld [vmem:[%s24329_s1 + $0x100] ss:$52 sps:$4 sm:$0xff]  }
 0x258   :  { %4856 = vmatprep.subr.bf16.mxu0 %v17572_v19  ;;  %5020 = vmatprep.subr.bf16.mxu1 %v17575_v31  ;;  %v5272_v19 = vrot.slane %v20841_v10, 2  ;;  %v5375_v31 = vrot.slane %v5374_v11, 4 }
 0x25a   :  { %4848 = vmatmul.mubr.bf16.vlgmr.msra.gmra.mrb[8].mxu0 %v19511_v36  ;;  %5012 = vmatmul.mubr.bf16.vlgmr.msra.gmra.mrb[8].mxu1 %v19511_v36  ;;  %v5376_v47 = vadd.f32 %v5375_v31, %v5374_v11  ;;  %v17601_v31 = vld [vmem:[%s24329_s1 + $0xc60] ss:$52 sps:$4 sm:$0xff]  }
 0x25b   :  { %4857 = vmatpush1.bf16.msra.mxu0 %v17570_v32  ;;  %5021 = vmatpush1.bf16.msra.mxu1 %v17573_v23  ;;  %v17589_v32 = vld [vmem:[%s24329_s1 + $0xb28] ss:$52 sps:$4 sm:$0xff]   ;;  %v20872_v23 = vsub.s32 4, %v18997_v43 }
 0x25c   :  { %4888 = vmatprep.mubr.bf16.mxu0 %v18835_v41  ;;  %5052 = vmatprep.mubr.bf16.mxu1 %v18835_v41 }
 0x25d   :  { %16034 = vmatprep.subr.bf16.mxu0 %v17576_v33  ;;  %16056 = vmatprep.subr.bf16.mxu1 %v17577_v35  ;;  %v17590_v33 = vld [vmem:[%s24329_s1 + $0x168] ss:$52 sps:$4 sm:$0xff]  }
 0x25e   :  { %v17591_v35 = vld [vmem:[%s24329_s1 + $0x7e8] ss:$52 sps:$4 sm:$0xff]  }
 0x266   :  { %15172 = vmatmul.mubr.msk.bf16.vlgmr.msra.gmra.mrb[8].mxu0 %vm4073_vm0, %v19532_v44  ;;  %15173 = vmatmul.mubr.msk.bf16.vlgmr.msra.gmra.mrb[8].mxu1 %vm4073_vm0, %v19532_v44 }
 0x267   :  { %16035 = vmatpush3.bf16.msra.mxu0 %v17578_v55  ;;  %16057 = vmatpush3.bf16.msra.mxu1 %v17579_v56  ;;  %v17594_v56 = vld [vmem:[%s24329_s1 + $0x1d0] ss:$52 sps:$4 sm:$0xff]  }
 0x268   :  { %16036 = vmatprep.subr.bf16.mxu0 %v17580_v63  ;;  %16058 = vmatprep.subr.bf16.mxu1 %v17581_v0  ;;  %v793_v63 = vrot.slane %v20699_v54, %v20872_v23  ;;  %v17597_v0 = vld [vmem:[%s24329_s1 + $0xbf8] ss:$52 sps:$4 sm:$0xff]  }
 0x269   :  { %5093 = vmatprep.mubr.bf16.mxu0 %v19042_v60  ;;  %5133 = vmatprep.mubr.bf16.mxu1 %v19110_v20  ;;  %v796_v60 = vsub.s32 5, %v18997_v43  ;;  %v20875_v20 = vadd.f32 %v5251_v58, %v5250_v46  ;;  %v5362_v46 = vadd.f32 %v5361_v8, %v5360_v52  ;;  %v20898_v58 = vadd.f32 %v5265_v3, %v20810_v48  ;;  %v17595_v52 = vld [vmem:[%s24329_s1 + $0x850] ss:$52 sps:$4 sm:$0xff]   ;;  %v17596_v48 = vld [vmem:[%s24329_s1 + $0x578] ss:$52 sps:$4 sm:$0xff]  }
 0x26a   :  { %v20916_v3 = vadd.f32 %v5356_v14, %v20829_v1  ;;  %v5377_v8 = vrot.slane %v5376_v47, 2  ;;  %v17600_v1 = vld [vmem:[%s24329_s1 + $0x5e0] ss:$52 sps:$4 sm:$0xff]   ;;  %v5260_v14 = vrot.slane %v20905_v62, 1 }
 0x26b   :  { %16037 = vmatpush3.bf16.msra.mxu0 %v17582_v6  ;;  %16059 = vmatpush3.bf16.msra.mxu1 %v17583_v7  ;;  %v5253_v50 = vrot.slane %v20875_v20, 1  ;;  %v797_v55 = vrot.slane %v20699_v54, %v796_v60  ;;  %v17599_v6 = vld [vmem:[%s24329_s1 + $0x8b8] ss:$52 sps:$4 sm:$0xff]   ;;  %v5363_v7 = vrot.slane %v5362_v46, 2 }
 0x26c   :  { %16038 = vmatprep.subr.bf16.mxu0 %v17584_v29  ;;  %16060 = vmatprep.subr.bf16.mxu1 %v17585_v12  ;;  %v20931_v29 = vadd.f32 %v5370_v30, %v20832_v4  ;;  %v805_v12 = vrot.slane %v20699_v54, %v804_v59  ;;  %v20943_v4 = vadd.f32 %v5272_v19, %v20841_v10  ;;  %v17602_v30 = vld [vmem:[%s24329_s1 + $0x2a0] ss:$52 sps:$4 sm:$0xff]  }
 0x26d   :  { %v4562_v25 = vpop.f32.mrb[4].mxu0  ;;  %v4726_v27 = vpop.f32.mrb[4].mxu1 }
 0x26e   :  { %v4564_v37 = vpop.f32.mrb[5].mxu0  ;;  %v4728_v38 = vpop.f32.mrb[5].mxu1  ;;  %v16498_v54 = vadd.f32 %v4726_v27, %v801_v51  ;;  %v5372_v10 = vrot.slane %v20931_v29, 1  ;;  %v17605_v27 = vld [vmem:[%s24329_s1 + $0xcc8] ss:$52 sps:$4 sm:$0xff]  }
 0x26f   :  { %16039 = vmatpush3.bf16.msra.mxu0 %v17586_v15  ;;  %16061 = vmatpush3.bf16.msra.mxu1 %v17587_v18  ;;  %v4566_v28 = vpop.f32.mrb[6].mxu0  ;;  %v4730_v40 = vpop.f32.mrb[6].mxu1  ;;  %v16497_v11 = vadd.f32 %v4564_v37, %v797_v55  ;;  %v5267_v15 = vrot.slane %v20898_v58, 1  ;;  %v16496_v18 = vadd.f32 %v4562_v25, %v793_v63  ;;  %v5364_v25 = vadd.f32 %v5363_v7, %v5362_v46  ;;  %v17608_v46 = vld [vmem:[%s24329_s1 + $0x1070] ss:$52 sps:$4 sm:$0xff]   ;;  %v21006_v7 = vld [vmem:[%s24333_s5 + $0x8] sm:$0xff] }
 0x270   :  { %v4567_v42 = vpop.f32.mrb[7].mxu0  ;;  %v4731_v45 = vpop.f32.mrb[7].mxu1  ;;  %16040 = vmatprep.subr.bf16.mxu0 %v17588_v21  ;;  %16062 = vmatprep.subr.bf16.mxu1 %v17589_v32  ;;  %v5358_v21 = vrot.slane %v20916_v3, 1  ;;  %v17603_v32 = vld [vmem:[%s24329_s1 + $0x920] ss:$52 sps:$4 sm:$0xff]   ;;  %v20956_v37 = vadd.f32 %v5377_v8, %v5376_v47  ;;  %v16499_v19 = vadd.f32 %v4728_v38, %v805_v12  ;;  %v5274_v28 = vrot.slane %v20943_v4, 1 }
 0x271   :  { %v20965_v40 = vmax.f32 %v16498_v54, 0.0  ;;  %v17606_v42 = vld [vmem:[%s24329_s1 + $0x308] ss:$52 sps:$4 sm:$0xff]   ;;  %v5365_v45 = vrot.slane %v5364_v25, 1  ;;  %v17611_v63 = vld [vmem:[%s24329_s1 + $0x13b0] ss:$52 sps:$4 sm:$0xff]  }
 0x272   :  { %v17607_v38 = vld [vmem:[%s24329_s1 + $0x988] ss:$52 sps:$4 sm:$0xff]   ;;  %v5379_v47 = vrot.slane %v20956_v37, 1  ;;  %v20979_v55 = vmax.f32 %v16499_v19, 0.0 }
 0x273   :  { %16041 = vmatpush3.bf16.msra.mxu0 %v17590_v33  ;;  %16063 = vmatpush3.bf16.msra.mxu1 %v17591_v35  ;;  %v20951_v33 = vmax.f32 %v16497_v11, 0.0  ;;  %v17604_v35 = vld [vmem:[%s24329_s1 + $0x648] ss:$52 sps:$4 sm:$0xff]   ;;  %v20985_v59 = vsel %vm5247_vm1, %v20965_v40, 0.0  ;;  %v5346_v11 = vmul.f32 %v20965_v40, %v20965_v40  ;;  %v5366_v19 = vadd.f32 %v5365_v45, %v5364_v25 }
 0x274   :  { %16042 = vmatprep.subr.bf16.mxu0 %v17592_v39  ;;  %16064 = vmatprep.subr.bf16.mxu1 %v17593_v26  ;;  %v20962_v39 = vmax.f32 %v16496_v18, 0.0  ;;  %v5347_v12 = vmul.f32 %v20979_v55, %v20979_v55  ;;  %v17612_v18 = vld [vmem:[%s24329_s1 + $0xd98] ss:$52 sps:$4 sm:$0xff]  }
 0x275   :  { %v5345_v26 = vmul.f32 %v20951_v33, %v20951_v33  ;;  %v21046_v25 = vld [vmem:[%s24333_s5 + $0x18] sm:$0xff] }
 0x276   :  { %v5344_v51 = vmul.f32 %v20962_v39, %v20962_v39 }
 0x277   :  { %16043 = vmatpush3.bf16.msra.mxu0 %v17594_v56  ;;  %16065 = vmatpush3.bf16.msra.mxu1 %v17595_v52  ;;  %v5276_v56 = vsel %vm5247_vm1, %v20962_v39, 0.0  ;;  %v17609_v52 = vld [vmem:[%s24329_s1 + $0xd30] ss:$52 sps:$4 sm:$0xff]  }
 0x278   :  { %16044 = vmatprep.subr.bf16.mxu0 %v17596_v48  ;;  %16066 = vmatprep.subr.bf16.mxu1 %v17597_v0  ;;  %v5388_v48 = vsel %vm5247_vm1, %v5345_v26, 0.0  ;;  %v17610_v0 = vld [vmem:[%s24329_s1 + $0x10d8] ss:$52 sps:$4 sm:$0xff]   ;;  %v5277_v8 = vrot.slane %v5276_v56, 4  ;;  %v5381_v54 = vsel %vm5247_vm1, %v5344_v51, 0.0  ;;  %v5297_v26 = vsel %vm5247_vm1, %v20979_v55, 0.0 }
 0x27b   :  { %16045 = vmatpush3.bf16.msra.mxu0 %v17598_v5  ;;  %16067 = vmatpush3.bf16.msra.mxu1 %v17599_v6  ;;  %v5283_v5 = vsel %vm5247_vm1, %v20951_v33, 0.0  ;;  %v18836_v6 = vmov 0.0  }
 0x27c   :  { %16046 = vmatprep.subr.bf16.mxu0 %v17600_v1  ;;  %16068 = vmatprep.subr.bf16.mxu1 %v17601_v31  ;;  %v5389_v1 = vrot.slane %v5388_v48, 4  ;;  %v17613_v31 = vld [vmem:[%s24329_s1 + $0x1140] ss:$52 sps:$4 sm:$0xff]  }
 0x27f   :  { %16047 = vmatpush3.bf16.msra.mxu0 %v17602_v30  ;;  %16069 = vmatpush3.bf16.msra.mxu1 %v17603_v32  ;;  %v5284_v30 = vrot.slane %v5283_v5, 4  ;;  %v5395_v32 = vsel %vm5247_vm1, %v5346_v11, 0.0  ;;  %v5291_v11 = vrot.slane %v20985_v59, 4 }
 0x280   :  { %16048 = vmatprep.subr.bf16.mxu0 %v17604_v35  ;;  %16070 = vmatprep.subr.bf16.mxu1 %v17605_v27  ;;  %v5390_v35 = vadd.f32 %v5389_v1, %v5388_v48  ;;  %v17615_v27 = vld [vmem:[%s24329_s1 + $0x11a8] ss:$52 sps:$4 sm:$0xff]   ;;  %v5396_v1 = vrot.slane %v5395_v32, 4 }
 0x283   :  { %16049 = vmatpush3.bf16.msra.mxu0 %v17606_v42  ;;  %16071 = vmatpush3.bf16.msra.mxu1 %v17607_v38  ;;  %v5382_v42 = vrot.slane %v5381_v54, 4  ;;  %v5285_v38 = vadd.f32 %v5284_v30, %v5283_v5  ;;  %v5298_v5 = vrot.slane %v5297_v26, 4 }
 0x284   :  { %16078 = vmatprep.subr.bf16.mxu0 %v17608_v46  ;;  %16358 = vmatprep.subr.bf16.mxu1 %v18836_v6  ;;  %v21038_v46 = vld [vmem:[%s24333_s5] sm:$0xff] }
 0x285   :  { %v5286_v51 = vrot.slane %v5285_v38, 2  ;;  %v5299_v30 = vadd.f32 %v5298_v5, %v5297_v26 }
 0x286   :  { %5094 = vmatmul.mubr.bf16.vlgmr.msra.gmra.mrb[12].mxu0 %v19099_v16  ;;  %5134 = vmatmul.mubr.bf16.vlgmr.msra.gmra.mrb[12].mxu1 %v19301_v24  ;;  %v5402_v16 = vsel %vm5247_vm1, %v5347_v12, 0.0  ;;  %v17614_v24 = vld [vmem:[%s24329_s1 + $0xe00] ss:$52 sps:$4 sm:$0xff]  }
 0x287   :  { %16079 = vmatpush3.bf16.msra.mxu0 %v17609_v52  ;;  %16359 = vmatpush3.bf16.msra.mxu1 %v17611_v63  ;;  %v5403_v45 = vrot.slane %v5402_v16, 4  ;;  %v17616_v52 = vld [vmem:[%s24329_s1 + $0xe68] ss:$52 sps:$4 sm:$0xff]   ;;  %v5391_v63 = vrot.slane %v5390_v35, 2 }
 0x288   :  { %16080 = vmatprep.subr.bf16.mxu0 %v17610_v0  ;;  %16360 = vmatprep.mubr.msk.bf16.mxu1 %vm18837_vm3, %v18836_v6  ;;  %v5383_v0 = vadd.f32 %v5382_v42, %v5381_v54  ;;  %v5397_v42 = vadd.f32 %v5396_v1, %v5395_v32 }
 0x289   :  { %5467 = vmatprep.subr.mxu1 %v21006_v7  ;;  %5173 = vmatprep.mubr.bf16.mxu0 %v19337_v34  ;;  %v5261_v34 = vadd.f32 %v5260_v14, %v20905_v62  ;;  %v17617_v62 = vld [vmem:[%s24329_s1 + $0x1210] ss:$52 sps:$4 sm:$0xff]   ;;  %v5278_v14 = vadd.f32 %v5277_v8, %v5276_v56  ;;  %v5404_v12 = vadd.f32 %v5403_v45, %v5402_v16  ;;  %v17622_v45 = vld [vmem:[%s24329_s1 + $0xfa0] ss:$52 sps:$4 sm:$0xff]  }
 0x28a   :  { %v17618_v56 = vld [vmem:[%s24329_s1 + $0xed0] ss:$52 sps:$4 sm:$0xff]   ;;  %v5392_v8 = vadd.f32 %v5391_v63, %v5390_v35  ;;  %v5384_v54 = vrot.slane %v5383_v0, 2  ;;  %v5287_v16 = vadd.f32 %v5286_v51, %v5285_v38  ;;  %v5300_v38 = vrot.slane %v5299_v30, 2 }
 0x28b   :  { %16081 = vmatpush3.bf16.msra.mxu0 %v17612_v18  ;;  %v5448_v48 = vsel %vm5446_vm2, %v5261_v34, %v5366_v19  ;;  %v5254_v18 = vadd.f32 %v5253_v50, %v20875_v20  ;;  %v5236_v35 = vld [vmem:[%s24333_s5 + $0x10] sm:$0xff]  ;;  %v5275_v20 = vadd.f32 %v5274_v28, %v20943_v4  ;;  %v5239_v50 = vld [vmem:[%s24333_s5 + $0x28] sm:$0xff]  ;;  %v5405_v19 = vrot.slane %v5404_v12, 2 }
 0x28c   :  { %16082 = vmatprep.subr.bf16.mxu0 %v17613_v31  ;;  %v5380_v31 = vadd.f32 %v5379_v47, %v20956_v37  ;;  %v17620_v47 = vld [vmem:[%s24329_s1 + $0xf38] ss:$52 sps:$4 sm:$0xff]   ;;  %v17621_v4 = vld [vmem:[%s24329_s1 + $0x12e0] ss:$52 sps:$4 sm:$0xff]   ;;  %v5292_v28 = vadd.f32 %v5291_v11, %v20985_v59  ;;  %v5288_v26 = vrot.slane %v5287_v16, 1  ;;  %v5373_v34 = vadd.f32 %v5372_v10, %v20931_v29 }
 0x28d   :  { %v5406_v63 = vadd.f32 %v5405_v19, %v5404_v12  ;;  %v5268_v59 = vadd.f32 %v5267_v15, %v20898_v58  ;;  %v5398_v5 = vrot.slane %v5397_v42, 2  ;;  %v5238_v29 = vld [vmem:[%s24333_s5 + $0x20] sm:$0xff]  ;;  %v5301_v10 = vadd.f32 %v5300_v38, %v5299_v30  ;;  %v5241_v58 = vld [vmem:[%s24333_s5 + $0x38] sm:$0xff] }
 0x28e   :  { %16361 = vmatmul.mubr.msk.bf16.vlgmr.msra.gmra.mrb[16].mxu1 %vm4073_vm0, %v19532_v44  ;;  %v5359_v44 = vadd.f32 %v5358_v21, %v20916_v3  ;;  %v17619_v3 = vld [vmem:[%s24329_s1 + $0x1278] ss:$52 sps:$4 sm:$0xff]   ;;  %v5279_v21 = vrot.slane %v5278_v14, 2  ;;  %v5293_v51 = vrot.slane %v5292_v28, 2 }
 0x28f   :  { %16083 = vmatpush3.bf16.msra.mxu0 %v17614_v24  ;;  %5531 = vmatprep.mubr.f32.mxu1 %v5448_v48  ;;  %v5393_v24 = vrot.slane %v5392_v8, 1  ;;  %v17623_v48 = vld [vmem:[%s24329_s1 + $0x1348] ss:$52 sps:$4 sm:$0xff]   ;;  %v5449_v15 = vsel %vm5446_vm2, %v5268_v59, %v5373_v34  ;;  %v5407_v11 = vrot.slane %v5406_v63, 1 }
 0x290   :  { %16084 = vmatprep.subr.bf16.mxu0 %v17615_v27  ;;  %5468 = vmatpush1.xpose.msra.mxu1 %v21038_v46  ;;  %v5447_v37 = vsel %vm5446_vm2, %v5254_v18, %v5359_v44  ;;  %v5450_v27 = vsel %vm5446_vm2, %v5275_v20, %v5380_v31  ;;  %v5399_v18 = vadd.f32 %v5398_v5, %v5397_v42 }
 0x291   :  { %5537 = vmatprep.subr.mxu1 %v21046_v25  ;;  %v5394_v32 = vadd.f32 %v5393_v24, %v5392_v8  ;;  %v5408_v31 = vadd.f32 %v5407_v11, %v5406_v63  ;;  %v21143_v24 = vld [vmem:[%s24333_s5 + $0x40] sm:$0xff] }
 0x293   :  { %16085 = vmatpush3.bf16.msra.mxu0 %v17616_v52  ;;  %v5385_v52 = vadd.f32 %v5384_v54, %v5383_v0  ;;  %v5289_v0 = vadd.f32 %v5288_v26, %v5287_v16  ;;  %v5400_v16 = vrot.slane %v5399_v18, 1 }
 0x294   :  { %16086 = vmatprep.subr.bf16.mxu0 %v17617_v62  ;;  %v5280_v62 = vadd.f32 %v5279_v21, %v5278_v14  ;;  %v17624_v14 = vld [vmem:[%s24329_s1 + $0x1008] ss:$52 sps:$4 sm:$0xff]   ;;  %v5294_v21 = vadd.f32 %v5293_v51, %v5292_v28 }
 0x295   :  { %v5386_v44 = vrot.slane %v5385_v52, 1  ;;  %v5452_v1 = vsel %vm5446_vm2, %v5289_v0, %v5394_v32 }
 0x296   :  { %5532 = vmatmul.mubr.f32.vlgmr.msra.gmra.mrb[20].mxu1 %v5447_v37  ;;  %v5281_v12 = vrot.slane %v5280_v62, 1  ;;  %v5401_v37 = vadd.f32 %v5400_v16, %v5399_v18 }
 0x297   :  { %16087 = vmatpush3.bf16.msra.mxu0 %v17618_v56  ;;  %5601 = vmatprep.mubr.f32.mxu1 %v5450_v27  ;;  %v5302_v56 = vrot.slane %v5301_v10, 1  ;;  %v5387_v8 = vadd.f32 %v5386_v44, %v5385_v52 }
 0x298   :  { %16088 = vmatprep.subr.bf16.mxu0 %v17619_v3  ;;  %5538 = vmatpush1.xpose.msra.mxu1 %v5236_v35  ;;  %v5240_v3 = vld [vmem:[%s24333_s5 + $0x30] sm:$0xff]  ;;  %v5282_v54 = vadd.f32 %v5281_v12, %v5280_v62 }
 0x299   :  { %5607 = vmatprep.subr.mxu1 %v5239_v50  ;;  %v5303_v30 = vadd.f32 %v5302_v56, %v5301_v10  ;;  %v5295_v50 = vrot.slane %v5294_v21, 1 }
 0x29a   :  { %v5451_v35 = vsel %vm5446_vm2, %v5282_v54, %v5387_v8 }
 0x29b   :  { %16089 = vmatpush3.bf16.msra.mxu0 %v17620_v47  ;;  %v5454_v20 = vsel %vm5446_vm2, %v5303_v30, %v5408_v31 }
 0x29c   :  { %16090 = vmatprep.subr.bf16.mxu0 %v17621_v4 }
 0x29e   :  { %5602 = vmatmul.mubr.f32.vlgmr.msra.gmra.mrb[20].mxu1 %v5449_v15 }
 0x29f   :  { %16091 = vmatpush3.bf16.msra.mxu0 %v17622_v45  ;;  %5671 = vmatprep.mubr.f32.mxu1 %v5452_v1 }
 0x2a0   :  { %16092 = vmatprep.subr.bf16.mxu0 %v17623_v48  ;;  %5608 = vmatpush1.xpose.msra.mxu1 %v5238_v29 }
 0x2a1   :  { %5677 = vmatprep.subr.mxu1 %v5241_v58 }
 0x2a3   :  { %16093 = vmatpush3.bf16.msra.mxu0 %v17624_v14 }
 0x2a4   :  { %5986 = vmatprep.subr.mxu0 %v21006_v7  ;;  %v5296_v7 = vadd.f32 %v5295_v50, %v5294_v21 }
 0x2a6   :  { %5174 = vmatmul.mubr.bf16.vlgmr.msra.gmra.mrb[16].mxu0 %v19511_v36  ;;  %5672 = vmatmul.mubr.f32.vlgmr.msra.gmra.mrb[20].mxu1 %v5451_v35  ;;  %v5453_v47 = vsel %vm5446_vm2, %v5296_v7, %v5401_v37  ;;  %v21138_v36 = vld [vmem:[%s24333_s5 + $0x48] sm:$0xff] }
 0x2a7   :  { %5741 = vmatprep.mubr.f32.mxu1 %v5454_v20  ;;  %5678 = vmatpush1.xpose.msra.mxu1 %v5240_v3 }
 0x2a8   :  { %5987 = vmatpush1.msra.mxu0 %v21038_v46  ;;  %6050 = vmatprep.mubr.f32.mxu0 %v18836_v6  ;;  %v21150_v46 = vld [vmem:[%s24333_s5 + $0x58] sm:$0xff] }
 0x2a9   :  { %6057 = vmatprep.subr.mxu0 %v21046_v25  ;;  %5747 = vmatprep.subr.mxu1 %v21138_v36 }
 0x2ae   :  { %5742 = vmatmul.mubr.f32.vlgmr.msra.gmra.mrb[20].mxu1 %v5453_v47 }
 0x2af   :  { %5748 = vmatpush1.xpose.msra.mxu1 %v21143_v24 }
 0x2b0   :  { %5817 = vmatprep.subr.mxu1 %v21150_v46 }
 0x2b1   :  { %12 = vsyncpa [#allocation3], 0  ;;  %v14529_v25 = vld [vmem:[%s24334_s6 + $0x40] ss:$8 sm:$0xf]  ;;  %vm5460_vm4 = vcmask 261120  }
 0x2b2   :  { %v14530_v19 = vld [vmem:[%s24334_s6 + $0x40] ss:$8 sm:$0x10]  ;;  %vm5332_vm5 = vcmask 254976   ;;  %vm5982_vm6 = vcmask 64512   ;;  %vm12177_vm7 = vcmask 123904   ;;  %vm16434_vm8 = vmpackc.low %vm4073_vm0, %vm4073_vm0 }
 0x2b3   :  { %v21159_v27 = vor.u32 %v14530_v19, %v14529_v25  ;;  %v18607_v43 = vld [vmem:[%s24331_s3 + $0x4] ss:$12 sps:$4 sm:$0xff]  }
 0x2b5   :  { %v809_v4 = vrot.slane %v21159_v27, %v20697_v53  ;;  %v817_v28 = vrot.slane %v21159_v27, %v20708_v57  ;;  %v813_v42 = vrot.slane %v21159_v27, %v20717_v61  ;;  %v821_v38 = vrot.slane %v21159_v27, %v20730_v2 }
 0x339   :  { %v4890_v26 = vpop.f32.mrb[8].mxu0  ;;  %v5054_v34 = vpop.f32.mrb[8].mxu1 }
 0x33a   :  { %v16500_v45 = vadd.f32 %v4890_v26, %v809_v4  ;;  %v16502_v52 = vadd.f32 %v5054_v34, %v817_v28  ;;  %v4892_v63 = vpop.f32.mrb[9].mxu0  ;;  %v5056_v59 = vpop.f32.mrb[9].mxu1 }
 0x33b   :  { %v16501_v32 = vadd.f32 %v4892_v63, %v813_v42  ;;  %v16503_v48 = vadd.f32 %v5056_v59, %v821_v38  ;;  %v4894_v62 = vpop.f32.mrb[10].mxu0  ;;  %v5058_v51 = vpop.f32.mrb[10].mxu1 }
 0x33c   :  { %v21169_v5 = vmax.f32 %v16500_v45, 0.0  ;;  %v21171_v29 = vmax.f32 %v16502_v52, 0.0  ;;  %v4895_v10 = vpop.f32.mrb[11].mxu0  ;;  %v5059_v0 = vpop.f32.mrb[11].mxu1 }
 0x33d   :  { %v21173_v58 = vmax.f32 %v16501_v32, 0.0  ;;  %v21175_v15 = vmax.f32 %v16503_v48, 0.0 }
 0x33e   :  { %v5304_v14 = vsel %vm5247_vm1, %v21169_v5, 0.0  ;;  %v5348_v44 = vmul.f32 %v21169_v5, %v21169_v5  ;;  %v5350_v11 = vmul.f32 %v21171_v29, %v21171_v29  ;;  %v5318_v12 = vsel %vm5247_vm1, %v21171_v29, 0.0 }
 0x33f   :  { %v5305_v1 = vrot.slane %v5304_v14, 4  ;;  %v5311_v56 = vsel %vm5247_vm1, %v21173_v58, 0.0  ;;  %v5349_v8 = vmul.f32 %v21173_v58, %v21173_v58  ;;  %v5325_v21 = vsel %vm5247_vm1, %v21175_v15, 0.0 }
 0x340   :  { %v5409_v18 = vsel %vm5247_vm1, %v5348_v44, 0.0  ;;  %v5423_v31 = vsel %vm5247_vm1, %v5350_v11, 0.0  ;;  %v5312_v3 = vrot.slane %v5311_v56, 4  ;;  %v5326_v50 = vrot.slane %v5325_v21, 4 }
 0x341   :  { %v5306_v54 = vadd.f32 %v5305_v1, %v5304_v14  ;;  %v5410_v30 = vrot.slane %v5409_v18, 4  ;;  %v5424_v35 = vrot.slane %v5423_v31, 4  ;;  %v5416_v20 = vsel %vm5247_vm1, %v5349_v8, 0.0 }
 0x342   :  { %v5313_v16 = vadd.f32 %v5312_v3, %v5311_v56  ;;  %v5351_v37 = vmul.f32 %v21175_v15, %v21175_v15  ;;  %v5319_v25 = vrot.slane %v5318_v12, 4  ;;  %v5417_v4 = vrot.slane %v5416_v20, 4 }
 0x343   :  { %v5307_v7 = vrot.slane %v5306_v54, 2  ;;  %v5411_v47 = vadd.f32 %v5410_v30, %v5409_v18  ;;  %v5327_v28 = vadd.f32 %v5326_v50, %v5325_v21  ;;  %v5425_v26 = vadd.f32 %v5424_v35, %v5423_v31 }
 0x344   :  { %v5314_v19 = vrot.slane %v5313_v16, 2  ;;  %v5430_v42 = vsel %vm5247_vm1, %v5351_v37, 0.0  ;;  %v5418_v34 = vadd.f32 %v5417_v4, %v5416_v20  ;;  %v5320_v32 = vadd.f32 %v5319_v25, %v5318_v12 }
 0x345   :  { %v5412_v38 = vrot.slane %v5411_v47, 2  ;;  %v5328_v45 = vrot.slane %v5327_v28, 2  ;;  %v5431_v52 = vrot.slane %v5430_v42, 4  ;;  %v5308_v59 = vadd.f32 %v5307_v7, %v5306_v54 }
 0x346   :  { %v5315_v63 = vadd.f32 %v5314_v19, %v5313_v16  ;;  %v5419_v51 = vrot.slane %v5418_v34, 2  ;;  %v5426_v0 = vrot.slane %v5425_v26, 2  ;;  %v5321_v56 = vrot.slane %v5320_v32, 2 }
 0x347   :  { %v5413_v48 = vadd.f32 %v5412_v38, %v5411_v47  ;;  %v5432_v62 = vadd.f32 %v5431_v52, %v5430_v42  ;;  %v5329_v10 = vadd.f32 %v5328_v45, %v5327_v28  ;;  %v5309_v8 = vrot.slane %v5308_v59, 1  ;;  %v21202_v47 = vld [vmem:[%s24333_s5 + $0x50] sm:$0xff] }
 0x348   :  { %v5316_v44 = vrot.slane %v5315_v63, 1  ;;  %v5420_v11 = vadd.f32 %v5419_v51, %v5418_v34  ;;  %v5427_v30 = vadd.f32 %v5426_v0, %v5425_v26  ;;  %v5322_v12 = vadd.f32 %v5321_v56, %v5320_v32  ;;  %v21213_v26 = vld [vmem:[%s24333_s5 + $0x60] sm:$0xff] }
 0x349   :  { %v5414_v14 = vrot.slane %v5413_v48, 1  ;;  %v5433_v1 = vrot.slane %v5432_v62, 2  ;;  %v5330_v3 = vrot.slane %v5329_v10, 1  ;;  %v5310_v20 = vadd.f32 %v5309_v8, %v5308_v59 }
 0x34a   :  { %v5421_v18 = vrot.slane %v5420_v11, 1  ;;  %v5317_v35 = vadd.f32 %v5316_v44, %v5315_v63  ;;  %v5428_v19 = vrot.slane %v5427_v30, 1  ;;  %v5323_v28 = vrot.slane %v5322_v12, 1 }
 0x34b   :  { %v5434_v31 = vadd.f32 %v5433_v1, %v5432_v62  ;;  %v5415_v21 = vadd.f32 %v5414_v14, %v5413_v48  ;;  %v5331_v37 = vadd.f32 %v5330_v3, %v5329_v10  ;;  %v825_v52 = vrot.slane %v21159_v27, %v20872_v23  ;;  %v18805_v27 = vld [vmem:[%s24333_s5 + $0x28] sm:$0xff] }
 0x34c   :  { %v5422_v16 = vadd.f32 %v5421_v18, %v5420_v11  ;;  %v5429_v42 = vadd.f32 %v5428_v19, %v5427_v30  ;;  %v5324_v38 = vadd.f32 %v5323_v28, %v5322_v12 }
 0x34d   :  { %v5435_v54 = vrot.slane %v5434_v31, 1  ;;  %v5455_v25 = vsel %vm5446_vm2, %v5310_v20, %v5415_v21 }
 0x34e   :  { %v5456_v50 = vsel %vm5446_vm2, %v5317_v35, %v5422_v16  ;;  %v5457_v45 = vsel %vm5446_vm2, %v5324_v38, %v5429_v42 }
 0x34f   :  { %v5436_v7 = vadd.f32 %v5435_v54, %v5434_v31  ;;  %5811 = vmatprep.mubr.f32.mxu1 %v5456_v50 }
 0x350   :  { %5812 = vmatmul.mubr.f32.vlgmr.msra.gmra.mrb[20].mxu1 %v5455_v25 }
 0x351   :  { %v5458_v4 = vsel %vm5446_vm2, %v5331_v37, %v5436_v7  ;;  %5818 = vmatpush1.xpose.msra.mxu1 %v21202_v47 }
 0x352   :  { %5881 = vmatprep.mubr.f32.mxu1 %v5458_v4  ;;  %16364 = vmatprep.subr.mxu1 %v18836_v6 }
 0x358   :  { %5882 = vmatmul.mubr.f32.vlgmr.msra.gmra.mrb[20].mxu1 %v5457_v45 }
 0x359   :  { %v16050_v34 = vpop.f32.mrb[12].mxu0  ;;  %v16072_v63 = vpop.f32.mrb[12].mxu1  ;;  %16365 = vmatpush3.xpose.msk.msra.mxu1 %vm5460_vm4, %v21213_v26  ;;  %16366 = vmatprep.mubr.msk.f32.mxu1 %vm18837_vm3, %v18836_v6 }
 0x35a   :  { %v16051_v59 = vpop.f32.mrb[13].mxu0  ;;  %v16073_v32 = vpop.f32.mrb[13].mxu1  ;;  %6128 = vmatprep.subr.mxu1 %v18805_v27 }
 0x35b   :  { %v16052_v48 = vadd.f32 %v16051_v59, %v16050_v34  ;;  %v16053_v62 = vpop.f32.mrb[14].mxu0  ;;  %v16074_v51 = vadd.f32 %v16073_v32, %v16072_v63  ;;  %v16075_v10 = vpop.f32.mrb[14].mxu1 }
 0x35c   :  { %v16054_v0 = vpop.f32.mrb[15].mxu0  ;;  %v16076_v14 = vpop.f32.mrb[15].mxu1 }
 0x35d   :  { %v5096_v44 = vadd.f32 %v16052_v48, %v825_v52  ;;  %v18806_v48 = vld [vmem:[%s24333_s5 + $0x20] sm:$0xff] }
 0x35f   :  { %v5136_v11 = vadd.f32 %v16074_v51, %v5096_v44 }
 0x361   :  { %v5215_v1 = vpop.f32.mrb[16].mxu1 }
 0x362   :  { %v16362_v56 = vpop.f32.mrb[17].mxu1 }
 0x363   :  { %v5218_v8 = vpop.f32.mrb[18].mxu1 }
 0x364   :  { %v16363_v18 = vpop.f32.mrb[19].mxu1 }
 0x365   :  { %v5964_v18 = vld [vmem:[%s24334_s6 + $0x2] ss:$0 sm:$0xff] }
 0x379   :  { %v16094_v3 = vpop.f32.mrb[16].mxu0 }
 0x37a   :  { %v16095_v31 = vpop.f32.mrb[17].mxu0 }
 0x37b   :  { %v16096_v21 = vadd.f32 %v16095_v31, %v16094_v3  ;;  %v16097_v30 = vpop.f32.mrb[18].mxu0 }
 0x37c   :  { %v16098_v35 = vpop.f32.mrb[19].mxu0 }
 0x37d   :  { %v5176_v16 = vadd.f32 %v16096_v21, %v5136_v11  ;;  %v5963_v11 = vld [vmem:[%s24334_s6 + $0x1] ss:$0 sm:$0xff]  ;;  %v18807_v35 = vld [vmem:[%s24333_s5 + $0x10] sm:$0xff] }
 0x37f   :  { %v5216_v54 = vadd.f32 %v5215_v1, %v5176_v16  ;;  %v18808_v16 = vld [vmem:[%s24333_s5 + $0x38] sm:$0xff] }
 0x381   :  { %v21226_v12 = vmax.f32 %v5216_v54, 0.0  ;;  %v17630_v54 = vld [vmem:[%s24330_s2 + $0xc] ss:$28 sps:$4 sm:$0xff]  }
 0x383   :  { %v5333_v20 = vsel %vm5332_vm5, %v21226_v12, 0.0  ;;  %v5352_v50 = vmul.f32 %v21226_v12, %v21226_v12 }
 0x384   :  { %v5334_v37 = vrot.slane %v5333_v20, 4 }
 0x385   :  { %v5437_v7 = vsel %vm5332_vm5, %v5352_v50, 0.0  ;;  %v17628_v50 = vld [vmem:[%s24330_s2 + $0x8] ss:$28 sps:$4 sm:$0xff]  }
 0x386   :  { %v5335_v25 = vadd.f32 %v5334_v37, %v5333_v20  ;;  %v5438_v19 = vrot.slane %v5437_v7, 4  ;;  %v17627_v20 = vld [vmem:[%s24330_s2 + $0x4] ss:$28 sps:$4 sm:$0xff]  }
 0x387   :  { %v17636_v37 = vld [vmem:[%s24330_s2 + $0x44] ss:$28 sps:$4 sm:$0xff]  }
 0x388   :  { %v5336_v4 = vrot.slane %v5335_v25, 2  ;;  %v5439_v28 = vadd.f32 %v5438_v19, %v5437_v7  ;;  %v17634_v7 = vld [vmem:[%s24330_s2 + $0x40] ss:$28 sps:$4 sm:$0xff]   ;;  %v17639_v19 = vld [vmem:[%s24330_s2 + $0x74] ss:$28 sps:$4 sm:$0xff]  }
 0x38a   :  { %v5337_v42 = vadd.f32 %v5336_v4, %v5335_v25  ;;  %v5440_v38 = vrot.slane %v5439_v28, 2  ;;  %v17631_v25 = vld [vmem:[%s24330_s2 + $0x38] ss:$28 sps:$4 sm:$0xff]  }
 0x38b   :  { %v17640_v4 = vld [vmem:[%s24330_s2 + $0x78] ss:$28 sps:$4 sm:$0xff]  }
 0x38c   :  { %v5338_v34 = vrot.slane %v5337_v42, 1  ;;  %v5441_v45 = vadd.f32 %v5440_v38, %v5439_v28  ;;  %v17648_v28 = vld [vmem:[%s24330_s2 + $0xb4] ss:$28 sps:$4 sm:$0xff]   ;;  %v17645_v38 = vld [vmem:[%s24330_s2 + $0xac] ss:$28 sps:$4 sm:$0xff]  }
 0x38e   :  { %v5442_v52 = vrot.slane %v5441_v45, 1  ;;  %v5339_v63 = vadd.f32 %v5338_v34, %v5337_v42  ;;  %v17637_v42 = vld [vmem:[%s24330_s2 + $0x70] ss:$28 sps:$4 sm:$0xff]  }
 0x38f   :  { %v17646_v34 = vld [vmem:[%s24330_s2 + $0xb0] ss:$28 sps:$4 sm:$0xff]  }
 0x390   :  { %v5443_v59 = vadd.f32 %v5442_v52, %v5441_v45  ;;  %v17654_v45 = vld [vmem:[%s24330_s2 + $0xec] ss:$28 sps:$4 sm:$0xff]  }
 0x391   :  { %v17643_v52 = vld [vmem:[%s24330_s2 + $0xa8] ss:$28 sps:$4 sm:$0xff]  }
 0x392   :  { %v5459_v32 = vsel %vm5446_vm2, %v5339_v63, %v5443_v59  ;;  %v17651_v63 = vld [vmem:[%s24330_s2 + $0xe4] ss:$28 sps:$4 sm:$0xff]  }
 0x393   :  { %16367 = vmatmul.mubr.msk.f32.vlgmr.msra.gmra.mrb[20].mxu1 %vm5460_vm4, %v5459_v32  ;;  %v17652_v59 = vld [vmem:[%s24330_s2 + $0xe8] ss:$28 sps:$4 sm:$0xff]  }
 0x394   :  { %6129 = vmatpush1.msra.mxu1 %v18806_v48  ;;  %6192 = vmatprep.mubr.f32.mxu1 %v18836_v6  ;;  %v17660_v32 = vld [vmem:[%s24330_s2 + $0x124] ss:$28 sps:$4 sm:$0xff]  }
 0x395   :  { %6270 = vmatprep.subr.mxu1 %v21138_v36  ;;  %v17649_v48 = vld [vmem:[%s24330_s2 + $0xe0] ss:$28 sps:$4 sm:$0xff]  }
 0x466   :  { %v5953_v62 = vpop.f32.mrb[20].mxu1 }
 0x467   :  { %v5957_v51 = vmul.f32 0.0025510204, %v5953_v62  ;;  %v16368_v10 = vpop.f32.mrb[21].mxu1  ;;  %v17657_v62 = vld [vmem:[%s24330_s2 + $0x11c] ss:$28 sps:$4 sm:$0xff]  }
 0x468   :  { %v17666_v10 = vld [vmem:[%s24330_s2 + $0x15c] ss:$28 sps:$4 sm:$0xff]  }
 0x469   :  { %v5958_v0 = vmul.f32 %v5957_v51, %v5957_v51 }
 0x46b   :  { %v5960_v14 = vrot.slane %v5958_v0, 7  ;;  %v17655_v0 = vld [vmem:[%s24330_s2 + $0x118] ss:$28 sps:$4 sm:$0xff]  }
 0x46d   :  { %v5962_v27 = vsub.f32 %v5957_v51, %v5960_v14  ;;  %v17663_v14 = vld [vmem:[%s24330_s2 + $0x154] ss:$28 sps:$4 sm:$0xff]  }
 0x46f   :  { %v5965_v44 = vadd.f32 1e-05, %v5962_v27  ;;  %v17664_v27 = vld [vmem:[%s24330_s2 + $0x158] ss:$28 sps:$4 sm:$0xff]  }
 0x471   :  { %18801 = vrsqrt.f32 %v5965_v44  ;;  %v17672_v44 = vld [vmem:[%s24330_s2 + $0x194] ss:$28 sps:$4 sm:$0xff]  }
 0x47b   :  { %v18802_v1 = vpop.eup %18801 }
 0x47c   :  { %v5967_v56 = vmul.f32 %v18802_v1, %v5963_v11  ;;  %v17661_v11 = vld [vmem:[%s24330_s2 + $0x150] ss:$28 sps:$4 sm:$0xff]  }
 0x47d   :  { %v17669_v1 = vld [vmem:[%s24330_s2 + $0x18c] ss:$28 sps:$4 sm:$0xff]  }
 0x47e   :  { %v5969_v8 = vrot.slane %v5967_v56, 1  ;;  %v5976_v31 = vrot.slane %v5967_v56, %v20717_v61  ;;  %v17670_v56 = vld [vmem:[%s24330_s2 + $0x190] ss:$28 sps:$4 sm:$0xff]  }
 0x480   :  { %v5971_v36 = vmul.f32 %v5969_v8, %v5957_v51  ;;  %v17658_v51 = vld [vmem:[%s24330_s2 + $0x120] ss:$28 sps:$4 sm:$0xff]   ;;  %v17678_v8 = vld [vmem:[%s24330_s2 + $0x1cc] ss:$28 sps:$4 sm:$0xff]  }
 0x482   :  { %v5972_v3 = vsub.f32 %v5964_v18, %v5971_v36  ;;  %v17667_v18 = vld [vmem:[%s24330_s2 + $0x188] ss:$28 sps:$4 sm:$0xff]  }
 0x483   :  { %v17675_v36 = vld [vmem:[%s24330_s2 + $0x1c4] ss:$28 sps:$4 sm:$0xff]  }
 0x484   :  { %v5980_v21 = vrot.slane %v5972_v3, %v20697_v53  ;;  %v17676_v3 = vld [vmem:[%s24330_s2 + $0x1c8] ss:$28 sps:$4 sm:$0xff]  }
 0x486   :  { %v5981_v30 = vsel %vm5446_vm2, %v5976_v31, %v5980_v21  ;;  %v17684_v31 = vld [vmem:[%s24330_s2 + $0x204] ss:$28 sps:$4 sm:$0xff]  }
 0x487   :  { %15177 = vmatmul.mubr.msk.f32.vlgmr.msra.gmra.mrb[20].mxu0 %vm5982_vm6, %v5981_v30  ;;  %15179 = vmatmul.mubr.msk.f32.vlgmr.msra.gmra.mrb[22].mxu1 %vm5982_vm6, %v5981_v30  ;;  %v17673_v21 = vld [vmem:[%s24330_s2 + $0x1c0] ss:$28 sps:$4 sm:$0xff]  }
 0x488   :  { %6058 = vmatpush1.msra.mxu0 %v18807_v35  ;;  %6121 = vmatprep.mubr.f32.mxu0 %v18836_v6  ;;  %v17682_v35 = vld [vmem:[%s24330_s2 + $0x200] ss:$28 sps:$4 sm:$0xff]  }
 0x489   :  { %6271 = vmatpush1.msra.mxu1 %v21143_v24  ;;  %6334 = vmatprep.mubr.f32.mxu1 %v18836_v6  ;;  %v18809_v24 = vld [vmem:[%s24333_s5 + $0x30] sm:$0xff] }
 0x48a   :  { %6199 = vmatprep.subr.mxu0 %v18808_v16  ;;  %16369 = vmatprep.subr.mxu1 %v18836_v6  ;;  %v17690_v16 = vld [vmem:[%s24330_s2 + $0x23c] ss:$28 sps:$4 sm:$0xff]  }
 0x48b   :  { %15178 = vmatmul.mubr.msk.f32.vlgmr.msra.gmra.mrb[22].mxu0 %vm5982_vm6, %v5981_v30  ;;  %15181 = vmatmul.mubr.msk.f32.vlgmr.msra.gmra.mrb[24].mxu1 %vm5982_vm6, %v5981_v30 }
 0x48c   :  { %6200 = vmatpush1.msra.mxu0 %v18809_v24  ;;  %6263 = vmatprep.mubr.f32.mxu0 %v18836_v6  ;;  %v17687_v24 = vld [vmem:[%s24330_s2 + $0x234] ss:$28 sps:$4 sm:$0xff]  }
 0x48d   :  { %16370 = vmatpush3.msra.mxu1 %v21213_v26  ;;  %16371 = vmatprep.mubr.msk.f32.mxu1 %vm18837_vm3, %v18836_v6  ;;  %v17625_v26 = vld [vmem:[%s24330_s2] ss:$28 sps:$4 sm:$0xff]  }
 0x48e   :  { %6341 = vmatprep.subr.mxu0 %v21150_v46  ;;  %11267 = vmatprep.subr.bf16.mxu1 %v17630_v54  ;;  %v17633_v46 = vld [vmem:[%s24330_s2 + $0x3c] ss:$28 sps:$4 sm:$0xff]  }
 0x48f   :  { %15180 = vmatmul.mubr.msk.f32.vlgmr.msra.gmra.mrb[24].mxu0 %vm5982_vm6, %v5981_v30  ;;  %16372 = vmatmul.mubr.msk.f32.vlgmr.msra.gmra.mrb[26].mxu1 %vm5982_vm6, %v5981_v30  ;;  %v17679_v54 = vld [vmem:[%s24330_s2 + $0x1f8] ss:$28 sps:$4 sm:$0xff]  }
 0x490   :  { %6342 = vmatpush1.msra.mxu0 %v21202_v47  ;;  %6405 = vmatprep.mubr.f32.mxu0 %v18836_v6  ;;  %v17642_v47 = vld [vmem:[%s24330_s2 + $0x7c] ss:$28 sps:$4 sm:$0xff]  }
 0x491   :  { %10980 = vmatprep.subr.bf16.mxu0 %v17627_v20  ;;  %11268 = vmatpush1.bf16.msra.mxu1 %v17628_v50  ;;  %v17688_v20 = vld [vmem:[%s24330_s2 + $0x238] ss:$28 sps:$4 sm:$0xff]  }
 0x492   :  { %11269 = vmatprep.subr.bf16.mxu1 %v17636_v37  ;;  %v17696_v50 = vld [vmem:[%s24330_s2 + $0x274] ss:$28 sps:$4 sm:$0xff]  }
 0x493   :  { %15182 = vmatmul.mubr.msk.f32.vlgmr.msra.gmra.mrb[26].mxu0 %vm5982_vm6, %v5981_v30  ;;  %v17681_v30 = vld [vmem:[%s24330_s2 + $0x1fc] ss:$28 sps:$4 sm:$0xff]   ;;  %v17685_v37 = vld [vmem:[%s24330_s2 + $0x230] ss:$28 sps:$4 sm:$0xff]  }
 0x494   :  { %10981 = vmatpush1.bf16.msra.mxu0 %v17625_v26  ;;  %v17693_v26 = vld [vmem:[%s24330_s2 + $0x26c] ss:$28 sps:$4 sm:$0xff]  }
 0x495   :  { %10982 = vmatprep.subr.bf16.mxu0 %v17633_v46  ;;  %11270 = vmatpush1.bf16.msra.mxu1 %v17634_v7  ;;  %v17694_v46 = vld [vmem:[%s24330_s2 + $0x270] ss:$28 sps:$4 sm:$0xff]  }
 0x496   :  { %11271 = vmatprep.subr.bf16.mxu1 %v17642_v47  ;;  %v17702_v7 = vld [vmem:[%s24330_s2 + $0x2ac] ss:$28 sps:$4 sm:$0xff]  }
 0x497   :  { %v17691_v47 = vld [vmem:[%s24330_s2 + $0x268] ss:$28 sps:$4 sm:$0xff]  }
 0x498   :  { %10983 = vmatpush1.bf16.msra.mxu0 %v17631_v25  ;;  %v17699_v25 = vld [vmem:[%s24330_s2 + $0x2a4] ss:$28 sps:$4 sm:$0xff]  }
 0x499   :  { %10984 = vmatprep.subr.bf16.mxu0 %v17639_v19  ;;  %11272 = vmatpush1.bf16.msra.mxu1 %v17640_v4  ;;  %v17700_v19 = vld [vmem:[%s24330_s2 + $0x2a8] ss:$28 sps:$4 sm:$0xff]  }
 0x49a   :  { %11273 = vmatprep.subr.bf16.mxu1 %v17648_v28  ;;  %v17708_v4 = vld [vmem:[%s24330_s2 + $0x2e4] ss:$28 sps:$4 sm:$0xff]  }
 0x49b   :  { %v17697_v28 = vld [vmem:[%s24330_s2 + $0x2a0] ss:$28 sps:$4 sm:$0xff]  }
 0x49c   :  { %10985 = vmatpush1.bf16.msra.mxu0 %v17637_v42  ;;  %v17705_v42 = vld [vmem:[%s24330_s2 + $0x2dc] ss:$28 sps:$4 sm:$0xff]  }
 0x49d   :  { %10986 = vmatprep.subr.bf16.mxu0 %v17645_v38  ;;  %11274 = vmatpush1.bf16.msra.mxu1 %v17646_v34  ;;  %v17706_v38 = vld [vmem:[%s24330_s2 + $0x2e0] ss:$28 sps:$4 sm:$0xff]   ;;  %v17703_v34 = vld [vmem:[%s24330_s2 + $0x2d8] ss:$28 sps:$4 sm:$0xff]  }
 0x49e   :  { %11275 = vmatprep.subr.bf16.mxu1 %v17654_v45  ;;  %v17711_v45 = vld [vmem:[%s24330_s2 + $0x314] ss:$28 sps:$4 sm:$0xff]  }
 0x4a0   :  { %10987 = vmatpush1.bf16.msra.mxu0 %v17643_v52  ;;  %v17714_v52 = vld [vmem:[%s24330_s2 + $0x31c] ss:$28 sps:$4 sm:$0xff]  }
 0x4a1   :  { %10988 = vmatprep.subr.bf16.mxu0 %v17651_v63  ;;  %11276 = vmatpush1.bf16.msra.mxu1 %v17652_v59  ;;  %v17709_v63 = vld [vmem:[%s24330_s2 + $0x310] ss:$28 sps:$4 sm:$0xff]   ;;  %v17712_v59 = vld [vmem:[%s24330_s2 + $0x318] ss:$28 sps:$4 sm:$0xff]  }
 0x4a2   :  { %11277 = vmatprep.subr.bf16.mxu1 %v17660_v32  ;;  %v17717_v32 = vld [vmem:[%s24330_s2 + $0x34c] ss:$28 sps:$4 sm:$0xff]  }
 0x4a4   :  { %10989 = vmatpush1.bf16.msra.mxu0 %v17649_v48  ;;  %v17720_v48 = vld [vmem:[%s24330_s2 + $0x354] ss:$28 sps:$4 sm:$0xff]  }
 0x4a5   :  { %10990 = vmatprep.subr.bf16.mxu0 %v17657_v62  ;;  %11278 = vmatpush1.bf16.msra.mxu1 %v17658_v51  ;;  %v17715_v62 = vld [vmem:[%s24330_s2 + $0x348] ss:$28 sps:$4 sm:$0xff]   ;;  %v17718_v51 = vld [vmem:[%s24330_s2 + $0x350] ss:$28 sps:$4 sm:$0xff]  }
 0x4a6   :  { %11279 = vmatprep.subr.bf16.mxu1 %v17666_v10  ;;  %v17723_v10 = vld [vmem:[%s24330_s2 + $0x384] ss:$28 sps:$4 sm:$0xff]  }
 0x4a8   :  { %10991 = vmatpush1.bf16.msra.mxu0 %v17655_v0  ;;  %v17726_v0 = vld [vmem:[%s24330_s2 + $0x38c] ss:$28 sps:$4 sm:$0xff]  }
 0x4a9   :  { %10992 = vmatprep.subr.bf16.mxu0 %v17663_v14  ;;  %11280 = vmatpush1.bf16.msra.mxu1 %v17664_v27 }
 0x4aa   :  { %11281 = vmatprep.subr.bf16.mxu1 %v17672_v44 }
 0x4ac   :  { %10993 = vmatpush1.bf16.msra.mxu0 %v17661_v11 }
 0x4ad   :  { %10994 = vmatprep.subr.bf16.mxu0 %v17669_v1  ;;  %11282 = vmatpush1.bf16.msra.mxu1 %v17670_v56 }
 0x4ae   :  { %11283 = vmatprep.subr.bf16.mxu1 %v17678_v8 }
 0x4b0   :  { %10995 = vmatpush1.bf16.msra.mxu0 %v17667_v18 }
 0x4b1   :  { %10996 = vmatprep.subr.bf16.mxu0 %v17675_v36  ;;  %11284 = vmatpush1.bf16.msra.mxu1 %v17676_v3 }
 0x4b2   :  { %11285 = vmatprep.subr.bf16.mxu1 %v17684_v31 }
 0x4b4   :  { %10997 = vmatpush1.bf16.msra.mxu0 %v17673_v21 }
 0x4b5   :  { %10998 = vmatprep.subr.bf16.mxu0 %v17681_v30  ;;  %11286 = vmatpush1.bf16.msra.mxu1 %v17682_v35 }
 0x4b6   :  { %11287 = vmatprep.subr.bf16.mxu1 %v17690_v16 }
 0x4b8   :  { %10999 = vmatpush1.bf16.msra.mxu0 %v17679_v54 }
 0x4b9   :  { %11000 = vmatprep.subr.bf16.mxu0 %v17687_v24  ;;  %11288 = vmatpush1.bf16.msra.mxu1 %v17688_v20 }
 0x4ba   :  { %11289 = vmatprep.subr.bf16.mxu1 %v17696_v50 }
 0x4bc   :  { %11001 = vmatpush1.bf16.msra.mxu0 %v17685_v37 }
 0x4bd   :  { %11002 = vmatprep.subr.bf16.mxu0 %v17693_v26  ;;  %11290 = vmatpush1.bf16.msra.mxu1 %v17694_v46 }
 0x4be   :  { %11291 = vmatprep.subr.bf16.mxu1 %v17702_v7  ;;  %v17721_v7 = vld [vmem:[%s24330_s2 + $0x380] ss:$28 sps:$4 sm:$0xff]  }
 0x4c0   :  { %11003 = vmatpush1.bf16.msra.mxu0 %v17691_v47 }
 0x4c1   :  { %11004 = vmatprep.subr.bf16.mxu0 %v17699_v25  ;;  %11292 = vmatpush1.bf16.msra.mxu1 %v17700_v19  ;;  %v17724_v25 = vld [vmem:[%s24330_s2 + $0x388] ss:$28 sps:$4 sm:$0xff]  }
 0x4c2   :  { %11293 = vmatprep.subr.bf16.mxu1 %v17708_v4 }
 0x4c4   :  { %11005 = vmatpush1.bf16.msra.mxu0 %v17697_v28 }
 0x4c5   :  { %11006 = vmatprep.subr.bf16.mxu0 %v17705_v42  ;;  %11294 = vmatpush1.bf16.msra.mxu1 %v17706_v38  ;;  %v17732_v38 = vld [vmem:[%s24330_s2 + $0x3c4] ss:$28 sps:$4 sm:$0xff]  }
 0x4c6   :  { %11295 = vmatprep.subr.bf16.mxu1 %v17714_v52  ;;  %v17735_v52 = vld [vmem:[%s24330_s2 + $0x3f4] ss:$28 sps:$4 sm:$0xff]  }
 0x4c8   :  { %11007 = vmatpush1.bf16.msra.mxu0 %v17703_v34  ;;  %v17727_v34 = vld [vmem:[%s24330_s2 + $0x3b8] ss:$28 sps:$4 sm:$0xff]  }
 0x4c9   :  { %11008 = vmatprep.subr.bf16.mxu0 %v17711_v45  ;;  %11296 = vmatpush1.bf16.msra.mxu1 %v17712_v59  ;;  %v17730_v45 = vld [vmem:[%s24330_s2 + $0x3c0] ss:$28 sps:$4 sm:$0xff]   ;;  %v17733_v59 = vld [vmem:[%s24330_s2 + $0x3f0] ss:$28 sps:$4 sm:$0xff]  }
 0x4ca   :  { %11297 = vmatprep.subr.bf16.mxu1 %v17720_v48  ;;  %v17741_v48 = vld [vmem:[%s24330_s2 + $0x42c] ss:$28 sps:$4 sm:$0xff]  }
 0x4cc   :  { %11009 = vmatpush1.bf16.msra.mxu0 %v17709_v63  ;;  %v17738_v63 = vld [vmem:[%s24330_s2 + $0x3fc] ss:$28 sps:$4 sm:$0xff]  }
 0x4cd   :  { %11010 = vmatprep.subr.bf16.mxu0 %v17717_v32  ;;  %11298 = vmatpush1.bf16.msra.mxu1 %v17718_v51  ;;  %v17736_v32 = vld [vmem:[%s24330_s2 + $0x3f8] ss:$28 sps:$4 sm:$0xff]   ;;  %v17739_v51 = vld [vmem:[%s24330_s2 + $0x428] ss:$28 sps:$4 sm:$0xff]  }
 0x4ce   :  { %11308 = vmatprep.subr.bf16.mxu1 %v17726_v0  ;;  %v17747_v0 = vld [vmem:[%s24330_s2 + $0x464] ss:$28 sps:$4 sm:$0xff]  }
 0x4d0   :  { %11011 = vmatpush1.bf16.msra.mxu0 %v17715_v62  ;;  %v17744_v62 = vld [vmem:[%s24330_s2 + $0x434] ss:$28 sps:$4 sm:$0xff]  }
 0x4d1   :  { %11021 = vmatprep.subr.bf16.mxu0 %v17723_v10  ;;  %v17742_v10 = vld [vmem:[%s24330_s2 + $0x430] ss:$28 sps:$4 sm:$0xff]  }
 0x55a   :  { %v6052_v14 = vpop.f32.mrb[20].mxu0  ;;  %v21474_v27 = vpop.f32.mrb[22].mxu1 }
 0x55b   :  { %v6485_v44 = vrot.slane %v6052_v14, %v20697_v53  ;;  %v6054_v11 = vpop.f32.mrb[21].mxu0  ;;  %v21477_v1 = vpop.f32.mrb[23].mxu1  ;;  %v6550_v18 = vrot.slane %v6052_v14, %v20717_v61  ;;  %v17750_v14 = vld [vmem:[%s24330_s2 + $0x46c] ss:$28 sps:$4 sm:$0xff]  }
 0x55c   :  { %v6489_v56 = vrot.slane %v6054_v11, %v20697_v53  ;;  %v6554_v3 = vrot.slane %v6054_v11, %v20717_v61  ;;  %v17748_v11 = vld [vmem:[%s24330_s2 + $0x468] ss:$28 sps:$4 sm:$0xff]  }
 0x55d   :  { %v6534_v8 = vmul.f32 %v6485_v44, %v20756_v13  ;;  %v17745_v44 = vld [vmem:[%s24330_s2 + $0x460] ss:$28 sps:$4 sm:$0xff]  }
 0x55e   :  { %v6535_v36 = vmul.f32 %v6489_v56, %v20776_v22  ;;  %v21484_v31 = vpop.f32.mrb[22].mxu0  ;;  %v21486_v21 = vpop.f32.mrb[24].mxu1  ;;  %v17753_v56 = vld [vmem:[%s24330_s2 + $0x49c] ss:$28 sps:$4 sm:$0xff]  }
 0x55f   :  { %v6125_v30 = vpop.f32.mrb[23].mxu0  ;;  %v21488_v35 = vpop.f32.mrb[25].mxu1  ;;  %v6599_v16 = vadd.f32 %v6550_v18, %v6534_v8  ;;  %v17756_v8 = vld [vmem:[%s24330_s2 + $0x4a4] ss:$28 sps:$4 sm:$0xff]   ;;  %v17751_v18 = vld [vmem:[%s24330_s2 + $0x498] ss:$28 sps:$4 sm:$0xff]  }
 0x560   :  { %v6600_v54 = vadd.f32 %v6554_v3, %v6535_v36  ;;  %v6497_v24 = vrot.slane %v6125_v30, %v20697_v53  ;;  %v6562_v37 = vrot.slane %v6125_v30, %v20717_v61  ;;  %v17754_v36 = vld [vmem:[%s24330_s2 + $0x4a0] ss:$28 sps:$4 sm:$0xff]   ;;  %v17759_v3 = vld [vmem:[%s24330_s2 + $0x4d4] ss:$28 sps:$4 sm:$0xff]  }
 0x561   :  { %v21504_v47 = vpack.c.bf16 %v6599_v16, %v6599_v16  ;;  %v17762_v30 = vld [vmem:[%s24330_s2 + $0x4dc] ss:$28 sps:$4 sm:$0xff]   ;;  %v17757_v16 = vld [vmem:[%s24330_s2 + $0x4d0] ss:$28 sps:$4 sm:$0xff]  }
 0x562   :  { %v21491_v20 = vpack.c.bf16 %v6600_v54, %v6600_v54  ;;  %v21493_v13 = vpop.f32.mrb[24].mxu0  ;;  %v21495_v50 = vpop.f32.mrb[26].mxu1  ;;  %v6537_v22 = vmul.f32 %v6497_v24, %v20788_v9  ;;  %v17729_v9 = vld [vmem:[%s24330_s2 + $0x3bc] ss:$28 sps:$4 sm:$0xff]   ;;  %v17765_v24 = vld [vmem:[%s24330_s2 + $0x50c] ss:$28 sps:$4 sm:$0xff]  }
 0x563   :  { %v21499_v26 = vpop.f32.mrb[25].mxu0  ;;  %v16373_v46 = vpop.f32.mrb[27].mxu1  ;;  %v17760_v54 = vld [vmem:[%s24330_s2 + $0x4d8] ss:$28 sps:$4 sm:$0xff]  }
 0x564   :  { %11012 = vmatprep.mubr.bf16.mxu0 %v21491_v20  ;;  %v6602_v19 = vadd.f32 %v6562_v37, %v6537_v22  ;;  %11299 = vmatprep.mubr.bf16.mxu1 %v21491_v20  ;;  %v17768_v22 = vld [vmem:[%s24330_s2 + $0x514] ss:$28 sps:$4 sm:$0xff]   ;;  %v17763_v37 = vld [vmem:[%s24330_s2 + $0x508] ss:$28 sps:$4 sm:$0xff]  }
 0x565   :  { %11013 = vmatmul.mubr.bf16.vlgmr.msra.gmra.mrb[28].mxu0 %v21504_v47  ;;  %11300 = vmatmul.mubr.bf16.vlgmr.msra.gmra.mrb[28].mxu1 %v21504_v47  ;;  %v17766_v46 = vld [vmem:[%s24330_s2 + $0x510] ss:$28 sps:$4 sm:$0xff]  }
 0x566   :  { %v21515_v4 = vpop.f32.mrb[26].mxu0  ;;  %v21517_v28 = vpack.c.bf16 %v6602_v19, %v6602_v19  ;;  %11022 = vmatpush1.bf16.msra.mxu0 %v17721_v7  ;;  %11309 = vmatpush1.bf16.msra.mxu1 %v17724_v25  ;;  %v17771_v7 = vld [vmem:[%s24330_s2 + $0x544] ss:$28 sps:$4 sm:$0xff]   ;;  %v17774_v25 = vld [vmem:[%s24330_s2 + $0x54c] ss:$28 sps:$4 sm:$0xff]  }
 0x567   :  { %v21520_v42 = vpop.f32.mrb[27].mxu0  ;;  %11023 = vmatprep.subr.bf16.mxu0 %v17729_v9  ;;  %11310 = vmatprep.subr.bf16.mxu1 %v17732_v38  ;;  %v17769_v19 = vld [vmem:[%s24330_s2 + $0x540] ss:$28 sps:$4 sm:$0xff]   ;;  %v17772_v9 = vld [vmem:[%s24330_s2 + $0x548] ss:$28 sps:$4 sm:$0xff]  }
 0x568   :  { %11053 = vmatprep.mubr.bf16.mxu0 %v21517_v28  ;;  %11340 = vmatprep.mubr.bf16.mxu1 %v21517_v28  ;;  %v17777_v38 = vld [vmem:[%s24330_s2 + $0x57c] ss:$28 sps:$4 sm:$0xff]  }
 0x56a   :  { %11024 = vmatpush1.bf16.msra.mxu0 %v17727_v34  ;;  %11311 = vmatpush1.bf16.msra.mxu1 %v17730_v45  ;;  %v17780_v34 = vld [vmem:[%s24330_s2 + $0x584] ss:$28 sps:$4 sm:$0xff]   ;;  %v17775_v45 = vld [vmem:[%s24330_s2 + $0x578] ss:$28 sps:$4 sm:$0xff]  }
 0x56b   :  { %11025 = vmatprep.subr.bf16.mxu0 %v17735_v52  ;;  %11312 = vmatprep.subr.bf16.mxu1 %v17738_v63  ;;  %v17778_v52 = vld [vmem:[%s24330_s2 + $0x580] ss:$28 sps:$4 sm:$0xff]   ;;  %v17783_v63 = vld [vmem:[%s24330_s2 + $0x5b4] ss:$28 sps:$4 sm:$0xff]  }
 0x56e   :  { %11026 = vmatpush1.bf16.msra.mxu0 %v17733_v59  ;;  %11313 = vmatpush1.bf16.msra.mxu1 %v17736_v32  ;;  %v17786_v59 = vld [vmem:[%s24330_s2 + $0x5bc] ss:$28 sps:$4 sm:$0xff]   ;;  %v17781_v32 = vld [vmem:[%s24330_s2 + $0x5b0] ss:$28 sps:$4 sm:$0xff]  }
 0x56f   :  { %11027 = vmatprep.subr.bf16.mxu0 %v17741_v48  ;;  %11314 = vmatprep.subr.bf16.mxu1 %v17744_v62  ;;  %v17784_v48 = vld [vmem:[%s24330_s2 + $0x5b8] ss:$28 sps:$4 sm:$0xff]   ;;  %v17789_v62 = vld [vmem:[%s24330_s2 + $0x5ec] ss:$28 sps:$4 sm:$0xff]  }
 0x572   :  { %11028 = vmatpush1.bf16.msra.mxu0 %v17739_v51  ;;  %11315 = vmatpush1.bf16.msra.mxu1 %v17742_v10  ;;  %v17792_v51 = vld [vmem:[%s24330_s2 + $0x5f4] ss:$28 sps:$4 sm:$0xff]   ;;  %v17787_v10 = vld [vmem:[%s24330_s2 + $0x5e8] ss:$28 sps:$4 sm:$0xff]  }
 0x573   :  { %11029 = vmatprep.subr.bf16.mxu0 %v17747_v0  ;;  %11316 = vmatprep.subr.bf16.mxu1 %v17750_v14  ;;  %v17790_v0 = vld [vmem:[%s24330_s2 + $0x5f0] ss:$28 sps:$4 sm:$0xff]   ;;  %v17795_v14 = vld [vmem:[%s24330_s2 + $0x624] ss:$28 sps:$4 sm:$0xff]  }
 0x576   :  { %11030 = vmatpush1.bf16.msra.mxu0 %v17745_v44  ;;  %11317 = vmatpush1.bf16.msra.mxu1 %v17748_v11  ;;  %v17798_v44 = vld [vmem:[%s24330_s2 + $0x62c] ss:$28 sps:$4 sm:$0xff]   ;;  %v17793_v11 = vld [vmem:[%s24330_s2 + $0x620] ss:$28 sps:$4 sm:$0xff]  }
 0x577   :  { %11031 = vmatprep.subr.bf16.mxu0 %v17753_v56  ;;  %11318 = vmatprep.subr.bf16.mxu1 %v17756_v8  ;;  %v17796_v56 = vld [vmem:[%s24330_s2 + $0x628] ss:$28 sps:$4 sm:$0xff]   ;;  %v17801_v8 = vld [vmem:[%s24330_s2 + $0x65c] ss:$28 sps:$4 sm:$0xff]  }
 0x57a   :  { %11032 = vmatpush1.bf16.msra.mxu0 %v17751_v18  ;;  %11319 = vmatpush1.bf16.msra.mxu1 %v17754_v36  ;;  %v17804_v18 = vld [vmem:[%s24330_s2 + $0x664] ss:$28 sps:$4 sm:$0xff]   ;;  %v17799_v36 = vld [vmem:[%s24330_s2 + $0x658] ss:$28 sps:$4 sm:$0xff]  }
 0x57b   :  { %11033 = vmatprep.subr.bf16.mxu0 %v17759_v3  ;;  %11320 = vmatprep.subr.bf16.mxu1 %v17762_v30  ;;  %v17802_v3 = vld [vmem:[%s24330_s2 + $0x660] ss:$28 sps:$4 sm:$0xff]   ;;  %v6493_v30 = vrot.slane %v21484_v31, %v20697_v53 }
 0x57e   :  { %11034 = vmatpush1.bf16.msra.mxu0 %v17757_v16  ;;  %11321 = vmatpush1.bf16.msra.mxu1 %v17760_v54  ;;  %v17807_v16 = vld [vmem:[%s24330_s2 + $0x694] ss:$28 sps:$4 sm:$0xff]   ;;  %v17810_v54 = vld [vmem:[%s24330_s2 + $0x69c] ss:$28 sps:$4 sm:$0xff]  }
 0x57f   :  { %11035 = vmatprep.subr.bf16.mxu0 %v17765_v24  ;;  %11322 = vmatprep.subr.bf16.mxu1 %v17768_v22  ;;  %v6505_v24 = vrot.slane %v21477_v1, %v20697_v53  ;;  %v17805_v22 = vld [vmem:[%s24330_s2 + $0x690] ss:$28 sps:$4 sm:$0xff]  }
 0x582   :  { %11036 = vmatpush1.bf16.msra.mxu0 %v17763_v37  ;;  %11323 = vmatpush1.bf16.msra.mxu1 %v17766_v46  ;;  %v17808_v37 = vld [vmem:[%s24330_s2 + $0x698] ss:$28 sps:$4 sm:$0xff]   ;;  %v6536_v46 = vmul.f32 %v6493_v30, %v20765_v17  ;;  %v17811_v17 = vld [vmem:[%s24330_s2 + $0x6c8] ss:$28 sps:$4 sm:$0xff]  }
 0x583   :  { %11037 = vmatprep.subr.bf16.mxu0 %v17771_v7  ;;  %11324 = vmatprep.subr.bf16.mxu1 %v17774_v25  ;;  %v17813_v7 = vld [vmem:[%s24330_s2 + $0x6cc] ss:$28 sps:$4 sm:$0xff]   ;;  %v17816_v25 = vld [vmem:[%s24330_s2 + $0x6d4] ss:$28 sps:$4 sm:$0xff]  }
 0x584   :  { %v17846_v30 = vld [vmem:[%s24330_s2 + $0x7ec] ss:$28 sps:$4 sm:$0xff]  }
 0x586   :  { %11038 = vmatpush1.bf16.msra.mxu0 %v17769_v19  ;;  %11325 = vmatpush1.bf16.msra.mxu1 %v17772_v9  ;;  %v6539_v19 = vmul.f32 %v6505_v24, %v20951_v33  ;;  %v6558_v9 = vrot.slane %v21484_v31, %v20717_v61  ;;  %v17819_v33 = vld [vmem:[%s24330_s2 + $0x704] ss:$28 sps:$4 sm:$0xff]   ;;  %v17849_v24 = vld [vmem:[%s24330_s2 + $0x81c] ss:$28 sps:$4 sm:$0xff]  }
 0x587   :  { %11039 = vmatprep.subr.bf16.mxu0 %v17777_v38  ;;  %11326 = vmatprep.subr.bf16.mxu1 %v17780_v34  ;;  %v6570_v38 = vrot.slane %v21477_v1, %v20717_v61  ;;  %v17814_v34 = vld [vmem:[%s24330_s2 + $0x6d0] ss:$28 sps:$4 sm:$0xff]  }
 0x588   :  { %v17822_v1 = vld [vmem:[%s24330_s2 + $0x70c] ss:$28 sps:$4 sm:$0xff]  }
 0x589   :  { %v6604_v31 = vadd.f32 %v6570_v38, %v6539_v19  ;;  %v17853_v19 = vld [vmem:[%s24330_s2 + $0x850] ss:$28 sps:$4 sm:$0xff]  }
 0x58a   :  { %11040 = vmatpush1.bf16.msra.mxu0 %v17775_v45  ;;  %11327 = vmatpush1.bf16.msra.mxu1 %v17778_v52  ;;  %v6601_v45 = vadd.f32 %v6558_v9, %v6536_v46  ;;  %v17817_v52 = vld [vmem:[%s24330_s2 + $0x700] ss:$28 sps:$4 sm:$0xff]   ;;  %v17856_v9 = vld [vmem:[%s24330_s2 + $0x858] ss:$28 sps:$4 sm:$0xff]   ;;  %v17861_v38 = vld [vmem:[%s24330_s2 + $0x88c] ss:$28 sps:$4 sm:$0xff]  }
 0x58b   :  { %11041 = vmatprep.subr.bf16.mxu0 %v17783_v63  ;;  %11328 = vmatprep.subr.bf16.mxu1 %v17786_v59  ;;  %v17820_v59 = vld [vmem:[%s24330_s2 + $0x708] ss:$28 sps:$4 sm:$0xff]   ;;  %v17850_v46 = vld [vmem:[%s24330_s2 + $0x820] ss:$28 sps:$4 sm:$0xff]  }
 0x58c   :  { %v21720_v63 = vpack.c.bf16 %v6601_v45, %v6601_v45  ;;  %v17862_v45 = vld [vmem:[%s24330_s2 + $0x890] ss:$28 sps:$4 sm:$0xff]  }
 0x58e   :  { %11042 = vmatpush1.bf16.msra.mxu0 %v17781_v32  ;;  %11329 = vmatpush1.bf16.msra.mxu1 %v17784_v48  ;;  %v21725_v32 = vpack.c.bf16 %v6604_v31, %v6604_v31  ;;  %v17825_v48 = vld [vmem:[%s24330_s2 + $0x73c] ss:$28 sps:$4 sm:$0xff]  }
 0x58f   :  { %11043 = vmatprep.subr.bf16.mxu0 %v17789_v62  ;;  %11330 = vmatprep.subr.bf16.mxu1 %v17792_v51  ;;  %v17828_v62 = vld [vmem:[%s24330_s2 + $0x744] ss:$28 sps:$4 sm:$0xff]   ;;  %v17823_v51 = vld [vmem:[%s24330_s2 + $0x738] ss:$28 sps:$4 sm:$0xff]  }
 0x590   :  { %v17865_v31 = vld [vmem:[%s24330_s2 + $0x8c0] ss:$28 sps:$4 sm:$0xff]  }
 0x592   :  { %11044 = vmatpush1.bf16.msra.mxu0 %v17787_v10  ;;  %11331 = vmatpush1.bf16.msra.mxu1 %v17790_v0  ;;  %v17826_v10 = vld [vmem:[%s24330_s2 + $0x740] ss:$28 sps:$4 sm:$0xff]   ;;  %v17831_v0 = vld [vmem:[%s24330_s2 + $0x774] ss:$28 sps:$4 sm:$0xff]  }
 0x593   :  { %11045 = vmatprep.subr.bf16.mxu0 %v17795_v14  ;;  %11332 = vmatprep.subr.bf16.mxu1 %v17798_v44  ;;  %v17834_v14 = vld [vmem:[%s24330_s2 + $0x77c] ss:$28 sps:$4 sm:$0xff]   ;;  %v17829_v44 = vld [vmem:[%s24330_s2 + $0x770] ss:$28 sps:$4 sm:$0xff]  }
 0x596   :  { %11046 = vmatpush1.bf16.msra.mxu0 %v17793_v11  ;;  %11333 = vmatpush1.bf16.msra.mxu1 %v17796_v56  ;;  %v17832_v11 = vld [vmem:[%s24330_s2 + $0x778] ss:$28 sps:$4 sm:$0xff]   ;;  %v17837_v56 = vld [vmem:[%s24330_s2 + $0x7ac] ss:$28 sps:$4 sm:$0xff]  }
 0x597   :  { %11047 = vmatprep.subr.bf16.mxu0 %v17801_v8  ;;  %11334 = vmatprep.subr.bf16.mxu1 %v17804_v18  ;;  %v17840_v8 = vld [vmem:[%s24330_s2 + $0x7b4] ss:$28 sps:$4 sm:$0xff]   ;;  %v17835_v18 = vld [vmem:[%s24330_s2 + $0x7a8] ss:$28 sps:$4 sm:$0xff]  }
 0x59a   :  { %11048 = vmatpush1.bf16.msra.mxu0 %v17799_v36  ;;  %11335 = vmatpush1.bf16.msra.mxu1 %v17802_v3  ;;  %v17838_v36 = vld [vmem:[%s24330_s2 + $0x7b0] ss:$28 sps:$4 sm:$0xff]   ;;  %v17843_v3 = vld [vmem:[%s24330_s2 + $0x7e4] ss:$28 sps:$4 sm:$0xff]  }
 0x59b   :  { %11049 = vmatprep.subr.bf16.mxu0 %v17807_v16  ;;  %11336 = vmatprep.subr.bf16.mxu1 %v17810_v54  ;;  %v17841_v16 = vld [vmem:[%s24330_s2 + $0x7e0] ss:$28 sps:$4 sm:$0xff]   ;;  %v17844_v54 = vld [vmem:[%s24330_s2 + $0x7e8] ss:$28 sps:$4 sm:$0xff]  }
 0x59e   :  { %11050 = vmatpush1.bf16.msra.mxu0 %v17805_v22  ;;  %11337 = vmatpush1.bf16.msra.mxu1 %v17808_v37  ;;  %v17852_v22 = vld [vmem:[%s24330_s2 + $0x824] ss:$28 sps:$4 sm:$0xff]   ;;  %v17847_v37 = vld [vmem:[%s24330_s2 + $0x818] ss:$28 sps:$4 sm:$0xff]  }
 0x59f   :  { %11051 = vmatprep.subr.bf16.mxu0 %v17813_v7  ;;  %11338 = vmatprep.subr.bf16.mxu1 %v17816_v25  ;;  %v17855_v7 = vld [vmem:[%s24330_s2 + $0x854] ss:$28 sps:$4 sm:$0xff]   ;;  %v17858_v25 = vld [vmem:[%s24330_s2 + $0x85c] ss:$28 sps:$4 sm:$0xff]  }
 0x5a2   :  { %11052 = vmatpush1.bf16.msra.mxu0 %v17811_v17  ;;  %11339 = vmatpush1.bf16.msra.mxu1 %v17814_v34  ;;  %v17864_v17 = vld [vmem:[%s24330_s2 + $0x894] ss:$28 sps:$4 sm:$0xff]   ;;  %v17859_v34 = vld [vmem:[%s24330_s2 + $0x888] ss:$28 sps:$4 sm:$0xff]  }
 0x5a3   :  { %11062 = vmatprep.subr.bf16.mxu0 %v17819_v33  ;;  %11349 = vmatprep.subr.bf16.mxu1 %v17822_v1  ;;  %v17867_v33 = vld [vmem:[%s24330_s2 + $0x8c4] ss:$28 sps:$4 sm:$0xff]   ;;  %v17870_v1 = vld [vmem:[%s24330_s2 + $0x8cc] ss:$28 sps:$4 sm:$0xff]  }
 0x5a5   :  { %11054 = vmatmul.mubr.bf16.vlgmr.msra.gmra.mrb[28].mxu0 %v21720_v63  ;;  %11341 = vmatmul.mubr.bf16.vlgmr.msra.gmra.mrb[28].mxu1 %v21720_v63 }
 0x5a6   :  { %11063 = vmatpush1.bf16.msra.mxu0 %v17817_v52  ;;  %11094 = vmatprep.mubr.bf16.mxu0 %v21725_v32  ;;  %v17868_v52 = vld [vmem:[%s24330_s2 + $0x8c8] ss:$28 sps:$4 sm:$0xff]  }
 0x5a7   :  { %11350 = vmatpush1.bf16.msra.mxu1 %v17820_v59  ;;  %11381 = vmatprep.mubr.bf16.mxu1 %v21725_v32  ;;  %v17873_v59 = vld [vmem:[%s24330_s2 + $0x8fc] ss:$28 sps:$4 sm:$0xff]  }
 0x5a8   :  { %11064 = vmatprep.subr.bf16.mxu0 %v17825_v48  ;;  %11351 = vmatprep.subr.bf16.mxu1 %v17828_v62  ;;  %v17876_v48 = vld [vmem:[%s24330_s2 + $0x904] ss:$28 sps:$4 sm:$0xff]   ;;  %v17871_v62 = vld [vmem:[%s24330_s2 + $0x8f8] ss:$28 sps:$4 sm:$0xff]  }
 0x5aa   :  { %11065 = vmatpush1.bf16.msra.mxu0 %v17823_v51  ;;  %v17874_v51 = vld [vmem:[%s24330_s2 + $0x900] ss:$28 sps:$4 sm:$0xff]  }
 0x5ab   :  { %11352 = vmatpush1.bf16.msra.mxu1 %v17826_v10  ;;  %11066 = vmatprep.subr.bf16.mxu0 %v17831_v0  ;;  %v17879_v10 = vld [vmem:[%s24330_s2 + $0x934] ss:$28 sps:$4 sm:$0xff]   ;;  %v17882_v0 = vld [vmem:[%s24330_s2 + $0x93c] ss:$28 sps:$4 sm:$0xff]  }
 0x5ac   :  { %11353 = vmatprep.subr.bf16.mxu1 %v17834_v14  ;;  %v17877_v14 = vld [vmem:[%s24330_s2 + $0x930] ss:$28 sps:$4 sm:$0xff]  }
 0x5ae   :  { %11067 = vmatpush1.bf16.msra.mxu0 %v17829_v44  ;;  %v17880_v44 = vld [vmem:[%s24330_s2 + $0x938] ss:$28 sps:$4 sm:$0xff]  }
 0x5af   :  { %11354 = vmatpush1.bf16.msra.mxu1 %v17832_v11  ;;  %11068 = vmatprep.subr.bf16.mxu0 %v17837_v56  ;;  %v17885_v11 = vld [vmem:[%s24330_s2 + $0x96c] ss:$28 sps:$4 sm:$0xff]   ;;  %v17888_v56 = vld [vmem:[%s24330_s2 + $0x974] ss:$28 sps:$4 sm:$0xff]  }
 0x5b0   :  { %11355 = vmatprep.subr.bf16.mxu1 %v17840_v8  ;;  %v17883_v8 = vld [vmem:[%s24330_s2 + $0x968] ss:$28 sps:$4 sm:$0xff]  }
 0x5b2   :  { %11069 = vmatpush1.bf16.msra.mxu0 %v17835_v18  ;;  %v17886_v18 = vld [vmem:[%s24330_s2 + $0x970] ss:$28 sps:$4 sm:$0xff]  }
 0x5b3   :  { %11356 = vmatpush1.bf16.msra.mxu1 %v17838_v36  ;;  %11070 = vmatprep.subr.bf16.mxu0 %v17843_v3  ;;  %v17891_v36 = vld [vmem:[%s24330_s2 + $0x9a4] ss:$28 sps:$4 sm:$0xff]   ;;  %v17894_v3 = vld [vmem:[%s24330_s2 + $0x9ac] ss:$28 sps:$4 sm:$0xff]  }
 0x5b4   :  { %11357 = vmatprep.subr.bf16.mxu1 %v17846_v30  ;;  %v17889_v30 = vld [vmem:[%s24330_s2 + $0x9a0] ss:$28 sps:$4 sm:$0xff]  }
 0x5b6   :  { %11071 = vmatpush1.bf16.msra.mxu0 %v17841_v16  ;;  %v17892_v16 = vld [vmem:[%s24330_s2 + $0x9a8] ss:$28 sps:$4 sm:$0xff]  }
 0x5b7   :  { %11358 = vmatpush1.bf16.msra.mxu1 %v17844_v54  ;;  %11072 = vmatprep.subr.bf16.mxu0 %v17849_v24  ;;  %v17897_v54 = vld [vmem:[%s24330_s2 + $0x9dc] ss:$28 sps:$4 sm:$0xff]   ;;  %v17900_v24 = vld [vmem:[%s24330_s2 + $0x9e4] ss:$28 sps:$4 sm:$0xff]  }
 0x5b8   :  { %11359 = vmatprep.subr.bf16.mxu1 %v17852_v22  ;;  %v17895_v22 = vld [vmem:[%s24330_s2 + $0x9d8] ss:$28 sps:$4 sm:$0xff]  }
 0x5ba   :  { %11073 = vmatpush1.bf16.msra.mxu0 %v17847_v37  ;;  %v6501_v37 = vrot.slane %v21474_v27, %v20697_v53 }
 0x5bb   :  { %11360 = vmatpush1.bf16.msra.mxu1 %v17850_v46  ;;  %11074 = vmatprep.subr.bf16.mxu0 %v17855_v7  ;;  %v17898_v46 = vld [vmem:[%s24330_s2 + $0x9e0] ss:$28 sps:$4 sm:$0xff]   ;;  %v17903_v7 = vld [vmem:[%s24330_s2 + $0xa14] ss:$28 sps:$4 sm:$0xff]  }
 0x5bc   :  { %11361 = vmatprep.subr.bf16.mxu1 %v17858_v25  ;;  %v17906_v25 = vld [vmem:[%s24330_s2 + $0xa1c] ss:$28 sps:$4 sm:$0xff]  }
 0x5be   :  { %11075 = vmatpush1.bf16.msra.mxu0 %v17853_v19  ;;  %v6513_v19 = vrot.slane %v21499_v26, %v20697_v53 }
 0x5bf   :  { %11362 = vmatpush1.bf16.msra.mxu1 %v17856_v9  ;;  %11076 = vmatprep.subr.bf16.mxu0 %v17861_v38  ;;  %v17901_v9 = vld [vmem:[%s24330_s2 + $0xa10] ss:$28 sps:$4 sm:$0xff]   ;;  %v6538_v38 = vmul.f32 %v6501_v37, %v20962_v39  ;;  %v17937_v37 = vld [vmem:[%s24330_s2 + $0xb60] ss:$28 sps:$4 sm:$0xff]  }
 0x5c0   :  { %11363 = vmatprep.subr.bf16.mxu1 %v17864_v17  ;;  %v17904_v17 = vld [vmem:[%s24330_s2 + $0xa18] ss:$28 sps:$4 sm:$0xff]   ;;  %v6541_v39 = vmul.f32 %v6513_v19, %v20979_v55  ;;  %v17918_v55 = vld [vmem:[%s24330_s2 + $0xa8c] ss:$28 sps:$4 sm:$0xff]  }
 0x5c1   :  { %v17943_v19 = vld [vmem:[%s24330_s2 + $0xb98] ss:$28 sps:$4 sm:$0xff]  }
 0x5c2   :  { %11077 = vmatpush1.bf16.msra.mxu0 %v17859_v34  ;;  %v17909_v34 = vld [vmem:[%s24330_s2 + $0xa4c] ss:$28 sps:$4 sm:$0xff]  }
 0x5c3   :  { %11364 = vmatpush1.bf16.msra.mxu1 %v17862_v45  ;;  %11078 = vmatprep.subr.bf16.mxu0 %v17867_v33  ;;  %v17912_v45 = vld [vmem:[%s24330_s2 + $0xa54] ss:$28 sps:$4 sm:$0xff]   ;;  %v6566_v33 = vrot.slane %v21474_v27, %v20717_v61  ;;  %v17915_v27 = vld [vmem:[%s24330_s2 + $0xa84] ss:$28 sps:$4 sm:$0xff]  }
 0x5c4   :  { %11365 = vmatprep.subr.bf16.mxu1 %v17870_v1  ;;  %v17907_v1 = vld [vmem:[%s24330_s2 + $0xa48] ss:$28 sps:$4 sm:$0xff]  }
 0x5c6   :  { %11079 = vmatpush1.bf16.msra.mxu0 %v17865_v31  ;;  %v6603_v31 = vadd.f32 %v6566_v33, %v6538_v38  ;;  %v17951_v38 = vld [vmem:[%s24330_s2 + $0xbd4] ss:$28 sps:$4 sm:$0xff]   ;;  %v17957_v33 = vld [vmem:[%s24330_s2 + $0xc0c] ss:$28 sps:$4 sm:$0xff]  }
 0x5c7   :  { %11366 = vmatpush1.bf16.msra.mxu1 %v17868_v52  ;;  %11080 = vmatprep.subr.bf16.mxu0 %v17873_v59  ;;  %v6578_v52 = vrot.slane %v21499_v26, %v20717_v61  ;;  %v17910_v59 = vld [vmem:[%s24330_s2 + $0xa50] ss:$28 sps:$4 sm:$0xff]   ;;  %v17913_v26 = vld [vmem:[%s24330_s2 + $0xa80] ss:$28 sps:$4 sm:$0xff]  }
 0x5c8   :  { %11367 = vmatprep.subr.bf16.mxu1 %v17876_v48 }
 0x5c9   :  { %v6606_v48 = vadd.f32 %v6578_v52, %v6541_v39  ;;  %v17960_v39 = vld [vmem:[%s24330_s2 + $0xc14] ss:$28 sps:$4 sm:$0xff]   ;;  %v17963_v52 = vld [vmem:[%s24330_s2 + $0xc44] ss:$28 sps:$4 sm:$0xff]  }
 0x5ca   :  { %11081 = vmatpush1.bf16.msra.mxu0 %v17871_v62  ;;  %v21930_v62 = vpack.c.bf16 %v6603_v31, %v6603_v31  ;;  %v17958_v31 = vld [vmem:[%s24330_s2 + $0xc10] ss:$28 sps:$4 sm:$0xff]  }
 0x5cb   :  { %11368 = vmatpush1.bf16.msra.mxu1 %v17874_v51  ;;  %11082 = vmatprep.subr.bf16.mxu0 %v17879_v10  ;;  %v17916_v51 = vld [vmem:[%s24330_s2 + $0xa88] ss:$28 sps:$4 sm:$0xff]   ;;  %v17921_v10 = vld [vmem:[%s24330_s2 + $0xabc] ss:$28 sps:$4 sm:$0xff]  }
 0x5cc   :  { %11369 = vmatprep.subr.bf16.mxu1 %v17882_v0  ;;  %v21938_v0 = vpack.c.bf16 %v6606_v48, %v6606_v48  ;;  %v17969_v48 = vld [vmem:[%s24330_s2 + $0xc7c] ss:$28 sps:$4 sm:$0xff]  }
 0x5ce   :  { %11083 = vmatpush1.bf16.msra.mxu0 %v17877_v14  ;;  %v17924_v14 = vld [vmem:[%s24330_s2 + $0xac4] ss:$28 sps:$4 sm:$0xff]  }
 0x5cf   :  { %11370 = vmatpush1.bf16.msra.mxu1 %v17880_v44  ;;  %11084 = vmatprep.subr.bf16.mxu0 %v17885_v11  ;;  %v17919_v44 = vld [vmem:[%s24330_s2 + $0xab8] ss:$28 sps:$4 sm:$0xff]   ;;  %v17922_v11 = vld [vmem:[%s24330_s2 + $0xac0] ss:$28 sps:$4 sm:$0xff]  }
 0x5d0   :  { %11371 = vmatprep.subr.bf16.mxu1 %v17888_v56  ;;  %v17927_v56 = vld [vmem:[%s24330_s2 + $0xaf4] ss:$28 sps:$4 sm:$0xff]  }
 0x5d2   :  { %11085 = vmatpush1.bf16.msra.mxu0 %v17883_v8  ;;  %v17930_v8 = vld [vmem:[%s24330_s2 + $0xafc] ss:$28 sps:$4 sm:$0xff]  }
 0x5d3   :  { %11372 = vmatpush1.bf16.msra.mxu1 %v17886_v18  ;;  %11086 = vmatprep.subr.bf16.mxu0 %v17891_v36  ;;  %v17925_v18 = vld [vmem:[%s24330_s2 + $0xaf0] ss:$28 sps:$4 sm:$0xff]   ;;  %v17928_v36 = vld [vmem:[%s24330_s2 + $0xaf8] ss:$28 sps:$4 sm:$0xff]  }
 0x5d4   :  { %11373 = vmatprep.subr.bf16.mxu1 %v17894_v3  ;;  %v17933_v3 = vld [vmem:[%s24330_s2 + $0xb2c] ss:$28 sps:$4 sm:$0xff]  }
 0x5d6   :  { %11087 = vmatpush1.bf16.msra.mxu0 %v17889_v30  ;;  %v17936_v30 = vld [vmem:[%s24330_s2 + $0xb34] ss:$28 sps:$4 sm:$0xff]  }
 0x5d7   :  { %11374 = vmatpush1.bf16.msra.mxu1 %v17892_v16  ;;  %11088 = vmatprep.subr.bf16.mxu0 %v17897_v54  ;;  %v17931_v16 = vld [vmem:[%s24330_s2 + $0xb28] ss:$28 sps:$4 sm:$0xff]   ;;  %v17934_v54 = vld [vmem:[%s24330_s2 + $0xb30] ss:$28 sps:$4 sm:$0xff]  }
 0x5d8   :  { %11375 = vmatprep.subr.bf16.mxu1 %v17900_v24  ;;  %v17939_v24 = vld [vmem:[%s24330_s2 + $0xb64] ss:$28 sps:$4 sm:$0xff]  }
 0x5da   :  { %11089 = vmatpush1.bf16.msra.mxu0 %v17895_v22  ;;  %v17942_v22 = vld [vmem:[%s24330_s2 + $0xb6c] ss:$28 sps:$4 sm:$0xff]  }
 0x5db   :  { %11376 = vmatpush1.bf16.msra.mxu1 %v17898_v46  ;;  %11090 = vmatprep.subr.bf16.mxu0 %v17903_v7  ;;  %v17940_v46 = vld [vmem:[%s24330_s2 + $0xb68] ss:$28 sps:$4 sm:$0xff]   ;;  %v17945_v7 = vld [vmem:[%s24330_s2 + $0xb9c] ss:$28 sps:$4 sm:$0xff]  }
 0x5dc   :  { %11377 = vmatprep.subr.bf16.mxu1 %v17906_v25  ;;  %v17948_v25 = vld [vmem:[%s24330_s2 + $0xba4] ss:$28 sps:$4 sm:$0xff]  }
 0x5de   :  { %11091 = vmatpush1.bf16.msra.mxu0 %v17901_v9  ;;  %v17946_v9 = vld [vmem:[%s24330_s2 + $0xba0] ss:$28 sps:$4 sm:$0xff]  }
 0x5df   :  { %11378 = vmatpush1.bf16.msra.mxu1 %v17904_v17  ;;  %11092 = vmatprep.subr.bf16.mxu0 %v17909_v34  ;;  %v17954_v17 = vld [vmem:[%s24330_s2 + $0xbdc] ss:$28 sps:$4 sm:$0xff]   ;;  %v17949_v34 = vld [vmem:[%s24330_s2 + $0xbd0] ss:$28 sps:$4 sm:$0xff]  }
 0x5e0   :  { %11379 = vmatprep.subr.bf16.mxu1 %v17912_v45  ;;  %v17952_v45 = vld [vmem:[%s24330_s2 + $0xbd8] ss:$28 sps:$4 sm:$0xff]  }
 0x5e2   :  { %11093 = vmatpush1.bf16.msra.mxu0 %v17907_v1  ;;  %v17955_v1 = vld [vmem:[%s24330_s2 + $0xc08] ss:$28 sps:$4 sm:$0xff]  }
 0x5e3   :  { %11380 = vmatpush1.bf16.msra.mxu1 %v17910_v59  ;;  %11103 = vmatprep.subr.bf16.mxu0 %v17915_v27  ;;  %v17966_v59 = vld [vmem:[%s24330_s2 + $0xc4c] ss:$28 sps:$4 sm:$0xff]   ;;  %v17961_v27 = vld [vmem:[%s24330_s2 + $0xc40] ss:$28 sps:$4 sm:$0xff]  }
 0x5e4   :  { %11390 = vmatprep.subr.bf16.mxu1 %v17918_v55  ;;  %v17964_v55 = vld [vmem:[%s24330_s2 + $0xc48] ss:$28 sps:$4 sm:$0xff]  }
 0x5e5   :  { %11095 = vmatmul.mubr.bf16.vlgmr.msra.gmra.mrb[28].mxu0 %v21930_v62 }
 0x5e6   :  { %11382 = vmatmul.mubr.bf16.vlgmr.msra.gmra.mrb[28].mxu1 %v21930_v62  ;;  %11104 = vmatpush1.bf16.msra.mxu0 %v17913_v26  ;;  %v17972_v26 = vld [vmem:[%s24330_s2 + $0xc84] ss:$28 sps:$4 sm:$0xff]  }
 0x5e7   :  { %11135 = vmatprep.mubr.bf16.mxu0 %v21938_v0  ;;  %11391 = vmatpush1.bf16.msra.mxu1 %v17916_v51  ;;  %v17967_v51 = vld [vmem:[%s24330_s2 + $0xc78] ss:$28 sps:$4 sm:$0xff]  }
 0x5e8   :  { %11422 = vmatprep.mubr.bf16.mxu1 %v21938_v0  ;;  %11105 = vmatprep.subr.bf16.mxu0 %v17921_v10  ;;  %v17970_v10 = vld [vmem:[%s24330_s2 + $0xc80] ss:$28 sps:$4 sm:$0xff]  }
 0x5e9   :  { %11392 = vmatprep.subr.bf16.mxu1 %v17924_v14  ;;  %v17975_v14 = vld [vmem:[%s24330_s2 + $0xcb4] ss:$28 sps:$4 sm:$0xff]  }
 0x5ea   :  { %11106 = vmatpush1.bf16.msra.mxu0 %v17919_v44  ;;  %v17978_v44 = vld [vmem:[%s24330_s2 + $0xcbc] ss:$28 sps:$4 sm:$0xff]  }
 0x5eb   :  { %11393 = vmatpush1.bf16.msra.mxu1 %v17922_v11  ;;  %11107 = vmatprep.subr.bf16.mxu0 %v17927_v56  ;;  %v17973_v11 = vld [vmem:[%s24330_s2 + $0xcb0] ss:$28 sps:$4 sm:$0xff]   ;;  %v17976_v56 = vld [vmem:[%s24330_s2 + $0xcb8] ss:$28 sps:$4 sm:$0xff]  }
 0x5ec   :  { %11394 = vmatprep.subr.bf16.mxu1 %v17930_v8  ;;  %v17981_v8 = vld [vmem:[%s24330_s2 + $0xcec] ss:$28 sps:$4 sm:$0xff]  }
 0x5ee   :  { %11108 = vmatpush1.bf16.msra.mxu0 %v17925_v18  ;;  %v17984_v18 = vld [vmem:[%s24330_s2 + $0xcf4] ss:$28 sps:$4 sm:$0xff]  }
 0x5ef   :  { %11395 = vmatpush1.bf16.msra.mxu1 %v17928_v36  ;;  %11109 = vmatprep.subr.bf16.mxu0 %v17933_v3  ;;  %v17979_v36 = vld [vmem:[%s24330_s2 + $0xce8] ss:$28 sps:$4 sm:$0xff]   ;;  %v17982_v3 = vld [vmem:[%s24330_s2 + $0xcf0] ss:$28 sps:$4 sm:$0xff]  }
 0x5f0   :  { %11396 = vmatprep.subr.bf16.mxu1 %v17936_v30  ;;  %v17987_v30 = vld [vmem:[%s24330_s2 + $0xd24] ss:$28 sps:$4 sm:$0xff]  }
 0x5f2   :  { %11110 = vmatpush1.bf16.msra.mxu0 %v17931_v16  ;;  %v17990_v16 = vld [vmem:[%s24330_s2 + $0xd2c] ss:$28 sps:$4 sm:$0xff]  }
 0x5f3   :  { %11397 = vmatpush1.bf16.msra.mxu1 %v17934_v54  ;;  %11111 = vmatprep.subr.bf16.mxu0 %v17939_v24  ;;  %v17985_v54 = vld [vmem:[%s24330_s2 + $0xd20] ss:$28 sps:$4 sm:$0xff]   ;;  %v17988_v24 = vld [vmem:[%s24330_s2 + $0xd28] ss:$28 sps:$4 sm:$0xff]  }
 0x5f4   :  { %11398 = vmatprep.subr.bf16.mxu1 %v17942_v22  ;;  %v17993_v22 = vld [vmem:[%s24330_s2 + $0xd5c] ss:$28 sps:$4 sm:$0xff]  }
 0x5f6   :  { %11112 = vmatpush1.bf16.msra.mxu0 %v17937_v37  ;;  %v17996_v37 = vld [vmem:[%s24330_s2 + $0xd64] ss:$28 sps:$4 sm:$0xff]  }
 0x5f7   :  { %11399 = vmatpush1.bf16.msra.mxu1 %v17940_v46  ;;  %11113 = vmatprep.subr.bf16.mxu0 %v17945_v7  ;;  %v17991_v46 = vld [vmem:[%s24330_s2 + $0xd58] ss:$28 sps:$4 sm:$0xff]   ;;  %v6509_v7 = vrot.slane %v21493_v13, %v20697_v53 }
 0x5f8   :  { %11400 = vmatprep.subr.bf16.mxu1 %v17948_v25  ;;  %v17994_v25 = vld [vmem:[%s24330_s2 + $0xd60] ss:$28 sps:$4 sm:$0xff]  }
 0x5fa   :  { %11114 = vmatpush1.bf16.msra.mxu0 %v17943_v19  ;;  %v17999_v19 = vld [vmem:[%s24330_s2 + $0xd94] ss:$28 sps:$4 sm:$0xff]  }
 0x5fb   :  { %11401 = vmatpush1.bf16.msra.mxu1 %v17946_v9  ;;  %11115 = vmatprep.subr.bf16.mxu0 %v17951_v38  ;;  %v18002_v9 = vld [vmem:[%s24330_s2 + $0xd9c] ss:$28 sps:$4 sm:$0xff]   ;;  %v6521_v38 = vrot.slane %v21488_v35, %v20697_v53 }
 0x5fc   :  { %11402 = vmatprep.subr.bf16.mxu1 %v17954_v17  ;;  %v17997_v17 = vld [vmem:[%s24330_s2 + $0xd90] ss:$28 sps:$4 sm:$0xff]  }
 0x5fe   :  { %11116 = vmatpush1.bf16.msra.mxu0 %v17949_v34  ;;  %v6540_v34 = vmul.f32 %v6509_v7, %v20965_v40  ;;  %v6574_v40 = vrot.slane %v21493_v13, %v20717_v61  ;;  %v18014_v13 = vld [vmem:[%s24330_s2 + $0xe0c] ss:$28 sps:$4 sm:$0xff]   ;;  %v18041_v7 = vld [vmem:[%s24330_s2 + $0xf1c] ss:$28 sps:$4 sm:$0xff]  }
 0x5ff   :  { %11403 = vmatpush1.bf16.msra.mxu1 %v17952_v45  ;;  %11117 = vmatprep.subr.bf16.mxu0 %v17957_v33  ;;  %v18000_v45 = vld [vmem:[%s24330_s2 + $0xd98] ss:$28 sps:$4 sm:$0xff]   ;;  %v18005_v33 = vld [vmem:[%s24330_s2 + $0xdcc] ss:$28 sps:$4 sm:$0xff]  }
 0x600   :  { %11404 = vmatprep.subr.bf16.mxu1 %v17960_v39  ;;  %v18008_v39 = vld [vmem:[%s24330_s2 + $0xdd4] ss:$28 sps:$4 sm:$0xff]  }
 0x602   :  { %11118 = vmatpush1.bf16.msra.mxu0 %v17955_v1  ;;  %v6543_v1 = vmul.f32 %v6521_v38, %v21173_v58  ;;  %v18011_v58 = vld [vmem:[%s24330_s2 + $0xe04] ss:$28 sps:$4 sm:$0xff]   ;;  %v18047_v38 = vld [vmem:[%s24330_s2 + $0xf54] ss:$28 sps:$4 sm:$0xff]  }
 0x603   :  { %11405 = vmatpush1.bf16.msra.mxu1 %v17958_v31  ;;  %11119 = vmatprep.subr.bf16.mxu0 %v17963_v52  ;;  %v18003_v31 = vld [vmem:[%s24330_s2 + $0xdc8] ss:$28 sps:$4 sm:$0xff]   ;;  %v6586_v52 = vrot.slane %v21488_v35, %v20717_v61  ;;  %v18009_v35 = vld [vmem:[%s24330_s2 + $0xe00] ss:$28 sps:$4 sm:$0xff]  }
 0x604   :  { %11406 = vmatprep.subr.bf16.mxu1 %v17966_v59  ;;  %v6605_v59 = vadd.f32 %v6574_v40, %v6540_v34  ;;  %v18045_v34 = vld [vmem:[%s24330_s2 + $0xf50] ss:$28 sps:$4 sm:$0xff]  }
 0x605   :  { %v18054_v40 = vld [vmem:[%s24330_s2 + $0xf90] ss:$28 sps:$4 sm:$0xff]  }
 0x606   :  { %11120 = vmatpush1.bf16.msra.mxu0 %v17961_v27  ;;  %v18006_v27 = vld [vmem:[%s24330_s2 + $0xdd0] ss:$28 sps:$4 sm:$0xff]  }
 0x607   :  { %11407 = vmatpush1.bf16.msra.mxu1 %v17964_v55  ;;  %11121 = vmatprep.subr.bf16.mxu0 %v17969_v48  ;;  %v6608_v55 = vadd.f32 %v6586_v52, %v6543_v1  ;;  %v22140_v48 = vpack.c.bf16 %v6605_v59, %v6605_v59  ;;  %v18051_v1 = vld [vmem:[%s24330_s2 + $0xf88] ss:$28 sps:$4 sm:$0xff]   ;;  %v18057_v59 = vld [vmem:[%s24330_s2 + $0xfc0] ss:$28 sps:$4 sm:$0xff]  }
 0x608   :  { %11408 = vmatprep.subr.bf16.mxu1 %v17972_v26  ;;  %v18012_v26 = vld [vmem:[%s24330_s2 + $0xe08] ss:$28 sps:$4 sm:$0xff]  }
 0x609   :  { %v18062_v52 = vld [vmem:[%s24330_s2 + $0xfcc] ss:$28 sps:$4 sm:$0xff]  }
 0x60a   :  { %11122 = vmatpush1.bf16.msra.mxu0 %v17967_v51  ;;  %v18017_v51 = vld [vmem:[%s24330_s2 + $0xe3c] ss:$28 sps:$4 sm:$0xff]  }
 0x60b   :  { %11409 = vmatpush1.bf16.msra.mxu1 %v17970_v10  ;;  %11123 = vmatprep.subr.bf16.mxu0 %v17975_v14  ;;  %v22148_v10 = vpack.c.bf16 %v6608_v55, %v6608_v55  ;;  %v18020_v14 = vld [vmem:[%s24330_s2 + $0xe44] ss:$28 sps:$4 sm:$0xff]   ;;  %v18063_v55 = vld [vmem:[%s24330_s2 + $0xff8] ss:$28 sps:$4 sm:$0xff]  }
 0x60c   :  { %11410 = vmatprep.subr.bf16.mxu1 %v17978_v44  ;;  %v18015_v44 = vld [vmem:[%s24330_s2 + $0xe38] ss:$28 sps:$4 sm:$0xff]  }
 0x60e   :  { %11124 = vmatpush1.bf16.msra.mxu0 %v17973_v11  ;;  %v18018_v11 = vld [vmem:[%s24330_s2 + $0xe40] ss:$28 sps:$4 sm:$0xff]  }
 0x60f   :  { %11411 = vmatpush1.bf16.msra.mxu1 %v17976_v56  ;;  %11125 = vmatprep.subr.bf16.mxu0 %v17981_v8  ;;  %v18023_v56 = vld [vmem:[%s24330_s2 + $0xe74] ss:$28 sps:$4 sm:$0xff]   ;;  %v18026_v8 = vld [vmem:[%s24330_s2 + $0xe7c] ss:$28 sps:$4 sm:$0xff]  }
 0x610   :  { %11412 = vmatprep.subr.bf16.mxu1 %v17984_v18  ;;  %v18021_v18 = vld [vmem:[%s24330_s2 + $0xe70] ss:$28 sps:$4 sm:$0xff]  }
 0x612   :  { %11126 = vmatpush1.bf16.msra.mxu0 %v17979_v36  ;;  %v18024_v36 = vld [vmem:[%s24330_s2 + $0xe78] ss:$28 sps:$4 sm:$0xff]  }
 0x613   :  { %11413 = vmatpush1.bf16.msra.mxu1 %v17982_v3  ;;  %11127 = vmatprep.subr.bf16.mxu0 %v17987_v30  ;;  %v18029_v3 = vld [vmem:[%s24330_s2 + $0xeac] ss:$28 sps:$4 sm:$0xff]   ;;  %v18032_v30 = vld [vmem:[%s24330_s2 + $0xeb4] ss:$28 sps:$4 sm:$0xff]  }
 0x614   :  { %11414 = vmatprep.subr.bf16.mxu1 %v17990_v16  ;;  %v18027_v16 = vld [vmem:[%s24330_s2 + $0xea8] ss:$28 sps:$4 sm:$0xff]  }
 0x616   :  { %11128 = vmatpush1.bf16.msra.mxu0 %v17985_v54  ;;  %v18030_v54 = vld [vmem:[%s24330_s2 + $0xeb0] ss:$28 sps:$4 sm:$0xff]  }
 0x617   :  { %11415 = vmatpush1.bf16.msra.mxu1 %v17988_v24  ;;  %11129 = vmatprep.subr.bf16.mxu0 %v17993_v22  ;;  %v18035_v24 = vld [vmem:[%s24330_s2 + $0xee4] ss:$28 sps:$4 sm:$0xff]   ;;  %v18038_v22 = vld [vmem:[%s24330_s2 + $0xeec] ss:$28 sps:$4 sm:$0xff]  }
 0x618   :  { %11416 = vmatprep.subr.bf16.mxu1 %v17996_v37  ;;  %v18033_v37 = vld [vmem:[%s24330_s2 + $0xee0] ss:$28 sps:$4 sm:$0xff]  }
 0x61a   :  { %11130 = vmatpush1.bf16.msra.mxu0 %v17991_v46  ;;  %v18036_v46 = vld [vmem:[%s24330_s2 + $0xee8] ss:$28 sps:$4 sm:$0xff]  }
 0x61b   :  { %11417 = vmatpush1.bf16.msra.mxu1 %v17994_v25  ;;  %11131 = vmatprep.subr.bf16.mxu0 %v17999_v19  ;;  %v18044_v25 = vld [vmem:[%s24330_s2 + $0xf24] ss:$28 sps:$4 sm:$0xff]   ;;  %v18039_v19 = vld [vmem:[%s24330_s2 + $0xf18] ss:$28 sps:$4 sm:$0xff]  }
 0x61c   :  { %11418 = vmatprep.subr.bf16.mxu1 %v18002_v9  ;;  %v18042_v9 = vld [vmem:[%s24330_s2 + $0xf20] ss:$28 sps:$4 sm:$0xff]  }
 0x61e   :  { %11132 = vmatpush1.bf16.msra.mxu0 %v17997_v17  ;;  %v18050_v17 = vld [vmem:[%s24330_s2 + $0xf5c] ss:$28 sps:$4 sm:$0xff]  }
 0x61f   :  { %11419 = vmatpush1.bf16.msra.mxu1 %v18000_v45  ;;  %11133 = vmatprep.subr.bf16.mxu0 %v18005_v33  ;;  %v18048_v45 = vld [vmem:[%s24330_s2 + $0xf58] ss:$28 sps:$4 sm:$0xff]   ;;  %v18053_v33 = vld [vmem:[%s24330_s2 + $0xf8c] ss:$28 sps:$4 sm:$0xff]  }
 0x620   :  { %11420 = vmatprep.subr.bf16.mxu1 %v18008_v39  ;;  %v18056_v39 = vld [vmem:[%s24330_s2 + $0xf94] ss:$28 sps:$4 sm:$0xff]  }
 0x622   :  { %11134 = vmatpush1.bf16.msra.mxu0 %v18003_v31  ;;  %v18059_v31 = vld [vmem:[%s24330_s2 + $0xfc4] ss:$28 sps:$4 sm:$0xff]  }
 0x623   :  { %11421 = vmatpush1.bf16.msra.mxu1 %v18006_v27  ;;  %11144 = vmatprep.subr.bf16.mxu0 %v18011_v58  ;;  %v18060_v27 = vld [vmem:[%s24330_s2 + $0xfc8] ss:$28 sps:$4 sm:$0xff]   ;;  %v18065_v58 = vld [vmem:[%s24330_s2 + $0xffc] ss:$28 sps:$4 sm:$0xff]  }
 0x624   :  { %11431 = vmatprep.subr.bf16.mxu1 %v18014_v13  ;;  %v18068_v13 = vld [vmem:[%s24330_s2 + $0x1004] ss:$28 sps:$4 sm:$0xff]  }
 0x625   :  { %11136 = vmatmul.mubr.bf16.vlgmr.msra.gmra.mrb[28].mxu0 %v22140_v48 }
 0x626   :  { %11423 = vmatmul.mubr.bf16.vlgmr.msra.gmra.mrb[28].mxu1 %v22140_v48  ;;  %11145 = vmatpush1.bf16.msra.mxu0 %v18009_v35  ;;  %v18066_v35 = vld [vmem:[%s24330_s2 + $0x1000] ss:$28 sps:$4 sm:$0xff]  }
 0x627   :  { %11176 = vmatprep.mubr.bf16.mxu0 %v22148_v10  ;;  %11432 = vmatpush1.bf16.msra.mxu1 %v18012_v26  ;;  %v18071_v26 = vld [vmem:[%s24330_s2 + $0x1034] ss:$28 sps:$4 sm:$0xff]  }
 0x628   :  { %11463 = vmatprep.mubr.bf16.mxu1 %v22148_v10  ;;  %11146 = vmatprep.subr.bf16.mxu0 %v18017_v51  ;;  %v18074_v51 = vld [vmem:[%s24330_s2 + $0x103c] ss:$28 sps:$4 sm:$0xff]  }
 0x629   :  { %11433 = vmatprep.subr.bf16.mxu1 %v18020_v14  ;;  %v18069_v14 = vld [vmem:[%s24330_s2 + $0x1030] ss:$28 sps:$4 sm:$0xff]  }
 0x62a   :  { %11147 = vmatpush1.bf16.msra.mxu0 %v18015_v44  ;;  %v18072_v44 = vld [vmem:[%s24330_s2 + $0x1038] ss:$28 sps:$4 sm:$0xff]  }
 0x62b   :  { %11434 = vmatpush1.bf16.msra.mxu1 %v18018_v11  ;;  %11148 = vmatprep.subr.bf16.mxu0 %v18023_v56  ;;  %v18077_v11 = vld [vmem:[%s24330_s2 + $0x106c] ss:$28 sps:$4 sm:$0xff]   ;;  %v18080_v56 = vld [vmem:[%s24330_s2 + $0x1074] ss:$28 sps:$4 sm:$0xff]  }
 0x62c   :  { %11435 = vmatprep.subr.bf16.mxu1 %v18026_v8  ;;  %v18075_v8 = vld [vmem:[%s24330_s2 + $0x1068] ss:$28 sps:$4 sm:$0xff]  }
 0x62e   :  { %11149 = vmatpush1.bf16.msra.mxu0 %v18021_v18  ;;  %v18078_v18 = vld [vmem:[%s24330_s2 + $0x1070] ss:$28 sps:$4 sm:$0xff]  }
 0x62f   :  { %11436 = vmatpush1.bf16.msra.mxu1 %v18024_v36  ;;  %11150 = vmatprep.subr.bf16.mxu0 %v18029_v3  ;;  %v18083_v36 = vld [vmem:[%s24330_s2 + $0x10a4] ss:$28 sps:$4 sm:$0xff]   ;;  %v18086_v3 = vld [vmem:[%s24330_s2 + $0x10ac] ss:$28 sps:$4 sm:$0xff]  }
 0x630   :  { %11437 = vmatprep.subr.bf16.mxu1 %v18032_v30  ;;  %v18081_v30 = vld [vmem:[%s24330_s2 + $0x10a0] ss:$28 sps:$4 sm:$0xff]  }
 0x632   :  { %11151 = vmatpush1.bf16.msra.mxu0 %v18027_v16  ;;  %v18084_v16 = vld [vmem:[%s24330_s2 + $0x10a8] ss:$28 sps:$4 sm:$0xff]  }
 0x633   :  { %11438 = vmatpush1.bf16.msra.mxu1 %v18030_v54  ;;  %11152 = vmatprep.subr.bf16.mxu0 %v18035_v24  ;;  %v18089_v54 = vld [vmem:[%s24330_s2 + $0x10dc] ss:$28 sps:$4 sm:$0xff]   ;;  %v18092_v24 = vld [vmem:[%s24330_s2 + $0x10e4] ss:$28 sps:$4 sm:$0xff]  }
 0x634   :  { %11439 = vmatprep.subr.bf16.mxu1 %v18038_v22  ;;  %v18087_v22 = vld [vmem:[%s24330_s2 + $0x10d8] ss:$28 sps:$4 sm:$0xff]  }
 0x636   :  { %11153 = vmatpush1.bf16.msra.mxu0 %v18033_v37  ;;  %v6517_v37 = vrot.slane %v21486_v21, %v20697_v53 }
 0x637   :  { %11440 = vmatpush1.bf16.msra.mxu1 %v18036_v46  ;;  %11154 = vmatprep.subr.bf16.mxu0 %v18041_v7  ;;  %v18090_v46 = vld [vmem:[%s24330_s2 + $0x10e0] ss:$28 sps:$4 sm:$0xff]   ;;  %v18095_v7 = vld [vmem:[%s24330_s2 + $0x1114] ss:$28 sps:$4 sm:$0xff]  }
 0x638   :  { %11441 = vmatprep.subr.bf16.mxu1 %v18044_v25  ;;  %v18098_v25 = vld [vmem:[%s24330_s2 + $0x111c] ss:$28 sps:$4 sm:$0xff]  }
 0x63a   :  { %11155 = vmatpush1.bf16.msra.mxu0 %v18039_v19  ;;  %v6529_v19 = vrot.slane %v21520_v42, %v20697_v53 }
 0x63b   :  { %11442 = vmatpush1.bf16.msra.mxu1 %v18042_v9  ;;  %11156 = vmatprep.subr.bf16.mxu0 %v18047_v38  ;;  %v18093_v9 = vld [vmem:[%s24330_s2 + $0x1110] ss:$28 sps:$4 sm:$0xff]   ;;  %v6542_v38 = vmul.f32 %v6517_v37, %v21169_v5  ;;  %v18135_v37 = vld [vmem:[%s24330_s2 + $0x1298] ss:$28 sps:$4 sm:$0xff]  }
 0x63c   :  { %11443 = vmatprep.subr.bf16.mxu1 %v18050_v17  ;;  %v18096_v17 = vld [vmem:[%s24330_s2 + $0x1118] ss:$28 sps:$4 sm:$0xff]   ;;  %v6545_v5 = vmul.f32 %v6529_v19, %v21175_v15  ;;  %v18110_v15 = vld [vmem:[%s24330_s2 + $0x118c] ss:$28 sps:$4 sm:$0xff]  }
 0x63d   :  { %v18141_v19 = vld [vmem:[%s24330_s2 + $0x12d0] ss:$28 sps:$4 sm:$0xff]  }
 0x63e   :  { %11157 = vmatpush1.bf16.msra.mxu0 %v18045_v34  ;;  %v18101_v34 = vld [vmem:[%s24330_s2 + $0x114c] ss:$28 sps:$4 sm:$0xff]  }
 0x63f   :  { %11444 = vmatpush1.bf16.msra.mxu1 %v18048_v45  ;;  %11158 = vmatprep.subr.bf16.mxu0 %v18053_v33  ;;  %v18104_v45 = vld [vmem:[%s24330_s2 + $0x1154] ss:$28 sps:$4 sm:$0xff]   ;;  %v6582_v33 = vrot.slane %v21486_v21, %v20717_v61  ;;  %v18107_v21 = vld [vmem:[%s24330_s2 + $0x1184] ss:$28 sps:$4 sm:$0xff]  }
 0x640   :  { %11445 = vmatprep.subr.bf16.mxu1 %v18056_v39  ;;  %v18099_v39 = vld [vmem:[%s24330_s2 + $0x1148] ss:$28 sps:$4 sm:$0xff]  }
 0x642   :  { %11159 = vmatpush1.bf16.msra.mxu0 %v18051_v1  ;;  %v6607_v1 = vadd.f32 %v6582_v33, %v6542_v38  ;;  %v18149_v38 = vld [vmem:[%s24330_s2 + $0x130c] ss:$28 sps:$4 sm:$0xff]   ;;  %v18155_v33 = vld [vmem:[%s24330_s2 + $0x1344] ss:$28 sps:$4 sm:$0xff]  }
 0x643   :  { %11446 = vmatpush1.bf16.msra.mxu1 %v18054_v40  ;;  %11160 = vmatprep.subr.bf16.mxu0 %v18059_v31  ;;  %v6594_v40 = vrot.slane %v21520_v42, %v20717_v61  ;;  %v18102_v31 = vld [vmem:[%s24330_s2 + $0x1150] ss:$28 sps:$4 sm:$0xff]   ;;  %v18105_v42 = vld [vmem:[%s24330_s2 + $0x1180] ss:$28 sps:$4 sm:$0xff]  }
 0x644   :  { %11447 = vmatprep.subr.bf16.mxu1 %v18062_v52 }
 0x645   :  { %v6610_v52 = vadd.f32 %v6594_v40, %v6545_v5  ;;  %v18158_v5 = vld [vmem:[%s24330_s2 + $0x134c] ss:$28 sps:$4 sm:$0xff]   ;;  %v18161_v40 = vld [vmem:[%s24330_s2 + $0x137c] ss:$28 sps:$4 sm:$0xff]  }
 0x646   :  { %11161 = vmatpush1.bf16.msra.mxu0 %v18057_v59  ;;  %v22350_v59 = vpack.c.bf16 %v6607_v1, %v6607_v1  ;;  %v18156_v1 = vld [vmem:[%s24330_s2 + $0x1348] ss:$28 sps:$4 sm:$0xff]  }
 0x647   :  { %11448 = vmatpush1.bf16.msra.mxu1 %v18060_v27  ;;  %11162 = vmatprep.subr.bf16.mxu0 %v18065_v58  ;;  %v18108_v27 = vld [vmem:[%s24330_s2 + $0x1188] ss:$28 sps:$4 sm:$0xff]   ;;  %v18113_v58 = vld [vmem:[%s24330_s2 + $0x11bc] ss:$28 sps:$4 sm:$0xff]  }
 0x648   :  { %11449 = vmatprep.subr.bf16.mxu1 %v18068_v13  ;;  %v22358_v13 = vpack.c.bf16 %v6610_v52, %v6610_v52  ;;  %v18167_v52 = vld [vmem:[%s24330_s2 + $0x13b4] ss:$28 sps:$4 sm:$0xff]  }
 0x64a   :  { %11163 = vmatpush1.bf16.msra.mxu0 %v18063_v55  ;;  %v18116_v55 = vld [vmem:[%s24330_s2 + $0x11c4] ss:$28 sps:$4 sm:$0xff]  }
 0x64b   :  { %11450 = vmatpush1.bf16.msra.mxu1 %v18066_v35  ;;  %11164 = vmatprep.subr.bf16.mxu0 %v18071_v26  ;;  %v18111_v35 = vld [vmem:[%s24330_s2 + $0x11b8] ss:$28 sps:$4 sm:$0xff]   ;;  %v18114_v26 = vld [vmem:[%s24330_s2 + $0x11c0] ss:$28 sps:$4 sm:$0xff]  }
 0x64c   :  { %11451 = vmatprep.subr.bf16.mxu1 %v18074_v51  ;;  %v18119_v51 = vld [vmem:[%s24330_s2 + $0x11f4] ss:$28 sps:$4 sm:$0xff]  }
 0x64e   :  { %11165 = vmatpush1.bf16.msra.mxu0 %v18069_v14  ;;  %v18122_v14 = vld [vmem:[%s24330_s2 + $0x11fc] ss:$28 sps:$4 sm:$0xff]  }
 0x64f   :  { %11452 = vmatpush1.bf16.msra.mxu1 %v18072_v44  ;;  %11166 = vmatprep.subr.bf16.mxu0 %v18077_v11  ;;  %v18117_v44 = vld [vmem:[%s24330_s2 + $0x11f0] ss:$28 sps:$4 sm:$0xff]   ;;  %v18120_v11 = vld [vmem:[%s24330_s2 + $0x11f8] ss:$28 sps:$4 sm:$0xff]  }
 0x650   :  { %11453 = vmatprep.subr.bf16.mxu1 %v18080_v56  ;;  %v18125_v56 = vld [vmem:[%s24330_s2 + $0x122c] ss:$28 sps:$4 sm:$0xff]  }
 0x652   :  { %11167 = vmatpush1.bf16.msra.mxu0 %v18075_v8  ;;  %v18128_v8 = vld [vmem:[%s24330_s2 + $0x1234] ss:$28 sps:$4 sm:$0xff]  }
 0x653   :  { %11454 = vmatpush1.bf16.msra.mxu1 %v18078_v18  ;;  %11168 = vmatprep.subr.bf16.mxu0 %v18083_v36  ;;  %v18123_v18 = vld [vmem:[%s24330_s2 + $0x1228] ss:$28 sps:$4 sm:$0xff]   ;;  %v18126_v36 = vld [vmem:[%s24330_s2 + $0x1230] ss:$28 sps:$4 sm:$0xff]  }
 0x654   :  { %11455 = vmatprep.subr.bf16.mxu1 %v18086_v3  ;;  %v18131_v3 = vld [vmem:[%s24330_s2 + $0x1264] ss:$28 sps:$4 sm:$0xff]  }
 0x656   :  { %11169 = vmatpush1.bf16.msra.mxu0 %v18081_v30  ;;  %v18134_v30 = vld [vmem:[%s24330_s2 + $0x126c] ss:$28 sps:$4 sm:$0xff]  }
 0x657   :  { %11456 = vmatpush1.bf16.msra.mxu1 %v18084_v16  ;;  %11170 = vmatprep.subr.bf16.mxu0 %v18089_v54  ;;  %v18129_v16 = vld [vmem:[%s24330_s2 + $0x1260] ss:$28 sps:$4 sm:$0xff]   ;;  %v18132_v54 = vld [vmem:[%s24330_s2 + $0x1268] ss:$28 sps:$4 sm:$0xff]  }
 0x658   :  { %11457 = vmatprep.subr.bf16.mxu1 %v18092_v24  ;;  %v18137_v24 = vld [vmem:[%s24330_s2 + $0x129c] ss:$28 sps:$4 sm:$0xff]  }
 0x65a   :  { %11171 = vmatpush1.bf16.msra.mxu0 %v18087_v22  ;;  %v18140_v22 = vld [vmem:[%s24330_s2 + $0x12a4] ss:$28 sps:$4 sm:$0xff]  }
 0x65b   :  { %11458 = vmatpush1.bf16.msra.mxu1 %v18090_v46  ;;  %11172 = vmatprep.subr.bf16.mxu0 %v18095_v7  ;;  %v18138_v46 = vld [vmem:[%s24330_s2 + $0x12a0] ss:$28 sps:$4 sm:$0xff]   ;;  %v18143_v7 = vld [vmem:[%s24330_s2 + $0x12d4] ss:$28 sps:$4 sm:$0xff]  }
 0x65c   :  { %11459 = vmatprep.subr.bf16.mxu1 %v18098_v25  ;;  %v18146_v25 = vld [vmem:[%s24330_s2 + $0x12dc] ss:$28 sps:$4 sm:$0xff]  }
 0x65e   :  { %11173 = vmatpush1.bf16.msra.mxu0 %v18093_v9  ;;  %v18144_v9 = vld [vmem:[%s24330_s2 + $0x12d8] ss:$28 sps:$4 sm:$0xff]  }
 0x65f   :  { %11460 = vmatpush1.bf16.msra.mxu1 %v18096_v17  ;;  %11174 = vmatprep.subr.bf16.mxu0 %v18101_v34  ;;  %v18152_v17 = vld [vmem:[%s24330_s2 + $0x1314] ss:$28 sps:$4 sm:$0xff]   ;;  %v18147_v34 = vld [vmem:[%s24330_s2 + $0x1308] ss:$28 sps:$4 sm:$0xff]  }
 0x660   :  { %11461 = vmatprep.subr.bf16.mxu1 %v18104_v45  ;;  %v18150_v45 = vld [vmem:[%s24330_s2 + $0x1310] ss:$28 sps:$4 sm:$0xff]  }
 0x662   :  { %11175 = vmatpush1.bf16.msra.mxu0 %v18099_v39  ;;  %v18153_v39 = vld [vmem:[%s24330_s2 + $0x1340] ss:$28 sps:$4 sm:$0xff]  }
 0x663   :  { %11462 = vmatpush1.bf16.msra.mxu1 %v18102_v31  ;;  %11185 = vmatprep.subr.bf16.mxu0 %v18107_v21  ;;  %v18164_v31 = vld [vmem:[%s24330_s2 + $0x1384] ss:$28 sps:$4 sm:$0xff]   ;;  %v18159_v21 = vld [vmem:[%s24330_s2 + $0x1378] ss:$28 sps:$4 sm:$0xff]  }
 0x664   :  { %11472 = vmatprep.subr.bf16.mxu1 %v18110_v15  ;;  %v18162_v15 = vld [vmem:[%s24330_s2 + $0x1380] ss:$28 sps:$4 sm:$0xff]  }
 0x665   :  { %11177 = vmatmul.mubr.bf16.vlgmr.msra.gmra.mrb[28].mxu0 %v22350_v59 }
 0x666   :  { %11464 = vmatmul.mubr.bf16.vlgmr.msra.gmra.mrb[28].mxu1 %v22350_v59  ;;  %11186 = vmatpush1.bf16.msra.mxu0 %v18105_v42  ;;  %v18170_v42 = vld [vmem:[%s24330_s2 + $0x13bc] ss:$28 sps:$4 sm:$0xff]  }
 0x667   :  { %11217 = vmatprep.mubr.bf16.mxu0 %v22358_v13  ;;  %11473 = vmatpush1.bf16.msra.mxu1 %v18108_v27  ;;  %v18165_v27 = vld [vmem:[%s24330_s2 + $0x13b0] ss:$28 sps:$4 sm:$0xff]  }
 0x668   :  { %11504 = vmatprep.mubr.bf16.mxu1 %v22358_v13  ;;  %11187 = vmatprep.subr.bf16.mxu0 %v18113_v58  ;;  %v18168_v58 = vld [vmem:[%s24330_s2 + $0x13b8] ss:$28 sps:$4 sm:$0xff]  }
 0x669   :  { %11474 = vmatprep.subr.bf16.mxu1 %v18116_v55  ;;  %v18173_v55 = vld [vmem:[%s24330_s2 + $0x13ec] ss:$28 sps:$4 sm:$0xff]  }
 0x66a   :  { %11188 = vmatpush1.bf16.msra.mxu0 %v18111_v35  ;;  %v18176_v35 = vld [vmem:[%s24330_s2 + $0x13f4] ss:$28 sps:$4 sm:$0xff]  }
 0x66b   :  { %11475 = vmatpush1.bf16.msra.mxu1 %v18114_v26  ;;  %11189 = vmatprep.subr.bf16.mxu0 %v18119_v51  ;;  %v18171_v26 = vld [vmem:[%s24330_s2 + $0x13e8] ss:$28 sps:$4 sm:$0xff]   ;;  %v18174_v51 = vld [vmem:[%s24330_s2 + $0x13f0] ss:$28 sps:$4 sm:$0xff]  }
 0x66c   :  { %11476 = vmatprep.subr.bf16.mxu1 %v18122_v14  ;;  %v18179_v14 = vld [vmem:[%s24330_s2 + $0x1424] ss:$28 sps:$4 sm:$0xff]  }
 0x66e   :  { %11190 = vmatpush1.bf16.msra.mxu0 %v18117_v44  ;;  %v18182_v44 = vld [vmem:[%s24330_s2 + $0x142c] ss:$28 sps:$4 sm:$0xff]  }
 0x66f   :  { %11477 = vmatpush1.bf16.msra.mxu1 %v18120_v11  ;;  %11191 = vmatprep.subr.bf16.mxu0 %v18125_v56  ;;  %v18177_v11 = vld [vmem:[%s24330_s2 + $0x1420] ss:$28 sps:$4 sm:$0xff]   ;;  %v18180_v56 = vld [vmem:[%s24330_s2 + $0x1428] ss:$28 sps:$4 sm:$0xff]  }
 0x670   :  { %11478 = vmatprep.subr.bf16.mxu1 %v18128_v8  ;;  %v18185_v8 = vld [vmem:[%s24330_s2 + $0x145c] ss:$28 sps:$4 sm:$0xff]  }
 0x672   :  { %11192 = vmatpush1.bf16.msra.mxu0 %v18123_v18  ;;  %v18188_v18 = vld [vmem:[%s24330_s2 + $0x1464] ss:$28 sps:$4 sm:$0xff]  }
 0x673   :  { %11479 = vmatpush1.bf16.msra.mxu1 %v18126_v36  ;;  %11193 = vmatprep.subr.bf16.mxu0 %v18131_v3  ;;  %v18183_v36 = vld [vmem:[%s24330_s2 + $0x1458] ss:$28 sps:$4 sm:$0xff]   ;;  %v6525_v3 = vrot.slane %v21515_v4, %v20697_v53 }
 0x674   :  { %11480 = vmatprep.subr.bf16.mxu1 %v18134_v30  ;;  %v18186_v30 = vld [vmem:[%s24330_s2 + $0x1460] ss:$28 sps:$4 sm:$0xff]  }
 0x676   :  { %11194 = vmatpush1.bf16.msra.mxu0 %v18129_v16  ;;  %v18191_v16 = vld [vmem:[%s24330_s2 + $0x1494] ss:$28 sps:$4 sm:$0xff]  }
 0x677   :  { %11481 = vmatpush1.bf16.msra.mxu1 %v18132_v54  ;;  %11195 = vmatprep.subr.bf16.mxu0 %v18137_v24  ;;  %v18194_v54 = vld [vmem:[%s24330_s2 + $0x149c] ss:$28 sps:$4 sm:$0xff]   ;;  %v18189_v24 = vld [vmem:[%s24330_s2 + $0x1490] ss:$28 sps:$4 sm:$0xff]  }
 0x678   :  { %11482 = vmatprep.subr.bf16.mxu1 %v18140_v22  ;;  %v6544_v22 = vmul.f32 %v6525_v3, %v21171_v29  ;;  %v18195_v29 = vld [vmem:[%s24330_s2 + $0x14c8] ss:$28 sps:$4 sm:$0xff]   ;;  %v18236_v3 = vld [vmem:[%s24330_s2 + $0x2b8] ss:$28 sps:$4 sm:$0xff]  }
 0x67a   :  { %11196 = vmatpush1.bf16.msra.mxu0 %v18135_v37  ;;  %v18192_v37 = vld [vmem:[%s24330_s2 + $0x1498] ss:$28 sps:$4 sm:$0xff]  }
 0x67b   :  { %11483 = vmatpush1.bf16.msra.mxu1 %v18138_v46  ;;  %11197 = vmatprep.subr.bf16.mxu0 %v18143_v7  ;;  %v18197_v46 = vld [vmem:[%s24330_s2 + $0x14cc] ss:$28 sps:$4 sm:$0xff]   ;;  %v18200_v7 = vld [vmem:[%s24330_s2 + $0x14d4] ss:$28 sps:$4 sm:$0xff]  }
 0x67c   :  { %11484 = vmatprep.subr.bf16.mxu1 %v18146_v25  ;;  %v6590_v25 = vrot.slane %v21515_v4, %v20717_v61  ;;  %v18206_v4 = vld [vmem:[%s24330_s2 + $0x150c] ss:$28 sps:$4 sm:$0xff]  }
 0x67e   :  { %11198 = vmatpush1.bf16.msra.mxu0 %v18141_v19  ;;  %v6609_v19 = vadd.f32 %v6590_v25, %v6544_v22  ;;  %v18238_v22 = vld [vmem:[%s24330_s2 + $0x128] ss:$28 sps:$4 sm:$0xff]   ;;  %v18243_v25 = vld [vmem:[%s24330_s2 + $0x160] ss:$28 sps:$4 sm:$0xff]  }
 0x67f   :  { %11485 = vmatpush1.bf16.msra.mxu1 %v18144_v9  ;;  %11199 = vmatprep.subr.bf16.mxu0 %v18149_v38  ;;  %v18198_v9 = vld [vmem:[%s24330_s2 + $0x14d0] ss:$28 sps:$4 sm:$0xff]   ;;  %v18203_v38 = vld [vmem:[%s24330_s2 + $0x1504] ss:$28 sps:$4 sm:$0xff]  }
 0x680   :  { %11486 = vmatprep.subr.bf16.mxu1 %v18152_v17  ;;  %v18201_v17 = vld [vmem:[%s24330_s2 + $0x1500] ss:$28 sps:$4 sm:$0xff]  }
 0x682   :  { %11200 = vmatpush1.bf16.msra.mxu0 %v18147_v34  ;;  %v6533_v34 = vrot.slane %v21495_v50, %v20697_v53 }
 0x683   :  { %11487 = vmatpush1.bf16.msra.mxu1 %v18150_v45  ;;  %11201 = vmatprep.subr.bf16.mxu0 %v18155_v33  ;;  %v22557_v45 = vpack.c.bf16 %v6609_v19, %v6609_v19  ;;  %v18204_v33 = vld [vmem:[%s24330_s2 + $0x1508] ss:$28 sps:$4 sm:$0xff]   ;;  %v18250_v19 = vld [vmem:[%s24330_s2 + $0x19c] ss:$28 sps:$4 sm:$0xff]  }
 0x684   :  { %11488 = vmatprep.subr.bf16.mxu1 %v18158_v5  ;;  %v18209_v5 = vld [vmem:[%s24330_s2 + $0x153c] ss:$28 sps:$4 sm:$0xff]  }
 0x686   :  { %11202 = vmatpush1.bf16.msra.mxu0 %v18153_v39  ;;  %v18212_v39 = vld [vmem:[%s24330_s2 + $0x1544] ss:$28 sps:$4 sm:$0xff]  }
 0x687   :  { %11489 = vmatpush1.bf16.msra.mxu1 %v18156_v1  ;;  %11203 = vmatprep.subr.bf16.mxu0 %v18161_v40  ;;  %v18207_v1 = vld [vmem:[%s24330_s2 + $0x1538] ss:$28 sps:$4 sm:$0xff]   ;;  %v6546_v40 = vmul.f32 %v6533_v34, %v21226_v12  ;;  %v6598_v12 = vrot.slane %v21495_v50, %v20717_v61  ;;  %v18220_v50 = vld [vmem:[%s24330_s2 + $0x4c] ss:$28 sps:$4 sm:$0xff]  }
 0x688   :  { %11490 = vmatprep.subr.bf16.mxu1 %v18164_v31  ;;  %v18210_v31 = vld [vmem:[%s24330_s2 + $0x1540] ss:$28 sps:$4 sm:$0xff]   ;;  %v18256_v34 = vld [vmem:[%s24330_s2 + $0x558] ss:$28 sps:$4 sm:$0xff]  }
 0x68a   :  { %11204 = vmatpush1.bf16.msra.mxu0 %v18159_v21  ;;  %v18215_v21 = vld [vmem:[%s24330_s2 + $0x14] ss:$28 sps:$4 sm:$0xff]  }
 0x68b   :  { %11491 = vmatpush1.bf16.msra.mxu1 %v18162_v15  ;;  %11205 = vmatprep.subr.bf16.mxu0 %v18167_v52  ;;  %v18216_v15 = vld [vmem:[%s24330_s2 + $0x1d8] ss:$28 sps:$4 sm:$0xff]   ;;  %v6611_v52 = vadd.f32 %v6598_v12, %v6546_v40  ;;  %v18258_v40 = vld [vmem:[%s24330_s2 + $0x208] ss:$28 sps:$4 sm:$0xff]   ;;  %v18263_v12 = vld [vmem:[%s24330_s2 + $0x240] ss:$28 sps:$4 sm:$0xff]  }
 0x68c   :  { %11492 = vmatprep.subr.bf16.mxu1 %v18170_v42  ;;  %v18213_v42 = vld [vmem:[%s24330_s2 + $0x10] ss:$28 sps:$4 sm:$0xff]  }
 0x68e   :  { %11206 = vmatpush1.bf16.msra.mxu0 %v18165_v27  ;;  %v22590_v27 = vpack.c.bf16 %v6611_v52, %v6611_v52  ;;  %v18267_v52 = vld [vmem:[%s24330_s2 + $0x408] ss:$28 sps:$4 sm:$0xff]  }
 0x68f   :  { %11493 = vmatpush1.bf16.msra.mxu1 %v18168_v58  ;;  %11207 = vmatprep.subr.bf16.mxu0 %v18173_v55  ;;  %v18217_v58 = vld [vmem:[%s24330_s2 + $0x18] ss:$28 sps:$4 sm:$0xff]   ;;  %v18221_v55 = vld [vmem:[%s24330_s2 + $0x210] ss:$28 sps:$4 sm:$0xff]  }
 0x690   :  { %11494 = vmatprep.subr.bf16.mxu1 %v18176_v35  ;;  %v18218_v35 = vld [vmem:[%s24330_s2 + $0x48] ss:$28 sps:$4 sm:$0xff]  }
 0x692   :  { %11208 = vmatpush1.bf16.msra.mxu0 %v18171_v26  ;;  %v18222_v26 = vld [vmem:[%s24330_s2 + $0x50] ss:$28 sps:$4 sm:$0xff]  }
 0x693   :  { %11495 = vmatpush1.bf16.msra.mxu1 %v18174_v51  ;;  %11209 = vmatprep.subr.bf16.mxu0 %v18179_v14  ;;  %v18225_v51 = vld [vmem:[%s24330_s2 + $0x84] ss:$28 sps:$4 sm:$0xff]  }
 0x694   :  { %11496 = vmatprep.subr.bf16.mxu1 %v18182_v44  ;;  %v18226_v14 = vld [vmem:[%s24330_s2 + $0x248] ss:$28 sps:$4 sm:$0xff]   ;;  %v18223_v44 = vld [vmem:[%s24330_s2 + $0x80] ss:$28 sps:$4 sm:$0xff]  }
 0x696   :  { %11210 = vmatpush1.bf16.msra.mxu0 %v18177_v11  ;;  %v18227_v11 = vld [vmem:[%s24330_s2 + $0x88] ss:$28 sps:$4 sm:$0xff]  }
 0x697   :  { %11497 = vmatpush1.bf16.msra.mxu1 %v18180_v56  ;;  %11211 = vmatprep.subr.bf16.mxu0 %v18185_v8  ;;  %v18231_v56 = vld [vmem:[%s24330_s2 + $0x280] ss:$28 sps:$4 sm:$0xff]   ;;  %v18228_v8 = vld [vmem:[%s24330_s2 + $0xb8] ss:$28 sps:$4 sm:$0xff]  }
 0x698   :  { %11498 = vmatprep.subr.bf16.mxu1 %v18188_v18  ;;  %v18232_v18 = vld [vmem:[%s24330_s2 + $0xc0] ss:$28 sps:$4 sm:$0xff]  }
 0x69a   :  { %11212 = vmatpush1.bf16.msra.mxu0 %v18183_v36  ;;  %v18235_v36 = vld [vmem:[%s24330_s2 + $0xf4] ss:$28 sps:$4 sm:$0xff]  }
 0x69b   :  { %11499 = vmatpush1.bf16.msra.mxu1 %v18186_v30  ;;  %11213 = vmatprep.subr.bf16.mxu0 %v18191_v16  ;;  %v18233_v30 = vld [vmem:[%s24330_s2 + $0xf0] ss:$28 sps:$4 sm:$0xff]   ;;  %v18237_v16 = vld [vmem:[%s24330_s2 + $0xf8] ss:$28 sps:$4 sm:$0xff]  }
 0x69c   :  { %11500 = vmatprep.subr.bf16.mxu1 %v18194_v54  ;;  %v18240_v54 = vld [vmem:[%s24330_s2 + $0x12c] ss:$28 sps:$4 sm:$0xff]  }
 0x69e   :  { %11214 = vmatpush1.bf16.msra.mxu0 %v18189_v24  ;;  %v18241_v24 = vld [vmem:[%s24330_s2 + $0x2f0] ss:$28 sps:$4 sm:$0xff]  }
 0x69f   :  { %11501 = vmatpush1.bf16.msra.mxu1 %v18192_v37  ;;  %11215 = vmatprep.subr.bf16.mxu0 %v18197_v46  ;;  %v18242_v37 = vld [vmem:[%s24330_s2 + $0x130] ss:$28 sps:$4 sm:$0xff]   ;;  %v18245_v46 = vld [vmem:[%s24330_s2 + $0x164] ss:$28 sps:$4 sm:$0xff]  }
 0x6a0   :  { %11502 = vmatprep.subr.bf16.mxu1 %v18200_v7  ;;  %v18246_v7 = vld [vmem:[%s24330_s2 + $0x328] ss:$28 sps:$4 sm:$0xff]  }
 0x6a2   :  { %11216 = vmatpush1.bf16.msra.mxu0 %v18195_v29  ;;  %v18247_v29 = vld [vmem:[%s24330_s2 + $0x168] ss:$28 sps:$4 sm:$0xff]  }
 0x6a3   :  { %11503 = vmatpush1.bf16.msra.mxu1 %v18198_v9  ;;  %11226 = vmatprep.subr.bf16.mxu0 %v18203_v38  ;;  %v18251_v9 = vld [vmem:[%s24330_s2 + $0x360] ss:$28 sps:$4 sm:$0xff]   ;;  %v18248_v38 = vld [vmem:[%s24330_s2 + $0x198] ss:$28 sps:$4 sm:$0xff]  }
 0x6a4   :  { %11513 = vmatprep.subr.bf16.mxu1 %v18206_v4  ;;  %v18252_v4 = vld [vmem:[%s24330_s2 + $0x1a0] ss:$28 sps:$4 sm:$0xff]  }
 0x6a5   :  { %11218 = vmatmul.mubr.bf16.vlgmr.msra.gmra.mrb[28].mxu0 %v22557_v45 }
 0x6a6   :  { %11505 = vmatmul.mubr.bf16.vlgmr.msra.gmra.mrb[28].mxu1 %v22557_v45  ;;  %11227 = vmatpush1.bf16.msra.mxu0 %v18201_v17  ;;  %v18255_v17 = vld [vmem:[%s24330_s2 + $0x1d4] ss:$28 sps:$4 sm:$0xff]  }
 0x6a7   :  { %11514 = vmatpush1.bf16.msra.mxu1 %v18204_v33  ;;  %11228 = vmatprep.subr.bf16.mxu0 %v18209_v5  ;;  %v18253_v33 = vld [vmem:[%s24330_s2 + $0x1d0] ss:$28 sps:$4 sm:$0xff]   ;;  %v18257_v5 = vld [vmem:[%s24330_s2 + $0x398] ss:$28 sps:$4 sm:$0xff]  }
 0x6a8   :  { %11515 = vmatprep.subr.bf16.mxu1 %v18212_v39  ;;  %11258 = vmatprep.mubr.bf16.mxu0 %v18835_v41  ;;  %v18260_v39 = vld [vmem:[%s24330_s2 + $0x20c] ss:$28 sps:$4 sm:$0xff]  }
 0x6a9   :  { %11545 = vmatprep.mubr.bf16.mxu1 %v18835_v41 }
 0x6aa   :  { %11229 = vmatpush1.bf16.msra.mxu0 %v18207_v1  ;;  %v18261_v1 = vld [vmem:[%s24330_s2 + $0x590] ss:$28 sps:$4 sm:$0xff]  }
 0x6ab   :  { %11516 = vmatpush1.bf16.msra.mxu1 %v18210_v31  ;;  %11554 = vmatprep.subr.bf16.mxu0 %v18215_v21  ;;  %v18262_v31 = vld [vmem:[%s24330_s2 + $0x3d0] ss:$28 sps:$4 sm:$0xff]   ;;  %v18265_v21 = vld [vmem:[%s24330_s2 + $0x244] ss:$28 sps:$4 sm:$0xff]  }
 0x6ac   :  { %16106 = vmatprep.subr.bf16.mxu1 %v18216_v15  ;;  %v18266_v15 = vld [vmem:[%s24330_s2 + $0x5c8] ss:$28 sps:$4 sm:$0xff]  }
 0x6b1   :  { %15872 = vmatmul.mubr.msk.bf16.vlgmr.msra.gmra.mrb[28].mxu0 %vm5460_vm4, %v22590_v27 }
 0x6b2   :  { %15873 = vmatmul.mubr.msk.bf16.vlgmr.msra.gmra.mrb[28].mxu1 %vm5460_vm4, %v22590_v27  ;;  %11555 = vmatpush1.bf16.msra.mxu0 %v18213_v42  ;;  %v18270_v42 = vld [vmem:[%s24330_s2 + $0x27c] ss:$28 sps:$4 sm:$0xff]  }
 0x6b3   :  { %16107 = vmatpush3.bf16.msra.mxu1 %v18217_v58  ;;  %11586 = vmatprep.mubr.bf16.mxu0 %v21491_v20  ;;  %v18271_v58 = vld [vmem:[%s24330_s2 + $0x600] ss:$28 sps:$4 sm:$0xff]  }
 0x6b4   :  { %11873 = vmatprep.mubr.bf16.mxu1 %v21491_v20  ;;  %11556 = vmatprep.subr.bf16.mxu0 %v18220_v50  ;;  %v18230_v20 = vld [vmem:[%s24330_s2 + $0xbc] ss:$28 sps:$4 sm:$0xff]  }
 0x6b5   :  { %16108 = vmatprep.subr.bf16.mxu1 %v18221_v55  ;;  %v18268_v50 = vld [vmem:[%s24330_s2 + $0x278] ss:$28 sps:$4 sm:$0xff]   ;;  %v18272_v55 = vld [vmem:[%s24330_s2 + $0x440] ss:$28 sps:$4 sm:$0xff]  }
 0x6b6   :  { %11557 = vmatpush1.bf16.msra.mxu0 %v18218_v35  ;;  %v18275_v35 = vld [vmem:[%s24330_s2 + $0x2b4] ss:$28 sps:$4 sm:$0xff]  }
 0x6b7   :  { %16109 = vmatpush3.bf16.msra.mxu1 %v18222_v26  ;;  %11558 = vmatprep.subr.bf16.mxu0 %v18225_v51  ;;  %v18276_v26 = vld [vmem:[%s24330_s2 + $0x638] ss:$28 sps:$4 sm:$0xff]   ;;  %v18273_v51 = vld [vmem:[%s24330_s2 + $0x2b0] ss:$28 sps:$4 sm:$0xff]  }
 0x6b8   :  { %16110 = vmatprep.subr.bf16.mxu1 %v18226_v14  ;;  %v18277_v14 = vld [vmem:[%s24330_s2 + $0x478] ss:$28 sps:$4 sm:$0xff]  }
 0x6ba   :  { %11559 = vmatpush1.bf16.msra.mxu0 %v18223_v44  ;;  %v18280_v44 = vld [vmem:[%s24330_s2 + $0x2ec] ss:$28 sps:$4 sm:$0xff]  }
 0x6bb   :  { %16111 = vmatpush3.bf16.msra.mxu1 %v18227_v11  ;;  %11560 = vmatprep.subr.bf16.mxu0 %v18230_v20  ;;  %v18281_v11 = vld [vmem:[%s24330_s2 + $0x670] ss:$28 sps:$4 sm:$0xff]   ;;  %v18278_v20 = vld [vmem:[%s24330_s2 + $0x2e8] ss:$28 sps:$4 sm:$0xff]  }
 0x6bc   :  { %16112 = vmatprep.subr.bf16.mxu1 %v18231_v56  ;;  %v18282_v56 = vld [vmem:[%s24330_s2 + $0x4b0] ss:$28 sps:$4 sm:$0xff]  }
 0x6be   :  { %11561 = vmatpush1.bf16.msra.mxu0 %v18228_v8  ;;  %v18285_v8 = vld [vmem:[%s24330_s2 + $0x324] ss:$28 sps:$4 sm:$0xff]  }
 0x6bf   :  { %16113 = vmatpush3.bf16.msra.mxu1 %v18232_v18  ;;  %11562 = vmatprep.subr.bf16.mxu0 %v18235_v36  ;;  %v18286_v18 = vld [vmem:[%s24330_s2 + $0x6a8] ss:$28 sps:$4 sm:$0xff]   ;;  %v18283_v36 = vld [vmem:[%s24330_s2 + $0x320] ss:$28 sps:$4 sm:$0xff]  }
 0x6c0   :  { %16114 = vmatprep.subr.bf16.mxu1 %v18236_v3  ;;  %v18287_v3 = vld [vmem:[%s24330_s2 + $0x4e8] ss:$28 sps:$4 sm:$0xff]  }
 0x6c2   :  { %11563 = vmatpush1.bf16.msra.mxu0 %v18233_v30  ;;  %v18290_v30 = vld [vmem:[%s24330_s2 + $0x35c] ss:$28 sps:$4 sm:$0xff]  }
 0x6c3   :  { %16115 = vmatpush3.bf16.msra.mxu1 %v18237_v16  ;;  %11564 = vmatprep.subr.bf16.mxu0 %v18240_v54  ;;  %v18291_v16 = vld [vmem:[%s24330_s2 + $0x6e0] ss:$28 sps:$4 sm:$0xff]   ;;  %v18288_v54 = vld [vmem:[%s24330_s2 + $0x358] ss:$28 sps:$4 sm:$0xff]  }
 0x6c4   :  { %16116 = vmatprep.subr.bf16.mxu1 %v18241_v24  ;;  %v18292_v24 = vld [vmem:[%s24330_s2 + $0x520] ss:$28 sps:$4 sm:$0xff]  }
 0x6c6   :  { %11565 = vmatpush1.bf16.msra.mxu0 %v18238_v22  ;;  %v18295_v22 = vld [vmem:[%s24330_s2 + $0x394] ss:$28 sps:$4 sm:$0xff]  }
 0x6c7   :  { %16117 = vmatpush3.bf16.msra.mxu1 %v18242_v37  ;;  %11566 = vmatprep.subr.bf16.mxu0 %v18245_v46  ;;  %v18296_v37 = vld [vmem:[%s24330_s2 + $0x8d8] ss:$28 sps:$4 sm:$0xff]   ;;  %v18293_v46 = vld [vmem:[%s24330_s2 + $0x390] ss:$28 sps:$4 sm:$0xff]  }
 0x6c8   :  { %16118 = vmatprep.subr.bf16.mxu1 %v18246_v7  ;;  %v18297_v7 = vld [vmem:[%s24330_s2 + $0x718] ss:$28 sps:$4 sm:$0xff]  }
 0x6ca   :  { %11567 = vmatpush1.bf16.msra.mxu0 %v18243_v25  ;;  %v18300_v25 = vld [vmem:[%s24330_s2 + $0x3cc] ss:$28 sps:$4 sm:$0xff]  }
 0x6cb   :  { %16119 = vmatpush3.bf16.msra.mxu1 %v18247_v29  ;;  %11568 = vmatprep.subr.bf16.mxu0 %v18250_v19  ;;  %v18301_v29 = vld [vmem:[%s24330_s2 + $0x910] ss:$28 sps:$4 sm:$0xff]   ;;  %v18298_v19 = vld [vmem:[%s24330_s2 + $0x3c8] ss:$28 sps:$4 sm:$0xff]  }
 0x6cc   :  { %16120 = vmatprep.subr.bf16.mxu1 %v18251_v9  ;;  %v18302_v9 = vld [vmem:[%s24330_s2 + $0x750] ss:$28 sps:$4 sm:$0xff]  }
 0x6ce   :  { %11569 = vmatpush1.bf16.msra.mxu0 %v18248_v38  ;;  %v18306_v38 = vld [vmem:[%s24330_s2 + $0x948] ss:$28 sps:$4 sm:$0xff]  }
 0x6cf   :  { %16121 = vmatpush3.bf16.msra.mxu1 %v18252_v4  ;;  %11570 = vmatprep.subr.bf16.mxu0 %v18255_v17  ;;  %v18307_v4 = vld [vmem:[%s24330_s2 + $0x788] ss:$28 sps:$4 sm:$0xff]   ;;  %v18310_v17 = vld [vmem:[%s24330_s2 + $0x43c] ss:$28 sps:$4 sm:$0xff]  }
 0x6d0   :  { %16128 = vmatprep.subr.bf16.mxu1 %v18256_v34  ;;  %v18311_v34 = vld [vmem:[%s24330_s2 + $0x980] ss:$28 sps:$4 sm:$0xff]  }
 0x6d2   :  { %11874 = vmatmul.mubr.bf16.vlgmr.msra.gmra.mrb[32].mxu1 %v21504_v47  ;;  %11571 = vmatpush1.bf16.msra.mxu0 %v18253_v33  ;;  %v18308_v33 = vld [vmem:[%s24330_s2 + $0x438] ss:$28 sps:$4 sm:$0xff]  }
 0x6d3   :  { %16129 = vmatpush3.bf16.msra.mxu1 %v18257_v5  ;;  %11913 = vmatprep.mubr.bf16.mxu1 %v21517_v28  ;;  %v18312_v5 = vld [vmem:[%s24330_s2 + $0x7c0] ss:$28 sps:$4 sm:$0xff]  }
 0x6d4   :  { %11572 = vmatprep.subr.bf16.mxu0 %v18260_v39  ;;  %16130 = vmatprep.subr.bf16.mxu1 %v18261_v1  ;;  %v18315_v39 = vld [vmem:[%s24330_s2 + $0x474] ss:$28 sps:$4 sm:$0xff]  }
 0x6d5   :  { %v18316_v1 = vld [vmem:[%s24330_s2 + $0x9b8] ss:$28 sps:$4 sm:$0xff]  }
 0x6d6   :  { %11573 = vmatpush1.bf16.msra.mxu0 %v18258_v40  ;;  %v18313_v40 = vld [vmem:[%s24330_s2 + $0x470] ss:$28 sps:$4 sm:$0xff]  }
 0x6d7   :  { %16131 = vmatpush3.bf16.msra.mxu1 %v18262_v31  ;;  %11574 = vmatprep.subr.bf16.mxu0 %v18265_v21  ;;  %v18317_v31 = vld [vmem:[%s24330_s2 + $0x7f8] ss:$28 sps:$4 sm:$0xff]   ;;  %v18320_v21 = vld [vmem:[%s24330_s2 + $0x4ac] ss:$28 sps:$4 sm:$0xff]  }
 0x6d8   :  { %16132 = vmatprep.subr.bf16.mxu1 %v18266_v15  ;;  %v18321_v15 = vld [vmem:[%s24330_s2 + $0x9f0] ss:$28 sps:$4 sm:$0xff]  }
 0x6da   :  { %11575 = vmatpush1.bf16.msra.mxu0 %v18263_v12  ;;  %v18318_v12 = vld [vmem:[%s24330_s2 + $0x4a8] ss:$28 sps:$4 sm:$0xff]  }
 0x6db   :  { %16133 = vmatpush3.bf16.msra.mxu1 %v18267_v52  ;;  %11576 = vmatprep.subr.bf16.mxu0 %v18270_v42  ;;  %v18322_v52 = vld [vmem:[%s24330_s2 + $0x830] ss:$28 sps:$4 sm:$0xff]   ;;  %v18325_v42 = vld [vmem:[%s24330_s2 + $0x4e4] ss:$28 sps:$4 sm:$0xff]  }
 0x6dc   :  { %16134 = vmatprep.subr.bf16.mxu1 %v18271_v58  ;;  %v18326_v58 = vld [vmem:[%s24330_s2 + $0xa28] ss:$28 sps:$4 sm:$0xff]  }
 0x6de   :  { %11577 = vmatpush1.bf16.msra.mxu0 %v18268_v50  ;;  %v18323_v50 = vld [vmem:[%s24330_s2 + $0x4e0] ss:$28 sps:$4 sm:$0xff]  }
 0x6df   :  { %16135 = vmatpush3.bf16.msra.mxu1 %v18272_v55  ;;  %11578 = vmatprep.subr.bf16.mxu0 %v18275_v35  ;;  %v18327_v55 = vld [vmem:[%s24330_s2 + $0x868] ss:$28 sps:$4 sm:$0xff]   ;;  %v18330_v35 = vld [vmem:[%s24330_s2 + $0x51c] ss:$28 sps:$4 sm:$0xff]  }
 0x6e0   :  { %16136 = vmatprep.subr.bf16.mxu1 %v18276_v26  ;;  %v18331_v26 = vld [vmem:[%s24330_s2 + $0xa60] ss:$28 sps:$4 sm:$0xff]  }
 0x6e2   :  { %11579 = vmatpush1.bf16.msra.mxu0 %v18273_v51  ;;  %v18328_v51 = vld [vmem:[%s24330_s2 + $0x518] ss:$28 sps:$4 sm:$0xff]  }
 0x6e3   :  { %16137 = vmatpush3.bf16.msra.mxu1 %v18277_v14  ;;  %11580 = vmatprep.subr.bf16.mxu0 %v18280_v44  ;;  %v18332_v14 = vld [vmem:[%s24330_s2 + $0x8a0] ss:$28 sps:$4 sm:$0xff]   ;;  %v18335_v44 = vld [vmem:[%s24330_s2 + $0x554] ss:$28 sps:$4 sm:$0xff]  }
 0x6e4   :  { %16138 = vmatprep.subr.bf16.mxu1 %v18281_v11  ;;  %v18336_v11 = vld [vmem:[%s24330_s2 + $0xc58] ss:$28 sps:$4 sm:$0xff]  }
 0x6e6   :  { %11581 = vmatpush1.bf16.msra.mxu0 %v18278_v20  ;;  %v18333_v20 = vld [vmem:[%s24330_s2 + $0x550] ss:$28 sps:$4 sm:$0xff]  }
 0x6e7   :  { %16139 = vmatpush3.bf16.msra.mxu1 %v18282_v56  ;;  %11582 = vmatprep.subr.bf16.mxu0 %v18285_v8  ;;  %v18337_v56 = vld [vmem:[%s24330_s2 + $0xa98] ss:$28 sps:$4 sm:$0xff]   ;;  %v18340_v8 = vld [vmem:[%s24330_s2 + $0x58c] ss:$28 sps:$4 sm:$0xff]  }
 0x6e8   :  { %16140 = vmatprep.subr.bf16.mxu1 %v18286_v18  ;;  %v18341_v18 = vld [vmem:[%s24330_s2 + $0xc90] ss:$28 sps:$4 sm:$0xff]  }
 0x6ea   :  { %11583 = vmatpush1.bf16.msra.mxu0 %v18283_v36  ;;  %v18338_v36 = vld [vmem:[%s24330_s2 + $0x588] ss:$28 sps:$4 sm:$0xff]  }
 0x6eb   :  { %16141 = vmatpush3.bf16.msra.mxu1 %v18287_v3  ;;  %11584 = vmatprep.subr.bf16.mxu0 %v18290_v30  ;;  %v18342_v3 = vld [vmem:[%s24330_s2 + $0xad0] ss:$28 sps:$4 sm:$0xff]   ;;  %v18345_v30 = vld [vmem:[%s24330_s2 + $0x5c4] ss:$28 sps:$4 sm:$0xff]  }
 0x6ec   :  { %16142 = vmatprep.subr.bf16.mxu1 %v18291_v16  ;;  %v18346_v16 = vld [vmem:[%s24330_s2 + $0xcc8] ss:$28 sps:$4 sm:$0xff]  }
 0x6ee   :  { %11585 = vmatpush1.bf16.msra.mxu0 %v18288_v54  ;;  %v18343_v54 = vld [vmem:[%s24330_s2 + $0x5c0] ss:$28 sps:$4 sm:$0xff]  }
 0x6ef   :  { %16143 = vmatpush3.bf16.msra.mxu1 %v18292_v24  ;;  %11595 = vmatprep.subr.bf16.mxu0 %v18295_v22  ;;  %v18347_v24 = vld [vmem:[%s24330_s2 + $0xb08] ss:$28 sps:$4 sm:$0xff]   ;;  %v18350_v22 = vld [vmem:[%s24330_s2 + $0x5fc] ss:$28 sps:$4 sm:$0xff]  }
 0x6f0   :  { %16150 = vmatprep.subr.bf16.mxu1 %v18296_v37  ;;  %v18351_v37 = vld [vmem:[%s24330_s2 + $0xd00] ss:$28 sps:$4 sm:$0xff]  }
 0x6f1   :  { %11587 = vmatmul.mubr.bf16.vlgmr.msra.gmra.mrb[32].mxu0 %v21504_v47  ;;  %v18305_v47 = vld [vmem:[%s24330_s2 + $0x404] ss:$28 sps:$4 sm:$0xff]  }
 0x6f2   :  { %11914 = vmatmul.mubr.bf16.vlgmr.msra.gmra.mrb[36].mxu1 %v21720_v63  ;;  %11596 = vmatpush1.bf16.msra.mxu0 %v18293_v46  ;;  %v18348_v46 = vld [vmem:[%s24330_s2 + $0x5f8] ss:$28 sps:$4 sm:$0xff]  }
 0x6f3   :  { %11627 = vmatprep.mubr.bf16.mxu0 %v21517_v28  ;;  %16151 = vmatpush3.bf16.msra.mxu1 %v18297_v7  ;;  %v18303_v28 = vld [vmem:[%s24330_s2 + $0x400] ss:$28 sps:$4 sm:$0xff]  }
 0x6f4   :  { %11953 = vmatprep.mubr.bf16.mxu1 %v21725_v32  ;;  %11597 = vmatprep.subr.bf16.mxu0 %v18300_v25  ;;  %v18352_v7 = vld [vmem:[%s24330_s2 + $0xb40] ss:$28 sps:$4 sm:$0xff]   ;;  %v18355_v25 = vld [vmem:[%s24330_s2 + $0x634] ss:$28 sps:$4 sm:$0xff]  }
 0x6f5   :  { %16152 = vmatprep.subr.bf16.mxu1 %v18301_v29  ;;  %v18356_v29 = vld [vmem:[%s24330_s2 + $0xd38] ss:$28 sps:$4 sm:$0xff]  }
 0x6f6   :  { %11598 = vmatpush1.bf16.msra.mxu0 %v18298_v19  ;;  %v18353_v19 = vld [vmem:[%s24330_s2 + $0x630] ss:$28 sps:$4 sm:$0xff]  }
 0x6f7   :  { %16153 = vmatpush3.bf16.msra.mxu1 %v18302_v9  ;;  %11599 = vmatprep.subr.bf16.mxu0 %v18305_v47  ;;  %v18357_v9 = vld [vmem:[%s24330_s2 + $0xb78] ss:$28 sps:$4 sm:$0xff]   ;;  %v18360_v47 = vld [vmem:[%s24330_s2 + $0x66c] ss:$28 sps:$4 sm:$0xff]  }
 0x6f8   :  { %16154 = vmatprep.subr.bf16.mxu1 %v18306_v38  ;;  %v18361_v38 = vld [vmem:[%s24330_s2 + $0xd70] ss:$28 sps:$4 sm:$0xff]  }
 0x6fa   :  { %11600 = vmatpush1.bf16.msra.mxu0 %v18303_v28  ;;  %v18358_v28 = vld [vmem:[%s24330_s2 + $0x668] ss:$28 sps:$4 sm:$0xff]  }
 0x6fb   :  { %16155 = vmatpush3.bf16.msra.mxu1 %v18307_v4  ;;  %11601 = vmatprep.subr.bf16.mxu0 %v18310_v17  ;;  %v18362_v4 = vld [vmem:[%s24330_s2 + $0xbb0] ss:$28 sps:$4 sm:$0xff]   ;;  %v18365_v17 = vld [vmem:[%s24330_s2 + $0x6a4] ss:$28 sps:$4 sm:$0xff]  }
 0x6fc   :  { %16156 = vmatprep.subr.bf16.mxu1 %v18311_v34  ;;  %v18366_v34 = vld [vmem:[%s24330_s2 + $0xda8] ss:$28 sps:$4 sm:$0xff]  }
 0x6fe   :  { %11602 = vmatpush1.bf16.msra.mxu0 %v18308_v33  ;;  %v18363_v33 = vld [vmem:[%s24330_s2 + $0x6a0] ss:$28 sps:$4 sm:$0xff]  }
 0x6ff   :  { %16157 = vmatpush3.bf16.msra.mxu1 %v18312_v5  ;;  %11603 = vmatprep.subr.bf16.mxu0 %v18315_v39  ;;  %v18367_v5 = vld [vmem:[%s24330_s2 + $0xbe8] ss:$28 sps:$4 sm:$0xff]   ;;  %v18370_v39 = vld [vmem:[%s24330_s2 + $0x6dc] ss:$28 sps:$4 sm:$0xff]  }
 0x700   :  { %16158 = vmatprep.subr.bf16.mxu1 %v18316_v1  ;;  %v18371_v1 = vld [vmem:[%s24330_s2 + $0xde0] ss:$28 sps:$4 sm:$0xff]  }
 0x702   :  { %11604 = vmatpush1.bf16.msra.mxu0 %v18313_v40  ;;  %v18368_v40 = vld [vmem:[%s24330_s2 + $0x6d8] ss:$28 sps:$4 sm:$0xff]  }
 0x703   :  { %16159 = vmatpush3.bf16.msra.mxu1 %v18317_v31  ;;  %11605 = vmatprep.subr.bf16.mxu0 %v18320_v21  ;;  %v18372_v31 = vld [vmem:[%s24330_s2 + $0xc20] ss:$28 sps:$4 sm:$0xff]   ;;  %v18375_v21 = vld [vmem:[%s24330_s2 + $0x714] ss:$28 sps:$4 sm:$0xff]  }
 0x704   :  { %16160 = vmatprep.subr.bf16.mxu1 %v18321_v15  ;;  %v18376_v15 = vld [vmem:[%s24330_s2 + $0xfd8] ss:$28 sps:$4 sm:$0xff]  }
 0x706   :  { %11606 = vmatpush1.bf16.msra.mxu0 %v18318_v12  ;;  %v18373_v12 = vld [vmem:[%s24330_s2 + $0x710] ss:$28 sps:$4 sm:$0xff]  }
 0x707   :  { %16161 = vmatpush3.bf16.msra.mxu1 %v18322_v52  ;;  %11607 = vmatprep.subr.bf16.mxu0 %v18325_v42  ;;  %v18377_v52 = vld [vmem:[%s24330_s2 + $0xe18] ss:$28 sps:$4 sm:$0xff]   ;;  %v18380_v42 = vld [vmem:[%s24330_s2 + $0x74c] ss:$28 sps:$4 sm:$0xff]  }
 0x708   :  { %16162 = vmatprep.subr.bf16.mxu1 %v18326_v58  ;;  %v18381_v58 = vld [vmem:[%s24330_s2 + $0x1010] ss:$28 sps:$4 sm:$0xff]  }
 0x70a   :  { %11608 = vmatpush1.bf16.msra.mxu0 %v18323_v50  ;;  %v18378_v50 = vld [vmem:[%s24330_s2 + $0x748] ss:$28 sps:$4 sm:$0xff]  }
 0x70b   :  { %16163 = vmatpush3.bf16.msra.mxu1 %v18327_v55  ;;  %11609 = vmatprep.subr.bf16.mxu0 %v18330_v35  ;;  %v18382_v55 = vld [vmem:[%s24330_s2 + $0xe50] ss:$28 sps:$4 sm:$0xff]   ;;  %v18386_v35 = vld [vmem:[%s24330_s2 + $0x1048] ss:$28 sps:$4 sm:$0xff]  }
 0x70c   :  { %16164 = vmatprep.subr.bf16.mxu1 %v18331_v26  ;;  %v18387_v26 = vld [vmem:[%s24330_s2 + $0xe88] ss:$28 sps:$4 sm:$0xff]  }
 0x70e   :  { %11610 = vmatpush1.bf16.msra.mxu0 %v18328_v51  ;;  %v18390_v51 = vld [vmem:[%s24330_s2 + $0x7bc] ss:$28 sps:$4 sm:$0xff]  }
 0x70f   :  { %16165 = vmatpush3.bf16.msra.mxu1 %v18332_v14  ;;  %11611 = vmatprep.subr.bf16.mxu0 %v18335_v44  ;;  %v18391_v14 = vld [vmem:[%s24330_s2 + $0x1080] ss:$28 sps:$4 sm:$0xff]   ;;  %v18388_v44 = vld [vmem:[%s24330_s2 + $0x7b8] ss:$28 sps:$4 sm:$0xff]  }
 0x710   :  { %16172 = vmatprep.subr.bf16.mxu1 %v18336_v11  ;;  %v18392_v11 = vld [vmem:[%s24330_s2 + $0xec0] ss:$28 sps:$4 sm:$0xff]  }
 0x712   :  { %11954 = vmatmul.mubr.bf16.vlgmr.msra.gmra.mrb[40].mxu1 %v21930_v62  ;;  %11612 = vmatpush1.bf16.msra.mxu0 %v18333_v20  ;;  %v18395_v20 = vld [vmem:[%s24330_s2 + $0x7f4] ss:$28 sps:$4 sm:$0xff]  }
 0x713   :  { %16173 = vmatpush3.bf16.msra.mxu1 %v18337_v56  ;;  %11993 = vmatprep.mubr.bf16.mxu1 %v21938_v0  ;;  %v18396_v56 = vld [vmem:[%s24330_s2 + $0x10b8] ss:$28 sps:$4 sm:$0xff]  }
 0x714   :  { %11613 = vmatprep.subr.bf16.mxu0 %v18340_v8  ;;  %16174 = vmatprep.subr.bf16.mxu1 %v18341_v18  ;;  %v18393_v8 = vld [vmem:[%s24330_s2 + $0x7f0] ss:$28 sps:$4 sm:$0xff]   ;;  %v18397_v18 = vld [vmem:[%s24330_s2 + $0xef8] ss:$28 sps:$4 sm:$0xff]  }
 0x716   :  { %11614 = vmatpush1.bf16.msra.mxu0 %v18338_v36  ;;  %v18400_v36 = vld [vmem:[%s24330_s2 + $0x82c] ss:$28 sps:$4 sm:$0xff]  }
 0x717   :  { %16175 = vmatpush3.bf16.msra.mxu1 %v18342_v3  ;;  %11615 = vmatprep.subr.bf16.mxu0 %v18345_v30  ;;  %v18401_v3 = vld [vmem:[%s24330_s2 + $0x10f0] ss:$28 sps:$4 sm:$0xff]   ;;  %v18398_v30 = vld [vmem:[%s24330_s2 + $0x828] ss:$28 sps:$4 sm:$0xff]  }
 0x718   :  { %16176 = vmatprep.subr.bf16.mxu1 %v18346_v16  ;;  %v18402_v16 = vld [vmem:[%s24330_s2 + $0xf30] ss:$28 sps:$4 sm:$0xff]  }
 0x71a   :  { %11616 = vmatpush1.bf16.msra.mxu0 %v18343_v54  ;;  %v18405_v54 = vld [vmem:[%s24330_s2 + $0x864] ss:$28 sps:$4 sm:$0xff]  }
 0x71b   :  { %16177 = vmatpush3.bf16.msra.mxu1 %v18347_v24  ;;  %11617 = vmatprep.subr.bf16.mxu0 %v18350_v22  ;;  %v18406_v24 = vld [vmem:[%s24330_s2 + $0x1128] ss:$28 sps:$4 sm:$0xff]   ;;  %v18403_v22 = vld [vmem:[%s24330_s2 + $0x860] ss:$28 sps:$4 sm:$0xff]  }
 0x71c   :  { %16178 = vmatprep.subr.bf16.mxu1 %v18351_v37  ;;  %v18407_v37 = vld [vmem:[%s24330_s2 + $0xf68] ss:$28 sps:$4 sm:$0xff]  }
 0x71e   :  { %11618 = vmatpush1.bf16.msra.mxu0 %v18348_v46  ;;  %v18410_v46 = vld [vmem:[%s24330_s2 + $0x89c] ss:$28 sps:$4 sm:$0xff]  }
 0x71f   :  { %16179 = vmatpush3.bf16.msra.mxu1 %v18352_v7  ;;  %11619 = vmatprep.subr.bf16.mxu0 %v18355_v25  ;;  %v18411_v7 = vld [vmem:[%s24330_s2 + $0x1160] ss:$28 sps:$4 sm:$0xff]   ;;  %v18408_v25 = vld [vmem:[%s24330_s2 + $0x898] ss:$28 sps:$4 sm:$0xff]  }
 0x720   :  { %16180 = vmatprep.subr.bf16.mxu1 %v18356_v29  ;;  %v18412_v29 = vld [vmem:[%s24330_s2 + $0xfa0] ss:$28 sps:$4 sm:$0xff]  }
 0x722   :  { %11620 = vmatpush1.bf16.msra.mxu0 %v18353_v19  ;;  %v18415_v19 = vld [vmem:[%s24330_s2 + $0x8d4] ss:$28 sps:$4 sm:$0xff]  }
 0x723   :  { %16181 = vmatpush3.bf16.msra.mxu1 %v18357_v9  ;;  %11621 = vmatprep.subr.bf16.mxu0 %v18360_v47  ;;  %v18416_v9 = vld [vmem:[%s24330_s2 + $0x1358] ss:$28 sps:$4 sm:$0xff]   ;;  %v18413_v47 = vld [vmem:[%s24330_s2 + $0x8d0] ss:$28 sps:$4 sm:$0xff]  }
 0x724   :  { %16182 = vmatprep.subr.bf16.mxu1 %v18361_v38  ;;  %v18417_v38 = vld [vmem:[%s24330_s2 + $0x1198] ss:$28 sps:$4 sm:$0xff]  }
 0x726   :  { %11622 = vmatpush1.bf16.msra.mxu0 %v18358_v28  ;;  %v18420_v28 = vld [vmem:[%s24330_s2 + $0x90c] ss:$28 sps:$4 sm:$0xff]  }
 0x727   :  { %16183 = vmatpush3.bf16.msra.mxu1 %v18362_v4  ;;  %11623 = vmatprep.subr.bf16.mxu0 %v18365_v17  ;;  %v18421_v4 = vld [vmem:[%s24330_s2 + $0x1390] ss:$28 sps:$4 sm:$0xff]   ;;  %v18418_v17 = vld [vmem:[%s24330_s2 + $0x908] ss:$28 sps:$4 sm:$0xff]  }
 0x728   :  { %16184 = vmatprep.subr.bf16.mxu1 %v18366_v34  ;;  %v18422_v34 = vld [vmem:[%s24330_s2 + $0x11d0] ss:$28 sps:$4 sm:$0xff]  }
 0x72a   :  { %11624 = vmatpush1.bf16.msra.mxu0 %v18363_v33  ;;  %v18425_v33 = vld [vmem:[%s24330_s2 + $0x944] ss:$28 sps:$4 sm:$0xff]  }
 0x72b   :  { %16185 = vmatpush3.bf16.msra.mxu1 %v18367_v5  ;;  %11625 = vmatprep.subr.bf16.mxu0 %v18370_v39  ;;  %v18426_v5 = vld [vmem:[%s24330_s2 + $0x13c8] ss:$28 sps:$4 sm:$0xff]   ;;  %v18423_v39 = vld [vmem:[%s24330_s2 + $0x940] ss:$28 sps:$4 sm:$0xff]  }
 0x72c   :  { %16186 = vmatprep.subr.bf16.mxu1 %v18371_v1  ;;  %v18427_v1 = vld [vmem:[%s24330_s2 + $0x1208] ss:$28 sps:$4 sm:$0xff]  }
 0x72e   :  { %11626 = vmatpush1.bf16.msra.mxu0 %v18368_v40  ;;  %v18430_v40 = vld [vmem:[%s24330_s2 + $0x97c] ss:$28 sps:$4 sm:$0xff]  }
 0x72f   :  { %16187 = vmatpush3.bf16.msra.mxu1 %v18372_v31  ;;  %11636 = vmatprep.subr.bf16.mxu0 %v18375_v21  ;;  %v18431_v31 = vld [vmem:[%s24330_s2 + $0x1400] ss:$28 sps:$4 sm:$0xff]   ;;  %v18428_v21 = vld [vmem:[%s24330_s2 + $0x978] ss:$28 sps:$4 sm:$0xff]  }
 0x730   :  { %16194 = vmatprep.subr.bf16.mxu1 %v18376_v15  ;;  %v18432_v15 = vld [vmem:[%s24330_s2 + $0x1240] ss:$28 sps:$4 sm:$0xff]  }
 0x731   :  { %11628 = vmatmul.mubr.bf16.vlgmr.msra.gmra.mrb[32].mxu0 %v21720_v63  ;;  %v18385_v63 = vld [vmem:[%s24330_s2 + $0x784] ss:$28 sps:$4 sm:$0xff]  }
 0x732   :  { %11994 = vmatmul.mubr.bf16.vlgmr.msra.gmra.mrb[44].mxu1 %v22140_v48  ;;  %11637 = vmatpush1.bf16.msra.mxu0 %v18373_v12  ;;  %v18435_v12 = vld [vmem:[%s24330_s2 + $0x9b4] ss:$28 sps:$4 sm:$0xff]  }
 0x733   :  { %11668 = vmatprep.mubr.bf16.mxu0 %v21725_v32  ;;  %16195 = vmatpush3.bf16.msra.mxu1 %v18377_v52  ;;  %v18383_v32 = vld [vmem:[%s24330_s2 + $0x780] ss:$28 sps:$4 sm:$0xff]   ;;  %v18436_v52 = vld [vmem:[%s24330_s2 + $0x1438] ss:$28 sps:$4 sm:$0xff]  }
 0x734   :  { %12033 = vmatprep.mubr.bf16.mxu1 %v22148_v10  ;;  %11638 = vmatprep.subr.bf16.mxu0 %v18380_v42  ;;  %v18433_v42 = vld [vmem:[%s24330_s2 + $0x9b0] ss:$28 sps:$4 sm:$0xff]  }
 0x735   :  { %16196 = vmatprep.subr.bf16.mxu1 %v18381_v58  ;;  %v18437_v58 = vld [vmem:[%s24330_s2 + $0x1278] ss:$28 sps:$4 sm:$0xff]  }
 0x736   :  { %11639 = vmatpush1.bf16.msra.mxu0 %v18378_v50  ;;  %v18440_v50 = vld [vmem:[%s24330_s2 + $0x9ec] ss:$28 sps:$4 sm:$0xff]  }
 0x737   :  { %16197 = vmatpush3.bf16.msra.mxu1 %v18382_v55  ;;  %11640 = vmatprep.subr.bf16.mxu0 %v18385_v63  ;;  %v18441_v55 = vld [vmem:[%s24330_s2 + $0x1470] ss:$28 sps:$4 sm:$0xff]   ;;  %v18438_v63 = vld [vmem:[%s24330_s2 + $0x9e8] ss:$28 sps:$4 sm:$0xff]  }
 0x738   :  { %16198 = vmatprep.subr.bf16.mxu1 %v18386_v35  ;;  %v18442_v35 = vld [vmem:[%s24330_s2 + $0x12b0] ss:$28 sps:$4 sm:$0xff]  }
 0x73a   :  { %11641 = vmatpush1.bf16.msra.mxu0 %v18383_v32  ;;  %v18445_v32 = vld [vmem:[%s24330_s2 + $0xa24] ss:$28 sps:$4 sm:$0xff]  }
 0x73b   :  { %16199 = vmatpush3.bf16.msra.mxu1 %v18387_v26  ;;  %11642 = vmatprep.subr.bf16.mxu0 %v18390_v51  ;;  %v18446_v26 = vld [vmem:[%s24330_s2 + $0x14a8] ss:$28 sps:$4 sm:$0xff]   ;;  %v18443_v51 = vld [vmem:[%s24330_s2 + $0xa20] ss:$28 sps:$4 sm:$0xff]  }
 0x73c   :  { %16200 = vmatprep.subr.bf16.mxu1 %v18391_v14  ;;  %v18447_v14 = vld [vmem:[%s24330_s2 + $0x12e8] ss:$28 sps:$4 sm:$0xff]  }
 0x73e   :  { %11643 = vmatpush1.bf16.msra.mxu0 %v18388_v44  ;;  %v18450_v44 = vld [vmem:[%s24330_s2 + $0xa5c] ss:$28 sps:$4 sm:$0xff]  }
 0x73f   :  { %16201 = vmatpush3.bf16.msra.mxu1 %v18392_v11  ;;  %11644 = vmatprep.subr.bf16.mxu0 %v18395_v20  ;;  %v18451_v11 = vld [vmem:[%s24330_s2 + $0x14e0] ss:$28 sps:$4 sm:$0xff]   ;;  %v18448_v20 = vld [vmem:[%s24330_s2 + $0xa58] ss:$28 sps:$4 sm:$0xff]  }
 0x740   :  { %16202 = vmatprep.subr.bf16.mxu1 %v18396_v56  ;;  %v18452_v56 = vld [vmem:[%s24330_s2 + $0x1320] ss:$28 sps:$4 sm:$0xff]  }
 0x742   :  { %11645 = vmatpush1.bf16.msra.mxu0 %v18393_v8  ;;  %v18455_v8 = vld [vmem:[%s24330_s2 + $0xa94] ss:$28 sps:$4 sm:$0xff]  }
 0x743   :  { %16203 = vmatpush3.bf16.msra.mxu1 %v18397_v18  ;;  %11646 = vmatprep.subr.bf16.mxu0 %v18400_v36  ;;  %v18453_v18 = vld [vmem:[%s24330_s2 + $0xa90] ss:$28 sps:$4 sm:$0xff]   ;;  %v18456_v36 = vld [vmem:[%s24330_s2 + $0x1518] ss:$28 sps:$4 sm:$0xff]  }
 0x744   :  { %16204 = vmatprep.subr.bf16.mxu1 %v18401_v3  ;;  %v18459_v3 = vld [vmem:[%s24330_s2 + $0xacc] ss:$28 sps:$4 sm:$0xff]  }
 0x746   :  { %11647 = vmatpush1.bf16.msra.mxu0 %v18398_v30  ;;  %v12122_v30 = vld [vmem:[%s24333_s5 + $0x70] sm:$0xff] }
 0x747   :  { %16205 = vmatpush3.bf16.msra.mxu1 %v18402_v16  ;;  %11648 = vmatprep.subr.bf16.mxu0 %v18405_v54  ;;  %v12129_v16 = vld [vmem:[%s24333_s5 + $0xd8] sm:$0xff]  ;;  %v18457_v54 = vld [vmem:[%s24330_s2 + $0xac8] ss:$28 sps:$4 sm:$0xff]  }
 0x748   :  { %16206 = vmatprep.subr.bf16.mxu1 %v18406_v24  ;;  %v18463_v24 = vld [vmem:[%s24330_s2 + $0xb04] ss:$28 sps:$4 sm:$0xff]  }
 0x74a   :  { %11649 = vmatpush1.bf16.msra.mxu0 %v18403_v22  ;;  %v23211_v22 = vpack.c.bf16 %v12129_v16, %v12122_v30 }
 0x74b   :  { %16207 = vmatpush3.bf16.msra.mxu1 %v18407_v37  ;;  %11650 = vmatprep.subr.bf16.mxu0 %v18410_v46  ;;  %v18466_v37 = vld [vmem:[%s24330_s2 + $0xb3c] ss:$28 sps:$4 sm:$0xff]  }
 0x74c   :  { %16208 = vmatprep.subr.bf16.mxu1 %v18411_v7  ;;  %v18464_v46 = vld [vmem:[%s24330_s2 + $0xb38] ss:$28 sps:$4 sm:$0xff]  }
 0x74d   :  { %v15184_v7 = vld [vmem:[%s24334_s6 + $0x3] ss:$8 sm:$0xf] }
 0x74e   :  { %11651 = vmatpush1.bf16.msra.mxu0 %v18408_v25  ;;  %v12121_v25 = vld [vmem:[%s24333_s5 + $0x68] sm:$0xff] }
 0x74f   :  { %16209 = vmatpush3.bf16.msra.mxu1 %v18412_v29  ;;  %11652 = vmatprep.subr.bf16.mxu0 %v18415_v19  ;;  %v12128_v29 = vld [vmem:[%s24333_s5 + $0xd0] sm:$0xff] }
 0x750   :  { %16216 = vmatprep.subr.bf16.mxu1 %v18416_v9  ;;  %v15185_v19 = vld [vmem:[%s24334_s6 + $0x3] ss:$8 sm:$0x70] }
 0x751   :  { %v12124_v9 = vld [vmem:[%s24333_s5 + $0x80] sm:$0xff] }
 0x752   :  { %12034 = vmatmul.mubr.bf16.vlgmr.msra.gmra.mrb[48].mxu1 %v22350_v59  ;;  %11653 = vmatpush1.bf16.msra.mxu0 %v18413_v47  ;;  %v12131_v47 = vld [vmem:[%s24333_s5 + $0xe8] sm:$0xff] }
 0x753   :  { %16217 = vmatpush3.bf16.msra.mxu1 %v18417_v38  ;;  %12073 = vmatprep.mubr.bf16.mxu1 %v22358_v13  ;;  %v18469_v38 = vld [vmem:[%s24330_s2 + $0xb74] ss:$28 sps:$4 sm:$0xff]  }
 0x754   :  { %11654 = vmatprep.subr.bf16.mxu0 %v18420_v28  ;;  %16218 = vmatprep.subr.bf16.mxu1 %v18421_v4  ;;  %v23248_v28 = vpack.c.bf16 %v12128_v29, %v12121_v25  ;;  %v23250_v4 = vor.u32 %v15185_v19, %v15184_v7  ;;  %v18481_v29 = vld [vmem:[%s24330_s2 + $0xc54] ss:$28 sps:$4 sm:$0xff]  }
 0x756   :  { %11655 = vmatpush1.bf16.msra.mxu0 %v18418_v17  ;;  %v23252_v17 = vpack.c.bf16 %v12131_v47, %v12124_v9 }
 0x757   :  { %16219 = vmatpush3.bf16.msra.mxu1 %v18422_v34  ;;  %11656 = vmatprep.subr.bf16.mxu0 %v18425_v33  ;;  %v18467_v34 = vld [vmem:[%s24330_s2 + $0xb70] ss:$28 sps:$4 sm:$0xff]  }
 0x758   :  { %16220 = vmatprep.subr.bf16.mxu1 %v18426_v5  ;;  %v18472_v33 = vld [vmem:[%s24330_s2 + $0xbac] ss:$28 sps:$4 sm:$0xff]   ;;  %v7417_v5 = vrot.slane %v23250_v4, %v20697_v53 }
 0x75a   :  { %11657 = vmatpush1.bf16.msra.mxu0 %v18423_v39  ;;  %v7425_v39 = vrot.slane %v23250_v4, %v20708_v57 }
 0x75b   :  { %16221 = vmatpush3.bf16.msra.mxu1 %v18427_v1  ;;  %11658 = vmatprep.subr.bf16.mxu0 %v18430_v40  ;;  %v18470_v1 = vld [vmem:[%s24330_s2 + $0xba8] ss:$28 sps:$4 sm:$0xff]   ;;  %v7421_v40 = vrot.slane %v23250_v4, %v20717_v61 }
 0x75c   :  { %16222 = vmatprep.subr.bf16.mxu1 %v18431_v31  ;;  %v7429_v31 = vrot.slane %v23250_v4, %v20730_v2  ;;  %v18473_v2 = vld [vmem:[%s24330_s2 + $0xbe0] ss:$28 sps:$4 sm:$0xff]  }
 0x75e   :  { %11659 = vmatpush1.bf16.msra.mxu0 %v18428_v21  ;;  %v18475_v21 = vld [vmem:[%s24330_s2 + $0xbe4] ss:$28 sps:$4 sm:$0xff]  }
 0x75f   :  { %16223 = vmatpush3.bf16.msra.mxu1 %v18432_v15  ;;  %11660 = vmatprep.subr.bf16.mxu0 %v18435_v12 }
 0x760   :  { %16224 = vmatprep.subr.bf16.mxu1 %v18436_v52 }
 0x762   :  { %11661 = vmatpush1.bf16.msra.mxu0 %v18433_v42 }
 0x763   :  { %16225 = vmatpush3.bf16.msra.mxu1 %v18437_v58  ;;  %11662 = vmatprep.subr.bf16.mxu0 %v18440_v50 }
 0x764   :  { %16226 = vmatprep.subr.bf16.mxu1 %v18441_v55 }
 0x766   :  { %11663 = vmatpush1.bf16.msra.mxu0 %v18438_v63 }
 0x767   :  { %16227 = vmatpush3.bf16.msra.mxu1 %v18442_v35  ;;  %11664 = vmatprep.subr.bf16.mxu0 %v18445_v32 }
 0x768   :  { %16228 = vmatprep.subr.bf16.mxu1 %v18446_v26 }
 0x76a   :  { %11665 = vmatpush1.bf16.msra.mxu0 %v18443_v51 }
 0x76b   :  { %16229 = vmatpush3.bf16.msra.mxu1 %v18447_v14  ;;  %11666 = vmatprep.subr.bf16.mxu0 %v18450_v44  ;;  %v18478_v44 = vld [vmem:[%s24330_s2 + $0xc1c] ss:$28 sps:$4 sm:$0xff]  }
 0x76c   :  { %16230 = vmatprep.subr.bf16.mxu1 %v18451_v11 }
 0x76e   :  { %11667 = vmatpush1.bf16.msra.mxu0 %v18448_v20 }
 0x76f   :  { %16231 = vmatpush3.bf16.msra.mxu1 %v18452_v56  ;;  %11677 = vmatprep.subr.bf16.mxu0 %v18455_v8 }
 0x770   :  { %16374 = vmatprep.subr.bf16.mxu1 %v18836_v6 }
 0x771   :  { %11669 = vmatmul.mubr.bf16.vlgmr.msra.gmra.mrb[32].mxu0 %v21930_v62  ;;  %v18460_v62 = vld [vmem:[%s24330_s2 + $0x1550] ss:$28 sps:$4 sm:$0xff]  }
 0x772   :  { %12074 = vmatmul.mubr.bf16.vlgmr.msra.gmra.mrb[52].mxu1 %v22557_v45  ;;  %11678 = vmatpush1.bf16.msra.mxu0 %v18453_v18 }
 0x773   :  { %11709 = vmatprep.mubr.bf16.mxu0 %v21938_v0  ;;  %16375 = vmatpush3.bf16.msra.mxu1 %v18456_v36  ;;  %v18461_v0 = vld [vmem:[%s24330_s2 + $0xb00] ss:$28 sps:$4 sm:$0xff]  }
 0x774   :  { %11679 = vmatprep.subr.bf16.mxu0 %v18459_v3  ;;  %16376 = vmatprep.subr.bf16.mxu1 %v18836_v6 }
 0x775   :  { %16378 = vmatprep.mubr.msk.bf16.mxu1 %vm18837_vm3, %v18836_v6 }
 0x776   :  { %11680 = vmatpush1.bf16.msra.mxu0 %v18457_v54 }
 0x777   :  { %16377 = vmatpush3.bf16.msra.mxu1 %v18460_v62  ;;  %11681 = vmatprep.subr.bf16.mxu0 %v18463_v24 }
 0x778   :  { %16421 = vmatprep.subr.bf16.mxu1 %v23211_v22 }
 0x77a   :  { %16379 = vmatmul.mubr.msk.bf16.vlgmr.msra.gmra.mrb[56].mxu1 %vm5460_vm4, %v22590_v27  ;;  %11682 = vmatpush1.bf16.msra.mxu0 %v18461_v0  ;;  %v18476_v0 = vld [vmem:[%s24330_s2 + $0xc18] ss:$28 sps:$4 sm:$0xff]  }
 0x77b   :  { %11683 = vmatprep.subr.bf16.mxu0 %v18466_v37 }
 0x77e   :  { %11684 = vmatpush1.bf16.msra.mxu0 %v18464_v46 }
 0x77f   :  { %11685 = vmatprep.subr.bf16.mxu0 %v18469_v38 }
 0x780   :  { %16423 = vmatpush1.bf16.xpose.msra.mxu1 %v23248_v28 }
 0x781   :  { %16425 = vmatprep.subr.bf16.mxu1 %v23252_v17 }
 0x782   :  { %11686 = vmatpush1.bf16.msra.mxu0 %v18467_v34 }
 0x783   :  { %11687 = vmatprep.subr.bf16.mxu0 %v18472_v33 }
 0x784   :  { %v11260_v15 = vpop.f32.mrb[28].mxu0 }
 0x785   :  { %v23276_v12 = vadd.f32 %v11260_v15, %v7417_v5  ;;  %v11547_v52 = vpop.f32.mrb[28].mxu1  ;;  %v11262_v42 = vpop.f32.mrb[29].mxu0 }
 0x786   :  { %v23278_v58 = vadd.f32 %v11547_v52, %v7425_v39  ;;  %v23280_v50 = vadd.f32 %v11262_v42, %v7421_v40  ;;  %v11549_v55 = vpop.f32.mrb[29].mxu1  ;;  %11688 = vmatpush1.bf16.msra.mxu0 %v18470_v1  ;;  %v11264_v63 = vpop.f32.mrb[30].mxu0 }
 0x787   :  { %v12135_v35 = vsel %vm5247_vm1, %v23276_v12, 0.0  ;;  %v12185_v32 = vmul.f32 %v23276_v12, %v23276_v12  ;;  %v23289_v26 = vadd.f32 %v11549_v55, %v7429_v31  ;;  %v11551_v51 = vpop.f32.mrb[30].mxu1  ;;  %v11265_v14 = vpop.f32.mrb[31].mxu0  ;;  %11689 = vmatprep.subr.bf16.mxu0 %v18475_v21  ;;  %v18479_v31 = vld [vmem:[%s24330_s2 + $0xc50] ss:$28 sps:$4 sm:$0xff]  }
 0x788   :  { %v12136_v11 = vrot.slane %v12135_v35, 4  ;;  %v12149_v20 = vsel %vm5247_vm1, %v23278_v58, 0.0  ;;  %v12187_v56 = vmul.f32 %v23278_v58, %v23278_v58  ;;  %v12142_v8 = vsel %vm5247_vm1, %v23280_v50, 0.0  ;;  %v11552_v18 = vpop.f32.mrb[31].mxu1  ;;  %v18484_v55 = vld [vmem:[%s24330_s2 + $0xc8c] ss:$28 sps:$4 sm:$0xff]  }
 0x789   :  { %v12192_v36 = vsel %vm5247_vm1, %v12185_v32, 0.0  ;;  %v12143_v3 = vrot.slane %v12142_v8, 4  ;;  %v12186_v30 = vmul.f32 %v23280_v50, %v23280_v50  ;;  %v12156_v24 = vsel %vm5247_vm1, %v23289_v26, 0.0  ;;  %v18487_v18 = vld [vmem:[%s24330_s2 + $0xcc4] ss:$28 sps:$4 sm:$0xff]  }
 0x78a   :  { %v12137_v16 = vadd.f32 %v12136_v11, %v12135_v35  ;;  %v12193_v54 = vrot.slane %v12192_v36, 4  ;;  %v12206_v62 = vsel %vm5247_vm1, %v12187_v56, 0.0  ;;  %11690 = vmatpush1.bf16.msra.mxu0 %v18473_v2  ;;  %v12150_v37 = vrot.slane %v12149_v20, 4  ;;  %v18482_v11 = vld [vmem:[%s24330_s2 + $0xc88] ss:$28 sps:$4 sm:$0xff]  }
 0x78b   :  { %v12207_v46 = vrot.slane %v12206_v62, 4  ;;  %v12144_v7 = vadd.f32 %v12143_v3, %v12142_v8  ;;  %v12199_v25 = vsel %vm5247_vm1, %v12186_v30, 0.0  ;;  %11691 = vmatprep.subr.bf16.mxu0 %v18478_v44  ;;  %v12157_v38 = vrot.slane %v12156_v24, 4 }
 0x78c   :  { %v12138_v19 = vrot.slane %v12137_v16, 2  ;;  %v12194_v9 = vadd.f32 %v12193_v54, %v12192_v36  ;;  %v12200_v47 = vrot.slane %v12199_v25, 4  ;;  %v12188_v5 = vmul.f32 %v23289_v26, %v23289_v26  ;;  %v12123_v54 = vld [vmem:[%s24333_s5 + $0x78] sm:$0xff] }
 0x78d   :  { %v12208_v34 = vadd.f32 %v12207_v46, %v12206_v62  ;;  %v12145_v33 = vrot.slane %v12144_v7, 2  ;;  %v12158_v40 = vadd.f32 %v12157_v38, %v12156_v24  ;;  %v12151_v15 = vadd.f32 %v12150_v37, %v12149_v20  ;;  %v12130_v62 = vld [vmem:[%s24333_s5 + $0xe0] sm:$0xff]  ;;  %v18490_v38 = vld [vmem:[%s24330_s2 + $0xcfc] ss:$28 sps:$4 sm:$0xff]  }
 0x78e   :  { %v12195_v39 = vrot.slane %v12194_v9, 2  ;;  %v12201_v1 = vadd.f32 %v12200_v47, %v12199_v25  ;;  %11692 = vmatpush1.bf16.msra.mxu0 %v18476_v0  ;;  %v12139_v21 = vadd.f32 %v12138_v19, %v12137_v16  ;;  %v12213_v42 = vsel %vm5247_vm1, %v12188_v5, 0.0  ;;  %v18485_v37 = vld [vmem:[%s24330_s2 + $0xcc0] ss:$28 sps:$4 sm:$0xff]  }
 0x78f   :  { %v12146_v52 = vadd.f32 %v12145_v33, %v12144_v7  ;;  %11693 = vmatprep.subr.bf16.mxu0 %v18481_v29  ;;  %v12159_v2 = vrot.slane %v12158_v40, 2  ;;  %v12214_v35 = vrot.slane %v12213_v42, 4  ;;  %v12209_v32 = vrot.slane %v12208_v34, 2 }
 0x790   :  { %v12202_v63 = vrot.slane %v12201_v1, 2  ;;  %v12196_v51 = vadd.f32 %v12195_v39, %v12194_v9  ;;  %v12152_v8 = vrot.slane %v12151_v15, 2  ;;  %v12140_v36 = vrot.slane %v12139_v21, 1 }
 0x791   :  { %v12160_v14 = vadd.f32 %v12159_v2, %v12158_v40  ;;  %v12215_v44 = vadd.f32 %v12214_v35, %v12213_v42  ;;  %v12147_v20 = vrot.slane %v12146_v52, 1  ;;  %v12210_v0 = vadd.f32 %v12209_v32, %v12208_v34  ;;  %v18496_v2 = vld [vmem:[%s24330_s2 + $0xd6c] ss:$28 sps:$4 sm:$0xff]  }
 0x792   :  { %11694 = vmatpush1.bf16.msra.mxu0 %v18479_v31  ;;  %v12203_v56 = vadd.f32 %v12202_v63, %v12201_v1  ;;  %v12197_v3 = vrot.slane %v12196_v51, 1  ;;  %v12153_v19 = vadd.f32 %v12152_v8, %v12151_v15  ;;  %v12141_v9 = vadd.f32 %v12140_v36, %v12139_v21  ;;  %v18488_v31 = vld [vmem:[%s24330_s2 + $0xcf8] ss:$28 sps:$4 sm:$0xff]   ;;  %v18494_v32 = vld [vmem:[%s24330_s2 + $0xd68] ss:$28 sps:$4 sm:$0xff]  }
 0x793   :  { %11695 = vmatprep.subr.bf16.mxu0 %v18484_v55  ;;  %v12216_v30 = vrot.slane %v12215_v44, 2  ;;  %v12148_v46 = vadd.f32 %v12147_v20, %v12146_v52  ;;  %v12161_v25 = vrot.slane %v12160_v14, 1  ;;  %v23337_v47 = vpack.c.bf16 %v12130_v62, %v12123_v54  ;;  %v18493_v21 = vld [vmem:[%s24330_s2 + $0xd34] ss:$28 sps:$4 sm:$0xff]   ;;  %v18502_v8 = vld [vmem:[%s24330_s2 + $0xddc] ss:$28 sps:$4 sm:$0xff]  }
 0x794   :  { %v12204_v16 = vrot.slane %v12203_v56, 1  ;;  %v12198_v24 = vadd.f32 %v12197_v3, %v12196_v51  ;;  %v12211_v39 = vrot.slane %v12210_v0, 1  ;;  %v12154_v15 = vrot.slane %v12153_v19, 1  ;;  %v18491_v55 = vld [vmem:[%s24330_s2 + $0xd30] ss:$28 sps:$4 sm:$0xff]  }
 0x795   :  { %v12217_v29 = vadd.f32 %v12216_v30, %v12215_v44  ;;  %v12162_v1 = vadd.f32 %v12161_v25, %v12160_v14  ;;  %v18499_v51 = vld [vmem:[%s24330_s2 + $0xda4] ss:$28 sps:$4 sm:$0xff]   ;;  %v18500_v36 = vld [vmem:[%s24330_s2 + $0xdd8] ss:$28 sps:$4 sm:$0xff]   ;;  %v18503_v30 = vld [vmem:[%s24330_s2 + $0xe10] ss:$28 sps:$4 sm:$0xff]   ;;  %v7441_v25 = vrot.slane %v23250_v4, %v800_v49 }
 0x796   :  { %11696 = vmatpush1.bf16.msra.mxu0 %v18482_v11  ;;  %v12205_v7 = vadd.f32 %v12204_v16, %v12203_v56  ;;  %v12241_v5 = vsel %vm5446_vm2, %v12141_v9, %v12198_v24  ;;  %v12212_v42 = vadd.f32 %v12211_v39, %v12210_v0  ;;  %v12155_v63 = vadd.f32 %v12154_v15, %v12153_v19  ;;  %v18497_v11 = vld [vmem:[%s24330_s2 + $0xda0] ss:$28 sps:$4 sm:$0xff]   ;;  %v18505_v3 = vld [vmem:[%s24330_s2 + $0xe14] ss:$28 sps:$4 sm:$0xff]   ;;  %v18508_v16 = vld [vmem:[%s24330_s2 + $0xe4c] ss:$28 sps:$4 sm:$0xff]  }
 0x797   :  { %11697 = vmatprep.subr.bf16.mxu0 %v18487_v18  ;;  %v12218_v33 = vrot.slane %v12217_v29, 1  ;;  %v18506_v54 = vld [vmem:[%s24330_s2 + $0xe48] ss:$28 sps:$4 sm:$0xff]   ;;  %v18509_v24 = vld [vmem:[%s24330_s2 + $0xe80] ss:$28 sps:$4 sm:$0xff]  }
 0x798   :  { %v12242_v34 = vsel %vm5446_vm2, %v12148_v46, %v12205_v7  ;;  %v12243_v35 = vsel %vm5446_vm2, %v12155_v63, %v12212_v42  ;;  %v18511_v62 = vld [vmem:[%s24330_s2 + $0xe84] ss:$28 sps:$4 sm:$0xff]   ;;  %v18517_v0 = vld [vmem:[%s24330_s2 + $0xef4] ss:$28 sps:$4 sm:$0xff]   ;;  %v18520_v46 = vld [vmem:[%s24330_s2 + $0xf2c] ss:$28 sps:$4 sm:$0xff]  }
 0x799   :  { %12321 = vmatprep.mubr.f32.mxu1 %v12242_v34  ;;  %v12219_v40 = vadd.f32 %v12218_v33, %v12217_v29  ;;  %v18518_v7 = vld [vmem:[%s24330_s2 + $0xf28] ss:$28 sps:$4 sm:$0xff]   ;;  %v18526_v49 = vld [vmem:[%s24330_s2 + $0xf9c] ss:$28 sps:$4 sm:$0xff]  }
 0x79a   :  { %11698 = vmatpush1.bf16.msra.mxu0 %v18485_v37  ;;  %12322 = vmatmul.mubr.f32.vlgmr.msra.gmra.mrb[60].mxu1 %v12241_v5  ;;  %v18515_v37 = vld [vmem:[%s24330_s2 + $0xef0] ss:$28 sps:$4 sm:$0xff]   ;;  %v18523_v29 = vld [vmem:[%s24330_s2 + $0xf64] ss:$28 sps:$4 sm:$0xff]   ;;  %v18538_v63 = vld [vmem:[%s24330_s2 + $0x107c] ss:$28 sps:$4 sm:$0xff]  }
 0x79b   :  { %16427 = vmatpush1.bf16.xpose.msra.mxu1 %v23337_v47  ;;  %11699 = vmatprep.subr.bf16.mxu0 %v18490_v38  ;;  %v12244_v52 = vsel %vm5446_vm2, %v12162_v1, %v12219_v40  ;;  %v18521_v38 = vld [vmem:[%s24330_s2 + $0xf60] ss:$28 sps:$4 sm:$0xff]   ;;  %v18524_v40 = vld [vmem:[%s24330_s2 + $0xf98] ss:$28 sps:$4 sm:$0xff]   ;;  %v18532_v15 = vld [vmem:[%s24330_s2 + $0x100c] ss:$28 sps:$4 sm:$0xff]  }
 0x79c   :  { %12391 = vmatprep.mubr.f32.mxu1 %v12244_v52  ;;  %v18530_v52 = vld [vmem:[%s24330_s2 + $0x1008] ss:$28 sps:$4 sm:$0xff]  }
 0x79d   :  { %v18535_v42 = vld [vmem:[%s24330_s2 + $0x1044] ss:$28 sps:$4 sm:$0xff]  }
 0x79e   :  { %11700 = vmatpush1.bf16.msra.mxu0 %v18488_v31  ;;  %v18529_v31 = vld [vmem:[%s24330_s2 + $0xfd4] ss:$28 sps:$4 sm:$0xff]  }
 0x79f   :  { %11701 = vmatprep.subr.bf16.mxu0 %v18493_v21  ;;  %v18527_v21 = vld [vmem:[%s24330_s2 + $0xfd0] ss:$28 sps:$4 sm:$0xff]  }
 0x7a2   :  { %11702 = vmatpush1.bf16.msra.mxu0 %v18491_v55  ;;  %12392 = vmatmul.mubr.f32.vlgmr.msra.gmra.mrb[60].mxu1 %v12243_v35  ;;  %v18533_v55 = vld [vmem:[%s24330_s2 + $0x1040] ss:$28 sps:$4 sm:$0xff]   ;;  %v18541_v35 = vld [vmem:[%s24330_s2 + $0x10b4] ss:$28 sps:$4 sm:$0xff]  }
 0x7a3   :  { %11703 = vmatprep.subr.bf16.mxu0 %v18496_v2  ;;  %v18536_v2 = vld [vmem:[%s24330_s2 + $0x1078] ss:$28 sps:$4 sm:$0xff]  }
 0x7a5   :  { %v16122_v14 = vpop.f32.mrb[32].mxu1 }
 0x7a6   :  { %v16123_v44 = vpop.f32.mrb[33].mxu1  ;;  %11704 = vmatpush1.bf16.msra.mxu0 %v18494_v32  ;;  %v18539_v32 = vld [vmem:[%s24330_s2 + $0x10b0] ss:$28 sps:$4 sm:$0xff]  }
 0x7a7   :  { %v16124_v20 = vadd.f32 %v16123_v44, %v16122_v14  ;;  %v16125_v56 = vpop.f32.mrb[34].mxu1  ;;  %11705 = vmatprep.subr.bf16.mxu0 %v18499_v51  ;;  %v18544_v51 = vld [vmem:[%s24330_s2 + $0x10ec] ss:$28 sps:$4 sm:$0xff]   ;;  %v18547_v44 = vld [vmem:[%s24330_s2 + $0x1124] ss:$28 sps:$4 sm:$0xff]  }
 0x7a8   :  { %v16126_v18 = vpop.f32.mrb[35].mxu1  ;;  %v18542_v14 = vld [vmem:[%s24330_s2 + $0x10e8] ss:$28 sps:$4 sm:$0xff]   ;;  %v18545_v56 = vld [vmem:[%s24330_s2 + $0x1120] ss:$28 sps:$4 sm:$0xff]  }
 0x7a9   :  { %v11876_v34 = vadd.f32 %v16124_v20, %v7441_v25  ;;  %v18566_v25 = vld [vmem:[%s24330_s2 + $0x12a8] ss:$28 sps:$4 sm:$0xff]  }
 0x7aa   :  { %11706 = vmatpush1.bf16.msra.mxu0 %v18497_v11 }
 0x7ab   :  { %11707 = vmatprep.subr.bf16.mxu0 %v18502_v8 }
 0x7ae   :  { %11708 = vmatpush1.bf16.msra.mxu0 %v18500_v36  ;;  %v18550_v36 = vld [vmem:[%s24330_s2 + $0x115c] ss:$28 sps:$4 sm:$0xff]  }
 0x7af   :  { %11718 = vmatprep.subr.bf16.mxu0 %v18505_v3 }
 0x7b1   :  { %11710 = vmatmul.mubr.bf16.vlgmr.msra.gmra.mrb[32].mxu0 %v22140_v48  ;;  %v18514_v48 = vld [vmem:[%s24330_s2 + $0xebc] ss:$28 sps:$4 sm:$0xff]  }
 0x7b2   :  { %11719 = vmatpush1.bf16.msra.mxu0 %v18503_v30  ;;  %11750 = vmatprep.mubr.bf16.mxu0 %v22148_v10  ;;  %v18512_v10 = vld [vmem:[%s24330_s2 + $0xeb8] ss:$28 sps:$4 sm:$0xff]  }
 0x7b3   :  { %11720 = vmatprep.subr.bf16.mxu0 %v18508_v16  ;;  %v18548_v16 = vld [vmem:[%s24330_s2 + $0x1158] ss:$28 sps:$4 sm:$0xff]  }
 0x7b6   :  { %11721 = vmatpush1.bf16.msra.mxu0 %v18506_v54  ;;  %v18553_v54 = vld [vmem:[%s24330_s2 + $0x1194] ss:$28 sps:$4 sm:$0xff]  }
 0x7b7   :  { %11722 = vmatprep.subr.bf16.mxu0 %v18511_v62  ;;  %v18551_v62 = vld [vmem:[%s24330_s2 + $0x1190] ss:$28 sps:$4 sm:$0xff]  }
 0x7ba   :  { %11723 = vmatpush1.bf16.msra.mxu0 %v18509_v24  ;;  %v18556_v24 = vld [vmem:[%s24330_s2 + $0x11cc] ss:$28 sps:$4 sm:$0xff]  }
 0x7bb   :  { %11724 = vmatprep.subr.bf16.mxu0 %v18514_v48  ;;  %v18554_v48 = vld [vmem:[%s24330_s2 + $0x11c8] ss:$28 sps:$4 sm:$0xff]  }
 0x7be   :  { %11725 = vmatpush1.bf16.msra.mxu0 %v18512_v10  ;;  %v18559_v10 = vld [vmem:[%s24330_s2 + $0x1204] ss:$28 sps:$4 sm:$0xff]  }
 0x7bf   :  { %11726 = vmatprep.subr.bf16.mxu0 %v18517_v0  ;;  %v18557_v0 = vld [vmem:[%s24330_s2 + $0x1200] ss:$28 sps:$4 sm:$0xff]  }
 0x7c2   :  { %11727 = vmatpush1.bf16.msra.mxu0 %v18515_v37  ;;  %v18565_v37 = vld [vmem:[%s24330_s2 + $0x1274] ss:$28 sps:$4 sm:$0xff]  }
 0x7c3   :  { %11728 = vmatprep.subr.bf16.mxu0 %v18520_v46  ;;  %v18563_v46 = vld [vmem:[%s24330_s2 + $0x1270] ss:$28 sps:$4 sm:$0xff]  }
 0x7c5   :  { %v16144_v19 = vpop.f32.mrb[36].mxu1 }
 0x7c6   :  { %v16145_v9 = vpop.f32.mrb[37].mxu1  ;;  %11729 = vmatpush1.bf16.msra.mxu0 %v18518_v7  ;;  %v18568_v7 = vld [vmem:[%s24330_s2 + $0x12ac] ss:$28 sps:$4 sm:$0xff]  }
 0x7c7   :  { %v16146_v33 = vadd.f32 %v16145_v9, %v16144_v19  ;;  %v16147_v5 = vpop.f32.mrb[38].mxu1  ;;  %11730 = vmatprep.subr.bf16.mxu0 %v18523_v29  ;;  %v18571_v29 = vld [vmem:[%s24330_s2 + $0x12e4] ss:$28 sps:$4 sm:$0xff]  }
 0x7c8   :  { %v16148_v39 = vpop.f32.mrb[39].mxu1  ;;  %v18574_v5 = vld [vmem:[%s24330_s2 + $0x131c] ss:$28 sps:$4 sm:$0xff]  }
 0x7c9   :  { %v11916_v1 = vadd.f32 %v16146_v33, %v11876_v34 }
 0x7ca   :  { %11731 = vmatpush1.bf16.msra.mxu0 %v18521_v38  ;;  %v18569_v38 = vld [vmem:[%s24330_s2 + $0x12e0] ss:$28 sps:$4 sm:$0xff]  }
 0x7cb   :  { %11732 = vmatprep.subr.bf16.mxu0 %v18526_v49 }
 0x7ce   :  { %11733 = vmatpush1.bf16.msra.mxu0 %v18524_v40  ;;  %v18577_v40 = vld [vmem:[%s24330_s2 + $0x1354] ss:$28 sps:$4 sm:$0xff]  }
 0x7cf   :  { %11734 = vmatprep.subr.bf16.mxu0 %v18529_v31  ;;  %v18575_v31 = vld [vmem:[%s24330_s2 + $0x1350] ss:$28 sps:$4 sm:$0xff]  }
 0x7d2   :  { %11735 = vmatpush1.bf16.msra.mxu0 %v18527_v21  ;;  %v18580_v21 = vld [vmem:[%s24330_s2 + $0x138c] ss:$28 sps:$4 sm:$0xff]  }
 0x7d3   :  { %11736 = vmatprep.subr.bf16.mxu0 %v18532_v15  ;;  %v18578_v15 = vld [vmem:[%s24330_s2 + $0x1388] ss:$28 sps:$4 sm:$0xff]  }
 0x7d6   :  { %11737 = vmatpush1.bf16.msra.mxu0 %v18530_v52  ;;  %v18583_v52 = vld [vmem:[%s24330_s2 + $0x13c4] ss:$28 sps:$4 sm:$0xff]  }
 0x7d7   :  { %11738 = vmatprep.subr.bf16.mxu0 %v18535_v42  ;;  %v18581_v42 = vld [vmem:[%s24330_s2 + $0x13c0] ss:$28 sps:$4 sm:$0xff]  }
 0x7da   :  { %11739 = vmatpush1.bf16.msra.mxu0 %v18533_v55  ;;  %v18586_v55 = vld [vmem:[%s24330_s2 + $0x13fc] ss:$28 sps:$4 sm:$0xff]  }
 0x7db   :  { %11740 = vmatprep.subr.bf16.mxu0 %v18538_v63  ;;  %v18584_v63 = vld [vmem:[%s24330_s2 + $0x13f8] ss:$28 sps:$4 sm:$0xff]  }
 0x7de   :  { %11741 = vmatpush1.bf16.msra.mxu0 %v18536_v2  ;;  %v18589_v2 = vld [vmem:[%s24330_s2 + $0x1434] ss:$28 sps:$4 sm:$0xff]  }
 0x7df   :  { %11742 = vmatprep.subr.bf16.mxu0 %v18541_v35  ;;  %v18587_v35 = vld [vmem:[%s24330_s2 + $0x1430] ss:$28 sps:$4 sm:$0xff]  }
 0x7e2   :  { %11743 = vmatpush1.bf16.msra.mxu0 %v18539_v32  ;;  %v18592_v32 = vld [vmem:[%s24330_s2 + $0x146c] ss:$28 sps:$4 sm:$0xff]  }
 0x7e3   :  { %11744 = vmatprep.subr.bf16.mxu0 %v18544_v51  ;;  %v18590_v51 = vld [vmem:[%s24330_s2 + $0x1468] ss:$28 sps:$4 sm:$0xff]  }
 0x7e5   :  { %v16166_v11 = vpop.f32.mrb[40].mxu1 }
 0x7e6   :  { %v16167_v20 = vpop.f32.mrb[41].mxu1  ;;  %11745 = vmatpush1.bf16.msra.mxu0 %v18542_v14  ;;  %v18595_v14 = vld [vmem:[%s24330_s2 + $0x14a4] ss:$28 sps:$4 sm:$0xff]  }
 0x7e7   :  { %v16168_v8 = vadd.f32 %v16167_v20, %v16166_v11  ;;  %v16169_v18 = vpop.f32.mrb[42].mxu1  ;;  %11746 = vmatprep.subr.bf16.mxu0 %v18547_v44  ;;  %v18593_v20 = vld [vmem:[%s24330_s2 + $0x14a0] ss:$28 sps:$4 sm:$0xff]  }
 0x7e8   :  { %v16170_v3 = vpop.f32.mrb[43].mxu1  ;;  %v18598_v18 = vld [vmem:[%s24330_s2 + $0x14dc] ss:$28 sps:$4 sm:$0xff]  }
 0x7e9   :  { %v11956_v30 = vadd.f32 %v16168_v8, %v11916_v1  ;;  %v18572_v1 = vld [vmem:[%s24330_s2 + $0x1318] ss:$28 sps:$4 sm:$0xff]  }
 0x7ea   :  { %11747 = vmatpush1.bf16.msra.mxu0 %v18545_v56 }
 0x7eb   :  { %11748 = vmatprep.subr.bf16.mxu0 %v18550_v36 }
 0x7ee   :  { %11749 = vmatpush1.bf16.msra.mxu0 %v18548_v16  ;;  %v18601_v16 = vld [vmem:[%s24330_s2 + $0x1514] ss:$28 sps:$4 sm:$0xff]  }
 0x7ef   :  { %11759 = vmatprep.subr.bf16.mxu0 %v18553_v54  ;;  %v18599_v54 = vld [vmem:[%s24330_s2 + $0x1510] ss:$28 sps:$4 sm:$0xff]  }
 0x7f1   :  { %11751 = vmatmul.mubr.bf16.vlgmr.msra.gmra.mrb[32].mxu0 %v22350_v59  ;;  %v18562_v59 = vld [vmem:[%s24330_s2 + $0x123c] ss:$28 sps:$4 sm:$0xff]  }
 0x7f2   :  { %11760 = vmatpush1.bf16.msra.mxu0 %v18551_v62  ;;  %11791 = vmatprep.mubr.bf16.mxu0 %v22358_v13  ;;  %v18560_v13 = vld [vmem:[%s24330_s2 + $0x1238] ss:$28 sps:$4 sm:$0xff]   ;;  %v18604_v62 = vld [vmem:[%s24330_s2 + $0x154c] ss:$28 sps:$4 sm:$0xff]  }
 0x7f3   :  { %11761 = vmatprep.subr.bf16.mxu0 %v18556_v24  ;;  %v18602_v24 = vld [vmem:[%s24330_s2 + $0x1548] ss:$28 sps:$4 sm:$0xff]  }
 0x7f6   :  { %11762 = vmatpush1.bf16.msra.mxu0 %v18554_v48 }
 0x7f7   :  { %11763 = vmatprep.subr.bf16.mxu0 %v18559_v10 }
 0x7fa   :  { %11764 = vmatpush1.bf16.msra.mxu0 %v18557_v0 }
 0x7fb   :  { %11765 = vmatprep.subr.bf16.mxu0 %v18562_v59 }
 0x7fe   :  { %11766 = vmatpush1.bf16.msra.mxu0 %v18560_v13 }
 0x7ff   :  { %11767 = vmatprep.subr.bf16.mxu0 %v18565_v37 }
 0x802   :  { %11768 = vmatpush1.bf16.msra.mxu0 %v18563_v46 }
 0x803   :  { %11769 = vmatprep.subr.bf16.mxu0 %v18568_v7 }
 0x805   :  { %v16188_v19 = vpop.f32.mrb[44].mxu1 }
 0x806   :  { %v16189_v9 = vpop.f32.mrb[45].mxu1  ;;  %11770 = vmatpush1.bf16.msra.mxu0 %v18566_v25 }
 0x807   :  { %v16190_v34 = vadd.f32 %v16189_v9, %v16188_v19  ;;  %v16191_v33 = vpop.f32.mrb[46].mxu1  ;;  %11771 = vmatprep.subr.bf16.mxu0 %v18571_v29  ;;  %v12126_v19 = vld [vmem:[%s24333_s5 + $0x90] sm:$0xff]  ;;  %v12125_v9 = vld [vmem:[%s24333_s5 + $0x88] sm:$0xff] }
 0x808   :  { %v16192_v49 = vpop.f32.mrb[47].mxu1 }
 0x809   :  { %v11996_v39 = vadd.f32 %v16190_v34, %v11956_v30  ;;  %v18596_v30 = vld [vmem:[%s24330_s2 + $0x14d8] ss:$28 sps:$4 sm:$0xff]  }
 0x80a   :  { %11772 = vmatpush1.bf16.msra.mxu0 %v18569_v38  ;;  %v12132_v34 = vld [vmem:[%s24333_s5 + $0xf0] sm:$0xff] }
 0x80b   :  { %11773 = vmatprep.subr.bf16.mxu0 %v18574_v5  ;;  %v23609_v33 = vpack.c.bf16 %v12132_v34, %v12125_v9  ;;  %v18838_v5 = vmov 0.0|0.0   ;;  %v12134_v9 = vld [vmem:[%s24333_s5 + $0x100] sm:$0xff] }
 0x80e   :  { %11774 = vmatpush1.bf16.msra.mxu0 %v18572_v1  ;;  %v7437_v1 = vrot.slane %v23250_v4, %v796_v60 }
 0x80f   :  { %11775 = vmatprep.subr.bf16.mxu0 %v18577_v40 }
 0x812   :  { %11776 = vmatpush1.bf16.msra.mxu0 %v18575_v31 }
 0x813   :  { %11777 = vmatprep.subr.bf16.mxu0 %v18580_v21 }
 0x816   :  { %11778 = vmatpush1.bf16.msra.mxu0 %v18578_v15 }
 0x817   :  { %11779 = vmatprep.subr.bf16.mxu0 %v18583_v52 }
 0x81a   :  { %11780 = vmatpush1.bf16.msra.mxu0 %v18581_v42 }
 0x81b   :  { %11781 = vmatprep.subr.bf16.mxu0 %v18586_v55 }
 0x81e   :  { %11782 = vmatpush1.bf16.msra.mxu0 %v18584_v63 }
 0x81f   :  { %11783 = vmatprep.subr.bf16.mxu0 %v18589_v2 }
 0x822   :  { %11784 = vmatpush1.bf16.msra.mxu0 %v18587_v35 }
 0x823   :  { %11785 = vmatprep.subr.bf16.mxu0 %v18592_v32 }
 0x825   :  { %v16210_v44 = vpop.f32.mrb[48].mxu1 }
 0x826   :  { %v16211_v11 = vpop.f32.mrb[49].mxu1  ;;  %11786 = vmatpush1.bf16.msra.mxu0 %v18590_v51 }
 0x827   :  { %v16212_v56 = vadd.f32 %v16211_v11, %v16210_v44  ;;  %v16213_v8 = vpop.f32.mrb[50].mxu1  ;;  %11787 = vmatprep.subr.bf16.mxu0 %v18595_v14 }
 0x828   :  { %v16214_v36 = vpop.f32.mrb[51].mxu1 }
 0x829   :  { %v12036_v3 = vadd.f32 %v16212_v56, %v11996_v39  ;;  %v7433_v39 = vrot.slane %v23250_v4, %v20872_v23 }
 0x82a   :  { %11788 = vmatpush1.bf16.msra.mxu0 %v18593_v20 }
 0x82b   :  { %11789 = vmatprep.subr.bf16.mxu0 %v18598_v18 }
 0x82e   :  { %11790 = vmatpush1.bf16.msra.mxu0 %v18596_v30 }
 0x82f   :  { %11800 = vmatprep.subr.bf16.mxu0 %v18601_v16 }
 0x831   :  { %11792 = vmatmul.mubr.bf16.vlgmr.msra.gmra.mrb[32].mxu0 %v22557_v45 }
 0x832   :  { %11801 = vmatpush1.bf16.msra.mxu0 %v18599_v54  ;;  %11832 = vmatprep.mubr.bf16.mxu0 %v18835_v41 }
 0x833   :  { %11802 = vmatprep.subr.bf16.mxu0 %v18604_v62 }
 0x836   :  { %11803 = vmatpush1.bf16.msra.mxu0 %v18602_v24 }
 0x83d   :  { %15874 = vmatmul.mubr.msk.bf16.vlgmr.msra.gmra.mrb[32].mxu0 %vm5460_vm4, %v22590_v27  ;;  %v12133_v27 = vld [vmem:[%s24333_s5 + $0xf8] sm:$0xff] }
 0x83e   :  { %v23604_v38 = vpack.c.bf16 %v12133_v27, %v12126_v19  ;;  %v12127_v27 = vld [vmem:[%s24333_s5 + $0x98] sm:$0xff] }
 0x840   :  { %16429 = vmatprep.subr.bf16.mxu1 %v23604_v38 }
 0x841   :  { %16431 = vmatpush1.bf16.xpose.msra.mxu1 %v23609_v33 }
 0x842   :  { %16432 = vmatprep.subr.bf16.mxu1 %v18838_v5 }
 0x845   :  { %v16232_v48 = vpop.f32.mrb[52].mxu1 }
 0x846   :  { %v16233_v10 = vpop.f32.mrb[53].mxu1 }
 0x847   :  { %v16234_v0 = vadd.f32 %v16233_v10, %v16232_v48  ;;  %v16235_v59 = vpop.f32.mrb[54].mxu1 }
 0x848   :  { %v16236_v13 = vpop.f32.mrb[55].mxu1 }
 0x849   :  { %v12076_v37 = vadd.f32 %v16234_v0, %v12036_v3 }
 0x84d   :  { %v12115_v46 = vpop.f32.mrb[56].mxu1 }
 0x84e   :  { %v23593_v45 = vadd.f32 %v12115_v46, %v12076_v37  ;;  %v16380_v7 = vpop.f32.mrb[57].mxu1 }
 0x84f   :  { %v12118_v25 = vpop.f32.mrb[58].mxu1 }
 0x850   :  { %v16381_v29 = vpop.f32.mrb[59].mxu1  ;;  %v12191_v49 = vmul.f32 %v23593_v45, %v23593_v45  ;;  %v12178_v55 = vsel %vm12177_vm7, %v23593_v45, 0.0 }
 0x851   :  { %v12179_v44 = vrot.slane %v12178_v55, 4 }
 0x852   :  { %v12234_v31 = vsel %vm12177_vm7, %v12191_v49, 0.0 }
 0x853   :  { %v12235_v4 = vrot.slane %v12234_v31, 4  ;;  %v12180_v62 = vadd.f32 %v12179_v44, %v12178_v55  ;;  %v18648_v44 = vld [vmem:[%s24331_s3 + $0x50] ss:$12 sps:$4 sm:$0xff]  }
 0x855   :  { %v12236_v36 = vadd.f32 %v12235_v4, %v12234_v31  ;;  %v12181_v7 = vrot.slane %v12180_v62, 2 }
 0x857   :  { %v12237_v59 = vrot.slane %v12236_v36, 2 }
 0x859   :  { %v12238_v34 = vadd.f32 %v12237_v59, %v12236_v36 }
 0x85b   :  { %v12239_v55 = vrot.slane %v12238_v34, 1 }
 0x910   :  { %v11834_v40 = vpop.f32.mrb[32].mxu0 }
 0x911   :  { %v23622_v21 = vadd.f32 %v11834_v40, %v7433_v39  ;;  %v11836_v15 = vpop.f32.mrb[33].mxu0  ;;  %v12182_v40 = vadd.f32 %v12181_v7, %v12180_v62  ;;  %v18613_v7 = vld [vmem:[%s24331_s3 + $0x34] ss:$12 sps:$4 sm:$0xff]  }
 0x912   :  { %v23624_v52 = vadd.f32 %v11836_v15, %v7437_v1  ;;  %v11838_v42 = vpop.f32.mrb[34].mxu0  ;;  %v23644_v15 = vpack.c.bf16 %v12134_v9, %v12127_v27  ;;  %v18619_v27 = vld [vmem:[%s24331_s3 + $0x64] ss:$12 sps:$4 sm:$0xff]   ;;  %v18617_v9 = vld [vmem:[%s24331_s3 + $0x60] ss:$12 sps:$4 sm:$0xff]  }
 0x913   :  { %v12163_v23 = vsel %vm5247_vm1, %v23622_v21, 0.0  ;;  %v12189_v63 = vmul.f32 %v23622_v21, %v23622_v21  ;;  %v11839_v60 = vpop.f32.mrb[35].mxu0 }
 0x914   :  { %v12164_v2 = vrot.slane %v12163_v23, 4  ;;  %v12170_v35 = vsel %vm5247_vm1, %v23624_v52, 0.0  ;;  %v12190_v32 = vmul.f32 %v23624_v52, %v23624_v52  ;;  %v12240_v60 = vadd.f32 %v12239_v55, %v12238_v34  ;;  %v18622_v34 = vld [vmem:[%s24331_s3 + $0x7c] ss:$12 sps:$4 sm:$0xff]  }
 0x915   :  { %v12220_v51 = vsel %vm5247_vm1, %v12189_v63, 0.0  ;;  %v12171_v14 = vrot.slane %v12170_v35, 4  ;;  %v12183_v63 = vrot.slane %v12182_v40, 1  ;;  %v18636_v55 = vld [vmem:[%s24331_s3 + $0xdc] ss:$12 sps:$4 sm:$0xff]  }
 0x916   :  { %v12165_v11 = vadd.f32 %v12164_v2, %v12163_v23  ;;  %v12221_v20 = vrot.slane %v12220_v51, 4  ;;  %v12227_v56 = vsel %vm5247_vm1, %v12190_v32, 0.0  ;;  %v18637_v32 = vld [vmem:[%s24331_s3 + $0xe0] ss:$12 sps:$4 sm:$0xff]  }
 0x917   :  { %v12172_v8 = vadd.f32 %v12171_v14, %v12170_v35  ;;  %v12228_v18 = vrot.slane %v12227_v56, 4  ;;  %v12184_v4 = vadd.f32 %v12183_v63, %v12182_v40  ;;  %v18632_v35 = vld [vmem:[%s24331_s3 + $0xc8] ss:$12 sps:$4 sm:$0xff]   ;;  %v18647_v14 = vld [vmem:[%s24331_s3 + $0x110] ss:$12 sps:$4 sm:$0xff]  }
 0x918   :  { %v12166_v3 = vrot.slane %v12165_v11, 2  ;;  %v12222_v30 = vadd.f32 %v12221_v20, %v12220_v51  ;;  %16247 = vmatprep.subr.bf16.mxu0 %v18632_v35  ;;  %v18643_v51 = vld [vmem:[%s24331_s3 + $0x38] ss:$12 sps:$4 sm:$0xff]   ;;  %v18653_v20 = vld [vmem:[%s24331_s3 + $0x68] ss:$12 sps:$4 sm:$0xff]  }
 0x919   :  { %v12173_v16 = vrot.slane %v12172_v8, 2  ;;  %v12229_v54 = vadd.f32 %v12228_v18, %v12227_v56  ;;  %v12247_v2 = vsel %vm5446_vm2, %v12184_v4, %v12240_v60  ;;  %v18628_v40 = vld [vmem:[%s24331_s3 + $0xac] ss:$12 sps:$4 sm:$0xff]   ;;  %v18641_v63 = vld [vmem:[%s24331_s3 + $0xf4] ss:$12 sps:$4 sm:$0xff]  }
 0x91a   :  { %v12167_v24 = vadd.f32 %v12166_v3, %v12165_v11  ;;  %v12223_v48 = vrot.slane %v12222_v30, 2  ;;  %v18652_v11 = vld [vmem:[%s24331_s3 + $0x128] ss:$12 sps:$4 sm:$0xff]   ;;  %v18639_v60 = vld [vmem:[%s24331_s3 + $0xf0] ss:$12 sps:$4 sm:$0xff]  }
 0x91b   :  { %v12174_v10 = vadd.f32 %v12173_v16, %v12172_v8  ;;  %v12230_v0 = vrot.slane %v12229_v54, 2  ;;  %v18646_v4 = vld [vmem:[%s24331_s3 + $0x10c] ss:$12 sps:$4 sm:$0xff]   ;;  %v18651_v35 = vld [vmem:[%s24331_s3 + $0x124] ss:$12 sps:$4 sm:$0xff]  }
 0x91c   :  { %v12224_v13 = vadd.f32 %v12223_v48, %v12222_v30  ;;  %v12168_v25 = vrot.slane %v12167_v24, 1 }
 0x91d   :  { %v12175_v37 = vrot.slane %v12174_v10, 1  ;;  %v12231_v46 = vadd.f32 %v12230_v0, %v12229_v54  ;;  %v12543_v54 = vld [vmem:[%s24334_s6 + $0x4] ss:$0 sm:$0xff] }
 0x91e   :  { %v12225_v29 = vrot.slane %v12224_v13, 1  ;;  %v12169_v31 = vadd.f32 %v12168_v25, %v12167_v24  ;;  %v18611_v25 = vld [vmem:[%s24331_s3 + $0x30] ss:$12 sps:$4 sm:$0xff]  }
 0x91f   :  { %v12232_v19 = vrot.slane %v12231_v46, 1  ;;  %v12176_v39 = vadd.f32 %v12175_v37, %v12174_v10  ;;  %v12544_v10 = vld [vmem:[%s24334_s6 + $0x5] ss:$0 sm:$0xff] }
 0x920   :  { %v12226_v49 = vadd.f32 %v12225_v29, %v12224_v13  ;;  %v18616_v29 = vld [vmem:[%s24331_s3 + $0x4c] ss:$12 sps:$4 sm:$0xff]  }
 0x921   :  { %v12233_v1 = vadd.f32 %v12232_v19, %v12231_v46  ;;  %v18614_v19 = vld [vmem:[%s24331_s3 + $0x48] ss:$12 sps:$4 sm:$0xff]  }
 0x922   :  { %v12245_v23 = vsel %vm5446_vm2, %v12169_v31, %v12226_v49  ;;  %v18620_v49 = vld [vmem:[%s24331_s3 + $0x78] ss:$12 sps:$4 sm:$0xff]   ;;  %v18626_v31 = vld [vmem:[%s24331_s3 + $0xa8] ss:$12 sps:$4 sm:$0xff]  }
 0x923   :  { %v12246_v42 = vsel %vm5446_vm2, %v12176_v39, %v12233_v1  ;;  %v18625_v39 = vld [vmem:[%s24331_s3 + $0x94] ss:$12 sps:$4 sm:$0xff]   ;;  %v18623_v1 = vld [vmem:[%s24331_s3 + $0x90] ss:$12 sps:$4 sm:$0xff]  }
 0x924   :  { %12461 = vmatprep.mubr.f32.mxu1 %v12246_v42  ;;  %v18629_v42 = vld [vmem:[%s24331_s3 + $0xc0] ss:$12 sps:$4 sm:$0xff]  }
 0x925   :  { %12462 = vmatmul.mubr.f32.vlgmr.msra.gmra.mrb[60].mxu1 %v12245_v23  ;;  %v18634_v23 = vld [vmem:[%s24331_s3 + $0xd8] ss:$12 sps:$4 sm:$0xff]  }
 0x926   :  { %16435 = vmatpush3.bf16.xpose.msk.msra.mxu1 %vm16434_vm8, %v23644_v15  ;;  %16386 = vmatprep.mubr.msk.f32.mxu1 %vm18837_vm3, %v18836_v6 }
 0x927   :  { %16437 = vmatprep.subr.bf16.mxu1 %v23211_v22  ;;  %v18633_v22 = vld [vmem:[%s24331_s3 + $0x8] ss:$12 sps:$4 sm:$0xff]  }
 0x928   :  { %16248 = vmatpush3.bf16.msra.mxu0 %v18633_v22  ;;  %v18649_v22 = vld [vmem:[%s24331_s3 + $0x120] ss:$12 sps:$4 sm:$0xff]  }
 0x929   :  { %16249 = vmatprep.subr.bf16.mxu0 %v18637_v32  ;;  %v18656_v32 = vld [vmem:[%s24331_s3 + $0x13c] ss:$12 sps:$4 sm:$0xff]  }
 0x92d   :  { %16387 = vmatmul.mubr.msk.f32.vlgmr.msra.gmra.mrb[60].mxu1 %vm4073_vm0, %v12247_v2  ;;  %v18644_v2 = vld [vmem:[%s24331_s3 + $0x108] ss:$12 sps:$4 sm:$0xff]  }
 0x92e   :  { %16439 = vmatpush1.bf16.msra.mxu1 %v23248_v28  ;;  %12629 = vmatprep.mubr.f32.mxu1 %v18836_v6  ;;  %v18638_v28 = vld [vmem:[%s24331_s3 + $0x20] ss:$12 sps:$4 sm:$0xff]  }
 0x92f   :  { %16441 = vmatprep.subr.bf16.mxu1 %v23252_v17  ;;  %v18642_v17 = vld [vmem:[%s24331_s3 + $0xf8] ss:$12 sps:$4 sm:$0xff]   ;;  %16250 = vmatpush3.bf16.msra.mxu0 %v18638_v28  ;;  %v18657_v28 = vld [vmem:[%s24331_s3 + $0x140] ss:$12 sps:$4 sm:$0xff]  }
 0x930   :  { %16251 = vmatprep.subr.bf16.mxu0 %v18642_v17  ;;  %v18654_v17 = vld [vmem:[%s24331_s3 + $0x138] ss:$12 sps:$4 sm:$0xff]  }
 0x933   :  { %16252 = vmatpush3.bf16.msra.mxu0 %v18643_v51  ;;  %v18658_v51 = vld [vmem:[%s24331_s3 + $0x80] ss:$12 sps:$4 sm:$0xff]  }
 0x934   :  { %16253 = vmatprep.subr.bf16.mxu0 %v18647_v14  ;;  %v18661_v14 = vld [vmem:[%s24331_s3 + $0x154] ss:$12 sps:$4 sm:$0xff]  }
 0x937   :  { %16254 = vmatpush3.bf16.msra.mxu0 %v18648_v44  ;;  %v18662_v44 = vld [vmem:[%s24331_s3 + $0x158] ss:$12 sps:$4 sm:$0xff]  }
 0x938   :  { %16255 = vmatprep.subr.bf16.mxu0 %v18652_v11  ;;  %v18659_v11 = vld [vmem:[%s24331_s3 + $0x150] ss:$12 sps:$4 sm:$0xff]  }
 0x93b   :  { %16256 = vmatpush3.bf16.msra.mxu0 %v18653_v20  ;;  %v18663_v20 = vld [vmem:[%s24331_s3 + $0x98] ss:$12 sps:$4 sm:$0xff]  }
 0x93c   :  { %16257 = vmatprep.subr.bf16.mxu0 %v18657_v28  ;;  %v18692_v28 = vld [vmem:[%s24331_s3 + $0x2a8] ss:$12 sps:$4 sm:$0xff]  }
 0x93f   :  { %16258 = vmatpush3.bf16.msra.mxu0 %v18658_v51  ;;  %v18693_v51 = vld [vmem:[%s24331_s3 + $0x1e8] ss:$12 sps:$4 sm:$0xff]  }
 0x940   :  { %16259 = vmatprep.subr.bf16.mxu0 %v18662_v44 }
 0x943   :  { %16260 = vmatpush3.bf16.msra.mxu0 %v18663_v20  ;;  %v18694_v20 = vld [vmem:[%s24331_s3 + $0x1f8] ss:$12 sps:$4 sm:$0xff]  }
 0xa00   :  { %v12533_v56 = vpop.f32.mrb[60].mxu1 }
 0xa01   :  { %v12537_v8 = vmul.f32 0.010204081, %v12533_v56  ;;  %v16388_v18 = vpop.f32.mrb[61].mxu1  ;;  %v18666_v56 = vld [vmem:[%s24331_s3 + $0x16c] ss:$12 sps:$4 sm:$0xff]  }
 0xa02   :  { %v18664_v18 = vld [vmem:[%s24331_s3 + $0x168] ss:$12 sps:$4 sm:$0xff]  }
 0xa03   :  { %v12538_v36 = vmul.f32 %v12537_v8, %v12537_v8 }
 0xa05   :  { %v12540_v3 = vrot.slane %v12538_v36, 7  ;;  %v18668_v36 = vld [vmem:[%s24331_s3 + $0xb0] ss:$12 sps:$4 sm:$0xff]  }
 0xa07   :  { %v12542_v30 = vsub.f32 %v12537_v8, %v12540_v3  ;;  %v18671_v3 = vld [vmem:[%s24331_s3 + $0x184] ss:$12 sps:$4 sm:$0xff]  }
 0xa09   :  { %v12545_v16 = vadd.f32 1e-05, %v12542_v30  ;;  %v18672_v30 = vld [vmem:[%s24331_s3 + $0x248] ss:$12 sps:$4 sm:$0xff]  }
 0xa0b   :  { %18803 = vrsqrt.f32 %v12545_v16 }
 0xa15   :  { %v18804_v62 = vpop.eup %18803 }
 0xa16   :  { %v12547_v24 = vmul.f32 %v18804_v62, %v12543_v54 }
 0xa18   :  { %v12549_v48 = vrot.slane %v12547_v24, 1  ;;  %v12556_v37 = vrot.slane %v12547_v24, %v20717_v61 }
 0xa1a   :  { %v12551_v0 = vmul.f32 %v12549_v48, %v12537_v8  ;;  %v18667_v8 = vld [vmem:[%s24331_s3 + $0x170] ss:$12 sps:$4 sm:$0xff]  }
 0xa1b   :  { %16261 = vmatprep.subr.bf16.mxu0 %v18667_v8  ;;  %v18701_v8 = vld [vmem:[%s24331_s3 + $0x214] ss:$12 sps:$4 sm:$0xff]  }
 0xa1c   :  { %v12552_v59 = vsub.f32 %v12544_v10, %v12551_v0  ;;  %16262 = vmatpush3.bf16.msra.mxu0 %v18668_v36  ;;  %v18702_v36 = vld [vmem:[%s24331_s3 + $0x2d8] ss:$12 sps:$4 sm:$0xff]  }
 0xa1d   :  { %16269 = vmatprep.subr.bf16.mxu0 %v18672_v30  ;;  %v18699_v30 = vld [vmem:[%s24331_s3 + $0x210] ss:$12 sps:$4 sm:$0xff]  }
 0xa1e   :  { %v12560_v13 = vrot.slane %v12552_v59, %v20697_v53 }
 0xa20   :  { %v12561_v46 = vsel %vm5446_vm2, %v12556_v37, %v12560_v13 }
 0xa21   :  { %15879 = vmatmul.mubr.msk.f32.vlgmr.msra.gmra.mrb[62].mxu1 %vm4073_vm0, %v12561_v46 }
 0xa22   :  { %16443 = vmatpush1.bf16.msra.mxu1 %v23337_v47  ;;  %12700 = vmatprep.mubr.f32.mxu1 %v18836_v6  ;;  %v18605_v47 = vld [vmem:[%s24331_s3] ss:$12 sps:$4 sm:$0xff]  }
 0xa23   :  { %16445 = vmatprep.subr.bf16.mxu1 %v23604_v38  ;;  %v18610_v38 = vld [vmem:[%s24331_s3 + $0x1c] ss:$12 sps:$4 sm:$0xff]  }
 0xa25   :  { %15880 = vmatmul.mubr.msk.f32.vlgmr.msra.gmra.mrb[64].mxu1 %vm4073_vm0, %v12561_v46 }
 0xa26   :  { %16447 = vmatpush1.bf16.msra.mxu1 %v23609_v33  ;;  %12771 = vmatprep.mubr.f32.mxu1 %v18836_v6  ;;  %v18608_v33 = vld [vmem:[%s24331_s3 + $0x18] ss:$12 sps:$4 sm:$0xff]  }
 0xa27   :  { %16448 = vmatprep.subr.bf16.mxu1 %v18838_v5 }
 0xa29   :  { %15881 = vmatmul.mubr.msk.f32.vlgmr.msra.gmra.mrb[66].mxu1 %vm4073_vm0, %v12561_v46 }
 0xa2a   :  { %16450 = vmatpush3.bf16.msra.mxu1 %v23644_v15  ;;  %16393 = vmatprep.mubr.msk.f32.mxu1 %vm18837_vm3, %v18836_v6  ;;  %v18631_v15 = vld [vmem:[%s24331_s3 + $0xc4] ss:$12 sps:$4 sm:$0xff]  }
 0xa2b   :  { %13933 = vmatprep.subr.bf16.mxu1 %v18607_v43 }
 0xa2d   :  { %16394 = vmatmul.mubr.msk.f32.vlgmr.msra.gmra.mrb[68].mxu1 %vm4073_vm0, %v12561_v46 }
 0xa2e   :  { %13934 = vmatpush1.bf16.msra.mxu1 %v18605_v47 }
 0xa2f   :  { %13935 = vmatprep.subr.bf16.mxu1 %v18610_v38 }
 0xa32   :  { %13936 = vmatpush1.bf16.msra.mxu1 %v18608_v33 }
 0xa33   :  { %13937 = vmatprep.subr.bf16.mxu1 %v18613_v7 }
 0xa36   :  { %13938 = vmatpush1.bf16.msra.mxu1 %v18611_v25 }
 0xa37   :  { %13939 = vmatprep.subr.bf16.mxu1 %v18616_v29 }
 0xa3a   :  { %13940 = vmatpush1.bf16.msra.mxu1 %v18614_v19 }
 0xa3b   :  { %13941 = vmatprep.subr.bf16.mxu1 %v18619_v27  ;;  %v18669_v27 = vld [vmem:[%s24331_s3 + $0x180] ss:$12 sps:$4 sm:$0xff]  }
 0xa3e   :  { %13942 = vmatpush1.bf16.msra.mxu1 %v18617_v9 }
 0xa3f   :  { %13943 = vmatprep.subr.bf16.mxu1 %v18622_v34  ;;  %v18673_v34 = vld [vmem:[%s24331_s3 + $0x188] ss:$12 sps:$4 sm:$0xff]  }
 0xa42   :  { %13944 = vmatpush1.bf16.msra.mxu1 %v18620_v49 }
 0xa43   :  { %13945 = vmatprep.subr.bf16.mxu1 %v18625_v39 }
 0xa46   :  { %13946 = vmatpush1.bf16.msra.mxu1 %v18623_v1  ;;  %v18677_v1 = vld [vmem:[%s24331_s3 + $0x260] ss:$12 sps:$4 sm:$0xff]  }
 0xa47   :  { %13947 = vmatprep.subr.bf16.mxu1 %v18628_v40 }
 0xa4a   :  { %13948 = vmatpush1.bf16.msra.mxu1 %v18626_v31  ;;  %v18674_v31 = vld [vmem:[%s24331_s3 + $0x198] ss:$12 sps:$4 sm:$0xff]  }
 0xa4b   :  { %13949 = vmatprep.subr.bf16.mxu1 %v18631_v15 }
 0xa4e   :  { %13950 = vmatpush1.bf16.msra.mxu1 %v18629_v42  ;;  %v18678_v42 = vld [vmem:[%s24331_s3 + $0x1a0] ss:$12 sps:$4 sm:$0xff]  }
 0xa4f   :  { %13951 = vmatprep.subr.bf16.mxu1 %v18636_v55  ;;  %v18681_v55 = vld [vmem:[%s24331_s3 + $0x1b4] ss:$12 sps:$4 sm:$0xff]  }
 0xa52   :  { %13952 = vmatpush1.bf16.msra.mxu1 %v18634_v23  ;;  %v18682_v23 = vld [vmem:[%s24331_s3 + $0x278] ss:$12 sps:$4 sm:$0xff]  }
 0xa53   :  { %13953 = vmatprep.subr.bf16.mxu1 %v18641_v63  ;;  %v18679_v63 = vld [vmem:[%s24331_s3 + $0x1b0] ss:$12 sps:$4 sm:$0xff]  }
 0xa56   :  { %13954 = vmatpush1.bf16.msra.mxu1 %v18639_v60  ;;  %v18683_v60 = vld [vmem:[%s24331_s3 + $0x1b8] ss:$12 sps:$4 sm:$0xff]  }
 0xa57   :  { %13955 = vmatprep.subr.bf16.mxu1 %v18646_v4  ;;  %v18686_v4 = vld [vmem:[%s24331_s3 + $0x1cc] ss:$12 sps:$4 sm:$0xff]  }
 0xa5a   :  { %13956 = vmatpush1.bf16.msra.mxu1 %v18644_v2  ;;  %v18687_v2 = vld [vmem:[%s24331_s3 + $0x290] ss:$12 sps:$4 sm:$0xff]  }
 0xa5b   :  { %13957 = vmatprep.subr.bf16.mxu1 %v18651_v35  ;;  %v18684_v35 = vld [vmem:[%s24331_s3 + $0x1c8] ss:$12 sps:$4 sm:$0xff]  }
 0xa5e   :  { %13958 = vmatpush1.bf16.msra.mxu1 %v18649_v22  ;;  %v18688_v22 = vld [vmem:[%s24331_s3 + $0x1d0] ss:$12 sps:$4 sm:$0xff]  }
 0xa5f   :  { %13959 = vmatprep.subr.bf16.mxu1 %v18656_v32  ;;  %v18691_v32 = vld [vmem:[%s24331_s3 + $0x1e4] ss:$12 sps:$4 sm:$0xff]  }
 0xa62   :  { %13960 = vmatpush1.bf16.msra.mxu1 %v18654_v17  ;;  %v18689_v17 = vld [vmem:[%s24331_s3 + $0x1e0] ss:$12 sps:$4 sm:$0xff]  }
 0xa63   :  { %13961 = vmatprep.subr.bf16.mxu1 %v18661_v14  ;;  %v18696_v14 = vld [vmem:[%s24331_s3 + $0x1fc] ss:$12 sps:$4 sm:$0xff]  }
 0xa66   :  { %13962 = vmatpush1.bf16.msra.mxu1 %v18659_v11  ;;  %v18697_v11 = vld [vmem:[%s24331_s3 + $0x2c0] ss:$12 sps:$4 sm:$0xff]  }
 0xa67   :  { %13963 = vmatprep.subr.bf16.mxu1 %v18666_v56  ;;  %v18698_v56 = vld [vmem:[%s24331_s3 + $0x200] ss:$12 sps:$4 sm:$0xff]  }
 0xa6a   :  { %13964 = vmatpush1.bf16.msra.mxu1 %v18664_v18 }
 0xa6b   :  { %13974 = vmatprep.subr.bf16.mxu1 %v18671_v3 }
 0xaf4   :  { %v12631_v16 = vpop.f32.mrb[62].mxu1 }
 0xaf5   :  { %v12851_v54 = vrot.slane %v12631_v16, %v20697_v53  ;;  %v12633_v62 = vpop.f32.mrb[63].mxu1  ;;  %v12886_v10 = vrot.slane %v12631_v16, %v20717_v61  ;;  %v18703_v16 = vld [vmem:[%s24331_s3 + $0x218] ss:$12 sps:$4 sm:$0xff]  }
 0xaf6   :  { %v12855_v24 = vrot.slane %v12633_v62, %v20697_v53  ;;  %v12890_v59 = vrot.slane %v12633_v62, %v20717_v61 }
 0xaf7   :  { %v12876_v48 = vmul.f32 %v23276_v12, %v12851_v54 }
 0xaf8   :  { %v12877_v0 = vmul.f32 %v23280_v50, %v12855_v24  ;;  %v23841_v13 = vpop.f32.mrb[64].mxu1  ;;  %v18707_v24 = vld [vmem:[%s24331_s3 + $0x2f0] ss:$12 sps:$4 sm:$0xff]  }
 0xaf9   :  { %v12911_v37 = vadd.f32 %v12886_v10, %v12876_v48  ;;  %v12704_v46 = vpop.f32.mrb[65].mxu1  ;;  %v12859_v44 = vrot.slane %v23841_v13, %v20697_v53  ;;  %v12894_v3 = vrot.slane %v23841_v13, %v20717_v61  ;;  %v18704_v48 = vld [vmem:[%s24331_s3 + $0x228] ss:$12 sps:$4 sm:$0xff]   ;;  %v18708_v10 = vld [vmem:[%s24331_s3 + $0x230] ss:$12 sps:$4 sm:$0xff]  }
 0xafa   :  { %v12912_v43 = vadd.f32 %v12890_v59, %v12877_v0  ;;  %v12863_v47 = vrot.slane %v12704_v46, %v20697_v53  ;;  %v12898_v25 = vrot.slane %v12704_v46, %v20717_v61  ;;  %v18711_v0 = vld [vmem:[%s24331_s3 + $0x244] ss:$12 sps:$4 sm:$0xff]   ;;  %v18709_v46 = vld [vmem:[%s24331_s3 + $0x240] ss:$12 sps:$4 sm:$0xff]  }
 0xafb   :  { %v12918_v38 = vmax.f32 %v12911_v37, 0.0  ;;  %v12878_v18 = vmul.f32 %v23278_v58, %v12859_v44  ;;  %v18706_v58 = vld [vmem:[%s24331_s3 + $0x22c] ss:$12 sps:$4 sm:$0xff]   ;;  %v18751_v44 = vld [vmem:[%s24331_s3 + $0x37c] ss:$12 sps:$4 sm:$0xff]  }
 0xafc   :  { %v12919_v33 = vmax.f32 %v12912_v43, 0.0  ;;  %v12879_v7 = vmul.f32 %v23289_v26, %v12863_v47  ;;  %v23846_v12 = vpop.f32.mrb[66].mxu1  ;;  %v18676_v26 = vld [vmem:[%s24331_s3 + $0x19c] ss:$12 sps:$4 sm:$0xff]  }
 0xafd   :  { %v23848_v29 = vpop.f32.mrb[67].mxu1  ;;  %v12925_v9 = vpack.c.bf16 %v12918_v38, %v12918_v38  ;;  %v12913_v54 = vadd.f32 %v12894_v3, %v12878_v18  ;;  %v18714_v43 = vld [vmem:[%s24331_s3 + $0x25c] ss:$12 sps:$4 sm:$0xff]   ;;  %v18758_v3 = vld [vmem:[%s24331_s3 + $0x3c0] ss:$12 sps:$4 sm:$0xff]  }
 0xafe   :  { %v12914_v50 = vadd.f32 %v12898_v25, %v12879_v7  ;;  %v12926_v19 = vpack.c.bf16 %v12919_v33, %v12919_v33  ;;  %v18715_v47 = vld [vmem:[%s24331_s3 + $0x488] ss:$12 sps:$4 sm:$0xff]   ;;  %v18712_v33 = vld [vmem:[%s24331_s3 + $0x258] ss:$12 sps:$4 sm:$0xff]  }
 0xaff   :  { %v12920_v59 = vmax.f32 %v12913_v54, 0.0  ;;  %v18718_v7 = vld [vmem:[%s24331_s3 + $0x274] ss:$12 sps:$4 sm:$0xff]   ;;  %v18764_v54 = vld [vmem:[%s24331_s3 + $0x3f0] ss:$12 sps:$4 sm:$0xff]  }
 0xb00   :  { %v12921_v49 = vmax.f32 %v12914_v50, 0.0  ;;  %v23859_v39 = vpop.f32.mrb[68].mxu1  ;;  %13965 = vmatprep.mubr.bf16.mxu1 %v12926_v19  ;;  %14129 = vmatprep.mubr.bf16.mxu0 %v12926_v19  ;;  %v18716_v50 = vld [vmem:[%s24331_s3 + $0x270] ss:$12 sps:$4 sm:$0xff]   ;;  %v18721_v19 = vld [vmem:[%s24331_s3 + $0x28c] ss:$12 sps:$4 sm:$0xff]  }
 0xb01   :  { %v16395_v40 = vpop.f32.mrb[69].mxu1  ;;  %13966 = vmatmul.mubr.bf16.vlgmr.msra.gmra.mrb[72].mxu1 %v12925_v9  ;;  %14130 = vmatmul.mubr.bf16.vlgmr.msra.gmra.mrb[36].mxu0 %v12925_v9  ;;  %v12875_v62 = vrot.slane %v23859_v39, %v20697_v53  ;;  %v12910_v37 = vrot.slane %v23859_v39, %v20717_v61  ;;  %v18719_v9 = vld [vmem:[%s24331_s3 + $0x288] ss:$12 sps:$4 sm:$0xff]   ;;  %v12871_v39 = vrot.slane %v23848_v29, %v20697_v53 }
 0xb02   :  { %13975 = vmatpush1.bf16.msra.mxu1 %v18669_v27  ;;  %v12928_v15 = vpack.c.bf16 %v12921_v49, %v12921_v49  ;;  %16270 = vmatpush3.bf16.msra.mxu0 %v18673_v34  ;;  %v18724_v34 = vld [vmem:[%s24331_s3 + $0x2a4] ss:$12 sps:$4 sm:$0xff]   ;;  %v18727_v49 = vld [vmem:[%s24331_s3 + $0x2bc] ss:$12 sps:$4 sm:$0xff]   ;;  %v18730_v40 = vld [vmem:[%s24331_s3 + $0x2d4] ss:$12 sps:$4 sm:$0xff]  }
 0xb03   :  { %13976 = vmatprep.subr.bf16.mxu1 %v18676_v26  ;;  %16271 = vmatprep.subr.bf16.mxu0 %v18677_v1  ;;  %v12882_v13 = vmul.f32 %v12875_v62, %v23593_v45  ;;  %v12927_v45 = vpack.c.bf16 %v12920_v59, %v12920_v59  ;;  %v18722_v26 = vld [vmem:[%s24331_s3 + $0x2a0] ss:$12 sps:$4 sm:$0xff]   ;;  %v18725_v1 = vld [vmem:[%s24331_s3 + $0x2b8] ss:$12 sps:$4 sm:$0xff]   ;;  %v18755_v18 = vld [vmem:[%s24331_s3 + $0x3a8] ss:$12 sps:$4 sm:$0xff]  }
 0xb04   :  { %14006 = vmatprep.mubr.bf16.mxu1 %v12928_v15  ;;  %14169 = vmatprep.mubr.bf16.mxu0 %v12928_v15  ;;  %v12906_v15 = vrot.slane %v23848_v29, %v20717_v61  ;;  %v18769_v62 = vld [vmem:[%s24331_s3 + $0x40c] ss:$12 sps:$4 sm:$0xff]   ;;  %v18775_v59 = vld [vmem:[%s24331_s3 + $0x43c] ss:$12 sps:$4 sm:$0xff]  }
 0xb05   :  { %v12917_v38 = vadd.f32 %v12910_v37, %v12882_v13  ;;  %v18773_v13 = vld [vmem:[%s24331_s3 + $0x438] ss:$12 sps:$4 sm:$0xff]  }
 0xb06   :  { %13977 = vmatpush1.bf16.msra.mxu1 %v18674_v31  ;;  %16272 = vmatpush3.bf16.msra.mxu0 %v18678_v42  ;;  %v12881_v31 = vmul.f32 %v23624_v52, %v12871_v39  ;;  %v18728_v42 = vld [vmem:[%s24331_s3 + $0x2d0] ss:$12 sps:$4 sm:$0xff]  }
 0xb07   :  { %13978 = vmatprep.subr.bf16.mxu1 %v18681_v55  ;;  %16273 = vmatprep.subr.bf16.mxu0 %v18682_v23  ;;  %v12924_v25 = vmax.f32 %v12917_v38, 0.0  ;;  %v18733_v55 = vld [vmem:[%s24331_s3 + $0x2ec] ss:$12 sps:$4 sm:$0xff]   ;;  %v18736_v52 = vld [vmem:[%s24331_s3 + $0x304] ss:$12 sps:$4 sm:$0xff]  }
 0xb08   :  { %v12916_v23 = vadd.f32 %v12906_v15, %v12881_v31  ;;  %v18781_v38 = vld [vmem:[%s24331_s3 + $0x46c] ss:$12 sps:$4 sm:$0xff]   ;;  %v14278_v39 = vld [vmem:[%s24332_s4 + $0x90] sm:$0xff] }
 0xb09   :  { %v23979_v27 = vpack.c.bf16 %v12924_v25, %v12924_v25  ;;  %v14262_v15 = vld [vmem:[%s24332_s4 + $0x10] sm:$0xff] }
 0xb0a   :  { %13979 = vmatpush1.bf16.msra.mxu1 %v18679_v63  ;;  %16274 = vmatpush3.bf16.msra.mxu0 %v18683_v60  ;;  %v18731_v63 = vld [vmem:[%s24331_s3 + $0x2e8] ss:$12 sps:$4 sm:$0xff]   ;;  %v12923_v29 = vmax.f32 %v12916_v23, 0.0  ;;  %v18734_v60 = vld [vmem:[%s24331_s3 + $0x300] ss:$12 sps:$4 sm:$0xff]  }
 0xb0b   :  { %13980 = vmatprep.subr.bf16.mxu1 %v18686_v4  ;;  %16275 = vmatprep.subr.bf16.mxu0 %v18687_v2  ;;  %v18739_v4 = vld [vmem:[%s24331_s3 + $0x31c] ss:$12 sps:$4 sm:$0xff]  }
 0xb0c   :  { %v24024_v2 = vpack.c.bf16 %v12923_v29, %v12923_v29  ;;  %v14265_v29 = vld [vmem:[%s24332_s4 + $0x28] sm:$0xff] }
 0xb0e   :  { %13981 = vmatpush1.bf16.msra.mxu1 %v18684_v35  ;;  %16276 = vmatpush3.bf16.msra.mxu0 %v18688_v22  ;;  %v18737_v35 = vld [vmem:[%s24331_s3 + $0x318] ss:$12 sps:$4 sm:$0xff]   ;;  %v18742_v22 = vld [vmem:[%s24331_s3 + $0x334] ss:$12 sps:$4 sm:$0xff]  }
 0xb0f   :  { %13982 = vmatprep.subr.bf16.mxu1 %v18691_v32  ;;  %16277 = vmatprep.subr.bf16.mxu0 %v18692_v28  ;;  %v18740_v32 = vld [vmem:[%s24331_s3 + $0x330] ss:$12 sps:$4 sm:$0xff]   ;;  %v18745_v28 = vld [vmem:[%s24331_s3 + $0x34c] ss:$12 sps:$4 sm:$0xff]  }
 0xb12   :  { %13983 = vmatpush1.bf16.msra.mxu1 %v18689_v17  ;;  %16278 = vmatpush3.bf16.msra.mxu0 %v18693_v51  ;;  %v18743_v17 = vld [vmem:[%s24331_s3 + $0x348] ss:$12 sps:$4 sm:$0xff]   ;;  %v18748_v51 = vld [vmem:[%s24331_s3 + $0x364] ss:$12 sps:$4 sm:$0xff]  }
 0xb13   :  { %13984 = vmatprep.subr.bf16.mxu1 %v18696_v14  ;;  %16279 = vmatprep.subr.bf16.mxu0 %v18697_v11  ;;  %v18746_v14 = vld [vmem:[%s24331_s3 + $0x360] ss:$12 sps:$4 sm:$0xff]   ;;  %v18749_v11 = vld [vmem:[%s24331_s3 + $0x378] ss:$12 sps:$4 sm:$0xff]  }
 0xb16   :  { %13985 = vmatpush1.bf16.msra.mxu1 %v18694_v20  ;;  %16280 = vmatpush3.bf16.msra.mxu0 %v18698_v56  ;;  %v18754_v20 = vld [vmem:[%s24331_s3 + $0x394] ss:$12 sps:$4 sm:$0xff]   ;;  %v18752_v56 = vld [vmem:[%s24331_s3 + $0x390] ss:$12 sps:$4 sm:$0xff]  }
 0xb17   :  { %13986 = vmatprep.subr.bf16.mxu1 %v18701_v8  ;;  %16281 = vmatprep.subr.bf16.mxu0 %v18702_v36  ;;  %v18757_v8 = vld [vmem:[%s24331_s3 + $0x3ac] ss:$12 sps:$4 sm:$0xff]   ;;  %v18760_v36 = vld [vmem:[%s24331_s3 + $0x3c4] ss:$12 sps:$4 sm:$0xff]  }
 0xb1a   :  { %13987 = vmatpush1.bf16.msra.mxu1 %v18699_v30  ;;  %16282 = vmatpush3.bf16.msra.mxu0 %v18703_v16  ;;  %v18763_v30 = vld [vmem:[%s24331_s3 + $0x3dc] ss:$12 sps:$4 sm:$0xff]   ;;  %v18761_v16 = vld [vmem:[%s24331_s3 + $0x3d8] ss:$12 sps:$4 sm:$0xff]  }
 0xb1b   :  { %13988 = vmatprep.subr.bf16.mxu1 %v18706_v58  ;;  %16283 = vmatprep.subr.bf16.mxu0 %v18707_v24  ;;  %v18766_v58 = vld [vmem:[%s24331_s3 + $0x3f4] ss:$12 sps:$4 sm:$0xff]  }
 0xb1c   :  { %v18767_v24 = vld [vmem:[%s24331_s3 + $0x408] ss:$12 sps:$4 sm:$0xff]  }
 0xb1e   :  { %13989 = vmatpush1.bf16.msra.mxu1 %v18704_v48  ;;  %16284 = vmatpush3.bf16.msra.mxu0 %v18708_v10  ;;  %v18772_v48 = vld [vmem:[%s24331_s3 + $0x424] ss:$12 sps:$4 sm:$0xff]   ;;  %v18770_v10 = vld [vmem:[%s24331_s3 + $0x420] ss:$12 sps:$4 sm:$0xff]  }
 0xb1f   :  { %13990 = vmatprep.subr.bf16.mxu1 %v18711_v0  ;;  %16396 = vmatprep.subr.bf16.mxu0 %v18836_v6  ;;  %v12867_v0 = vrot.slane %v23846_v12, %v20697_v53 }
 0xb21   :  { %14170 = vmatmul.mubr.bf16.vlgmr.msra.gmra.mrb[40].mxu0 %v12927_v45  ;;  %v12880_v37 = vmul.f32 %v23622_v21, %v12867_v0  ;;  %v18779_v21 = vld [vmem:[%s24331_s3 + $0x468] ss:$12 sps:$4 sm:$0xff]  }
 0xb22   :  { %13991 = vmatpush1.bf16.msra.mxu1 %v18709_v46  ;;  %16397 = vmatpush3.bf16.msra.mxu0 %v18715_v47  ;;  %v18778_v46 = vld [vmem:[%s24331_s3 + $0x454] ss:$12 sps:$4 sm:$0xff]   ;;  %v18776_v47 = vld [vmem:[%s24331_s3 + $0x450] ss:$12 sps:$4 sm:$0xff]  }
 0xb23   :  { %13992 = vmatprep.subr.bf16.mxu1 %v18714_v43  ;;  %16398 = vmatprep.mubr.msk.bf16.mxu0 %vm18837_vm3, %v18836_v6  ;;  %v12902_v43 = vrot.slane %v23846_v12, %v20717_v61  ;;  %v18784_v12 = vld [vmem:[%s24331_s3 + $0x484] ss:$12 sps:$4 sm:$0xff]  }
 0xb26   :  { %13993 = vmatpush1.bf16.msra.mxu1 %v18712_v33 }
 0xb27   :  { %13994 = vmatprep.subr.bf16.mxu1 %v18718_v7  ;;  %v18782_v7 = vld [vmem:[%s24331_s3 + $0x480] ss:$12 sps:$4 sm:$0xff]  }
 0xb29   :  { %16399 = vmatmul.mubr.msk.bf16.vlgmr.msra.gmra.mrb[44].mxu0 %vm4073_vm0, %v23979_v27 }
 0xb2a   :  { %13995 = vmatpush1.bf16.msra.mxu1 %v18716_v50  ;;  %v18785_v50 = vld [vmem:[%s24331_s3 + $0x3c8] ss:$12 sps:$4 sm:$0xff]  }
 0xb2b   :  { %13996 = vmatprep.subr.bf16.mxu1 %v18721_v19  ;;  %v14276_v19 = vld [vmem:[%s24332_s4 + $0x80] sm:$0xff] }
 0xb2e   :  { %13997 = vmatpush1.bf16.msra.mxu1 %v18719_v9  ;;  %v14277_v9 = vld [vmem:[%s24332_s4 + $0x88] sm:$0xff] }
 0xb2f   :  { %13998 = vmatprep.subr.bf16.mxu1 %v18724_v34  ;;  %v14260_v34 = vld [vmem:[%s24332_s4] sm:$0xff] }
 0xb32   :  { %13999 = vmatpush1.bf16.msra.mxu1 %v18722_v26  ;;  %v16451_v26 = vpack.c.bf16 %v14277_v9, %v14276_v19  ;;  %v14272_v9 = vld [vmem:[%s24332_s4 + $0x60] sm:$0xff] }
 0xb33   :  { %14000 = vmatprep.subr.bf16.mxu1 %v18727_v49  ;;  %v14261_v49 = vld [vmem:[%s24332_s4 + $0x8] sm:$0xff] }
 0xb34   :  { %16452 = vmatprep.subr.bf16.mxu0 %v16451_v26 }
 0xb36   :  { %14001 = vmatpush1.bf16.msra.mxu1 %v18725_v1  ;;  %v14279_v1 = vld [vmem:[%s24332_s4 + $0x98] sm:$0xff] }
 0xb37   :  { %14002 = vmatprep.subr.bf16.mxu1 %v18730_v40  ;;  %v16453_v40 = vpack.c.bf16 %v14261_v49, %v14260_v34  ;;  %v16455_v31 = vpack.c.bf16 %v14279_v1, %v14278_v39  ;;  %v14273_v34 = vld [vmem:[%s24332_s4 + $0x68] sm:$0xff]  ;;  %v14291_v49 = vld [vmem:[%s24332_s4 + $0xf8] sm:$0xff]  ;;  %v14274_v1 = vld [vmem:[%s24332_s4 + $0x70] sm:$0xff] }
 0xb38   :  { %v16477_v26 = vpack.c.bf16 %v14273_v34, %v14272_v9 }
 0xb39   :  { %16454 = vmatpush3.bf16.msra.mxu0 %v16453_v40  ;;  %v14275_v40 = vld [vmem:[%s24332_s4 + $0x78] sm:$0xff] }
 0xb3a   :  { %14003 = vmatpush1.bf16.msra.mxu1 %v18728_v42  ;;  %v14263_v42 = vld [vmem:[%s24332_s4 + $0x18] sm:$0xff]  ;;  %16456 = vmatprep.subr.bf16.mxu0 %v16455_v31  ;;  %v16481_v31 = vpack.c.bf16 %v14275_v40, %v14274_v1 }
 0xb3b   :  { %14004 = vmatprep.subr.bf16.mxu1 %v18733_v55  ;;  %v14280_v55 = vld [vmem:[%s24332_s4 + $0xa0] sm:$0xff]  ;;  %v16457_v23 = vpack.c.bf16 %v14263_v42, %v14262_v15 }
 0xb3c   :  { %v15883_v15 = vld [vmem:[%s24334_s6 + $0x6] ss:$8 sm:$0x7] }
 0xb3d   :  { %16458 = vmatpush3.bf16.msra.mxu0 %v16457_v23  ;;  %v13142_v42 = vrot.slane %v15883_v15, %v20708_v57 }
 0xb3e   :  { %14005 = vmatpush1.bf16.msra.mxu1 %v18731_v63 }
 0xb3f   :  { %14015 = vmatprep.subr.bf16.mxu1 %v18736_v52  ;;  %v14264_v52 = vld [vmem:[%s24332_s4 + $0x20] sm:$0xff] }
 0xb41   :  { %14007 = vmatmul.mubr.bf16.vlgmr.msra.gmra.mrb[72].mxu1 %v12927_v45  ;;  %v12915_v45 = vadd.f32 %v12902_v43, %v12880_v37  ;;  %v18794_v37 = vld [vmem:[%s24331_s3 + $0x368] ss:$12 sps:$4 sm:$0xff]   ;;  %v18796_v43 = vld [vmem:[%s24331_s3 + $0x380] ss:$12 sps:$4 sm:$0xff]  }
 0xb42   :  { %14016 = vmatpush1.bf16.msra.mxu1 %v18734_v60  ;;  %14047 = vmatprep.mubr.bf16.mxu1 %v24024_v2  ;;  %v14282_v60 = vld [vmem:[%s24332_s4 + $0xb0] sm:$0xff] }
 0xb43   :  { %14017 = vmatprep.subr.bf16.mxu1 %v18739_v4  ;;  %v12922_v33 = vmax.f32 %v12915_v45, 0.0  ;;  %v14283_v4 = vld [vmem:[%s24332_s4 + $0xb8] sm:$0xff] }
 0xb44   :  { %v18798_v45 = vld [vmem:[%s24331_s3 + $0x398] ss:$12 sps:$4 sm:$0xff]  }
 0xb45   :  { %v24125_v25 = vpack.c.bf16 %v12922_v33, %v12922_v33 }
 0xb46   :  { %14018 = vmatpush1.bf16.msra.mxu1 %v18737_v35  ;;  %v16461_v35 = vpack.c.bf16 %v14265_v29, %v14264_v52 }
 0xb47   :  { %14019 = vmatprep.subr.bf16.mxu1 %v18742_v22  ;;  %v16463_v22 = vpack.c.bf16 %v14283_v4, %v14282_v60 }
 0xb4a   :  { %14020 = vmatpush1.bf16.msra.mxu1 %v18740_v32  ;;  %v14266_v32 = vld [vmem:[%s24332_s4 + $0x30] sm:$0xff] }
 0xb4b   :  { %14021 = vmatprep.subr.bf16.mxu1 %v18745_v28  ;;  %v14267_v28 = vld [vmem:[%s24332_s4 + $0x38] sm:$0xff] }
 0xb4e   :  { %14022 = vmatpush1.bf16.msra.mxu1 %v18743_v17  ;;  %v18786_v17 = vld [vmem:[%s24331_s3 + $0x308] ss:$12 sps:$4 sm:$0xff]  }
 0xb4f   :  { %14023 = vmatprep.subr.bf16.mxu1 %v18748_v51  ;;  %v14284_v51 = vld [vmem:[%s24332_s4 + $0xc0] sm:$0xff] }
 0xb52   :  { %14024 = vmatpush1.bf16.msra.mxu1 %v18746_v14  ;;  %v14285_v14 = vld [vmem:[%s24332_s4 + $0xc8] sm:$0xff] }
 0xb53   :  { %14025 = vmatprep.subr.bf16.mxu1 %v18751_v44  ;;  %v18787_v44 = vld [vmem:[%s24331_s3 + $0x3e0] ss:$12 sps:$4 sm:$0xff]  }
 0xb56   :  { %14026 = vmatpush1.bf16.msra.mxu1 %v18749_v11  ;;  %v16465_v11 = vpack.c.bf16 %v14267_v28, %v14266_v32  ;;  %v14292_v28 = vld [vmem:[%s24332_s4 + $0x100] sm:$0xff] }
 0xb57   :  { %14027 = vmatprep.subr.bf16.mxu1 %v18754_v20  ;;  %v16467_v20 = vpack.c.bf16 %v14285_v14, %v14284_v51  ;;  %v14294_v51 = vld [vmem:[%s24332_s4 + $0x110] sm:$0xff]  ;;  %v14295_v14 = vld [vmem:[%s24332_s4 + $0x118] sm:$0xff] }
 0xb5a   :  { %14028 = vmatpush1.bf16.msra.mxu1 %v18752_v56  ;;  %v14268_v56 = vld [vmem:[%s24332_s4 + $0x40] sm:$0xff] }
 0xb5b   :  { %14029 = vmatprep.subr.bf16.mxu1 %v18757_v8  ;;  %v14269_v8 = vld [vmem:[%s24332_s4 + $0x48] sm:$0xff] }
 0xb5e   :  { %14030 = vmatpush1.bf16.msra.mxu1 %v18755_v18  ;;  %v18788_v18 = vld [vmem:[%s24331_s3 + $0x320] ss:$12 sps:$4 sm:$0xff]  }
 0xb5f   :  { %14031 = vmatprep.subr.bf16.mxu1 %v18760_v36  ;;  %v14287_v36 = vld [vmem:[%s24332_s4 + $0xd8] sm:$0xff] }
 0xb62   :  { %14032 = vmatpush1.bf16.msra.mxu1 %v18758_v3  ;;  %v18789_v3 = vld [vmem:[%s24331_s3 + $0x3f8] ss:$12 sps:$4 sm:$0xff]  }
 0xb63   :  { %14033 = vmatprep.subr.bf16.mxu1 %v18763_v30  ;;  %v16469_v30 = vpack.c.bf16 %v14269_v8, %v14268_v56 }
 0xb66   :  { %14034 = vmatpush1.bf16.msra.mxu1 %v18761_v16  ;;  %v14270_v16 = vld [vmem:[%s24332_s4 + $0x50] sm:$0xff] }
 0xb67   :  { %14035 = vmatprep.subr.bf16.mxu1 %v18766_v58  ;;  %v14271_v58 = vld [vmem:[%s24332_s4 + $0x58] sm:$0xff] }
 0xb6a   :  { %14036 = vmatpush1.bf16.msra.mxu1 %v18764_v54  ;;  %v18790_v54 = vld [vmem:[%s24331_s3 + $0x338] ss:$12 sps:$4 sm:$0xff]  }
 0xb6b   :  { %14037 = vmatprep.subr.bf16.mxu1 %v18769_v62  ;;  %v14288_v62 = vld [vmem:[%s24332_s4 + $0xe0] sm:$0xff] }
 0xb6e   :  { %14038 = vmatpush1.bf16.msra.mxu1 %v18767_v24  ;;  %v14289_v24 = vld [vmem:[%s24332_s4 + $0xe8] sm:$0xff] }
 0xb6f   :  { %14039 = vmatprep.subr.bf16.mxu1 %v18772_v48  ;;  %v18791_v48 = vld [vmem:[%s24331_s3 + $0x410] ss:$12 sps:$4 sm:$0xff]   ;;  %v16475_v0 = vpack.c.bf16 %v14289_v24, %v14288_v62 }
 0xb72   :  { %14040 = vmatpush1.bf16.msra.mxu1 %v18770_v10  ;;  %v16473_v10 = vpack.c.bf16 %v14271_v58, %v14270_v16 }
 0xb73   :  { %14041 = vmatprep.subr.bf16.mxu1 %v18775_v59  ;;  %v18792_v59 = vld [vmem:[%s24331_s3 + $0x350] ss:$12 sps:$4 sm:$0xff]  }
 0xb76   :  { %14042 = vmatpush1.bf16.msra.mxu1 %v18773_v13  ;;  %v18793_v13 = vld [vmem:[%s24331_s3 + $0x428] ss:$12 sps:$4 sm:$0xff]  }
 0xb77   :  { %14043 = vmatprep.subr.bf16.mxu1 %v18778_v46  ;;  %v18795_v46 = vld [vmem:[%s24331_s3 + $0x440] ss:$12 sps:$4 sm:$0xff]  }
 0xb7a   :  { %14044 = vmatpush1.bf16.msra.mxu1 %v18776_v47  ;;  %v18797_v47 = vld [vmem:[%s24331_s3 + $0x458] ss:$12 sps:$4 sm:$0xff]  }
 0xb7b   :  { %14045 = vmatprep.subr.bf16.mxu1 %v18781_v38  ;;  %v18799_v38 = vld [vmem:[%s24331_s3 + $0x470] ss:$12 sps:$4 sm:$0xff]  }
 0xb7e   :  { %14046 = vmatpush1.bf16.msra.mxu1 %v18779_v21  ;;  %v18800_v21 = vld [vmem:[%s24331_s3 + $0x3b0] ss:$12 sps:$4 sm:$0xff]  }
 0xb7f   :  { %14056 = vmatprep.subr.bf16.mxu1 %v18784_v12 }
 0xb81   :  { %14048 = vmatmul.mubr.bf16.vlgmr.msra.gmra.mrb[72].mxu1 %v24125_v25 }
 0xb82   :  { %14057 = vmatpush1.bf16.msra.mxu1 %v18782_v7  ;;  %14088 = vmatprep.mubr.bf16.mxu1 %v18835_v41  ;;  %v14281_v41 = vld [vmem:[%s24332_s4 + $0xa8] sm:$0xff] }
 0xb83   :  { %16291 = vmatprep.subr.bf16.mxu1 %v18785_v50  ;;  %v16459_v63 = vpack.c.bf16 %v14281_v41, %v14280_v55 }
 0xb85   :  { %16460 = vmatprep.subr.bf16.mxu0 %v16459_v63 }
 0xb86   :  { %16462 = vmatpush3.bf16.msra.mxu0 %v16461_v35 }
 0xb87   :  { %16464 = vmatprep.subr.bf16.mxu0 %v16463_v22 }
 0xb8a   :  { %16466 = vmatpush3.bf16.msra.mxu0 %v16465_v11  ;;  %v13134_v11 = vrot.slane %v15883_v15, %v20697_v53 }
 0xb8b   :  { %16468 = vmatprep.subr.bf16.mxu0 %v16467_v20  ;;  %v13138_v20 = vrot.slane %v15883_v15, %v20717_v61  ;;  %v14441_v61 = vld [vmem:[%s24332_s4 + $0x120] sm:$0xff] }
 0xb8d   :  { %16031 = vmatmul.mubr.msk.bf16.vlgmr.msra.gmra.mrb[72].mxu1 %vm4073_vm0, %v23979_v27  ;;  %v14286_v27 = vld [vmem:[%s24332_s4 + $0xd0] sm:$0xff] }
 0xb8e   :  { %16292 = vmatpush3.bf16.msra.mxu1 %v18786_v17  ;;  %14209 = vmatprep.mubr.bf16.mxu1 %v24024_v2  ;;  %v16471_v2 = vpack.c.bf16 %v14287_v36, %v14286_v27  ;;  %v14293_v17 = vld [vmem:[%s24332_s4 + $0x108] sm:$0xff] }
 0xb8f   :  { %16293 = vmatprep.subr.bf16.mxu1 %v18787_v44  ;;  %16470 = vmatpush3.bf16.msra.mxu0 %v16469_v30  ;;  %v16484_v57 = vpack.c.bf16 %v14293_v17, %v14292_v28  ;;  %v16487_v44 = vpack.c.bf16 %v14295_v14, %v14294_v51 }
 0xb90   :  { %16472 = vmatprep.subr.bf16.mxu0 %v16471_v2 }
 0xb92   :  { %16294 = vmatpush3.bf16.msra.mxu1 %v18788_v18 }
 0xb93   :  { %16295 = vmatprep.subr.bf16.mxu1 %v18789_v3  ;;  %16474 = vmatpush3.bf16.msra.mxu0 %v16473_v10  ;;  %v14442_v10 = vld [vmem:[%s24332_s4 + $0x128] sm:$0xff] }
 0xb94   :  { %16476 = vmatprep.subr.bf16.mxu0 %v16475_v0  ;;  %v16490_v0 = vpack.c.bf16 %v14442_v10, %v14441_v61 }
 0xb96   :  { %16296 = vmatpush3.bf16.msra.mxu1 %v18790_v54 }
 0xb97   :  { %16297 = vmatprep.subr.bf16.mxu1 %v18791_v48  ;;  %16478 = vmatpush3.bf16.msra.mxu0 %v16477_v26 }
 0xb9a   :  { %16298 = vmatpush3.bf16.msra.mxu1 %v18792_v59 }
 0xb9b   :  { %16299 = vmatprep.subr.bf16.mxu1 %v18793_v13 }
 0xb9e   :  { %16300 = vmatpush3.bf16.msra.mxu1 %v18794_v37 }
 0xb9f   :  { %16301 = vmatprep.subr.bf16.mxu1 %v18795_v46  ;;  %v14296_v46 = vld [vmem:[%s24334_s6 + $0x7] ss:$0 sm:$0xff] }
 0xba2   :  { %16302 = vmatpush3.bf16.msra.mxu1 %v18796_v43 }
 0xba3   :  { %16303 = vmatprep.subr.bf16.mxu1 %v18797_v47 }
 0xba6   :  { %16304 = vmatpush3.bf16.msra.mxu1 %v18798_v45 }
 0xba7   :  { %16305 = vmatprep.subr.bf16.mxu1 %v18799_v38 }
 0xbaa   :  { %16306 = vmatpush3.bf16.msra.mxu1 %v18800_v21  ;;  %v14443_v21 = vld [vmem:[%s24334_s6 + $0x68] ss:$0 sm:$0xff] }
 0xbab   :  { %16483 = vmatprep.subr.bf16.mxu1 %v18838_v5 }
 0xbad   :  { %14210 = vmatmul.mubr.bf16.vlgmr.msra.gmra.mrb[76].mxu1 %v24125_v25  ;;  %v14290_v25 = vld [vmem:[%s24332_s4 + $0xf0] sm:$0xff]  ;;  %s18839_s4 = smov [#allocation2]  }
 0xbae   :  { %16410 = vmatprep.mubr.msk.f32.mxu1 %vm18837_vm3, %v18836_v6  ;;  %v16479_v39 = vpack.c.bf16 %v14291_v49, %v14290_v25  ;;  %16485 = vmatpush3.bf16.msra.mxu1 %v16484_v57  ;;  %s14521_s19 = sshll.u32 %s18839_s4, 4  ;;  %s14522_s19 = int_to_ptr.vmem [resolvable:$true] %s14521_s19 }
 0xbaf   :  { %16486 = vmatprep.subr.bf16.mxu1 %v18838_v5  ;;  %s18810_s3 = scalar_lea.vmem %s14522_s19, 32  ;;  %p18815_p1 = scmp.lt.s32.totalorder %s14522_s19, %s14522_s19 }
 0xbb0   :  { %16480 = vmatprep.subr.bf16.mxu0 %v16479_v39  ;;  %p18811_p0 = scmp.ne.s32.totalorder %s14522_s19, %s18810_s3  ;;  %p18816_p2 = scmp.lt.s32.totalorder %s18810_s3, %s18810_s3 }
 0xbb1   :  { %16482 = vmatpush3.bf16.msra.mxu0 %v16481_v31 }
 0xbb2   :  { %16488 = vmatpush3.bf16.msra.mxu1 %v16487_v44  ;;  %p18817_p3 = por %p18816_p2, %p18815_p1 }
 0xbb3   :  { %16489 = vmatprep.subr.bf16.mxu1 %v18838_v5 }
 0xbb4   :  { %p18818_p4 = pnand %p18817_p3, %p18811_p0 }
 0xbd4   :  { %v16263_v33 = vpop.f32.mrb[36].mxu0 }
 0xbd5   :  { %v16264_v12 = vpop.f32.mrb[37].mxu0 }
 0xbd6   :  { %v16265_v7 = vadd.f32 %v16264_v12, %v16263_v33  ;;  %v16266_v50 = vpop.f32.mrb[38].mxu0 }
 0xbd7   :  { %v16267_v19 = vpop.f32.mrb[39].mxu0 }
 0xbd8   :  { %v14132_v23 = vadd.f32 %v16265_v7, %v13142_v42 }
 0xbf4   :  { %v16285_v55 = vpop.f32.mrb[40].mxu0 }
 0xbf5   :  { %v16286_v41 = vpop.f32.mrb[41].mxu0 }
 0xbf6   :  { %v16287_v63 = vadd.f32 %v16286_v41, %v16285_v55  ;;  %v16288_v52 = vpop.f32.mrb[42].mxu0 }
 0xbf7   :  { %v16289_v29 = vpop.f32.mrb[43].mxu0 }
 0xbf8   :  { %v14172_v60 = vadd.f32 %v16287_v63, %v14132_v23 }
 0xbfc   :  { %v14251_v4 = vpop.f32.mrb[44].mxu0 }
 0xbfd   :  { %v16400_v35 = vpop.f32.mrb[45].mxu0 }
 0xbfe   :  { %v14254_v22 = vpop.f32.mrb[46].mxu0 }
 0xbff   :  { %v16401_v32 = vpop.f32.mrb[47].mxu0 }
 0xc60   :  { %v14090_v56 = vpop.f32.mrb[72].mxu1 }
 0xc61   :  { %v16510_v8 = vadd.f32 %v14090_v56, %v13134_v11  ;;  %v14092_v18 = vpop.f32.mrb[73].mxu1 }
 0xc62   :  { %v16511_v27 = vadd.f32 %v14092_v18, %v13138_v20  ;;  %v14094_v36 = vpop.f32.mrb[74].mxu1 }
 0xc63   :  { %v14095_v3 = vpop.f32.mrb[75].mxu1  ;;  %v14257_v2 = vmax.f32 %v16510_v8, 0.0 }
 0xc64   :  { %v14258_v30 = vmax.f32 %v16511_v27, 0.0 }
 0xc66   :  { %14364 = vmatprep.mubr.f32.mxu0 %v14258_v30 }
 0xc67   :  { %14365 = vmatmul.mubr.f32.vlgmr.msra.gmra.mrb[48].mxu0 %v14257_v2 }
 0xc80   :  { %v16307_v16 = vpop.f32.mrb[76].mxu1 }
 0xc81   :  { %v16308_v58 = vpop.f32.mrb[77].mxu1 }
 0xc82   :  { %v16309_v54 = vadd.f32 %v16308_v58, %v16307_v16  ;;  %v16310_v62 = vpop.f32.mrb[78].mxu1 }
 0xc83   :  { %v16311_v24 = vpop.f32.mrb[79].mxu1 }
 0xc84   :  { %v14212_v5 = vadd.f32 %v16309_v54, %v14172_v60 }
 0xc86   :  { %v14252_v48 = vadd.f32 %v14251_v4, %v14212_v5 }
 0xc88   :  { %v14259_v53 = vmax.f32 %v14252_v48, 0.0 }
 0xc8a   :  { %16411 = vmatmul.mubr.msk.f32.vlgmr.msra.gmra.mrb[70].mxu1 %vm5460_vm4, %v14259_v53 }
 0xc8b   :  { %16417 = vmatprep.mubr.msk.f32.mxu1 %vm18837_vm3, %v18836_v6  ;;  %16491 = vmatpush3.bf16.xpose.msra.mxu1 %v16490_v0 }
 0xd3a   :  { %v16347_v59 = vpop.f32.mrb[48].mxu0 }
 0xd3b   :  { %v16348_v13 = vpop.f32.mrb[49].mxu0 }
 0xd3c   :  { %v16349_v37 = vadd.f32 %v16348_v13, %v16347_v59 }
 0xd3e   :  { %v14367_v43 = vadd.f32 %v16349_v37, %v14296_v46 }
 0xd5d   :  { %v14436_v47 = vpop.f32.mrb[70].mxu1 }
 0xd5e   :  { %v14437_v6 = vadd.f32 %v14436_v47, %v14367_v43  ;;  %v16412_v45 = vpop.f32.mrb[71].mxu1 }
 0xd60   :  { %v14440_v38 = vmax.f32 %v14437_v6, 0.0 }
 0xd62   :  { %16418 = vmatmul.mubr.f32.vlgmr.msra.gmra.mrb[80].mxu1 %v14440_v38 }
 0xe35   :  { %v14510_v33 = vpop.f32.mrb[80].mxu1 }
 0xe36   :  { %v14511_v12 = vadd.f32 %v14510_v33, %v14443_v21  ;;  %v16419_v7 = vpop.f32.mrb[81].mxu1 }
 0xe38   :  { %14514 = vst.msk [vmem:[#allocation2] sm:$0x3] %vm12177_vm7, %v14511_v12 }
 0xe39   :  { %18821 = shalt.err (!%p18818_p4)
}
 0xe3a   :  { %s18822_s21 = scalar_lea.hbm %s24335_s7, 32 }
 0xe3b   :  { %p18823_p5 = scmp.ne.s32.totalorder %s24335_s7, %s18822_s21  ;;  %p18826_p6 = scmp.lt.u32.totalorder %s18822_s21, %s24335_s7 }
 0xe3d   :  { %p18828_p7 = pnand %p18826_p6, %p18823_p5 }
 0xe3f   :  { %18831 = shalt.err (!%p18828_p7)
}
 0xe40   :  { %14524 = dma.vmem_to_hbm [thread:$0]  %s14522_s19, 32, %s24335_s7, [#allocation3]  }
 0xe41   :  { %18832 = dma.done.wait [#allocation3], 32  }
 0xe42   :  { %18833 = vsyncadd [#allocation3], 4294967264 }
 0xe43   :  { %14528 = vsyncpa [#allocation3], 1 }

</bundles_post_ra>
